<compile_context>
chip_gen: v7x
topology: tpu7x:2x2x1
jax: 0.10.0
libtpu: 0.0.40
codegen_flags: <defaults>
</compile_context>

<pallas_src>
import functools

import jax
import jax.numpy as jnp
from jax.experimental import pallas as pl
from jax.experimental.pallas import tpu as pltpu


# ----------------------------------------------------------------------------
# Fused MLC-layer kernel:  all 3 conv nodes of a layer in one call
#   out = relu(patches @ W3 + b3) + (x @ W1 + b1)
# ----------------------------------------------------------------------------
def conv_layer_kernel(p_ref, x_ref, w3_ref, b3_ref, w1_ref, b1_ref, o_ref):
    # p_ref : (TM, 9*Cin)        im2col patches (rows = flattened (n,h,w))
    # x_ref : (TM, Cin)          center pixels (input to the 1x1 shortcuts)
    # w3_ref: (9*Cin, Cout_tot)  3x3 weights of the 3 nodes stacked on Cout
    # b3_ref: (1, Cout_tot)
    # w1_ref: (Cin, Cout_tot)    1x1 shortcut-projection weights (stacked)
    # b1_ref: (1, Cout_tot)
    # o_ref : (TM, Cout_tot)     == channel-concat of the 3 node outputs
    conv = jnp.dot(p_ref[...], w3_ref[...], preferred_element_type=jnp.float32)
    conv = jnp.maximum(conv + b3_ref[...], 0.0)             # ReLU(conv3x3 + b3)
    sc = jnp.dot(x_ref[...], w1_ref[...], preferred_element_type=jnp.float32)
    o_ref[...] = (conv + sc + b1_ref[...]).astype(o_ref.dtype)


def _im2col_3x3(x_nhwc):
    """(N, H, W, C) -> (N*H*W, 9*C), column order (kh, kw, c)."""
    N, H, W, C = x_nhwc.shape
    xp = jnp.pad(x_nhwc, ((0, 0), (1, 1), (1, 1), (0, 0)))  # 'same' padding
    taps = [xp[:, kh:kh + H, kw:kw + W, :]
            for kh in range(3) for kw in range(3)]
    return jnp.concatenate(taps, axis=-1).reshape(N * H * W, 9 * C)


def _pick_tm(M):
    # Keep M-blocks >= 128 rows (full MXU height on v5e/v6e); only split into
    # multiple (parallel) grid steps when there is enough work for both
    # TensorCores without under-filling the systolic array.
    if M >= 512 and M % 256 == 0:
        return 256
    if M >= 256 and M % 128 == 0:
        return 128
    return M


def conv_layer(x_nhwc, w3f, b3f, w1f, b1f):
    """Fused 3-node MLC layer.  x_nhwc (N,H,W,Cin) -> (N,H,W,Cout_total)."""
    N, H, W, Cin = x_nhwc.shape
    Cout = w3f.shape[-1]
    M = N * H * W
    K3 = 9 * Cin

    patches = _im2col_3x3(x_nhwc)          # (M, 9*Cin)
    x_flat = x_nhwc.reshape(M, Cin)        # (M, Cin)

    TM = _pick_tm(M)
    grid = (M // TM,)

    out = pl.pallas_call(
        conv_layer_kernel,
        out_shape=jax.ShapeDtypeStruct((M, Cout), jnp.float32),
        grid=grid,
        in_specs=[
            pl.BlockSpec((TM, K3), lambda i: (i, 0)),
            pl.BlockSpec((TM, Cin), lambda i: (i, 0)),
            pl.BlockSpec((K3, Cout), lambda i: (0, 0)),
            pl.BlockSpec((1, Cout), lambda i: (0, 0)),
            pl.BlockSpec((Cin, Cout), lambda i: (0, 0)),
            pl.BlockSpec((1, Cout), lambda i: (0, 0)),
        ],
        out_specs=pl.BlockSpec((TM, Cout), lambda i: (i, 0)),
        compiler_params=pltpu.CompilerParams(
            dimension_semantics=("parallel",)),
    )(patches, x_flat, w3f, b3f, w1f, b1f)
    return out.reshape(N, H, W, Cout)


# ----------------------------------------------------------------------------
# Fused MLP head: (Linear + ReLU) * len(mlp_units)  then final Linear
# ----------------------------------------------------------------------------
def mlp_kernel(x_ref, *refs, n_layers):
    # refs = (w0, b0, w1, b1, ..., w_{L-1}, b_{L-1}, o_ref); ReLU on all but
    # the final layer.
    o_ref = refs[-1]
    h = x_ref[...]
    for i in range(n_layers):
        w = refs[2 * i][...]
        b = refs[2 * i + 1][...]
        h = jnp.dot(h, w, preferred_element_type=jnp.float32) + b
        if i < n_layers - 1:
            h = jnp.maximum(h, 0.0)
    o_ref[...] = h.astype(o_ref.dtype)


def mlp_head(x, layers):
    """x: (N, K); layers: list of (w, b).  Single pallas_call for whole head."""
    n_layers = len(layers)
    args = [x]
    for (w, b) in layers:
        args.extend((w, b))
    out_dim = layers[-1][0].shape[1]
    return pl.pallas_call(
        functools.partial(mlp_kernel, n_layers=n_layers),
        out_shape=jax.ShapeDtypeStruct((x.shape[0], out_dim), jnp.float32),
        in_specs=[pl.BlockSpec(memory_space=pltpu.MemorySpace.VMEM)] * len(args),
        out_specs=pl.BlockSpec(memory_space=pltpu.MemorySpace.VMEM),
    )(*args)


# ----------------------------------------------------------------------------
# Parameter init (deterministic, synthetic, pre-fused) + forward
# ----------------------------------------------------------------------------
def init_params(key, input_channels, num_classes, H, W,
                num_mlc_layers=2, num_conv_nodes_per_layer=3,
                initial_filters=32, mlp_units=(128, 64)):
    params = {"mlc_layers": [], "mlp": []}

    def nrm(k, shape, fan_in):
        return (jax.random.normal(k, shape, jnp.float32)
                / jnp.sqrt(jnp.float32(fan_in)))

    cur_in = input_channels
    for i in range(num_mlc_layers):
        filters = initial_filters * (2 ** i)
        cout_total = filters * num_conv_nodes_per_layer  # fused across nodes
        key, k1, k2, k3, k4 = jax.random.split(key, 5)
        # HWIO weights, nodes stacked along Cout, reshaped for im2col matmul
        w3 = nrm(k1, (3, 3, cur_in, cout_total), 9 * cur_in)
        w3 = w3.reshape(9 * cur_in, cout_total)           # row order (kh,kw,ci)
        b3 = 0.01 * jax.random.normal(k2, (1, cout_total), jnp.float32)
        w1 = nrm(k3, (cur_in, cout_total), cur_in)         # 1x1 projections
        b1 = 0.01 * jax.random.normal(k4, (1, cout_total), jnp.float32)
        params["mlc_layers"].append((w3, b3, w1, b1))
        cur_in = cout_total

    # MLP head.  Flat size = C*H*W ('same' padding keeps spatial dims).
    # NOTE: first weight's rows are in (h, w, c) order because we flatten NHWC
    # directly; a PyTorch checkpoint (rows in (c, h, w) order) would be
    # permuted once at load time — identical math, zero runtime cost.
    in_features = cur_in * H * W
    for units in list(mlp_units) + [num_classes]:
        key, k1, k2 = jax.random.split(key, 3)
        w = nrm(k1, (in_features, units), in_features)
        b = 0.01 * jax.random.normal(k2, (1, units), jnp.float32)
        params["mlp"].append((w, b))
        in_features = units
    return params


def forward(params, x_nchw):
    # NCHW -> NHWC (channels on the TPU lane axis) for the conv stack
    x = jnp.transpose(x_nchw, (0, 2, 3, 1)).astype(jnp.float32)

    for (w3f, b3f, w1f, b1f) in params["mlc_layers"]:
        # one fused pallas_call per MLC layer == the 3 nodes + channel concat
        x = conv_layer(x, w3f, b3f, w1f, b1f)

    # flatten directly from NHWC (MLP weight rows are in matching h,w,c order)
    x = x.reshape(x.shape[0], -1)

    # whole MLP head (hidden layers + output layer) in one pallas_call
    return mlp_head(x, params["mlp"])


if __name__ == "__main__":
    # Small shapes: batch=2, input_channels=4, spatial 8x8, 10 classes
    # => fused conv matmuls see M = N*H*W = 128 rows.
    N, C, H, W = 2, 4, 8, 8
    num_classes = 10

    key = jax.random.PRNGKey(0)
    kx, kp = jax.random.split(key)
    x = jax.random.normal(kx, (N, C, H, W), jnp.float32)

    params = init_params(kp, input_channels=C, num_classes=num_classes,
                         H=H, W=W, num_mlc_layers=2,
                         num_conv_nodes_per_layer=3, initial_filters=32,
                         mlp_units=(128, 64))

    fwd = jax.jit(forward)
    out = fwd(params, x)
    out = jax.block_until_ready(out)
    assert out.shape == (N, num_classes), out.shape
    assert out.dtype == jnp.float32
    print("KERNEL_OK")
</pallas_src>

<mosaic_0001>
module attributes {stable_mosaic.version = 11 : i64} {
  func.func @conv_layer_kernel(%arg0: i32, %arg1: memref<128x36xf32, #tpu.memory_space<vmem>>, %arg2: memref<128x4xf32, #tpu.memory_space<vmem>>, %arg3: memref<36x96xf32, #tpu.memory_space<vmem>>, %arg4: memref<1x96xf32, #tpu.memory_space<vmem>>, %arg5: memref<4x96xf32, #tpu.memory_space<vmem>>, %arg6: memref<1x96xf32, #tpu.memory_space<vmem>>, %arg7: memref<128x96xf32, #tpu.memory_space<vmem>>) attributes {dimension_semantics = [#tpu.dimension_semantics<parallel>], iteration_bounds = array<i64: 1>, scalar_prefetch = 0 : i64, scratch_operands = 0 : i64, tpu.core_type = #tpu.core_type<tc>, window_params = [{transform_indices = @transform_0, window_bounds = array<i64: 128, 36>}, {transform_indices = @transform_1, window_bounds = array<i64: 128, 4>}, {pipeline_mode = #tpu.pipeline_mode<synchronous>, transform_indices = @transform_2, window_bounds = array<i64: 36, 96>}, {pipeline_mode = #tpu.pipeline_mode<synchronous>, transform_indices = @transform_3, window_bounds = array<i64: 1, 96>}, {pipeline_mode = #tpu.pipeline_mode<synchronous>, transform_indices = @transform_4, window_bounds = array<i64: 4, 96>}, {pipeline_mode = #tpu.pipeline_mode<synchronous>, transform_indices = @transform_5, window_bounds = array<i64: 1, 96>}, {transform_indices = @transform_6, window_bounds = array<i64: 128, 96>}]} {
    %c0 = arith.constant 0 : index
    %c0_0 = arith.constant 0 : index
    %0 = vector.load %arg1[%c0, %c0_0] : memref<128x36xf32, #tpu.memory_space<vmem>>, vector<128x36xf32>
    %c0_1 = arith.constant 0 : index
    %c0_2 = arith.constant 0 : index
    %1 = vector.load %arg3[%c0_1, %c0_2] : memref<36x96xf32, #tpu.memory_space<vmem>>, vector<36x96xf32>
    %cst = arith.constant dense<0.000000e+00> : vector<128x96xf32>
    %2 = tpu.matmul %0, %1, %cst {dimension_numbers = #tpu.dot_dimension_numbers<[1], [0], [0], [1], [0, 0, 1, 1], [], []>} : vector<128x36xf32>, vector<36x96xf32>, vector<128x96xf32> -> vector<128x96xf32>
    %c0_3 = arith.constant 0 : index
    %c0_4 = arith.constant 0 : index
    %3 = vector.load %arg4[%c0_3, %c0_4] : memref<1x96xf32, #tpu.memory_space<vmem>>, vector<1x96xf32>
    %4 = vector.broadcast %3 : vector<1x96xf32> to vector<128x96xf32>
    %5 = arith.addf %2, %4 : vector<128x96xf32>
    %cst_5 = arith.constant 0.000000e+00 : f32
    %6 = vector.broadcast %cst_5 : f32 to vector<128x96xf32>
    %7 = arith.maximumf %5, %6 : vector<128x96xf32>
    %c0_6 = arith.constant 0 : index
    %c0_7 = arith.constant 0 : index
    %8 = vector.load %arg2[%c0_6, %c0_7] : memref<128x4xf32, #tpu.memory_space<vmem>>, vector<128x4xf32>
    %c0_8 = arith.constant 0 : index
    %c0_9 = arith.constant 0 : index
    %9 = vector.load %arg5[%c0_8, %c0_9] : memref<4x96xf32, #tpu.memory_space<vmem>>, vector<4x96xf32>
    %cst_10 = arith.constant dense<0.000000e+00> : vector<128x96xf32>
    %10 = tpu.matmul %8, %9, %cst_10 {dimension_numbers = #tpu.dot_dimension_numbers<[1], [0], [0], [1], [0, 0, 1, 1], [], []>} : vector<128x4xf32>, vector<4x96xf32>, vector<128x96xf32> -> vector<128x96xf32>
    %11 = arith.addf %7, %10 : vector<128x96xf32>
    %c0_11 = arith.constant 0 : index
    %c0_12 = arith.constant 0 : index
    %12 = vector.load %arg6[%c0_11, %c0_12] : memref<1x96xf32, #tpu.memory_space<vmem>>, vector<1x96xf32>
    %13 = vector.broadcast %12 : vector<1x96xf32> to vector<128x96xf32>
    %14 = arith.addf %11, %13 : vector<128x96xf32>
    %c0_13 = arith.constant 0 : index
    %c0_14 = arith.constant 0 : index
    %15 = vector.load %arg7[%c0_13, %c0_14] : memref<128x96xf32, #tpu.memory_space<vmem>>, vector<128x96xf32>
    tpu.vector_store %arg7[%c0_13, %c0_14], %14 {strides = array<i32>} : memref<128x96xf32, #tpu.memory_space<vmem>>, vector<128x96xf32>,
    return
  }
  func.func @transform_0(%arg0: i32) -> (i32, i32) {
    %c0_i32 = arith.constant 0 : i32
    %c0_i32_0 = arith.constant 0 : i32
    return %arg0, %c0_i32 : i32, i32
  }
  func.func @transform_1(%arg0: i32) -> (i32, i32) {
    %c0_i32 = arith.constant 0 : i32
    %c0_i32_0 = arith.constant 0 : i32
    return %arg0, %c0_i32 : i32, i32
  }
  func.func @transform_2(%arg0: i32) -> (i32, i32) {
    %c0_i32 = arith.constant 0 : i32
    %c0_i32_0 = arith.constant 0 : i32
    %c0_i32_1 = arith.constant 0 : i32
    return %c0_i32, %c0_i32_0 : i32, i32
  }
  func.func @transform_3(%arg0: i32) -> (i32, i32) {
    %c0_i32 = arith.constant 0 : i32
    %c0_i32_0 = arith.constant 0 : i32
    %c0_i32_1 = arith.constant 0 : i32
    return %c0_i32, %c0_i32_0 : i32, i32
  }
  func.func @transform_4(%arg0: i32) -> (i32, i32) {
    %c0_i32 = arith.constant 0 : i32
    %c0_i32_0 = arith.constant 0 : i32
    %c0_i32_1 = arith.constant 0 : i32
    return %c0_i32, %c0_i32_0 : i32, i32
  }
  func.func @transform_5(%arg0: i32) -> (i32, i32) {
    %c0_i32 = arith.constant 0 : i32
    %c0_i32_0 = arith.constant 0 : i32
    %c0_i32_1 = arith.constant 0 : i32
    return %c0_i32, %c0_i32_0 : i32, i32
  }
  func.func @transform_6(%arg0: i32) -> (i32, i32) {
    %c0_i32 = arith.constant 0 : i32
    %c0_i32_0 = arith.constant 0 : i32
    return %arg0, %c0_i32 : i32, i32
  }
}

module attributes {stable_mosaic.version = 11 : i64} {
  func.func @conv_layer_kernel(%arg0: i32, %arg1: memref<128x864xf32, #tpu.memory_space<vmem>>, %arg2: memref<128x96xf32, #tpu.memory_space<vmem>>, %arg3: memref<864x192xf32, #tpu.memory_space<vmem>>, %arg4: memref<1x192xf32, #tpu.memory_space<vmem>>, %arg5: memref<96x192xf32, #tpu.memory_space<vmem>>, %arg6: memref<1x192xf32, #tpu.memory_space<vmem>>, %arg7: memref<128x192xf32, #tpu.memory_space<vmem>>) attributes {dimension_semantics = [#tpu.dimension_semantics<parallel>], iteration_bounds = array<i64: 1>, scalar_prefetch = 0 : i64, scratch_operands = 0 : i64, tpu.core_type = #tpu.core_type<tc>, window_params = [{transform_indices = @transform_0, window_bounds = array<i64: 128, 864>}, {transform_indices = @transform_1, window_bounds = array<i64: 128, 96>}, {pipeline_mode = #tpu.pipeline_mode<synchronous>, transform_indices = @transform_2, window_bounds = array<i64: 864, 192>}, {pipeline_mode = #tpu.pipeline_mode<synchronous>, transform_indices = @transform_3, window_bounds = array<i64: 1, 192>}, {pipeline_mode = #tpu.pipeline_mode<synchronous>, transform_indices = @transform_4, window_bounds = array<i64: 96, 192>}, {pipeline_mode = #tpu.pipeline_mode<synchronous>, transform_indices = @transform_5, window_bounds = array<i64: 1, 192>}, {transform_indices = @transform_6, window_bounds = array<i64: 128, 192>}]} {
    %c0 = arith.constant 0 : index
    %c0_0 = arith.constant 0 : index
    %0 = vector.load %arg1[%c0, %c0_0] : memref<128x864xf32, #tpu.memory_space<vmem>>, vector<128x864xf32>
    %c0_1 = arith.constant 0 : index
    %c0_2 = arith.constant 0 : index
    %1 = vector.load %arg3[%c0_1, %c0_2] : memref<864x192xf32, #tpu.memory_space<vmem>>, vector<864x192xf32>
    %cst = arith.constant dense<0.000000e+00> : vector<128x192xf32>
    %2 = tpu.matmul %0, %1, %cst {dimension_numbers = #tpu.dot_dimension_numbers<[1], [0], [0], [1], [0, 0, 1, 1], [], []>} : vector<128x864xf32>, vector<864x192xf32>, vector<128x192xf32> -> vector<128x192xf32>
    %c0_3 = arith.constant 0 : index
    %c0_4 = arith.constant 0 : index
    %3 = vector.load %arg4[%c0_3, %c0_4] : memref<1x192xf32, #tpu.memory_space<vmem>>, vector<1x192xf32>
    %4 = vector.broadcast %3 : vector<1x192xf32> to vector<128x192xf32>
    %5 = arith.addf %2, %4 : vector<128x192xf32>
    %cst_5 = arith.constant 0.000000e+00 : f32
    %6 = vector.broadcast %cst_5 : f32 to vector<128x192xf32>
    %7 = arith.maximumf %5, %6 : vector<128x192xf32>
    %c0_6 = arith.constant 0 : index
    %c0_7 = arith.constant 0 : index
    %8 = vector.load %arg2[%c0_6, %c0_7] : memref<128x96xf32, #tpu.memory_space<vmem>>, vector<128x96xf32>
    %c0_8 = arith.constant 0 : index
    %c0_9 = arith.constant 0 : index
    %9 = vector.load %arg5[%c0_8, %c0_9] : memref<96x192xf32, #tpu.memory_space<vmem>>, vector<96x192xf32>
    %cst_10 = arith.constant dense<0.000000e+00> : vector<128x192xf32>
    %10 = tpu.matmul %8, %9, %cst_10 {dimension_numbers = #tpu.dot_dimension_numbers<[1], [0], [0], [1], [0, 0, 1, 1], [], []>} : vector<128x96xf32>, vector<96x192xf32>, vector<128x192xf32> -> vector<128x192xf32>
    %11 = arith.addf %7, %10 : vector<128x192xf32>
    %c0_11 = arith.constant 0 : index
    %c0_12 = arith.constant 0 : index
    %12 = vector.load %arg6[%c0_11, %c0_12] : memref<1x192xf32, #tpu.memory_space<vmem>>, vector<1x192xf32>
    %13 = vector.broadcast %12 : vector<1x192xf32> to vector<128x192xf32>
    %14 = arith.addf %11, %13 : vector<128x192xf32>
    %c0_13 = arith.constant 0 : index
    %c0_14 = arith.constant 0 : index
    %15 = vector.load %arg7[%c0_13, %c0_14] : memref<128x192xf32, #tpu.memory_space<vmem>>, vector<128x192xf32>
    tpu.vector_store %arg7[%c0_13, %c0_14], %14 {strides = array<i32>} : memref<128x192xf32, #tpu.memory_space<vmem>>, vector<128x192xf32>,
    return
  }
  func.func @transform_0(%arg0: i32) -> (i32, i32) {
    %c0_i32 = arith.constant 0 : i32
    %c0_i32_0 = arith.constant 0 : i32
    return %arg0, %c0_i32 : i32, i32
  }
  func.func @transform_1(%arg0: i32) -> (i32, i32) {
    %c0_i32 = arith.constant 0 : i32
    %c0_i32_0 = arith.constant 0 : i32
    return %arg0, %c0_i32 : i32, i32
  }
  func.func @transform_2(%arg0: i32) -> (i32, i32) {
    %c0_i32 = arith.constant 0 : i32
    %c0_i32_0 = arith.constant 0 : i32
    %c0_i32_1 = arith.constant 0 : i32
    return %c0_i32, %c0_i32_0 : i32, i32
  }
  func.func @transform_3(%arg0: i32) -> (i32, i32) {
    %c0_i32 = arith.constant 0 : i32
    %c0_i32_0 = arith.constant 0 : i32
    %c0_i32_1 = arith.constant 0 : i32
    return %c0_i32, %c0_i32_0 : i32, i32
  }
  func.func @transform_4(%arg0: i32) -> (i32, i32) {
    %c0_i32 = arith.constant 0 : i32
    %c0_i32_0 = arith.constant 0 : i32
    %c0_i32_1 = arith.constant 0 : i32
    return %c0_i32, %c0_i32_0 : i32, i32
  }
  func.func @transform_5(%arg0: i32) -> (i32, i32) {
    %c0_i32 = arith.constant 0 : i32
    %c0_i32_0 = arith.constant 0 : i32
    %c0_i32_1 = arith.constant 0 : i32
    return %c0_i32, %c0_i32_0 : i32, i32
  }
  func.func @transform_6(%arg0: i32) -> (i32, i32) {
    %c0_i32 = arith.constant 0 : i32
    %c0_i32_0 = arith.constant 0 : i32
    return %arg0, %c0_i32 : i32, i32
  }
}

module attributes {stable_mosaic.version = 11 : i64} {
  func.func @mlp_kernel(%arg0: memref<2x12288xf32, #tpu.memory_space<vmem>>, %arg1: memref<12288x128xf32, #tpu.memory_space<vmem>>, %arg2: memref<1x128xf32, #tpu.memory_space<vmem>>, %arg3: memref<128x64xf32, #tpu.memory_space<vmem>>, %arg4: memref<1x64xf32, #tpu.memory_space<vmem>>, %arg5: memref<64x10xf32, #tpu.memory_space<vmem>>, %arg6: memref<1x10xf32, #tpu.memory_space<vmem>>, %arg7: memref<2x10xf32, #tpu.memory_space<vmem>>) attributes {dimension_semantics = [], scalar_prefetch = 0 : i64, scratch_operands = 0 : i64, tpu.core_type = #tpu.core_type<tc>} {
    %c0 = arith.constant 0 : index
    %c0_0 = arith.constant 0 : index
    %0 = vector.load %arg0[%c0, %c0_0] : memref<2x12288xf32, #tpu.memory_space<vmem>>, vector<2x12288xf32>
    %c0_1 = arith.constant 0 : index
    %c0_2 = arith.constant 0 : index
    %1 = vector.load %arg1[%c0_1, %c0_2] : memref<12288x128xf32, #tpu.memory_space<vmem>>, vector<12288x128xf32>
    %c0_3 = arith.constant 0 : index
    %c0_4 = arith.constant 0 : index
    %2 = vector.load %arg2[%c0_3, %c0_4] : memref<1x128xf32, #tpu.memory_space<vmem>>, vector<1x128xf32>
    %cst = arith.constant dense<0.000000e+00> : vector<2x128xf32>
    %3 = tpu.matmul %0, %1, %cst {dimension_numbers = #tpu.dot_dimension_numbers<[1], [0], [0], [1], [0, 0, 1, 1], [], []>} : vector<2x12288xf32>, vector<12288x128xf32>, vector<2x128xf32> -> vector<2x128xf32>
    %4 = vector.broadcast %2 : vector<1x128xf32> to vector<2x128xf32>
    %5 = arith.addf %3, %4 : vector<2x128xf32>
    %cst_5 = arith.constant 0.000000e+00 : f32
    %6 = vector.broadcast %cst_5 : f32 to vector<2x128xf32>
    %7 = arith.maximumf %5, %6 : vector<2x128xf32>
    %c0_6 = arith.constant 0 : index
    %c0_7 = arith.constant 0 : index
    %8 = vector.load %arg3[%c0_6, %c0_7] : memref<128x64xf32, #tpu.memory_space<vmem>>, vector<128x64xf32>
    %c0_8 = arith.constant 0 : index
    %c0_9 = arith.constant 0 : index
    %9 = vector.load %arg4[%c0_8, %c0_9] : memref<1x64xf32, #tpu.memory_space<vmem>>, vector<1x64xf32>
    %cst_10 = arith.constant dense<0.000000e+00> : vector<2x64xf32>
    %10 = tpu.matmul %7, %8, %cst_10 {dimension_numbers = #tpu.dot_dimension_numbers<[1], [0], [0], [1], [0, 0, 1, 1], [], []>} : vector<2x128xf32>, vector<128x64xf32>, vector<2x64xf32> -> vector<2x64xf32>
    %11 = vector.broadcast %9 : vector<1x64xf32> to vector<2x64xf32>
    %12 = arith.addf %10, %11 : vector<2x64xf32>
    %cst_11 = arith.constant 0.000000e+00 : f32
    %13 = vector.broadcast %cst_11 : f32 to vector<2x64xf32>
    %14 = arith.maximumf %12, %13 : vector<2x64xf32>
    %c0_12 = arith.constant 0 : index
    %c0_13 = arith.constant 0 : index
    %15 = vector.load %arg5[%c0_12, %c0_13] : memref<64x10xf32, #tpu.memory_space<vmem>>, vector<64x10xf32>
    %c0_14 = arith.constant 0 : index
    %c0_15 = arith.constant 0 : index
    %16 = vector.load %arg6[%c0_14, %c0_15] : memref<1x10xf32, #tpu.memory_space<vmem>>, vector<1x10xf32>
    %cst_16 = arith.constant dense<0.000000e+00> : vector<2x10xf32>
    %17 = tpu.matmul %14, %15, %cst_16 {dimension_numbers = #tpu.dot_dimension_numbers<[1], [0], [0], [1], [0, 0, 1, 1], [], []>} : vector<2x64xf32>, vector<64x10xf32>, vector<2x10xf32> -> vector<2x10xf32>
    %18 = vector.broadcast %16 : vector<1x10xf32> to vector<2x10xf32>
    %19 = arith.addf %17, %18 : vector<2x10xf32>
    %c0_17 = arith.constant 0 : index
    %c0_18 = arith.constant 0 : index
    %20 = vector.load %arg7[%c0_17, %c0_18] : memref<2x10xf32, #tpu.memory_space<vmem>>, vector<2x10xf32>
    tpu.vector_store %arg7[%c0_17, %c0_18], %19 {strides = array<i32>} : memref<2x10xf32, #tpu.memory_space<vmem>>, vector<2x10xf32>,
    return
  }
}

</mosaic_0001>

<bundles_post_ra>
// kernel: forward.3
= control target key start
LH: loop header
LB: loop body
LE: loop exit
PB: predicated region body
PF: predicated region fallthrough
CT: control target
= control target key end

     0   :  { %11 = vsyncpa [#allocation3], 0  ;;  %s1161_s0 = inlined_call_operand.vmem [shape: f32[128,36], index: 0, kind: input, shape index: {}]   ;;  %s1162_s1 = inlined_call_operand.vmem [shape: f32[128,4], index: 1, kind: input, shape index: {}]   ;;  %s1163_s2 = inlined_call_operand.hbm [shape: f32[36,96], index: 2, kind: input, shape index: {}]   ;;  %s1164_s3 = inlined_call_operand.hbm [shape: f32[1,96], index: 3, kind: input, shape index: {}]   ;;  %s1165_s4 = inlined_call_operand.hbm [shape: f32[4,96], index: 4, kind: input, shape index: {}]   ;;  %s1166_s5 = inlined_call_operand.hbm [shape: f32[1,96], index: 5, kind: input, shape index: {}]   ;;  %s1167_s6 = inlined_call_operand.vmem [shape: f32[128,96], index: 6, kind: output, shape index: {}]  }
   0x1   :  { %12 = vsyncpa [#allocation5], 0 }
   0x2   :  { %13 = vsyncpa [#allocation8], 0  ;;  %s833_s21 = smov [#allocation4]   ;;  %s834_s23 = smov [#allocation2]  }
   0x3   :  { %s36_s22 = sshll.u32 %s833_s21, 4  ;;  %s23_s24 = sshll.u32 %s834_s23, 4  ;;  %s37_s22 = int_to_ptr.vmem [resolvable:$true] %s36_s22  ;;  %s874_s24 = int_to_ptr.vmem [resolvable:$true] %s23_s24 }
   0x4   :  { %s739_s27 = scalar_lea.hbm %s1164_s3, 16 }
   0x5   :  { %p740_p0 = scmp.ne.s32.totalorder %s1164_s3, %s739_s27  ;;  %p743_p1 = scmp.lt.u32.totalorder %s739_s27, %s1164_s3 }
   0x7   :  { %p745_p2 = pnand %p743_p1, %p740_p0 }
   0x9   :  { %748 = shalt.err (!%p745_p2)
}
   0xa   :  { %s749_s8 = scalar_lea.vmem %s37_s22, 16  ;;  %s753_s9 = scalar_lea.vmem %s37_s22, 32 }
   0xb   :  { %p750_p3 = scmp.ne.s32.totalorder %s37_s22, %s749_s8  ;;  %p754_p4 = scmp.lt.s32.totalorder %s37_s22, %s37_s22 }
   0xc   :  { %p755_p5 = scmp.lt.s32.totalorder %s753_s9, %s749_s8 }
   0xe   :  { %p756_p6 = por %p755_p5, %p754_p4 }
  0x10   :  { %p757_p7 = pnand %p756_p6, %p750_p3 }
  0x12   :  { %760 = shalt.err (!%p757_p7)
}
  0x13   :  { %39 = dma.hbm_to_vmem [thread:$0]  %s1164_s3, 16, %s37_s22, [#allocation5]  }
  0x14   :  { %s761_s14 = scalar_lea.hbm %s1163_s2, 640 }
  0x15   :  { %p762_p8 = scmp.ne.s32.totalorder %s1163_s2, %s761_s14  ;;  %p765_p9 = scmp.lt.u32.totalorder %s761_s14, %s1163_s2 }
  0x17   :  { %p767_p10 = pnand %p765_p9, %p762_p8 }
  0x19   :  { %770 = shalt.err (!%p767_p10)
}
  0x1a   :  { %s771_s19 = scalar_lea.vmem %s874_s24, 640  ;;  %p776_p12 = scmp.lt.s32.totalorder %s874_s24, %s874_s24 }
  0x1b   :  { %p772_p11 = scmp.ne.s32.totalorder %s874_s24, %s771_s19  ;;  %p777_p13 = scmp.lt.s32.totalorder %s771_s19, %s771_s19 }
  0x1d   :  { %p778_p0 = por %p777_p13, %p776_p12 }
  0x1f   :  { %p779_p1 = pnand %p778_p0, %p772_p11 }
  0x21   :  { %782 = shalt.err (!%p779_p1)
}
  0x22   :  { %s835_s3 = smov 128   ;;  %s836_s20 = smov 8  }
  0x23   :  { %29 = dma.hbm_to_vmem [thread:$0]  %s1163_s2, 640, %s874_s24, [#allocation3], %s835_s3, %s835_s3, %s836_s20  }
  0x24   :  { %s837_s23 = smov [#allocation6]   ;;  %s838_s26 = smov [#allocation7]  }
  0x25   :  { %s46_s25 = sshll.u32 %s837_s23, 4  ;;  %s56_s27 = sshll.u32 %s838_s26, 4  ;;  %s47_s25 = int_to_ptr.vmem [resolvable:$true] %s46_s25  ;;  %s57_s27 = int_to_ptr.vmem [resolvable:$true] %s56_s27 }
  0x26   :  { %s783_s30 = scalar_lea.hbm %s1165_s4, 64 }
  0x27   :  { %p784_p2 = scmp.ne.s32.totalorder %s1165_s4, %s783_s30  ;;  %p787_p3 = scmp.lt.u32.totalorder %s783_s30, %s1165_s4 }
  0x29   :  { %p789_p4 = pnand %p787_p3, %p784_p2 }
  0x2b   :  { %792 = shalt.err (!%p789_p4)
}
  0x2c   :  { %s793_s2 = scalar_lea.vmem %s47_s25, 64  ;;  %p798_p6 = scmp.lt.s32.totalorder %s47_s25, %s47_s25 }
  0x2d   :  { %p794_p5 = scmp.ne.s32.totalorder %s47_s25, %s793_s2  ;;  %p799_p7 = scmp.lt.s32.totalorder %s793_s2, %s793_s2 }
  0x2f   :  { %p800_p8 = por %p799_p7, %p798_p6 }
  0x31   :  { %p801_p9 = pnand %p800_p8, %p794_p5 }
  0x33   :  { %804 = shalt.err (!%p801_p9)
}
  0x34   :  { %49 = dma.hbm_to_vmem [thread:$0]  %s1165_s4, 64, %s47_s25, [#allocation5]  }
  0x35   :  { %s805_s14 = scalar_lea.hbm %s1166_s5, 16 }
  0x36   :  { %p806_p10 = scmp.ne.s32.totalorder %s1166_s5, %s805_s14  ;;  %p809_p11 = scmp.lt.u32.totalorder %s805_s14, %s1166_s5 }
  0x38   :  { %p811_p12 = pnand %p809_p11, %p806_p10 }
  0x3a   :  { %814 = shalt.err (!%p811_p12)
}
  0x3b   :  { %s815_s19 = scalar_lea.vmem %s57_s27, 16  ;;  %s819_s3 = scalar_lea.vmem %s57_s27, 32 }
  0x3c   :  { %p816_p13 = scmp.ne.s32.totalorder %s57_s27, %s815_s19  ;;  %p820_p0 = scmp.lt.s32.totalorder %s57_s27, %s57_s27 }
  0x3d   :  { %p821_p1 = scmp.lt.s32.totalorder %s819_s3, %s815_s19 }
  0x3f   :  { %p822_p2 = por %p821_p1, %p820_p0 }
  0x41   :  { %p823_p3 = pnand %p822_p2, %p816_p13 }
  0x43   :  { %826 = shalt.err (!%p823_p3)
}
  0x44   :  { %59 = dma.hbm_to_vmem [thread:$0]  %s1166_s5, 16, %s57_s27, [#allocation8]  }
  0x45   :  { %827 = dma.done.wait [#allocation3], 640  }
  0x46   :  { %828 = vsyncadd [#allocation3], 4294966656 }
  0x47   :  { %829 = dma.done.wait [#allocation5], 80  }
  0x48   :  { %830 = vsyncadd [#allocation5], 4294967216 }
  0x49   :  { %831 = dma.done.wait [#allocation8], 16  }
  0x4a   :  { %832 = vsyncadd [#allocation8], 4294967280  ;;  %vm100_vm0 = vcmask 293888   ;;  %v88_v0 = vld [vmem:[#allocation2] sm:$0xff]  ;;  %v89_v1 = vld [vmem:[#allocation2 + $0x8] sm:$0xff]  ;;  %vm149_vm1 = vcmask 1043456  }
  0x4b   :  { %v90_v2 = vld [vmem:[#allocation2 + $0x10] sm:$0xff]  ;;  %v725_v3 = vpack.c.bf16 %v89_v1, %v88_v0  ;;  %v91_v4 = vld [vmem:[#allocation2 + $0x18] sm:$0xff]  ;;  %v72_v5 = vld [vmem:[%s1161_s0] sm:$0xff]  ;;  %vm331_vm2 = vcmask 31744   ;;  %vm567_vm3 = vcmask 785408  }
  0x4c   :  { %v729_v6 = vpack.c.bf16 %v91_v4, %v90_v2  ;;  %675 = vmatprep.mubr.msk.f32.mxu0 %vm100_vm0, %v72_v5  ;;  %v330_v7 = vld [vmem:[#allocation6] sm:$0xf]  ;;  %v314_v8 = vld [vmem:[%s1162_s1] sm:$0xff]  ;;  %v316_v10 = vld [vmem:[%s1162_s1 + $0x10] sm:$0xff] }
  0x4d   :  { %726 = vmatprep.subr.bf16.mxu0 %v725_v3  ;;  %699 = vmatprep.subr.msk.mxu1 %vm149_vm1, %v330_v7  ;;  %v315_v9 = vld [vmem:[%s1162_s1 + $0x8] sm:$0xff]  ;;  %v92_v11 = vld [vmem:[#allocation2 + $0x20] sm:$0xf]  ;;  %v317_v12 = vld [vmem:[%s1162_s1 + $0x18] sm:$0xff] }
  0x4e   :  { %728 = vmatpush3.bf16.msra.mxu0 %v725_v3  ;;  %700 = vmatpush3.msk.msra.mxu1 %vm149_vm1, %v330_v7  ;;  %v318_v13 = vld [vmem:[%s1162_s1 + $0x20] sm:$0xff]  ;;  %v73_v14 = vld [vmem:[%s1161_s0 + $0x8] sm:$0xff]  ;;  %v74_v15 = vld [vmem:[%s1161_s0 + $0x10] sm:$0xff] }
  0x4f   :  { %730 = vmatprep.subr.bf16.mxu0 %v729_v6  ;;  %701 = vmatprep.mubr.msk.f32.mxu1 %vm331_vm2, %v314_v8  ;;  %v319_v16 = vld [vmem:[%s1162_s1 + $0x28] sm:$0xff]  ;;  %v320_v17 = vld [vmem:[%s1162_s1 + $0x30] sm:$0xff]  ;;  %v75_v18 = vld [vmem:[%s1161_s0 + $0x18] sm:$0xff] }
  0x50   :  { %702 = vmatmul.mubr.msk.f32.vlgmr.msra.gmra.mrb[0].mxu1 %vm331_vm2, %v315_v9  ;;  %v76_v19 = vld [vmem:[%s1161_s0 + $0x20] sm:$0xff]  ;;  %v321_v20 = vld [vmem:[%s1162_s1 + $0x38] sm:$0xff]  ;;  %v77_v22 = vld [vmem:[%s1161_s0 + $0x28] sm:$0xff] }
  0x51   :  { %704 = vmatprep.mubr.msk.f32.mxu1 %vm331_vm2, %v316_v10  ;;  %v322_v21 = vld [vmem:[%s1162_s1 + $0x40] sm:$0xff]  ;;  %v78_v23 = vld [vmem:[%s1161_s0 + $0x30] sm:$0xff]  ;;  %v323_v24 = vld [vmem:[%s1162_s1 + $0x48] sm:$0xff] }
  0x52   :  { %732 = vmatpush3.bf16.msra.mxu0 %v729_v6  ;;  %v324_v25 = vld [vmem:[%s1162_s1 + $0x50] sm:$0xff]  ;;  %v79_v26 = vld [vmem:[%s1161_s0 + $0x38] sm:$0xff]  ;;  %v80_v27 = vld [vmem:[%s1161_s0 + $0x40] sm:$0xff] }
  0x53   :  { %673 = vmatprep.subr.msk.mxu0 %vm149_vm1, %v92_v11  ;;  %v325_v28 = vld [vmem:[%s1162_s1 + $0x58] sm:$0xff]  ;;  %v326_v29 = vld [vmem:[%s1162_s1 + $0x60] sm:$0xff]  ;;  %v81_v30 = vld [vmem:[%s1161_s0 + $0x48] sm:$0xff] }
  0x54   :  { %705 = vmatmul.mubr.msk.f32.gmra.mrb[2].mxu1 %vm331_vm2, %v317_v12  ;;  %v82_v31 = vld [vmem:[%s1161_s0 + $0x50] sm:$0xff]  ;;  %v327_v32 = vld [vmem:[%s1162_s1 + $0x68] sm:$0xff]  ;;  %v83_v34 = vld [vmem:[%s1161_s0 + $0x58] sm:$0xff] }
  0x55   :  { %707 = vmatprep.mubr.msk.f32.mxu1 %vm331_vm2, %v318_v13  ;;  %v328_v33 = vld [vmem:[%s1162_s1 + $0x70] sm:$0xff]  ;;  %v84_v35 = vld [vmem:[%s1161_s0 + $0x60] sm:$0xff]  ;;  %v329_v36 = vld [vmem:[%s1162_s1 + $0x78] sm:$0xff] }
  0x56   :  { %674 = vmatpush3.msk.msra.mxu0 %vm149_vm1, %v92_v11  ;;  %v85_v37 = vld [vmem:[%s1161_s0 + $0x68] sm:$0xff]  ;;  %v86_v38 = vld [vmem:[%s1161_s0 + $0x70] sm:$0xff]  ;;  %v87_v39 = vld [vmem:[%s1161_s0 + $0x78] sm:$0xff] }
  0x57   :  { %676 = vmatmul.mubr.msk.f32.vlgmr.msra.gmra.mrb[0].mxu0 %vm100_vm0, %v73_v14  ;;  %v1061_v43 = vld [vmem:[#allocation4] ss:$0 sm:$0xff]  ;;  %v1065_v53 = vld [vmem:[#allocation7] ss:$0 sm:$0xff] }
  0x58   :  { %678 = vmatprep.mubr.msk.f32.mxu0 %vm100_vm0, %v74_v15  ;;  %708 = vmatmul.mubr.msk.f32.gmra.mrb[4].mxu1 %vm331_vm2, %v319_v16 }
  0x59   :  { %710 = vmatprep.mubr.msk.f32.mxu1 %vm331_vm2, %v320_v17 }
  0x5b   :  { %679 = vmatmul.mubr.msk.f32.gmra.mrb[2].mxu0 %vm100_vm0, %v75_v18 }
  0x5c   :  { %681 = vmatprep.mubr.msk.f32.mxu0 %vm100_vm0, %v76_v19  ;;  %711 = vmatmul.mubr.msk.f32.gmra.mrb[6].mxu1 %vm331_vm2, %v321_v20 }
  0x5d   :  { %713 = vmatprep.mubr.msk.f32.mxu1 %vm331_vm2, %v322_v21 }
  0x5f   :  { %682 = vmatmul.mubr.msk.f32.gmra.mrb[4].mxu0 %vm100_vm0, %v77_v22 }
  0x60   :  { %684 = vmatprep.mubr.msk.f32.mxu0 %vm100_vm0, %v78_v23  ;;  %714 = vmatmul.mubr.msk.f32.gmra.mrb[8].mxu1 %vm331_vm2, %v323_v24 }
  0x61   :  { %716 = vmatprep.mubr.msk.f32.mxu1 %vm331_vm2, %v324_v25 }
  0x63   :  { %685 = vmatmul.mubr.msk.f32.gmra.mrb[6].mxu0 %vm100_vm0, %v79_v26 }
  0x64   :  { %687 = vmatprep.mubr.msk.f32.mxu0 %vm100_vm0, %v80_v27  ;;  %717 = vmatmul.mubr.msk.f32.gmra.mrb[10].mxu1 %vm331_vm2, %v325_v28 }
  0x65   :  { %719 = vmatprep.mubr.msk.f32.mxu1 %vm331_vm2, %v326_v29 }
  0x67   :  { %688 = vmatmul.mubr.msk.f32.gmra.mrb[8].mxu0 %vm100_vm0, %v81_v30 }
  0x68   :  { %690 = vmatprep.mubr.msk.f32.mxu0 %vm100_vm0, %v82_v31  ;;  %720 = vmatmul.mubr.msk.f32.gmra.mrb[12].mxu1 %vm331_vm2, %v327_v32 }
  0x69   :  { %722 = vmatprep.mubr.msk.f32.mxu1 %vm331_vm2, %v328_v33 }
  0x6b   :  { %691 = vmatmul.mubr.msk.f32.gmra.mrb[10].mxu0 %vm100_vm0, %v83_v34 }
  0x6c   :  { %693 = vmatprep.mubr.msk.f32.mxu0 %vm100_vm0, %v84_v35  ;;  %723 = vmatmul.mubr.msk.f32.gmra.mrb[14].mxu1 %vm331_vm2, %v329_v36 }
  0x6f   :  { %694 = vmatmul.mubr.msk.f32.gmra.mrb[12].mxu0 %vm100_vm0, %v85_v37 }
  0x70   :  { %696 = vmatprep.mubr.msk.f32.mxu0 %vm100_vm0, %v86_v38 }
  0x73   :  { %697 = vmatmul.mubr.msk.f32.gmra.mrb[14].mxu0 %vm100_vm0, %v87_v39 }
 0x123   :  { %v703_v40 = vpop.f32.mrb[0].mxu1 }
 0x124   :  { %v449_v41 = vpop.f32.mrb[1].mxu1 }
 0x127   :  { %v706_v42 = vpop.f32.mrb[2].mxu1 }
 0x128   :  { %v459_v44 = vpop.f32.mrb[3].mxu1 }
 0x12a   :  { %v677_v45 = vpop.f32.mrb[0].mxu0 }
 0x12b   :  { %v225_v46 = vadd.f32 %v677_v45, %v1061_v43  ;;  %v219_v47 = vpop.f32.mrb[1].mxu0  ;;  %v709_v48 = vpop.f32.mrb[4].mxu1 }
 0x12c   :  { %v220_v49 = vadd.f32 %v1061_v43, %v219_v47  ;;  %v469_v50 = vpop.f32.mrb[5].mxu1 }
 0x12d   :  { %v299_v51 = vmax.f32 %v225_v46, 0.0 }
 0x12e   :  { %v298_v52 = vmax.f32 %v220_v49, 0.0  ;;  %v680_v54 = vpop.f32.mrb[2].mxu0 }
 0x12f   :  { %v529_v55 = vadd.f32 %v703_v40, %v299_v51  ;;  %v235_v56 = vadd.f32 %v680_v54, %v1061_v43  ;;  %v229_v57 = vpop.f32.mrb[3].mxu0  ;;  %v712_v58 = vpop.f32.mrb[6].mxu1 }
 0x130   :  { %v528_v59 = vadd.f32 %v449_v41, %v298_v52  ;;  %v230_v60 = vadd.f32 %v1061_v43, %v229_v57  ;;  %v479_v61 = vpop.f32.mrb[7].mxu1 }
 0x131   :  { %v552_v62 = vadd.f32 %v1065_v53, %v529_v55  ;;  %v301_v63 = vmax.f32 %v235_v56, 0.0 }
 0x132   :  { %v551_v0 = vadd.f32 %v1065_v53, %v528_v59  ;;  %v300_v1 = vmax.f32 %v230_v60, 0.0  ;;  %v683_v2 = vpop.f32.mrb[4].mxu0 }
 0x133   :  { %569 = vst.msk [vmem:[%s1167_s6 + $0x8] sm:$0xff] %vm567_vm3, %v552_v62  ;;  %v531_v3 = vadd.f32 %v706_v42, %v301_v63  ;;  %v245_v4 = vadd.f32 %v683_v2, %v1061_v43  ;;  %v239_v5 = vpop.f32.mrb[5].mxu0  ;;  %v715_v6 = vpop.f32.mrb[8].mxu1 }
 0x134   :  { %568 = vst.msk [vmem:[%s1167_s6] sm:$0xff] %vm567_vm3, %v551_v0  ;;  %v530_v7 = vadd.f32 %v459_v44, %v300_v1  ;;  %v240_v8 = vadd.f32 %v1061_v43, %v239_v5  ;;  %v489_v9 = vpop.f32.mrb[9].mxu1 }
 0x135   :  { %v554_v10 = vadd.f32 %v1065_v53, %v531_v3  ;;  %v303_v11 = vmax.f32 %v245_v4, 0.0 }
 0x136   :  { %v553_v12 = vadd.f32 %v1065_v53, %v530_v7  ;;  %v302_v13 = vmax.f32 %v240_v8, 0.0  ;;  %v686_v14 = vpop.f32.mrb[6].mxu0 }
 0x137   :  { %571 = vst.msk [vmem:[%s1167_s6 + $0x18] sm:$0xff] %vm567_vm3, %v554_v10  ;;  %v533_v15 = vadd.f32 %v709_v48, %v303_v11  ;;  %v255_v16 = vadd.f32 %v686_v14, %v1061_v43  ;;  %v249_v17 = vpop.f32.mrb[7].mxu0  ;;  %v718_v18 = vpop.f32.mrb[10].mxu1 }
 0x138   :  { %570 = vst.msk [vmem:[%s1167_s6 + $0x10] sm:$0xff] %vm567_vm3, %v553_v12  ;;  %v532_v19 = vadd.f32 %v469_v50, %v302_v13  ;;  %v250_v20 = vadd.f32 %v1061_v43, %v249_v17  ;;  %v499_v21 = vpop.f32.mrb[11].mxu1 }
 0x139   :  { %v556_v22 = vadd.f32 %v1065_v53, %v533_v15  ;;  %v305_v23 = vmax.f32 %v255_v16, 0.0 }
 0x13a   :  { %v555_v24 = vadd.f32 %v1065_v53, %v532_v19  ;;  %v304_v25 = vmax.f32 %v250_v20, 0.0  ;;  %v689_v26 = vpop.f32.mrb[8].mxu0 }
 0x13b   :  { %573 = vst.msk [vmem:[%s1167_s6 + $0x28] sm:$0xff] %vm567_vm3, %v556_v22  ;;  %v535_v27 = vadd.f32 %v712_v58, %v305_v23  ;;  %v265_v28 = vadd.f32 %v689_v26, %v1061_v43  ;;  %v259_v29 = vpop.f32.mrb[9].mxu0  ;;  %v721_v30 = vpop.f32.mrb[12].mxu1 }
 0x13c   :  { %572 = vst.msk [vmem:[%s1167_s6 + $0x20] sm:$0xff] %vm567_vm3, %v555_v24  ;;  %v534_v31 = vadd.f32 %v479_v61, %v304_v25  ;;  %v260_v32 = vadd.f32 %v1061_v43, %v259_v29  ;;  %v509_v33 = vpop.f32.mrb[13].mxu1 }
 0x13d   :  { %v558_v34 = vadd.f32 %v1065_v53, %v535_v27  ;;  %v307_v35 = vmax.f32 %v265_v28, 0.0 }
 0x13e   :  { %v557_v36 = vadd.f32 %v1065_v53, %v534_v31  ;;  %v306_v37 = vmax.f32 %v260_v32, 0.0  ;;  %v692_v38 = vpop.f32.mrb[10].mxu0 }
 0x13f   :  { %575 = vst.msk [vmem:[%s1167_s6 + $0x38] sm:$0xff] %vm567_vm3, %v558_v34  ;;  %v537_v39 = vadd.f32 %v715_v6, %v307_v35  ;;  %v275_v40 = vadd.f32 %v692_v38, %v1061_v43  ;;  %v269_v41 = vpop.f32.mrb[11].mxu0  ;;  %v724_v42 = vpop.f32.mrb[14].mxu1 }
 0x140   :  { %574 = vst.msk [vmem:[%s1167_s6 + $0x30] sm:$0xff] %vm567_vm3, %v557_v36  ;;  %v536_v44 = vadd.f32 %v489_v9, %v306_v37  ;;  %v270_v45 = vadd.f32 %v1061_v43, %v269_v41  ;;  %v519_v46 = vpop.f32.mrb[15].mxu1 }
 0x141   :  { %v560_v47 = vadd.f32 %v1065_v53, %v537_v39  ;;  %v309_v48 = vmax.f32 %v275_v40, 0.0 }
 0x142   :  { %v559_v49 = vadd.f32 %v1065_v53, %v536_v44  ;;  %v308_v50 = vmax.f32 %v270_v45, 0.0  ;;  %v695_v51 = vpop.f32.mrb[12].mxu0 }
 0x143   :  { %577 = vst.msk [vmem:[%s1167_s6 + $0x48] sm:$0xff] %vm567_vm3, %v560_v47  ;;  %v539_v52 = vadd.f32 %v718_v18, %v309_v48  ;;  %v285_v54 = vadd.f32 %v695_v51, %v1061_v43  ;;  %v279_v55 = vpop.f32.mrb[13].mxu0 }
 0x144   :  { %576 = vst.msk [vmem:[%s1167_s6 + $0x40] sm:$0xff] %vm567_vm3, %v559_v49  ;;  %v538_v56 = vadd.f32 %v499_v21, %v308_v50  ;;  %v280_v57 = vadd.f32 %v1061_v43, %v279_v55 }
 0x145   :  { %v562_v58 = vadd.f32 %v1065_v53, %v539_v52  ;;  %v311_v59 = vmax.f32 %v285_v54, 0.0 }
 0x146   :  { %v561_v60 = vadd.f32 %v1065_v53, %v538_v56  ;;  %v310_v61 = vmax.f32 %v280_v57, 0.0  ;;  %v698_v62 = vpop.f32.mrb[14].mxu0 }
 0x147   :  { %579 = vst.msk [vmem:[%s1167_s6 + $0x58] sm:$0xff] %vm567_vm3, %v562_v58  ;;  %v541_v63 = vadd.f32 %v721_v30, %v311_v59  ;;  %v295_v0 = vadd.f32 %v698_v62, %v1061_v43  ;;  %v289_v1 = vpop.f32.mrb[15].mxu0 }
 0x148   :  { %578 = vst.msk [vmem:[%s1167_s6 + $0x50] sm:$0xff] %vm567_vm3, %v561_v60  ;;  %v540_v2 = vadd.f32 %v509_v33, %v310_v61  ;;  %v290_v3 = vadd.f32 %v1061_v43, %v289_v1 }
 0x149   :  { %v564_v4 = vadd.f32 %v1065_v53, %v541_v63  ;;  %v313_v5 = vmax.f32 %v295_v0, 0.0 }
 0x14a   :  { %v563_v6 = vadd.f32 %v1065_v53, %v540_v2  ;;  %v312_v7 = vmax.f32 %v290_v3, 0.0 }
 0x14b   :  { %581 = vst.msk [vmem:[%s1167_s6 + $0x68] sm:$0xff] %vm567_vm3, %v564_v4  ;;  %v543_v8 = vadd.f32 %v724_v42, %v313_v5 }
 0x14c   :  { %580 = vst.msk [vmem:[%s1167_s6 + $0x60] sm:$0xff] %vm567_vm3, %v563_v6  ;;  %v542_v9 = vadd.f32 %v519_v46, %v312_v7 }
 0x14d   :  { %v566_v43 = vadd.f32 %v1065_v53, %v543_v8 }
 0x14e   :  { %v565_v10 = vadd.f32 %v1065_v53, %v542_v9 }
 0x14f   :  { %583 = vst.msk [vmem:[%s1167_s6 + $0x78] sm:$0xff] %vm567_vm3, %v566_v43 }
 0x150   :  { %582 = vst.msk [vmem:[%s1167_s6 + $0x70] sm:$0xff] %vm567_vm3, %v565_v10 }
 0x151   :  { %588 = vsyncpa [#allocation3], 1 }
 0x152   :  { %589 = vsyncpa [#allocation5], 1 }
 0x153   :  { %590 = vsyncpa [#allocation8], 1 }

// kernel: forward.4
= control target key start
LH: loop header
LB: loop body
LE: loop exit
PB: predicated region body
PF: predicated region fallthrough
CT: control target
= control target key end

     0   :  { %11 = vsyncpa [#allocation3], 0  ;;  %s3462_s0 = inlined_call_operand.vmem [shape: f32[128,864], index: 0, kind: input, shape index: {}]   ;;  %s3463_s1 = inlined_call_operand.vmem [shape: f32[128,96], index: 1, kind: input, shape index: {}]   ;;  %s3464_s2 = inlined_call_operand.vmem [shape: f32[864,192], index: 2, kind: input, shape index: {}]   ;;  %s3465_s3 = inlined_call_operand.hbm [shape: f32[1,192], index: 3, kind: input, shape index: {}]   ;;  %s3466_s4 = inlined_call_operand.hbm [shape: f32[96,192], index: 4, kind: input, shape index: {}]   ;;  %s3467_s5 = inlined_call_operand.hbm [shape: f32[1,192], index: 5, kind: input, shape index: {}]   ;;  %s3468_s6 = inlined_call_operand.vmem [shape: f32[128,192], index: 6, kind: output, shape index: {}]  }
   0x1   :  { %12 = vsyncpa [#allocation5], 0  ;;  %s1997_s21 = smov [#allocation4]   ;;  %s1927_s25 = scalar_lea.hbm %s3466_s4, 3072 }
   0x2   :  { %s34_s22 = sshll.u32 %s1997_s21, 4  ;;  %p1928_p0 = scmp.ne.s32.totalorder %s3466_s4, %s1927_s25  ;;  %s35_s22 = int_to_ptr.vmem [resolvable:$true] %s34_s22 }
   0x3   :  { %p1931_p1 = scmp.lt.u32.totalorder %s1927_s25, %s3466_s4 }
   0x5   :  { %p1933_p2 = pnand %p1931_p1, %p1928_p0 }
   0x7   :  { %1936 = shalt.err (!%p1933_p2)
}
   0x8   :  { %s1937_s30 = scalar_lea.vmem %s35_s22, 3072  ;;  %p1942_p4 = scmp.lt.s32.totalorder %s35_s22, %s35_s22 }
   0x9   :  { %p1938_p3 = scmp.ne.s32.totalorder %s35_s22, %s1937_s30  ;;  %p1943_p5 = scmp.lt.s32.totalorder %s1937_s30, %s1937_s30 }
   0xb   :  { %p1944_p6 = por %p1943_p5, %p1942_p4 }
   0xd   :  { %p1945_p7 = pnand %p1944_p6, %p1938_p3 }
   0xf   :  { %1948 = shalt.err (!%p1945_p7)
}
  0x10   :  { %s1998_s7 = smov 256   ;;  %s1999_s8 = smov 16  }
  0x11   :  { %40 = dma.hbm_to_vmem [thread:$0]  %s3466_s4, 3072, %s35_s22, [#allocation5], %s1998_s7, %s1998_s7, %s1999_s8  }
  0x12   :  { %s2000_s11 = smov [#allocation2]   ;;  %s2001_s13 = smov [#allocation6]  }
  0x13   :  { %s25_s12 = sshll.u32 %s2000_s11, 4  ;;  %s47_s14 = sshll.u32 %s2001_s13, 4  ;;  %s26_s12 = int_to_ptr.vmem [resolvable:$true] %s25_s12  ;;  %s48_s14 = int_to_ptr.vmem [resolvable:$true] %s47_s14 }
  0x14   :  { %s1949_s17 = scalar_lea.hbm %s3465_s3, 32 }
  0x15   :  { %p1950_p8 = scmp.ne.s32.totalorder %s3465_s3, %s1949_s17  ;;  %p1953_p9 = scmp.lt.u32.totalorder %s1949_s17, %s3465_s3 }
  0x17   :  { %p1955_p10 = pnand %p1953_p9, %p1950_p8 }
  0x19   :  { %1958 = shalt.err (!%p1955_p10)
}
  0x1a   :  { %s1959_s4 = scalar_lea.vmem %s26_s12, 32  ;;  %p1964_p12 = scmp.lt.s32.totalorder %s26_s12, %s26_s12 }
  0x1b   :  { %p1960_p11 = scmp.ne.s32.totalorder %s26_s12, %s1959_s4  ;;  %p1965_p13 = scmp.lt.s32.totalorder %s1959_s4, %s1959_s4 }
  0x1d   :  { %p1966_p0 = por %p1965_p13, %p1964_p12 }
  0x1f   :  { %p1967_p1 = pnand %p1966_p0, %p1960_p11 }
  0x21   :  { %1970 = shalt.err (!%p1967_p1)
}
  0x22   :  { %28 = dma.hbm_to_vmem [thread:$0]  %s3465_s3, 32, %s26_s12, [#allocation3]  }
  0x23   :  { %s1971_s26 = scalar_lea.hbm %s3467_s5, 32 }
  0x24   :  { %p1972_p2 = scmp.ne.s32.totalorder %s3467_s5, %s1971_s26  ;;  %p1975_p3 = scmp.lt.u32.totalorder %s1971_s26, %s3467_s5 }
  0x26   :  { %p1977_p4 = pnand %p1975_p3, %p1972_p2 }
  0x28   :  { %1980 = shalt.err (!%p1977_p4)
}
  0x29   :  { %s1981_s7 = scalar_lea.vmem %s48_s14, 32  ;;  %p1986_p6 = scmp.lt.s32.totalorder %s48_s14, %s48_s14 }
  0x2a   :  { %p1982_p5 = scmp.ne.s32.totalorder %s48_s14, %s1981_s7  ;;  %p1987_p7 = scmp.lt.s32.totalorder %s1981_s7, %s1981_s7 }
  0x2c   :  { %p1988_p8 = por %p1987_p7, %p1986_p6 }
  0x2e   :  { %p1989_p9 = pnand %p1988_p8, %p1982_p5 }
  0x30   :  { %1992 = shalt.err (!%p1989_p9)
}
  0x31   :  { %50 = dma.hbm_to_vmem [thread:$0]  %s3467_s5, 32, %s48_s14, [#allocation5]  }
  0x32   :  { %1993 = dma.done.wait [#allocation3], 32  }
  0x33   :  { %1994 = vsyncadd [#allocation3], 4294967264 }
  0x34   :  { %1995 = dma.done.wait [#allocation5], 3104  }
  0x35   :  { %1996 = vsyncadd [#allocation5], 4294964192  ;;  %v173_v0 = vld [vmem:[%s3464_s2 + $0x8] sm:$0xff]  ;;  %v175_v1 = vld [vmem:[%s3464_s2 + $0x18] sm:$0xff]  ;;  %vm400_vm0 = vcmask 785408   ;;  %vm1451_vm1 = vcmask 523264  }
  0x36   :  { %v237_v2 = vld [vmem:[%s3464_s2 + $0x208] sm:$0xff]  ;;  %v1521_v3 = vpack.c.bf16 %v175_v1, %v173_v0  ;;  %v239_v4 = vld [vmem:[%s3464_s2 + $0x218] sm:$0xff]  ;;  %v172_v5 = vld [vmem:[%s3464_s2] sm:$0xff] }
  0x37   :  { %v174_v6 = vld [vmem:[%s3464_s2 + $0x10] sm:$0xff]  ;;  %v1585_v7 = vpack.c.bf16 %v239_v4, %v237_v2  ;;  %v236_v9 = vld [vmem:[%s3464_s2 + $0x200] sm:$0xff]  ;;  %v177_v11 = vld [vmem:[%s3464_s2 + $0x28] sm:$0xff] }
  0x38   :  { %v1523_v8 = vpack.c.bf16 %v174_v6, %v172_v5  ;;  %v238_v10 = vld [vmem:[%s3464_s2 + $0x210] sm:$0xff]  ;;  %1522 = vmatprep.subr.bf16.mxu1 %v1521_v3  ;;  %v179_v13 = vld [vmem:[%s3464_s2 + $0x38] sm:$0xff]  ;;  %v241_v14 = vld [vmem:[%s3464_s2 + $0x228] sm:$0xff] }
  0x39   :  { %v1587_v12 = vpack.c.bf16 %v238_v10, %v236_v9  ;;  %v243_v15 = vld [vmem:[%s3464_s2 + $0x238] sm:$0xff]  ;;  %1586 = vmatprep.subr.bf16.mxu0 %v1585_v7  ;;  %v1525_v16 = vpack.c.bf16 %v179_v13, %v177_v11  ;;  %v176_v18 = vld [vmem:[%s3464_s2 + $0x20] sm:$0xff]  ;;  %v178_v19 = vld [vmem:[%s3464_s2 + $0x30] sm:$0xff] }
  0x3a   :  { %1524 = vmatpush1.bf16.msra.mxu1 %v1523_v8  ;;  %v1589_v17 = vpack.c.bf16 %v243_v15, %v241_v14  ;;  %v240_v20 = vld [vmem:[%s3464_s2 + $0x220] sm:$0xff]  ;;  %v1527_v21 = vpack.c.bf16 %v178_v19, %v176_v18  ;;  %v242_v22 = vld [vmem:[%s3464_s2 + $0x230] sm:$0xff]  ;;  %v181_v23 = vld [vmem:[%s3464_s2 + $0x48] sm:$0xff] }
  0x3b   :  { %1588 = vmatpush1.bf16.msra.mxu0 %v1587_v12  ;;  %v183_v24 = vld [vmem:[%s3464_s2 + $0x58] sm:$0xff]  ;;  %1526 = vmatprep.subr.bf16.mxu1 %v1525_v16  ;;  %v1591_v25 = vpack.c.bf16 %v242_v22, %v240_v20  ;;  %v245_v27 = vld [vmem:[%s3464_s2 + $0x248] sm:$0xff]  ;;  %v180_v29 = vld [vmem:[%s3464_s2 + $0x40] sm:$0xff] }
  0x3c   :  { %1590 = vmatprep.subr.bf16.mxu0 %v1589_v17  ;;  %v1529_v26 = vpack.c.bf16 %v183_v24, %v181_v23  ;;  %v247_v28 = vld [vmem:[%s3464_s2 + $0x258] sm:$0xff]  ;;  %v182_v31 = vld [vmem:[%s3464_s2 + $0x50] sm:$0xff]  ;;  %v244_v32 = vld [vmem:[%s3464_s2 + $0x240] sm:$0xff] }
  0x3d   :  { %v1593_v30 = vpack.c.bf16 %v247_v28, %v245_v27  ;;  %v246_v33 = vld [vmem:[%s3464_s2 + $0x250] sm:$0xff]  ;;  %v1531_v34 = vpack.c.bf16 %v182_v31, %v180_v29  ;;  %v185_v35 = vld [vmem:[%s3464_s2 + $0x68] sm:$0xff]  ;;  %v187_v36 = vld [vmem:[%s3464_s2 + $0x78] sm:$0xff] }
  0x3e   :  { %1528 = vmatpush1.bf16.msra.mxu1 %v1527_v21  ;;  %v249_v37 = vld [vmem:[%s3464_s2 + $0x268] sm:$0xff]  ;;  %v1595_v38 = vpack.c.bf16 %v246_v33, %v244_v32  ;;  %v1533_v39 = vpack.c.bf16 %v187_v36, %v185_v35  ;;  %v251_v40 = vld [vmem:[%s3464_s2 + $0x278] sm:$0xff]  ;;  %v184_v41 = vld [vmem:[%s3464_s2 + $0x60] sm:$0xff] }
  0x3f   :  { %1592 = vmatpush1.bf16.msra.mxu0 %v1591_v25  ;;  %1530 = vmatprep.subr.bf16.mxu1 %v1529_v26  ;;  %v186_v42 = vld [vmem:[%s3464_s2 + $0x70] sm:$0xff]  ;;  %v1597_v43 = vpack.c.bf16 %v251_v40, %v249_v37  ;;  %v248_v44 = vld [vmem:[%s3464_s2 + $0x260] sm:$0xff]  ;;  %v189_v46 = vld [vmem:[%s3464_s2 + $0x88] sm:$0xff] }
  0x40   :  { %1594 = vmatprep.subr.bf16.mxu0 %v1593_v30  ;;  %v250_v45 = vld [vmem:[%s3464_s2 + $0x270] sm:$0xff]  ;;  %v191_v47 = vld [vmem:[%s3464_s2 + $0x98] sm:$0xff]  ;;  %v253_v48 = vld [vmem:[%s3464_s2 + $0x288] sm:$0xff]  ;;  %v1535_v50 = vpack.c.bf16 %v186_v42, %v184_v41 }
  0x41   :  { %v255_v49 = vld [vmem:[%s3464_s2 + $0x298] sm:$0xff]  ;;  %v1599_v51 = vpack.c.bf16 %v250_v45, %v248_v44  ;;  %v1537_v52 = vpack.c.bf16 %v191_v47, %v189_v46  ;;  %v188_v53 = vld [vmem:[%s3464_s2 + $0x80] sm:$0xff]  ;;  %v190_v54 = vld [vmem:[%s3464_s2 + $0x90] sm:$0xff] }
  0x42   :  { %1532 = vmatpush1.bf16.msra.mxu1 %v1531_v34  ;;  %v252_v55 = vld [vmem:[%s3464_s2 + $0x280] sm:$0xff]  ;;  %v1601_v56 = vpack.c.bf16 %v255_v49, %v253_v48  ;;  %v254_v57 = vld [vmem:[%s3464_s2 + $0x290] sm:$0xff]  ;;  %v193_v58 = vld [vmem:[%s3464_s2 + $0xa8] sm:$0xff]  ;;  %v1539_v62 = vpack.c.bf16 %v190_v54, %v188_v53 }
  0x43   :  { %1596 = vmatpush1.bf16.msra.mxu0 %v1595_v38  ;;  %1534 = vmatprep.subr.bf16.mxu1 %v1533_v39  ;;  %v195_v59 = vld [vmem:[%s3464_s2 + $0xb8] sm:$0xff]  ;;  %v257_v60 = vld [vmem:[%s3464_s2 + $0x2a8] sm:$0xff]  ;;  %v1603_v63 = vpack.c.bf16 %v254_v57, %v252_v55  ;;  %v192_v1 = vld [vmem:[%s3464_s2 + $0xa0] sm:$0xff] }
  0x44   :  { %1598 = vmatprep.subr.bf16.mxu0 %v1597_v43  ;;  %v259_v61 = vld [vmem:[%s3464_s2 + $0x2b8] sm:$0xff]  ;;  %v1541_v0 = vpack.c.bf16 %v195_v59, %v193_v58  ;;  %v194_v2 = vld [vmem:[%s3464_s2 + $0xb0] sm:$0xff]  ;;  %v256_v3 = vld [vmem:[%s3464_s2 + $0x2a0] sm:$0xff] }
  0x45   :  { %v1605_v4 = vpack.c.bf16 %v259_v61, %v257_v60  ;;  %v258_v5 = vld [vmem:[%s3464_s2 + $0x2b0] sm:$0xff]  ;;  %v197_v6 = vld [vmem:[%s3464_s2 + $0xc8] sm:$0xff]  ;;  %v199_v7 = vld [vmem:[%s3464_s2 + $0xd8] sm:$0xff]  ;;  %v1543_v10 = vpack.c.bf16 %v194_v2, %v192_v1 }
  0x46   :  { %1536 = vmatpush1.bf16.msra.mxu1 %v1535_v50  ;;  %v261_v8 = vld [vmem:[%s3464_s2 + $0x2c8] sm:$0xff]  ;;  %v263_v9 = vld [vmem:[%s3464_s2 + $0x2d8] sm:$0xff]  ;;  %v1607_v11 = vpack.c.bf16 %v258_v5, %v256_v3  ;;  %v1545_v12 = vpack.c.bf16 %v199_v7, %v197_v6  ;;  %v196_v13 = vld [vmem:[%s3464_s2 + $0xc0] sm:$0xff] }
  0x47   :  { %1600 = vmatpush1.bf16.msra.mxu0 %v1599_v51  ;;  %1538 = vmatprep.subr.bf16.mxu1 %v1537_v52  ;;  %v198_v14 = vld [vmem:[%s3464_s2 + $0xd0] sm:$0xff]  ;;  %v260_v15 = vld [vmem:[%s3464_s2 + $0x2c0] sm:$0xff]  ;;  %v1609_v16 = vpack.c.bf16 %v263_v9, %v261_v8  ;;  %v201_v18 = vld [vmem:[%s3464_s2 + $0xe8] sm:$0xff] }
  0x48   :  { %1602 = vmatprep.subr.bf16.mxu0 %v1601_v56  ;;  %v262_v17 = vld [vmem:[%s3464_s2 + $0x2d0] sm:$0xff]  ;;  %v203_v19 = vld [vmem:[%s3464_s2 + $0xf8] sm:$0xff]  ;;  %v265_v20 = vld [vmem:[%s3464_s2 + $0x2e8] sm:$0xff]  ;;  %v1547_v22 = vpack.c.bf16 %v198_v14, %v196_v13 }
  0x49   :  { %v267_v21 = vld [vmem:[%s3464_s2 + $0x2f8] sm:$0xff]  ;;  %v1611_v23 = vpack.c.bf16 %v262_v17, %v260_v15  ;;  %v1549_v24 = vpack.c.bf16 %v203_v19, %v201_v18  ;;  %v200_v25 = vld [vmem:[%s3464_s2 + $0xe0] sm:$0xff]  ;;  %v202_v26 = vld [vmem:[%s3464_s2 + $0xf0] sm:$0xff] }
  0x4a   :  { %1540 = vmatpush1.bf16.msra.mxu1 %v1539_v62  ;;  %v264_v27 = vld [vmem:[%s3464_s2 + $0x2e0] sm:$0xff]  ;;  %v1613_v28 = vpack.c.bf16 %v267_v21, %v265_v20  ;;  %v266_v29 = vld [vmem:[%s3464_s2 + $0x2f0] sm:$0xff]  ;;  %v205_v30 = vld [vmem:[%s3464_s2 + $0x108] sm:$0xff]  ;;  %v1551_v34 = vpack.c.bf16 %v202_v26, %v200_v25 }
  0x4b   :  { %1604 = vmatpush1.bf16.msra.mxu0 %v1603_v63  ;;  %1542 = vmatprep.subr.bf16.mxu1 %v1541_v0  ;;  %v207_v31 = vld [vmem:[%s3464_s2 + $0x118] sm:$0xff]  ;;  %v269_v32 = vld [vmem:[%s3464_s2 + $0x308] sm:$0xff]  ;;  %v1615_v35 = vpack.c.bf16 %v266_v29, %v264_v27  ;;  %v204_v37 = vld [vmem:[%s3464_s2 + $0x100] sm:$0xff] }
  0x4c   :  { %1606 = vmatprep.subr.bf16.mxu0 %v1605_v4  ;;  %v271_v33 = vld [vmem:[%s3464_s2 + $0x318] sm:$0xff]  ;;  %v1553_v36 = vpack.c.bf16 %v207_v31, %v205_v30  ;;  %v206_v38 = vld [vmem:[%s3464_s2 + $0x110] sm:$0xff]  ;;  %v268_v39 = vld [vmem:[%s3464_s2 + $0x300] sm:$0xff] }
  0x4d   :  { %v1617_v40 = vpack.c.bf16 %v271_v33, %v269_v32  ;;  %v270_v41 = vld [vmem:[%s3464_s2 + $0x310] sm:$0xff]  ;;  %v209_v42 = vld [vmem:[%s3464_s2 + $0x128] sm:$0xff]  ;;  %v211_v43 = vld [vmem:[%s3464_s2 + $0x138] sm:$0xff]  ;;  %v1555_v46 = vpack.c.bf16 %v206_v38, %v204_v37 }
  0x4e   :  { %1544 = vmatpush1.bf16.msra.mxu1 %v1543_v10  ;;  %v273_v44 = vld [vmem:[%s3464_s2 + $0x328] sm:$0xff]  ;;  %v275_v45 = vld [vmem:[%s3464_s2 + $0x338] sm:$0xff]  ;;  %v1619_v47 = vpack.c.bf16 %v270_v41, %v268_v39  ;;  %v1557_v48 = vpack.c.bf16 %v211_v43, %v209_v42  ;;  %v208_v49 = vld [vmem:[%s3464_s2 + $0x120] sm:$0xff] }
  0x4f   :  { %1608 = vmatpush1.bf16.msra.mxu0 %v1607_v11  ;;  %1546 = vmatprep.subr.bf16.mxu1 %v1545_v12  ;;  %v210_v50 = vld [vmem:[%s3464_s2 + $0x130] sm:$0xff]  ;;  %v272_v51 = vld [vmem:[%s3464_s2 + $0x320] sm:$0xff]  ;;  %v1621_v52 = vpack.c.bf16 %v275_v45, %v273_v44  ;;  %v213_v54 = vld [vmem:[%s3464_s2 + $0x148] sm:$0xff] }
  0x50   :  { %1610 = vmatprep.subr.bf16.mxu0 %v1609_v16  ;;  %v274_v53 = vld [vmem:[%s3464_s2 + $0x330] sm:$0xff]  ;;  %v215_v55 = vld [vmem:[%s3464_s2 + $0x158] sm:$0xff]  ;;  %v277_v56 = vld [vmem:[%s3464_s2 + $0x348] sm:$0xff]  ;;  %v1559_v58 = vpack.c.bf16 %v210_v50, %v208_v49 }
  0x51   :  { %v279_v57 = vld [vmem:[%s3464_s2 + $0x358] sm:$0xff]  ;;  %v1623_v59 = vpack.c.bf16 %v274_v53, %v272_v51  ;;  %v1561_v60 = vpack.c.bf16 %v215_v55, %v213_v54  ;;  %v212_v61 = vld [vmem:[%s3464_s2 + $0x140] sm:$0xff]  ;;  %v214_v62 = vld [vmem:[%s3464_s2 + $0x150] sm:$0xff] }
  0x52   :  { %1548 = vmatpush1.bf16.msra.mxu1 %v1547_v22  ;;  %v276_v63 = vld [vmem:[%s3464_s2 + $0x340] sm:$0xff]  ;;  %v1625_v0 = vpack.c.bf16 %v279_v57, %v277_v56  ;;  %v278_v1 = vld [vmem:[%s3464_s2 + $0x350] sm:$0xff]  ;;  %v217_v2 = vld [vmem:[%s3464_s2 + $0x168] sm:$0xff]  ;;  %v1563_v6 = vpack.c.bf16 %v214_v62, %v212_v61 }
  0x53   :  { %1612 = vmatpush1.bf16.msra.mxu0 %v1611_v23  ;;  %1550 = vmatprep.subr.bf16.mxu1 %v1549_v24  ;;  %v219_v3 = vld [vmem:[%s3464_s2 + $0x178] sm:$0xff]  ;;  %v281_v4 = vld [vmem:[%s3464_s2 + $0x368] sm:$0xff]  ;;  %v216_v7 = vld [vmem:[%s3464_s2 + $0x160] sm:$0xff]  ;;  %v1627_v8 = vpack.c.bf16 %v278_v1, %v276_v63 }
  0x54   :  { %1614 = vmatprep.subr.bf16.mxu0 %v1613_v28  ;;  %v283_v5 = vld [vmem:[%s3464_s2 + $0x378] sm:$0xff]  ;;  %v1565_v9 = vpack.c.bf16 %v219_v3, %v217_v2  ;;  %v218_v10 = vld [vmem:[%s3464_s2 + $0x170] sm:$0xff]  ;;  %v280_v11 = vld [vmem:[%s3464_s2 + $0x360] sm:$0xff] }
  0x55   :  { %v282_v12 = vld [vmem:[%s3464_s2 + $0x370] sm:$0xff]  ;;  %v1629_v13 = vpack.c.bf16 %v283_v5, %v281_v4  ;;  %v221_v14 = vld [vmem:[%s3464_s2 + $0x188] sm:$0xff]  ;;  %v223_v15 = vld [vmem:[%s3464_s2 + $0x198] sm:$0xff]  ;;  %v1567_v20 = vpack.c.bf16 %v218_v10, %v216_v7 }
  0x56   :  { %1552 = vmatpush1.bf16.msra.mxu1 %v1551_v34  ;;  %v61_v16 = vld [vmem:[%s3462_s0 + $0x8] sm:$0xff]  ;;  %v287_v18 = vld [vmem:[%s3464_s2 + $0x398] sm:$0xff]  ;;  %v1631_v21 = vpack.c.bf16 %v282_v12, %v280_v11  ;;  %v1569_v22 = vpack.c.bf16 %v223_v15, %v221_v14  ;;  %v220_v23 = vld [vmem:[%s3464_s2 + $0x180] sm:$0xff] }
  0x57   :  { %1616 = vmatpush1.bf16.msra.mxu0 %v1615_v35  ;;  %1554 = vmatprep.subr.bf16.mxu1 %v1553_v36  ;;  %v285_v17 = vld [vmem:[%s3464_s2 + $0x388] sm:$0xff]  ;;  %v63_v19 = vld [vmem:[%s3462_s0 + $0x18] sm:$0xff]  ;;  %v222_v24 = vld [vmem:[%s3464_s2 + $0x190] sm:$0xff] }
  0x58   :  { %1618 = vmatprep.subr.bf16.mxu0 %v1617_v40  ;;  %513 = vmatprep.mubr.f32.mxu1 %v61_v16  ;;  %v284_v25 = vld [vmem:[%s3464_s2 + $0x380] sm:$0xff]  ;;  %v1633_v26 = vpack.c.bf16 %v287_v18, %v285_v17  ;;  %v286_v27 = vld [vmem:[%s3464_s2 + $0x390] sm:$0xff]  ;;  %v225_v28 = vld [vmem:[%s3464_s2 + $0x1a8] sm:$0xff]  ;;  %v1571_v32 = vpack.c.bf16 %v222_v24, %v220_v23 }
  0x59   :  { %674 = vmatprep.mubr.f32.mxu0 %v63_v19  ;;  %v227_v29 = vld [vmem:[%s3464_s2 + $0x1b8] sm:$0xff]  ;;  %v289_v30 = vld [vmem:[%s3464_s2 + $0x3a8] sm:$0xff]  ;;  %v1635_v33 = vpack.c.bf16 %v286_v27, %v284_v25  ;;  %v224_v35 = vld [vmem:[%s3464_s2 + $0x1a0] sm:$0xff] }
  0x5a   :  { %1556 = vmatpush1.bf16.msra.mxu1 %v1555_v46  ;;  %v291_v31 = vld [vmem:[%s3464_s2 + $0x3b8] sm:$0xff]  ;;  %v1573_v34 = vpack.c.bf16 %v227_v29, %v225_v28  ;;  %v226_v36 = vld [vmem:[%s3464_s2 + $0x1b0] sm:$0xff]  ;;  %v288_v37 = vld [vmem:[%s3464_s2 + $0x3a0] sm:$0xff] }
  0x5b   :  { %1620 = vmatpush1.bf16.msra.mxu0 %v1619_v47  ;;  %1558 = vmatprep.subr.bf16.mxu1 %v1557_v48  ;;  %v1637_v38 = vpack.c.bf16 %v291_v31, %v289_v30  ;;  %v290_v39 = vld [vmem:[%s3464_s2 + $0x3b0] sm:$0xff]  ;;  %v229_v40 = vld [vmem:[%s3464_s2 + $0x1c8] sm:$0xff]  ;;  %v231_v41 = vld [vmem:[%s3464_s2 + $0x1d8] sm:$0xff]  ;;  %v1575_v44 = vpack.c.bf16 %v226_v36, %v224_v35 }
  0x5c   :  { %1622 = vmatprep.subr.bf16.mxu0 %v1621_v52  ;;  %v293_v42 = vld [vmem:[%s3464_s2 + $0x3c8] sm:$0xff]  ;;  %v295_v43 = vld [vmem:[%s3464_s2 + $0x3d8] sm:$0xff]  ;;  %v1639_v45 = vpack.c.bf16 %v290_v39, %v288_v37  ;;  %v1577_v46 = vpack.c.bf16 %v231_v41, %v229_v40  ;;  %v228_v47 = vld [vmem:[%s3464_s2 + $0x1c0] sm:$0xff] }
  0x5d   :  { %v230_v48 = vld [vmem:[%s3464_s2 + $0x1d0] sm:$0xff]  ;;  %v292_v49 = vld [vmem:[%s3464_s2 + $0x3c0] sm:$0xff]  ;;  %v1641_v50 = vpack.c.bf16 %v295_v43, %v293_v42  ;;  %v233_v52 = vld [vmem:[%s3464_s2 + $0x1e8] sm:$0xff] }
  0x5e   :  { %1560 = vmatpush1.bf16.msra.mxu1 %v1559_v58  ;;  %v294_v51 = vld [vmem:[%s3464_s2 + $0x3d0] sm:$0xff]  ;;  %v235_v53 = vld [vmem:[%s3464_s2 + $0x1f8] sm:$0xff]  ;;  %v297_v54 = vld [vmem:[%s3464_s2 + $0x3e8] sm:$0xff]  ;;  %v1579_v56 = vpack.c.bf16 %v230_v48, %v228_v47 }
  0x5f   :  { %1624 = vmatpush1.bf16.msra.mxu0 %v1623_v59  ;;  %1562 = vmatprep.subr.bf16.mxu1 %v1561_v60  ;;  %v299_v55 = vld [vmem:[%s3464_s2 + $0x3f8] sm:$0xff]  ;;  %v1643_v57 = vpack.c.bf16 %v294_v51, %v292_v49  ;;  %v1581_v58 = vpack.c.bf16 %v235_v53, %v233_v52  ;;  %v232_v59 = vld [vmem:[%s3464_s2 + $0x1e0] sm:$0xff]  ;;  %v234_v60 = vld [vmem:[%s3464_s2 + $0x1f0] sm:$0xff] }
  0x60   :  { %1626 = vmatprep.subr.bf16.mxu0 %v1625_v0  ;;  %v296_v61 = vld [vmem:[%s3464_s2 + $0x3e0] sm:$0xff]  ;;  %v1645_v62 = vpack.c.bf16 %v299_v55, %v297_v54  ;;  %v298_v63 = vld [vmem:[%s3464_s2 + $0x3f0] sm:$0xff]  ;;  %v301_v0 = vld [vmem:[%s3464_s2 + $0x408] sm:$0xff]  ;;  %v1583_v2 = vpack.c.bf16 %v234_v60, %v232_v59 }
  0x61   :  { %v303_v1 = vld [vmem:[%s3464_s2 + $0x418] sm:$0xff]  ;;  %v1647_v3 = vpack.c.bf16 %v298_v63, %v296_v61  ;;  %v300_v5 = vld [vmem:[%s3464_s2 + $0x400] sm:$0xff]  ;;  %v305_v7 = vld [vmem:[%s3464_s2 + $0x428] sm:$0xff] }
  0x62   :  { %1564 = vmatpush1.bf16.msra.mxu1 %v1563_v6  ;;  %v1649_v4 = vpack.c.bf16 %v303_v1, %v301_v0  ;;  %v302_v6 = vld [vmem:[%s3464_s2 + $0x410] sm:$0xff]  ;;  %v304_v12 = vld [vmem:[%s3464_s2 + $0x420] sm:$0xff]  ;;  %v309_v17 = vld [vmem:[%s3464_s2 + $0x448] sm:$0xff] }
  0x63   :  { %1628 = vmatpush1.bf16.msra.mxu0 %v1627_v8  ;;  %1566 = vmatprep.subr.bf16.mxu1 %v1565_v9  ;;  %v307_v8 = vld [vmem:[%s3464_s2 + $0x438] sm:$0xff]  ;;  %v60_v9 = vld [vmem:[%s3462_s0] sm:$0xff]  ;;  %v1651_v10 = vpack.c.bf16 %v302_v6, %v300_v5  ;;  %v62_v11 = vld [vmem:[%s3462_s0 + $0x10] sm:$0xff] }
  0x64   :  { %1630 = vmatprep.subr.bf16.mxu0 %v1629_v13  ;;  %v306_v13 = vld [vmem:[%s3464_s2 + $0x430] sm:$0xff]  ;;  %v68_v14 = vld [vmem:[%s3462_s0 + $0x40] sm:$0xff]  ;;  %v1653_v15 = vpack.c.bf16 %v307_v8, %v305_v7  ;;  %v311_v18 = vld [vmem:[%s3464_s2 + $0x458] sm:$0xff] }
  0x65   :  { %v70_v16 = vld [vmem:[%s3462_s0 + $0x50] sm:$0xff]  ;;  %v67_v19 = vld [vmem:[%s3462_s0 + $0x38] sm:$0xff]  ;;  %v1657_v25 = vpack.c.bf16 %v311_v18, %v309_v17  ;;  %v313_v27 = vld [vmem:[%s3464_s2 + $0x468] sm:$0xff] }
  0x66   :  { %1568 = vmatpush1.bf16.msra.mxu1 %v1567_v20  ;;  %v1655_v20 = vpack.c.bf16 %v306_v13, %v304_v12  ;;  %v310_v23 = vld [vmem:[%s3464_s2 + $0x450] sm:$0xff]  ;;  %v75_v24 = vld [vmem:[%s3462_s0 + $0x78] sm:$0xff]  ;;  %v76_v31 = vld [vmem:[%s3462_s0 + $0x80] sm:$0xff] }
  0x67   :  { %1632 = vmatpush1.bf16.msra.mxu0 %v1631_v21  ;;  %1570 = vmatprep.subr.bf16.mxu1 %v1569_v22  ;;  %v69_v21 = vld [vmem:[%s3462_s0 + $0x48] sm:$0xff]  ;;  %v308_v22 = vld [vmem:[%s3464_s2 + $0x440] sm:$0xff]  ;;  %v315_v28 = vld [vmem:[%s3464_s2 + $0x478] sm:$0xff] }
  0x68   :  { %1634 = vmatprep.subr.bf16.mxu0 %v1633_v26  ;;  %v77_v26 = vld [vmem:[%s3462_s0 + $0x88] sm:$0xff]  ;;  %v74_v29 = vld [vmem:[%s3462_s0 + $0x70] sm:$0xff]  ;;  %v1659_v30 = vpack.c.bf16 %v310_v23, %v308_v22  ;;  %v1661_v35 = vpack.c.bf16 %v315_v28, %v313_v27  ;;  %v84_v36 = vld [vmem:[%s3462_s0 + $0xc0] sm:$0xff] }
  0x69   :  { %v317_v37 = vld [vmem:[%s3464_s2 + $0x488] sm:$0xff]  ;;  %v83_v41 = vld [vmem:[%s3462_s0 + $0xb8] sm:$0xff]  ;;  %v316_v42 = vld [vmem:[%s3464_s2 + $0x480] sm:$0xff] }
  0x6a   :  { %1572 = vmatpush1.bf16.msra.mxu1 %v1571_v32  ;;  %v312_v32 = vld [vmem:[%s3464_s2 + $0x460] sm:$0xff]  ;;  %v81_v39 = vld [vmem:[%s3462_s0 + $0xa8] sm:$0xff]  ;;  %v318_v43 = vld [vmem:[%s3464_s2 + $0x490] sm:$0xff] }
  0x6b   :  { %1636 = vmatpush1.bf16.msra.mxu0 %v1635_v33  ;;  %1574 = vmatprep.subr.bf16.mxu1 %v1573_v34  ;;  %v314_v33 = vld [vmem:[%s3464_s2 + $0x470] sm:$0xff]  ;;  %v321_v47 = vld [vmem:[%s3464_s2 + $0x4a8] sm:$0xff]  ;;  %v323_v48 = vld [vmem:[%s3464_s2 + $0x4b8] sm:$0xff] }
  0x6c   :  { %1638 = vmatprep.subr.bf16.mxu0 %v1637_v38  ;;  %v82_v34 = vld [vmem:[%s3462_s0 + $0xb0] sm:$0xff]  ;;  %v319_v38 = vld [vmem:[%s3464_s2 + $0x498] sm:$0xff]  ;;  %v1663_v40 = vpack.c.bf16 %v314_v33, %v312_v32  ;;  %v88_v49 = vld [vmem:[%s3462_s0 + $0xe0] sm:$0xff]  ;;  %v1669_v55 = vpack.c.bf16 %v323_v48, %v321_v47 }
  0x6d   :  { %v90_v51 = vld [vmem:[%s3462_s0 + $0xf0] sm:$0xff]  ;;  %v320_v52 = vld [vmem:[%s3464_s2 + $0x4a0] sm:$0xff]  ;;  %v95_v59 = vld [vmem:[%s3462_s0 + $0x118] sm:$0xff] }
  0x6e   :  { %1576 = vmatpush1.bf16.msra.mxu1 %v1575_v44  ;;  %v89_v44 = vld [vmem:[%s3462_s0 + $0xe8] sm:$0xff]  ;;  %v322_v53 = vld [vmem:[%s3464_s2 + $0x4b0] sm:$0xff]  ;;  %v96_v54 = vld [vmem:[%s3462_s0 + $0x120] sm:$0xff] }
  0x6f   :  { %1640 = vmatpush1.bf16.msra.mxu0 %v1639_v45  ;;  %1578 = vmatprep.subr.bf16.mxu1 %v1577_v46  ;;  %v1665_v45 = vpack.c.bf16 %v319_v38, %v317_v37  ;;  %v91_v46 = vld [vmem:[%s3462_s0 + $0xf8] sm:$0xff]  ;;  %v1671_v60 = vpack.c.bf16 %v322_v53, %v320_v52  ;;  %v97_v61 = vld [vmem:[%s3462_s0 + $0x128] sm:$0xff]  ;;  %v326_v63 = vld [vmem:[%s3464_s2 + $0x4d0] sm:$0xff] }
  0x70   :  { %1642 = vmatprep.subr.bf16.mxu0 %v1641_v50  ;;  %v1667_v50 = vpack.c.bf16 %v318_v43, %v316_v42  ;;  %v103_v0 = vld [vmem:[%s3462_s0 + $0x158] sm:$0xff]  ;;  %v102_v5 = vld [vmem:[%s3462_s0 + $0x150] sm:$0xff]  ;;  %v104_v7 = vld [vmem:[%s3462_s0 + $0x160] sm:$0xff] }
  0x71   :  { %v328_v8 = vld [vmem:[%s3464_s2 + $0x4e0] sm:$0xff]  ;;  %v333_v13 = vld [vmem:[%s3464_s2 + $0x508] sm:$0xff]  ;;  %v111_v17 = vld [vmem:[%s3462_s0 + $0x198] sm:$0xff] }
  0x72   :  { %1580 = vmatpush1.bf16.msra.mxu1 %v1579_v56  ;;  %v98_v56 = vld [vmem:[%s3462_s0 + $0x130] sm:$0xff]  ;;  %v112_v12 = vld [vmem:[%s3462_s0 + $0x1a0] sm:$0xff]  ;;  %v119_v22 = vld [vmem:[%s3462_s0 + $0x1d8] sm:$0xff] }
  0x73   :  { %1644 = vmatpush1.bf16.msra.mxu0 %v1643_v57  ;;  %1582 = vmatprep.subr.bf16.mxu1 %v1581_v58  ;;  %v325_v57 = vld [vmem:[%s3464_s2 + $0x4c8] sm:$0xff]  ;;  %v327_v58 = vld [vmem:[%s3464_s2 + $0x4d8] sm:$0xff]  ;;  %v332_v18 = vld [vmem:[%s3464_s2 + $0x500] sm:$0xff] }
  0x74   :  { %1646 = vmatprep.subr.bf16.mxu0 %v1645_v62  ;;  %v324_v62 = vld [vmem:[%s3464_s2 + $0x4c0] sm:$0xff]  ;;  %v1673_v1 = vpack.c.bf16 %v327_v58, %v325_v57  ;;  %v337_v23 = vld [vmem:[%s3464_s2 + $0x528] sm:$0xff]  ;;  %v118_v27 = vld [vmem:[%s3462_s0 + $0x1d0] sm:$0xff] }
  0x75   :  { %v1675_v6 = vpack.c.bf16 %v326_v63, %v324_v62  ;;  %v336_v28 = vld [vmem:[%s3464_s2 + $0x520] sm:$0xff]  ;;  %v126_v32 = vld [vmem:[%s3462_s0 + $0x210] sm:$0xff]  ;;  %v341_v33 = vld [vmem:[%s3464_s2 + $0x548] sm:$0xff] }
  0x76   :  { %1584 = vmatpush1.bf16.msra.mxu1 %v1583_v2  ;;  %v105_v2 = vld [vmem:[%s3462_s0 + $0x168] sm:$0xff]  ;;  %v340_v38 = vld [vmem:[%s3464_s2 + $0x540] sm:$0xff]  ;;  %v139_v57 = vld [vmem:[%s3462_s0 + $0x278] sm:$0xff] }
  0x77   :  { %1648 = vmatpush1.bf16.msra.mxu0 %v1647_v3  ;;  %1761 = vmatprep.subr.bf16.mxu1 %v1649_v4  ;;  %v329_v3 = vld [vmem:[%s3464_s2 + $0x4e8] sm:$0xff]  ;;  %v132_v47 = vld [vmem:[%s3462_s0 + $0x240] sm:$0xff]  ;;  %v147_v62 = vld [vmem:[%s3462_s0 + $0x2b8] sm:$0xff] }
  0x78   :  { %1650 = vmatprep.subr.bf16.mxu0 %v1649_v4  ;;  %v331_v4 = vld [vmem:[%s3464_s2 + $0x4f8] sm:$0xff]  ;;  %v125_v37 = vld [vmem:[%s3462_s0 + $0x208] sm:$0xff]  ;;  %v344_v48 = vld [vmem:[%s3464_s2 + $0x560] sm:$0xff] }
  0x79   :  { %514 = vmatmul.mubr.f32.vlgmr.msra.gmra.mrb[0].mxu1 %v60_v9  ;;  %v330_v9 = vld [vmem:[%s3464_s2 + $0x4f0] sm:$0xff]  ;;  %v133_v42 = vld [vmem:[%s3462_s0 + $0x248] sm:$0xff]  ;;  %v140_v52 = vld [vmem:[%s3462_s0 + $0x280] sm:$0xff] }
  0x7a   :  { %675 = vmatmul.mubr.f32.vlgmr.msra.gmra.mrb[0].mxu0 %v62_v11  ;;  %1777 = vmatpush1.bf16.msra.mxu1 %v1651_v10  ;;  %v1677_v11 = vpack.c.bf16 %v331_v4, %v329_v3  ;;  %v345_v43 = vld [vmem:[%s3464_s2 + $0x568] sm:$0xff]  ;;  %v348_v58 = vld [vmem:[%s3464_s2 + $0x580] sm:$0xff]  ;;  %v146_v3 = vld [vmem:[%s3462_s0 + $0x2b0] sm:$0xff] }
  0x7b   :  { %1652 = vmatpush1.bf16.msra.mxu0 %v1651_v10  ;;  %519 = vmatprep.mubr.f32.mxu1 %v68_v14  ;;  %v110_v10 = vld [vmem:[%s3462_s0 + $0x190] sm:$0xff]  ;;  %v335_v14 = vld [vmem:[%s3464_s2 + $0x518] sm:$0xff]  ;;  %v349_v53 = vld [vmem:[%s3464_s2 + $0x588] sm:$0xff] }
  0x7c   :  { %680 = vmatprep.mubr.f32.mxu0 %v70_v16  ;;  %1654 = vmatprep.subr.bf16.mxu0 %v1653_v15  ;;  %v1679_v16 = vpack.c.bf16 %v330_v9, %v328_v8  ;;  %v353_v63 = vld [vmem:[%s3464_s2 + $0x5a8] sm:$0xff]  ;;  %v352_v4 = vld [vmem:[%s3464_s2 + $0x5a0] sm:$0xff]  ;;  %v154_v8 = vld [vmem:[%s3462_s0 + $0x2f0] sm:$0xff] }
  0x7d   :  { %520 = vmatmul.mubr.f32.gmra.mrb[2].mxu1 %v67_v19  ;;  %1762 = vmatprep.subr.bf16.mxu1 %v1653_v15  ;;  %v109_v15 = vld [vmem:[%s3462_s0 + $0x188] sm:$0xff]  ;;  %v334_v19 = vld [vmem:[%s3464_s2 + $0x510] sm:$0xff] }
  0x7e   :  { %681 = vmatmul.mubr.f32.gmra.mrb[2].mxu0 %v69_v21  ;;  %1778 = vmatpush1.bf16.msra.mxu1 %v1655_v20  ;;  %v1681_v21 = vpack.c.bf16 %v335_v14, %v333_v13  ;;  %v357_v9 = vld [vmem:[%s3464_s2 + $0x5c8] sm:$0xff]  ;;  %v356_v14 = vld [vmem:[%s3464_s2 + $0x5c0] sm:$0xff] }
  0x7f   :  { %1656 = vmatpush1.bf16.msra.mxu0 %v1655_v20  ;;  %525 = vmatprep.mubr.f32.mxu1 %v75_v24  ;;  %v117_v20 = vld [vmem:[%s3462_s0 + $0x1c8] sm:$0xff]  ;;  %v339_v24 = vld [vmem:[%s3464_s2 + $0x538] sm:$0xff] }
  0x80   :  { %686 = vmatprep.mubr.f32.mxu0 %v77_v26  ;;  %1658 = vmatprep.subr.bf16.mxu0 %v1657_v25  ;;  %v1683_v26 = vpack.c.bf16 %v334_v19, %v332_v18  ;;  %v153_v13 = vld [vmem:[%s3462_s0 + $0x2e8] sm:$0xff] }
  0x81   :  { %526 = vmatmul.mubr.f32.gmra.mrb[4].mxu1 %v74_v29  ;;  %1763 = vmatprep.subr.bf16.mxu1 %v1657_v25  ;;  %v116_v25 = vld [vmem:[%s3462_s0 + $0x1c0] sm:$0xff]  ;;  %v338_v29 = vld [vmem:[%s3464_s2 + $0x530] sm:$0xff]  ;;  %v161_v18 = vld [vmem:[%s3462_s0 + $0x328] sm:$0xff] }
  0x82   :  { %687 = vmatmul.mubr.f32.gmra.mrb[4].mxu0 %v76_v31  ;;  %1779 = vmatpush1.bf16.msra.mxu1 %v1659_v30  ;;  %v1685_v31 = vpack.c.bf16 %v339_v24, %v337_v23  ;;  %v361_v19 = vld [vmem:[%s3464_s2 + $0x5e8] sm:$0xff]  ;;  %v160_v23 = vld [vmem:[%s3462_s0 + $0x320] sm:$0xff] }
  0x83   :  { %1660 = vmatpush1.bf16.msra.mxu0 %v1659_v30  ;;  %531 = vmatprep.mubr.f32.mxu1 %v82_v34  ;;  %v124_v30 = vld [vmem:[%s3462_s0 + $0x200] sm:$0xff]  ;;  %v343_v34 = vld [vmem:[%s3464_s2 + $0x558] sm:$0xff] }
  0x84   :  { %692 = vmatprep.mubr.f32.mxu0 %v84_v36  ;;  %1662 = vmatprep.subr.bf16.mxu0 %v1661_v35  ;;  %v1687_v36 = vpack.c.bf16 %v338_v29, %v336_v28  ;;  %v360_v24 = vld [vmem:[%s3464_s2 + $0x5e0] sm:$0xff]  ;;  %v365_v29 = vld [vmem:[%s3464_s2 + $0x608] sm:$0xff] }
  0x85   :  { %532 = vmatmul.mubr.f32.gmra.mrb[6].mxu1 %v81_v39  ;;  %1764 = vmatprep.subr.bf16.mxu1 %v1661_v35  ;;  %v123_v35 = vld [vmem:[%s3462_s0 + $0x1f8] sm:$0xff]  ;;  %v342_v39 = vld [vmem:[%s3464_s2 + $0x550] sm:$0xff]  ;;  %v168_v28 = vld [vmem:[%s3462_s0 + $0x360] sm:$0xff] }
  0x86   :  { %693 = vmatmul.mubr.f32.gmra.mrb[6].mxu0 %v83_v41  ;;  %1780 = vmatpush1.bf16.msra.mxu1 %v1663_v40  ;;  %v1689_v41 = vpack.c.bf16 %v343_v34, %v341_v33  ;;  %v1142_v33 = vld [vmem:[#allocation4 + $0x8] sm:$0xff]  ;;  %v1144_v34 = vld [vmem:[#allocation4 + $0x18] sm:$0xff] }
  0x87   :  { %1664 = vmatpush1.bf16.msra.mxu0 %v1663_v40  ;;  %537 = vmatprep.mubr.f32.mxu1 %v89_v44  ;;  %v131_v40 = vld [vmem:[%s3462_s0 + $0x238] sm:$0xff] }
  0x88   :  { %698 = vmatprep.mubr.f32.mxu0 %v91_v46  ;;  %1666 = vmatprep.subr.bf16.mxu0 %v1665_v45  ;;  %v347_v44 = vld [vmem:[%s3464_s2 + $0x578] sm:$0xff]  ;;  %v1691_v46 = vpack.c.bf16 %v342_v39, %v340_v38  ;;  %v364_v39 = vld [vmem:[%s3464_s2 + $0x600] sm:$0xff] }
  0x89   :  { %538 = vmatmul.mubr.f32.gmra.mrb[8].mxu1 %v88_v49  ;;  %1765 = vmatprep.subr.bf16.mxu1 %v1665_v45  ;;  %v130_v45 = vld [vmem:[%s3462_s0 + $0x230] sm:$0xff] }
  0x8a   :  { %699 = vmatmul.mubr.f32.gmra.mrb[8].mxu0 %v90_v51  ;;  %1781 = vmatpush1.bf16.msra.mxu1 %v1667_v50  ;;  %v346_v49 = vld [vmem:[%s3464_s2 + $0x570] sm:$0xff]  ;;  %v1693_v51 = vpack.c.bf16 %v347_v44, %v345_v43  ;;  %v369_v44 = vld [vmem:[%s3464_s2 + $0x628] sm:$0xff] }
  0x8b   :  { %1668 = vmatpush1.bf16.msra.mxu0 %v1667_v50  ;;  %543 = vmatprep.mubr.f32.mxu1 %v96_v54  ;;  %v138_v50 = vld [vmem:[%s3462_s0 + $0x270] sm:$0xff]  ;;  %v351_v54 = vld [vmem:[%s3464_s2 + $0x598] sm:$0xff] }
  0x8c   :  { %704 = vmatprep.mubr.f32.mxu0 %v98_v56  ;;  %1670 = vmatprep.subr.bf16.mxu0 %v1669_v55  ;;  %v1695_v56 = vpack.c.bf16 %v346_v49, %v344_v48  ;;  %v1143_v43 = vld [vmem:[#allocation4 + $0x10] sm:$0xff]  ;;  %v1148_v48 = vld [vmem:[#allocation4 + $0x38] sm:$0xff] }
  0x8d   :  { %544 = vmatmul.mubr.f32.gmra.mrb[10].mxu1 %v95_v59  ;;  %1766 = vmatprep.subr.bf16.mxu1 %v1669_v55  ;;  %v137_v55 = vld [vmem:[%s3462_s0 + $0x268] sm:$0xff]  ;;  %v350_v59 = vld [vmem:[%s3464_s2 + $0x590] sm:$0xff]  ;;  %v64_v49 = vld [vmem:[%s3462_s0 + $0x20] sm:$0xff] }
  0x8e   :  { %705 = vmatmul.mubr.f32.gmra.mrb[10].mxu0 %v97_v61  ;;  %1782 = vmatpush1.bf16.msra.mxu1 %v1671_v60  ;;  %v1697_v61 = vpack.c.bf16 %v351_v54, %v349_v53 }
  0x8f   :  { %1672 = vmatpush1.bf16.msra.mxu0 %v1671_v60  ;;  %549 = vmatprep.mubr.f32.mxu1 %v103_v0  ;;  %v145_v60 = vld [vmem:[%s3462_s0 + $0x2a8] sm:$0xff]  ;;  %v355_v0 = vld [vmem:[%s3464_s2 + $0x5b8] sm:$0xff] }
  0x90   :  { %710 = vmatprep.mubr.f32.mxu0 %v105_v2  ;;  %1674 = vmatprep.subr.bf16.mxu0 %v1673_v1  ;;  %v1699_v2 = vpack.c.bf16 %v350_v59, %v348_v58  ;;  %v375_v59 = vld [vmem:[%s3464_s2 + $0x658] sm:$0xff] }
  0x91   :  { %550 = vmatmul.mubr.f32.gmra.mrb[12].mxu1 %v102_v5  ;;  %1767 = vmatprep.subr.bf16.mxu1 %v1673_v1  ;;  %v144_v1 = vld [vmem:[%s3462_s0 + $0x2a0] sm:$0xff]  ;;  %v354_v5 = vld [vmem:[%s3464_s2 + $0x5b0] sm:$0xff] }
  0x92   :  { %711 = vmatmul.mubr.f32.gmra.mrb[12].mxu0 %v104_v7  ;;  %1783 = vmatpush1.bf16.msra.mxu1 %v1675_v6  ;;  %v1701_v7 = vpack.c.bf16 %v355_v0, %v353_v63  ;;  %v1150_v63 = vld [vmem:[#allocation4 + $0x48] sm:$0xff]  ;;  %v1152_v0 = vld [vmem:[#allocation4 + $0x58] sm:$0xff] }
  0x93   :  { %1676 = vmatpush1.bf16.msra.mxu0 %v1675_v6  ;;  %555 = vmatprep.mubr.f32.mxu1 %v110_v10  ;;  %v152_v6 = vld [vmem:[%s3462_s0 + $0x2e0] sm:$0xff]  ;;  %v359_v10 = vld [vmem:[%s3464_s2 + $0x5d8] sm:$0xff] }
  0x94   :  { %716 = vmatprep.mubr.f32.mxu0 %v112_v12  ;;  %1678 = vmatprep.subr.bf16.mxu0 %v1677_v11  ;;  %v1703_v12 = vpack.c.bf16 %v354_v5, %v352_v4 }
  0x95   :  { %556 = vmatmul.mubr.f32.gmra.mrb[14].mxu1 %v109_v15  ;;  %1768 = vmatprep.subr.bf16.mxu1 %v1677_v11  ;;  %v151_v11 = vld [vmem:[%s3462_s0 + $0x2d8] sm:$0xff]  ;;  %v358_v15 = vld [vmem:[%s3464_s2 + $0x5d0] sm:$0xff] }
  0x96   :  { %717 = vmatmul.mubr.f32.gmra.mrb[14].mxu0 %v111_v17  ;;  %1784 = vmatpush1.bf16.msra.mxu1 %v1679_v16  ;;  %v1705_v17 = vpack.c.bf16 %v359_v10, %v357_v9  ;;  %v377_v9 = vld [vmem:[%s3464_s2 + $0x668] sm:$0xff]  ;;  %v1745_v10 = vpack.c.bf16 %v1152_v0, %v1150_v63  ;;  %v107_v0 = vld [vmem:[%s3462_s0 + $0x178] sm:$0xff] }
  0x97   :  { %1680 = vmatpush1.bf16.msra.mxu0 %v1679_v16  ;;  %561 = vmatprep.mubr.f32.mxu1 %v117_v20  ;;  %v159_v16 = vld [vmem:[%s3462_s0 + $0x318] sm:$0xff] }
  0x98   :  { %722 = vmatprep.mubr.f32.mxu0 %v119_v22  ;;  %1682 = vmatprep.subr.bf16.mxu0 %v1681_v21  ;;  %v363_v20 = vld [vmem:[%s3464_s2 + $0x5f8] sm:$0xff]  ;;  %v1707_v22 = vpack.c.bf16 %v358_v15, %v356_v14  ;;  %v134_v14 = vld [vmem:[%s3462_s0 + $0x250] sm:$0xff] }
  0x99   :  { %562 = vmatmul.mubr.f32.gmra.mrb[16].mxu1 %v116_v25  ;;  %1769 = vmatprep.subr.bf16.mxu1 %v1681_v21  ;;  %v158_v21 = vld [vmem:[%s3462_s0 + $0x310] sm:$0xff] }
  0x9a   :  { %723 = vmatmul.mubr.f32.gmra.mrb[16].mxu0 %v118_v27  ;;  %1785 = vmatpush1.bf16.msra.mxu1 %v1683_v26  ;;  %v362_v25 = vld [vmem:[%s3464_s2 + $0x5f0] sm:$0xff]  ;;  %v1709_v27 = vpack.c.bf16 %v363_v20, %v361_v19 }
  0x9b   :  { %1684 = vmatpush1.bf16.msra.mxu0 %v1683_v26  ;;  %567 = vmatprep.mubr.f32.mxu1 %v124_v30  ;;  %v166_v26 = vld [vmem:[%s3462_s0 + $0x350] sm:$0xff]  ;;  %v367_v30 = vld [vmem:[%s3464_s2 + $0x618] sm:$0xff] }
  0x9c   :  { %728 = vmatprep.mubr.f32.mxu0 %v126_v32  ;;  %1686 = vmatprep.subr.bf16.mxu0 %v1685_v31  ;;  %v1711_v32 = vpack.c.bf16 %v362_v25, %v360_v24  ;;  %v1713_v38 = vpack.c.bf16 %v367_v30, %v365_v29  ;;  %v1154_v15 = vld [vmem:[#allocation4 + $0x68] sm:$0xff]  ;;  %v1153_v25 = vld [vmem:[#allocation4 + $0x60] sm:$0xff]  ;;  %v383_v29 = vld [vmem:[%s3464_s2 + $0x698] sm:$0xff] }
  0x9d   :  { %568 = vmatmul.mubr.f32.gmra.mrb[18].mxu1 %v123_v35  ;;  %1770 = vmatprep.subr.bf16.mxu1 %v1685_v31  ;;  %v165_v31 = vld [vmem:[%s3462_s0 + $0x348] sm:$0xff]  ;;  %v167_v35 = vld [vmem:[%s3462_s0 + $0x358] sm:$0xff]  ;;  %v142_v19 = vld [vmem:[%s3462_s0 + $0x290] sm:$0xff] }
  0x9e   :  { %729 = vmatmul.mubr.f32.gmra.mrb[18].mxu0 %v125_v37  ;;  %1786 = vmatpush1.bf16.msra.mxu1 %v1687_v36  ;;  %v121_v37 = vld [vmem:[%s3462_s0 + $0x1e8] sm:$0xff]  ;;  %v378_v24 = vld [vmem:[%s3464_s2 + $0x670] sm:$0xff] }
  0x9f   :  { %1688 = vmatpush1.bf16.msra.mxu0 %v1687_v36  ;;  %573 = vmatprep.mubr.f32.mxu1 %v131_v40  ;;  %v65_v36 = vld [vmem:[%s3462_s0 + $0x28] sm:$0xff]  ;;  %v366_v40 = vld [vmem:[%s3464_s2 + $0x610] sm:$0xff] }
  0xa0   :  { %734 = vmatprep.mubr.f32.mxu0 %v133_v42  ;;  %1690 = vmatprep.subr.bf16.mxu0 %v1689_v41  ;;  %v1737_v42 = vpack.c.bf16 %v1144_v34, %v1142_v33  ;;  %v141_v30 = vld [vmem:[%s3462_s0 + $0x288] sm:$0xff] }
  0xa1   :  { %574 = vmatmul.mubr.f32.gmra.mrb[20].mxu1 %v130_v45  ;;  %1771 = vmatprep.subr.bf16.mxu1 %v1689_v41  ;;  %v1141_v41 = vld [vmem:[#allocation4] sm:$0xff]  ;;  %v371_v45 = vld [vmem:[%s3464_s2 + $0x638] sm:$0xff] }
  0xa2   :  { %735 = vmatmul.mubr.f32.gmra.mrb[20].mxu0 %v132_v47  ;;  %1787 = vmatpush1.bf16.msra.mxu1 %v1691_v46  ;;  %v1146_v47 = vld [vmem:[#allocation4 + $0x28] sm:$0xff]  ;;  %v1739_v53 = vpack.c.bf16 %v1143_v43, %v1141_v41  ;;  %v1717_v54 = vpack.c.bf16 %v371_v45, %v369_v44  ;;  %v387_v43 = vld [vmem:[%s3464_s2 + $0x6b8] sm:$0xff]  ;;  %v1157_v44 = vld [vmem:[#allocation4 + $0x80] sm:$0xff] }
  0xa3   :  { %1692 = vmatpush1.bf16.msra.mxu0 %v1691_v46  ;;  %579 = vmatprep.mubr.f32.mxu1 %v138_v50  ;;  %v120_v46 = vld [vmem:[%s3462_s0 + $0x1e0] sm:$0xff]  ;;  %v1715_v50 = vpack.c.bf16 %v366_v40, %v364_v39  ;;  %v1741_v58 = vpack.c.bf16 %v1148_v48, %v1146_v47  ;;  %v85_v33 = vld [vmem:[%s3462_s0 + $0xc8] sm:$0xff]  ;;  %v382_v40 = vld [vmem:[%s3464_s2 + $0x690] sm:$0xff] }
  0xa4   :  { %740 = vmatprep.mubr.f32.mxu0 %v140_v52  ;;  %1694 = vmatprep.subr.bf16.mxu0 %v1693_v51  ;;  %v128_v52 = vld [vmem:[%s3462_s0 + $0x220] sm:$0xff]  ;;  %v93_v34 = vld [vmem:[%s3462_s0 + $0x108] sm:$0xff]  ;;  %v1159_v45 = vld [vmem:[#allocation4 + $0x90] sm:$0xff] }
  0xa5   :  { %580 = vmatmul.mubr.f32.gmra.mrb[22].mxu1 %v137_v55  ;;  %1772 = vmatprep.subr.bf16.mxu1 %v1693_v51  ;;  %v72_v51 = vld [vmem:[%s3462_s0 + $0x60] sm:$0xff]  ;;  %v385_v41 = vld [vmem:[%s3464_s2 + $0x6a8] sm:$0xff] }
  0xa6   :  { %741 = vmatmul.mubr.f32.gmra.mrb[22].mxu0 %v139_v57  ;;  %1788 = vmatpush1.bf16.msra.mxu1 %v1695_v56  ;;  %v368_v55 = vld [vmem:[%s3464_s2 + $0x620] sm:$0xff]  ;;  %v373_v57 = vld [vmem:[%s3464_s2 + $0x648] sm:$0xff] }
  0xa7   :  { %1696 = vmatpush1.bf16.msra.mxu0 %v1695_v56  ;;  %585 = vmatprep.mubr.f32.mxu1 %v145_v60  ;;  %v370_v56 = vld [vmem:[%s3464_s2 + $0x630] sm:$0xff]  ;;  %v1145_v60 = vld [vmem:[#allocation4 + $0x20] sm:$0xff]  ;;  %v1721_v5 = vpack.c.bf16 %v375_v59, %v373_v57  ;;  %v1164_v48 = vld [vmem:[#allocation4 + $0xb8] sm:$0xff] }
  0xa8   :  { %746 = vmatprep.mubr.f32.mxu0 %v147_v62  ;;  %1698 = vmatprep.subr.bf16.mxu0 %v1697_v61  ;;  %v127_v62 = vld [vmem:[%s3462_s0 + $0x218] sm:$0xff]  ;;  %v1719_v4 = vpack.c.bf16 %v370_v56, %v368_v55  ;;  %v380_v39 = vld [vmem:[%s3464_s2 + $0x680] sm:$0xff]  ;;  %v1162_v47 = vld [vmem:[#allocation4 + $0xa8] sm:$0xff] }
  0xa9   :  { %586 = vmatmul.mubr.f32.gmra.mrb[24].mxu1 %v144_v1  ;;  %1773 = vmatprep.subr.bf16.mxu1 %v1697_v61  ;;  %v1147_v61 = vld [vmem:[#allocation4 + $0x30] sm:$0xff]  ;;  %v384_v55 = vld [vmem:[%s3464_s2 + $0x6a0] sm:$0xff]  ;;  %v1757_v57 = vpack.c.bf16 %v1164_v48, %v1162_v47 }
  0xaa   :  { %747 = vmatmul.mubr.f32.gmra.mrb[24].mxu0 %v146_v3  ;;  %1789 = vmatpush1.bf16.msra.mxu1 %v1699_v2  ;;  %v71_v1 = vld [vmem:[%s3462_s0 + $0x58] sm:$0xff]  ;;  %v386_v56 = vld [vmem:[%s3464_s2 + $0x6b0] sm:$0xff] }
  0xab   :  { %1700 = vmatpush1.bf16.msra.mxu0 %v1699_v2  ;;  %591 = vmatprep.mubr.f32.mxu1 %v152_v6  ;;  %v79_v2 = vld [vmem:[%s3462_s0 + $0x98] sm:$0xff]  ;;  %v1743_v6 = vpack.c.bf16 %v1147_v61, %v1145_v60  ;;  %v1735_v63 = vpack.c.bf16 %v386_v56, %v384_v55 }
  0xac   :  { %752 = vmatprep.mubr.f32.mxu0 %v154_v8  ;;  %1702 = vmatprep.subr.bf16.mxu0 %v1701_v7  ;;  %v135_v3 = vld [vmem:[%s3462_s0 + $0x258] sm:$0xff]  ;;  %v374_v8 = vld [vmem:[%s3464_s2 + $0x650] sm:$0xff] }
  0xad   :  { %592 = vmatmul.mubr.f32.gmra.mrb[26].mxu1 %v151_v11  ;;  %1774 = vmatprep.subr.bf16.mxu1 %v1701_v7  ;;  %v372_v7 = vld [vmem:[%s3464_s2 + $0x640] sm:$0xff]  ;;  %v379_v11 = vld [vmem:[%s3464_s2 + $0x678] sm:$0xff] }
  0xae   :  { %753 = vmatmul.mubr.f32.gmra.mrb[26].mxu0 %v153_v13  ;;  %1790 = vmatpush1.bf16.msra.mxu1 %v1703_v12  ;;  %v1151_v13 = vld [vmem:[#allocation4 + $0x50] sm:$0xff]  ;;  %v1723_v20 = vpack.c.bf16 %v374_v8, %v372_v7  ;;  %v113_v7 = vld [vmem:[%s3462_s0 + $0x1a8] sm:$0xff]  ;;  %v2002_v8 = vmov 0.0  }
  0xaf   :  { %1704 = vmatpush1.bf16.msra.mxu0 %v1703_v12  ;;  %597 = vmatprep.mubr.f32.mxu1 %v159_v16  ;;  %v1149_v12 = vld [vmem:[#allocation4 + $0x40] sm:$0xff]  ;;  %v1156_v16 = vld [vmem:[#allocation4 + $0x78] sm:$0xff]  ;;  %v1163_v59 = vld [vmem:[#allocation4 + $0xb0] sm:$0xff] }
  0xb0   :  { %758 = vmatprep.mubr.f32.mxu0 %v161_v18  ;;  %1706 = vmatprep.subr.bf16.mxu0 %v1705_v17  ;;  %v86_v18 = vld [vmem:[%s3462_s0 + $0xd0] sm:$0xff]  ;;  %v155_v60 = vld [vmem:[%s3462_s0 + $0x2f8] sm:$0xff] }
  0xb1   :  { %598 = vmatmul.mubr.f32.gmra.mrb[28].mxu1 %v158_v21  ;;  %1775 = vmatprep.subr.bf16.mxu1 %v1705_v17  ;;  %v78_v17 = vld [vmem:[%s3462_s0 + $0x90] sm:$0xff]  ;;  %v1725_v21 = vpack.c.bf16 %v379_v11, %v377_v9  ;;  %v99_v61 = vld [vmem:[%s3462_s0 + $0x138] sm:$0xff]  ;;  %v1125_v9 = vld [vmem:[%s3463_s1] sm:$0xff] }
  0xb2   :  { %759 = vmatmul.mubr.f32.gmra.mrb[28].mxu0 %v160_v23  ;;  %1791 = vmatpush1.bf16.msra.mxu1 %v1707_v22  ;;  %v376_v23 = vld [vmem:[%s3464_s2 + $0x660] sm:$0xff]  ;;  %v1126_v11 = vld [vmem:[%s3463_s1 + $0x8] sm:$0xff] }
  0xb3   :  { %1708 = vmatpush1.bf16.msra.mxu0 %v1707_v22  ;;  %603 = vmatprep.mubr.f32.mxu1 %v166_v26  ;;  %v1747_v22 = vpack.c.bf16 %v1151_v13, %v1149_v12  ;;  %v1749_v26 = vpack.c.bf16 %v1156_v16, %v1154_v15  ;;  %v73_v12 = vld [vmem:[%s3462_s0 + $0x68] sm:$0xff]  ;;  %v1127_v13 = vld [vmem:[%s3463_s1 + $0x10] sm:$0xff]  ;;  %v1128_v15 = vld [vmem:[%s3463_s1 + $0x18] sm:$0xff] }
  0xb4   :  { %764 = vmatprep.mubr.f32.mxu0 %v168_v28  ;;  %1710 = vmatprep.subr.bf16.mxu0 %v1709_v27  ;;  %v381_v28 = vld [vmem:[%s3464_s2 + $0x688] sm:$0xff]  ;;  %v87_v16 = vld [vmem:[%s3462_s0 + $0xd8] sm:$0xff] }
  0xb5   :  { %604 = vmatmul.mubr.f32.gmra.mrb[30].mxu1 %v165_v31  ;;  %1776 = vmatprep.subr.bf16.mxu1 %v1709_v27  ;;  %v1155_v27 = vld [vmem:[#allocation4 + $0x70] sm:$0xff]  ;;  %v1158_v31 = vld [vmem:[#allocation4 + $0x88] sm:$0xff] }
  0xb6   :  { %765 = vmatmul.mubr.f32.gmra.mrb[30].mxu0 %v167_v35  ;;  %1792 = vmatpush1.bf16.msra.mxu1 %v1711_v32  ;;  %v149_v35 = vld [vmem:[%s3462_s0 + $0x2c8] sm:$0xff] }
  0xb7   :  { %1712 = vmatpush1.bf16.msra.mxu0 %v1711_v32  ;;  %835 = vmatprep.mubr.f32.mxu0 %v65_v36  ;;  %v1160_v32 = vld [vmem:[#allocation4 + $0x98] sm:$0xff]  ;;  %v1727_v36 = vpack.c.bf16 %v378_v24, %v376_v23 }
  0xb8   :  { %883 = vmatprep.mubr.f32.mxu1 %v121_v37  ;;  %1714 = vmatprep.subr.bf16.mxu0 %v1713_v38  ;;  %v1751_v37 = vpack.c.bf16 %v1155_v27, %v1153_v25  ;;  %v1729_v38 = vpack.c.bf16 %v383_v29, %v381_v28  ;;  %v1132_v23 = vld [vmem:[%s3463_s1 + $0x38] sm:$0xff]  ;;  %v1133_v25 = vld [vmem:[%s3463_s1 + $0x40] sm:$0xff]  ;;  %v1134_v27 = vld [vmem:[%s3463_s1 + $0x48] sm:$0xff] }
  0xb9   :  { %884 = vmatmul.mubr.f32.vlgmr.msra.gmra.mrb[32].mxu1 %v120_v46  ;;  %1738 = vmatprep.subr.bf16.mxu1 %v1737_v42  ;;  %v1753_v42 = vpack.c.bf16 %v1160_v32, %v1158_v31  ;;  %v148_v46 = vld [vmem:[%s3462_s0 + $0x2c0] sm:$0xff]  ;;  %v115_v24 = vld [vmem:[%s3462_s0 + $0x1b8] sm:$0xff]  ;;  %v129_v28 = vld [vmem:[%s3462_s0 + $0x228] sm:$0xff] }
  0xba   :  { %836 = vmatmul.mubr.f32.vlgmr.msra.gmra.mrb[0].mxu0 %v64_v49  ;;  %889 = vmatprep.mubr.f32.mxu1 %v128_v52  ;;  %v92_v49 = vld [vmem:[%s3462_s0 + $0x100] sm:$0xff]  ;;  %v1135_v29 = vld [vmem:[%s3463_s1 + $0x50] sm:$0xff]  ;;  %v1136_v31 = vld [vmem:[%s3463_s1 + $0x58] sm:$0xff] }
  0xbb   :  { %1716 = vmatpush1.bf16.msra.mxu0 %v1715_v50  ;;  %841 = vmatprep.mubr.f32.mxu0 %v72_v51  ;;  %v156_v50 = vld [vmem:[%s3462_s0 + $0x300] sm:$0xff]  ;;  %v1731_v51 = vpack.c.bf16 %v382_v40, %v380_v39  ;;  %v143_v32 = vld [vmem:[%s3462_s0 + $0x298] sm:$0xff] }
  0xbc   :  { %1740 = vmatpush1.bf16.msra.mxu1 %v1739_v53  ;;  %1718 = vmatprep.subr.bf16.mxu0 %v1717_v54  ;;  %v100_v52 = vld [vmem:[%s3462_s0 + $0x140] sm:$0xff]  ;;  %v1733_v53 = vpack.c.bf16 %v387_v43, %v385_v41  ;;  %v1755_v54 = vpack.c.bf16 %v1159_v45, %v1157_v44  ;;  %v1140_v39 = vld [vmem:[%s3463_s1 + $0x78] sm:$0xff] }
  0xbd   :  { %890 = vmatmul.mubr.f32.gmra.mrb[34].mxu1 %v127_v62  ;;  %1742 = vmatprep.subr.bf16.mxu1 %v1741_v58  ;;  %v1161_v58 = vld [vmem:[#allocation4 + $0xa0] sm:$0xff]  ;;  %v163_v62 = vld [vmem:[%s3462_s0 + $0x338] sm:$0xff] }
  0xbe   :  { %842 = vmatmul.mubr.f32.gmra.mrb[2].mxu0 %v71_v1  ;;  %895 = vmatprep.mubr.f32.mxu1 %v135_v3  ;;  %v1759_v1 = vpack.c.bf16 %v1163_v59, %v1161_v58  ;;  %v106_v3 = vld [vmem:[%s3462_s0 + $0x170] sm:$0xff]  ;;  %v171_v40 = vld [vmem:[%s3462_s0 + $0x378] sm:$0xff]  ;;  %v388_v58 = vld [vmem:[#allocation2] sm:$0x3] }
  0xbf   :  { %847 = vmatprep.mubr.f32.mxu0 %v79_v2  ;;  %1720 = vmatpush1.bf16.msra.mxu0 %v1719_v4  ;;  %v162_v2 = vld [vmem:[%s3462_s0 + $0x330] sm:$0xff] }
  0xc0   :  { %1722 = vmatprep.subr.bf16.mxu0 %v1721_v5  ;;  %1744 = vmatpush1.bf16.msra.mxu1 %v1743_v6  ;;  %v170_v4 = vld [vmem:[%s3462_s0 + $0x370] sm:$0xff]  ;;  %v169_v6 = vld [vmem:[%s3462_s0 + $0x368] sm:$0xff] }
  0xc1   :  { %896 = vmatmul.mubr.f32.gmra.mrb[36].mxu1 %v134_v14  ;;  %1746 = vmatprep.subr.bf16.mxu1 %v1745_v10  ;;  %v114_v5 = vld [vmem:[%s3462_s0 + $0x1b0] sm:$0xff]  ;;  %v80_v14 = vld [vmem:[%s3462_s0 + $0xa0] sm:$0xff] }
  0xc2   :  { %848 = vmatmul.mubr.f32.gmra.mrb[4].mxu0 %v78_v17  ;;  %901 = vmatprep.mubr.f32.mxu1 %v142_v19  ;;  %v66_v10 = vld [vmem:[%s3462_s0 + $0x30] sm:$0xff]  ;;  %v1129_v17 = vld [vmem:[%s3463_s1 + $0x20] sm:$0xff]  ;;  %v1130_v19 = vld [vmem:[%s3463_s1 + $0x28] sm:$0xff] }
  0xc3   :  { %853 = vmatprep.mubr.f32.mxu0 %v86_v18  ;;  %1724 = vmatpush1.bf16.msra.mxu0 %v1723_v20  ;;  %v94_v18 = vld [vmem:[%s3462_s0 + $0x110] sm:$0xff]  ;;  %v101_v20 = vld [vmem:[%s3462_s0 + $0x148] sm:$0xff] }
  0xc4   :  { %1726 = vmatprep.subr.bf16.mxu0 %v1725_v21  ;;  %1748 = vmatpush1.bf16.msra.mxu1 %v1747_v22  ;;  %v1131_v21 = vld [vmem:[%s3463_s1 + $0x30] sm:$0xff]  ;;  %v108_v22 = vld [vmem:[%s3462_s0 + $0x180] sm:$0xff] }
  0xc5   :  { %902 = vmatmul.mubr.f32.gmra.mrb[38].mxu1 %v141_v30  ;;  %1750 = vmatprep.subr.bf16.mxu1 %v1749_v26  ;;  %v122_v26 = vld [vmem:[%s3462_s0 + $0x1f0] sm:$0xff]  ;;  %v136_v30 = vld [vmem:[%s3462_s0 + $0x260] sm:$0xff] }
  0xc6   :  { %854 = vmatmul.mubr.f32.gmra.mrb[6].mxu0 %v85_v33  ;;  %907 = vmatprep.mubr.f32.mxu1 %v149_v35  ;;  %v1137_v33 = vld [vmem:[%s3463_s1 + $0x60] sm:$0xff]  ;;  %v1138_v35 = vld [vmem:[%s3463_s1 + $0x68] sm:$0xff] }
  0xc7   :  { %859 = vmatprep.mubr.f32.mxu0 %v93_v34  ;;  %1728 = vmatpush1.bf16.msra.mxu0 %v1727_v36  ;;  %v150_v34 = vld [vmem:[%s3462_s0 + $0x2d0] sm:$0xff]  ;;  %v157_v36 = vld [vmem:[%s3462_s0 + $0x308] sm:$0xff] }
  0xc8   :  { %1752 = vmatpush1.bf16.msra.mxu1 %v1751_v37  ;;  %1730 = vmatprep.subr.bf16.mxu0 %v1729_v38  ;;  %v1139_v37 = vld [vmem:[%s3463_s1 + $0x70] sm:$0xff]  ;;  %v164_v38 = vld [vmem:[%s3462_s0 + $0x340] sm:$0xff] }
  0xc9   :  { %908 = vmatmul.mubr.f32.gmra.mrb[40].mxu1 %v148_v46  ;;  %1754 = vmatprep.subr.bf16.mxu1 %v1753_v42 }
  0xca   :  { %860 = vmatmul.mubr.f32.gmra.mrb[8].mxu0 %v92_v49  ;;  %913 = vmatprep.mubr.f32.mxu1 %v156_v50 }
  0xcb   :  { %865 = vmatprep.mubr.f32.mxu0 %v100_v52  ;;  %1732 = vmatpush1.bf16.msra.mxu0 %v1731_v51  ;;  %v390_v51 = vlaneseq }
  0xcc   :  { %1734 = vmatprep.subr.bf16.mxu0 %v1733_v53  ;;  %1756 = vmatpush1.bf16.msra.mxu1 %v1755_v54 }
  0xcd   :  { %914 = vmatmul.mubr.f32.gmra.mrb[42].mxu1 %v155_v60  ;;  %1758 = vmatprep.subr.bf16.mxu1 %v1757_v57  ;;  %v3194_v54 = vshrl.u32 %v390_v51, 7 }
  0xce   :  { %866 = vmatmul.mubr.f32.gmra.mrb[10].mxu0 %v99_v61  ;;  %919 = vmatprep.mubr.f32.mxu1 %v163_v62 }
  0xcf   :  { %871 = vmatprep.mubr.f32.mxu0 %v107_v0  ;;  %1736 = vmatpush1.bf16.msra.mxu0 %v1735_v63  ;;  %v392_v57 = vsub.s32 0, %v3194_v54  ;;  %v396_v59 = vsub.s32 1, %v3194_v54 }
  0xd0   :  { %1760 = vmatpush1.bf16.msra.mxu1 %v1759_v1 }
  0xd1   :  { %920 = vmatmul.mubr.f32.gmra.mrb[44].mxu1 %v162_v2  ;;  %v3208_v62 = vrot.slane %v388_v58, %v392_v57  ;;  %v3212_v63 = vrot.slane %v388_v58, %v396_v59 }
  0xd2   :  { %872 = vmatmul.mubr.f32.gmra.mrb[12].mxu0 %v106_v3  ;;  %925 = vmatprep.mubr.f32.mxu1 %v170_v4 }
  0xd3   :  { %877 = vmatprep.mubr.f32.mxu0 %v114_v5 }
  0xd5   :  { %926 = vmatmul.mubr.f32.gmra.mrb[46].mxu1 %v169_v6 }
  0xd6   :  { %878 = vmatmul.mubr.f32.gmra.mrb[14].mxu0 %v113_v7  ;;  %1277 = vmatprep.mubr.f32.mxu1 %v2002_v8 }
  0xd7   :  { %996 = vmatprep.mubr.f32.mxu0 %v2002_v8 }
  0xd9   :  { %1505 = vmatmul.mubr.msk.f32.vlgmr.msra.gmra.mrb[48].mxu1 %vm400_vm0, %v1125_v9 }
  0xda   :  { %1489 = vmatmul.mubr.msk.f32.vlgmr.msra.gmra.mrb[0].mxu0 %vm400_vm0, %v66_v10  ;;  %1283 = vmatprep.mubr.f32.mxu1 %v2002_v8 }
  0xdb   :  { %1002 = vmatprep.mubr.f32.mxu0 %v2002_v8 }
  0xdd   :  { %1506 = vmatmul.mubr.msk.f32.gmra.mrb[50].mxu1 %vm400_vm0, %v1126_v11 }
  0xde   :  { %1490 = vmatmul.mubr.msk.f32.gmra.mrb[2].mxu0 %vm400_vm0, %v73_v12  ;;  %1289 = vmatprep.mubr.f32.mxu1 %v2002_v8 }
  0xdf   :  { %1008 = vmatprep.mubr.f32.mxu0 %v2002_v8 }
  0xe1   :  { %1507 = vmatmul.mubr.msk.f32.gmra.mrb[52].mxu1 %vm400_vm0, %v1127_v13 }
  0xe2   :  { %1491 = vmatmul.mubr.msk.f32.gmra.mrb[4].mxu0 %vm400_vm0, %v80_v14  ;;  %1295 = vmatprep.mubr.f32.mxu1 %v2002_v8 }
  0xe3   :  { %1014 = vmatprep.mubr.f32.mxu0 %v2002_v8 }
  0xe5   :  { %1508 = vmatmul.mubr.msk.f32.gmra.mrb[54].mxu1 %vm400_vm0, %v1128_v15 }
  0xe6   :  { %1492 = vmatmul.mubr.msk.f32.gmra.mrb[6].mxu0 %vm400_vm0, %v87_v16  ;;  %1301 = vmatprep.mubr.f32.mxu1 %v2002_v8 }
  0xe7   :  { %1020 = vmatprep.mubr.f32.mxu0 %v2002_v8 }
  0xe9   :  { %1509 = vmatmul.mubr.msk.f32.gmra.mrb[56].mxu1 %vm400_vm0, %v1129_v17 }
  0xea   :  { %1493 = vmatmul.mubr.msk.f32.gmra.mrb[8].mxu0 %vm400_vm0, %v94_v18  ;;  %1307 = vmatprep.mubr.f32.mxu1 %v2002_v8 }
  0xeb   :  { %1026 = vmatprep.mubr.f32.mxu0 %v2002_v8 }
  0xed   :  { %1510 = vmatmul.mubr.msk.f32.gmra.mrb[58].mxu1 %vm400_vm0, %v1130_v19 }
  0xee   :  { %1494 = vmatmul.mubr.msk.f32.gmra.mrb[10].mxu0 %vm400_vm0, %v101_v20  ;;  %1313 = vmatprep.mubr.f32.mxu1 %v2002_v8 }
  0xef   :  { %1032 = vmatprep.mubr.f32.mxu0 %v2002_v8 }
  0xf1   :  { %1511 = vmatmul.mubr.msk.f32.gmra.mrb[60].mxu1 %vm400_vm0, %v1131_v21 }
  0xf2   :  { %1495 = vmatmul.mubr.msk.f32.gmra.mrb[12].mxu0 %vm400_vm0, %v108_v22  ;;  %1319 = vmatprep.mubr.f32.mxu1 %v2002_v8 }
  0xf3   :  { %1038 = vmatprep.mubr.f32.mxu0 %v2002_v8 }
  0xf5   :  { %1512 = vmatmul.mubr.msk.f32.gmra.mrb[62].mxu1 %vm400_vm0, %v1132_v23 }
  0xf6   :  { %1496 = vmatmul.mubr.msk.f32.gmra.mrb[14].mxu0 %vm400_vm0, %v115_v24  ;;  %1325 = vmatprep.mubr.f32.mxu1 %v2002_v8 }
  0xf7   :  { %1044 = vmatprep.mubr.f32.mxu0 %v2002_v8 }
  0xf9   :  { %1513 = vmatmul.mubr.msk.f32.gmra.mrb[64].mxu1 %vm400_vm0, %v1133_v25 }
  0xfa   :  { %1497 = vmatmul.mubr.msk.f32.gmra.mrb[32].mxu0 %vm400_vm0, %v122_v26  ;;  %1331 = vmatprep.mubr.f32.mxu1 %v2002_v8 }
  0xfb   :  { %1050 = vmatprep.mubr.f32.mxu0 %v2002_v8 }
  0xfd   :  { %1514 = vmatmul.mubr.msk.f32.gmra.mrb[66].mxu1 %vm400_vm0, %v1134_v27 }
  0xfe   :  { %1498 = vmatmul.mubr.msk.f32.gmra.mrb[34].mxu0 %vm400_vm0, %v129_v28  ;;  %1337 = vmatprep.mubr.f32.mxu1 %v2002_v8 }
  0xff   :  { %1056 = vmatprep.mubr.f32.mxu0 %v2002_v8 }
 0x101   :  { %1515 = vmatmul.mubr.msk.f32.gmra.mrb[68].mxu1 %vm400_vm0, %v1135_v29 }
 0x102   :  { %1499 = vmatmul.mubr.msk.f32.gmra.mrb[36].mxu0 %vm400_vm0, %v136_v30  ;;  %1343 = vmatprep.mubr.f32.mxu1 %v2002_v8 }
 0x103   :  { %1062 = vmatprep.mubr.f32.mxu0 %v2002_v8 }
 0x105   :  { %1516 = vmatmul.mubr.msk.f32.gmra.mrb[70].mxu1 %vm400_vm0, %v1136_v31 }
 0x106   :  { %1500 = vmatmul.mubr.msk.f32.gmra.mrb[38].mxu0 %vm400_vm0, %v143_v32  ;;  %1349 = vmatprep.mubr.f32.mxu1 %v2002_v8 }
 0x107   :  { %1068 = vmatprep.mubr.f32.mxu0 %v2002_v8 }
 0x109   :  { %1517 = vmatmul.mubr.msk.f32.gmra.mrb[72].mxu1 %vm400_vm0, %v1137_v33 }
 0x10a   :  { %1501 = vmatmul.mubr.msk.f32.gmra.mrb[40].mxu0 %vm400_vm0, %v150_v34  ;;  %1355 = vmatprep.mubr.f32.mxu1 %v2002_v8 }
 0x10b   :  { %1074 = vmatprep.mubr.f32.mxu0 %v2002_v8 }
 0x10d   :  { %1518 = vmatmul.mubr.msk.f32.gmra.mrb[74].mxu1 %vm400_vm0, %v1138_v35 }
 0x10e   :  { %1502 = vmatmul.mubr.msk.f32.gmra.mrb[42].mxu0 %vm400_vm0, %v157_v36  ;;  %1361 = vmatprep.mubr.f32.mxu1 %v2002_v8 }
 0x10f   :  { %1080 = vmatprep.mubr.f32.mxu0 %v2002_v8 }
 0x111   :  { %1519 = vmatmul.mubr.msk.f32.gmra.mrb[76].mxu1 %vm400_vm0, %v1139_v37 }
 0x112   :  { %1503 = vmatmul.mubr.msk.f32.gmra.mrb[44].mxu0 %vm400_vm0, %v164_v38  ;;  %1367 = vmatprep.mubr.f32.mxu1 %v2002_v8 }
 0x113   :  { %1086 = vmatprep.mubr.f32.mxu0 %v2002_v8 }
 0x115   :  { %1520 = vmatmul.mubr.msk.f32.gmra.mrb[78].mxu1 %vm400_vm0, %v1140_v39 }
 0x116   :  { %1504 = vmatmul.mubr.msk.f32.gmra.mrb[46].mxu0 %vm400_vm0, %v171_v40 }
 0x14c   :  { %v3170_v41 = vpop.f32.mrb[0].mxu1 }
 0x14d   :  { %v3172_v42 = vpop.f32.mrb[1].mxu1 }
 0x150   :  { %v3174_v43 = vpop.f32.mrb[2].mxu1 }
 0x151   :  { %v3176_v44 = vpop.f32.mrb[3].mxu1 }
 0x154   :  { %v3178_v45 = vpop.f32.mrb[4].mxu1 }
 0x155   :  { %v3180_v46 = vpop.f32.mrb[5].mxu1 }
 0x158   :  { %v3182_v47 = vpop.f32.mrb[6].mxu1 }
 0x159   :  { %v3184_v48 = vpop.f32.mrb[7].mxu1 }
 0x15c   :  { %v3186_v49 = vpop.f32.mrb[8].mxu1 }
 0x15d   :  { %v3188_v50 = vpop.f32.mrb[9].mxu1 }
 0x160   :  { %v3190_v52 = vpop.f32.mrb[10].mxu1 }
 0x161   :  { %v3192_v53 = vpop.f32.mrb[11].mxu1 }
 0x164   :  { %v3196_v55 = vpop.f32.mrb[12].mxu1 }
 0x165   :  { %v3198_v56 = vpop.f32.mrb[13].mxu1 }
 0x168   :  { %v3202_v60 = vpop.f32.mrb[14].mxu1 }
 0x169   :  { %v3204_v61 = vpop.f32.mrb[15].mxu1 }
 0x16c   :  { %v563_v0 = vpop.f32.mrb[16].mxu1 }
 0x16d   :  { %v564_v1 = vadd.f32 %v563_v0, %v3208_v62  ;;  %v724_v2 = vpop.f32.mrb[16].mxu0  ;;  %v565_v3 = vpop.f32.mrb[17].mxu1 }
 0x16e   :  { %v566_v4 = vadd.f32 %v565_v3, %v3212_v63  ;;  %v726_v5 = vpop.f32.mrb[17].mxu0 }
 0x16f   :  { %v725_v6 = vadd.f32 %v724_v2, %v564_v1 }
 0x170   :  { %v727_v7 = vadd.f32 %v726_v5, %v566_v4  ;;  %v569_v8 = vpop.f32.mrb[18].mxu1 }
 0x171   :  { %v570_v9 = vadd.f32 %v569_v8, %v3208_v62  ;;  %v730_v10 = vpop.f32.mrb[18].mxu0  ;;  %v571_v11 = vpop.f32.mrb[19].mxu1 }
 0x172   :  { %v572_v12 = vadd.f32 %v571_v11, %v3212_v63  ;;  %v732_v13 = vpop.f32.mrb[19].mxu0 }
 0x173   :  { %v731_v14 = vadd.f32 %v730_v10, %v570_v9 }
 0x174   :  { %v733_v15 = vadd.f32 %v732_v13, %v572_v12  ;;  %v575_v16 = vpop.f32.mrb[20].mxu1 }
 0x175   :  { %v576_v17 = vadd.f32 %v575_v16, %v3208_v62  ;;  %v736_v18 = vpop.f32.mrb[20].mxu0  ;;  %v577_v19 = vpop.f32.mrb[21].mxu1 }
 0x176   :  { %v578_v20 = vadd.f32 %v577_v19, %v3212_v63  ;;  %v738_v21 = vpop.f32.mrb[21].mxu0 }
 0x177   :  { %v737_v22 = vadd.f32 %v736_v18, %v576_v17 }
 0x178   :  { %v739_v23 = vadd.f32 %v738_v21, %v578_v20  ;;  %v581_v24 = vpop.f32.mrb[22].mxu1 }
 0x179   :  { %v582_v25 = vadd.f32 %v581_v24, %v3208_v62  ;;  %v742_v26 = vpop.f32.mrb[22].mxu0  ;;  %v583_v27 = vpop.f32.mrb[23].mxu1 }
 0x17a   :  { %v584_v28 = vadd.f32 %v583_v27, %v3212_v63  ;;  %v744_v29 = vpop.f32.mrb[23].mxu0 }
 0x17b   :  { %v743_v30 = vadd.f32 %v742_v26, %v582_v25 }
 0x17c   :  { %v745_v31 = vadd.f32 %v744_v29, %v584_v28  ;;  %v587_v32 = vpop.f32.mrb[24].mxu1 }
 0x17d   :  { %v588_v33 = vadd.f32 %v587_v32, %v3208_v62  ;;  %v748_v34 = vpop.f32.mrb[24].mxu0  ;;  %v589_v35 = vpop.f32.mrb[25].mxu1 }
 0x17e   :  { %v590_v36 = vadd.f32 %v589_v35, %v3212_v63  ;;  %v750_v37 = vpop.f32.mrb[25].mxu0 }
 0x17f   :  { %v749_v38 = vadd.f32 %v748_v34, %v588_v33 }
 0x180   :  { %v751_v39 = vadd.f32 %v750_v37, %v590_v36  ;;  %v593_v40 = vpop.f32.mrb[26].mxu1 }
 0x181   :  { %v594_v51 = vadd.f32 %v593_v40, %v3208_v62  ;;  %v754_v58 = vpop.f32.mrb[26].mxu0  ;;  %v595_v0 = vpop.f32.mrb[27].mxu1 }
 0x182   :  { %v596_v1 = vadd.f32 %v595_v0, %v3212_v63  ;;  %v756_v2 = vpop.f32.mrb[27].mxu0 }
 0x183   :  { %v755_v3 = vadd.f32 %v754_v58, %v594_v51 }
 0x184   :  { %v757_v4 = vadd.f32 %v756_v2, %v596_v1  ;;  %v599_v5 = vpop.f32.mrb[28].mxu1 }
 0x185   :  { %v600_v8 = vadd.f32 %v599_v5, %v3208_v62  ;;  %v760_v9 = vpop.f32.mrb[28].mxu0  ;;  %v601_v10 = vpop.f32.mrb[29].mxu1 }
 0x186   :  { %v602_v11 = vadd.f32 %v601_v10, %v3212_v63  ;;  %v762_v12 = vpop.f32.mrb[29].mxu0 }
 0x187   :  { %v761_v13 = vadd.f32 %v760_v9, %v600_v8 }
 0x188   :  { %v763_v16 = vadd.f32 %v762_v12, %v602_v11  ;;  %v605_v17 = vpop.f32.mrb[30].mxu1 }
 0x189   :  { %v606_v18 = vadd.f32 %v605_v17, %v3208_v62  ;;  %v766_v19 = vpop.f32.mrb[30].mxu0  ;;  %v607_v20 = vpop.f32.mrb[31].mxu1 }
 0x18a   :  { %v608_v21 = vadd.f32 %v607_v20, %v3212_v63  ;;  %v768_v24 = vpop.f32.mrb[31].mxu0  ;;  %v1406_v20 = vld [vmem:[#allocation6] sm:$0x3] }
 0x18b   :  { %v767_v25 = vadd.f32 %v766_v19, %v606_v18 }
 0x18c   :  { %v769_v26 = vadd.f32 %v768_v24, %v608_v21  ;;  %v885_v27 = vpop.f32.mrb[32].mxu1 }
 0x18d   :  { %v3230_v28 = vadd.f32 %v885_v27, %v725_v6  ;;  %v887_v29 = vpop.f32.mrb[33].mxu1 }
 0x18e   :  { %v3232_v32 = vadd.f32 %v887_v29, %v727_v7 }
 0x190   :  { %v891_v33 = vpop.f32.mrb[34].mxu1 }
 0x191   :  { %v3234_v34 = vadd.f32 %v891_v33, %v731_v14  ;;  %v893_v35 = vpop.f32.mrb[35].mxu1 }
 0x192   :  { %v3236_v36 = vadd.f32 %v893_v35, %v733_v15  ;;  %v3276_v35 = vrot.slane %v1406_v20, %v396_v59 }
 0x194   :  { %v897_v37 = vpop.f32.mrb[36].mxu1 }
 0x195   :  { %v3238_v40 = vadd.f32 %v897_v37, %v737_v22  ;;  %v899_v51 = vpop.f32.mrb[37].mxu1 }
 0x196   :  { %v3240_v58 = vadd.f32 %v899_v51, %v739_v23 }
 0x198   :  { %v903_v0 = vpop.f32.mrb[38].mxu1 }
 0x199   :  { %v3242_v1 = vadd.f32 %v903_v0, %v743_v30  ;;  %v905_v6 = vpop.f32.mrb[39].mxu1 }
 0x19a   :  { %v3244_v2 = vadd.f32 %v905_v6, %v745_v31 }
 0x19c   :  { %v909_v7 = vpop.f32.mrb[40].mxu1 }
 0x19d   :  { %v3246_v5 = vadd.f32 %v909_v7, %v749_v38  ;;  %v911_v14 = vpop.f32.mrb[41].mxu1 }
 0x19e   :  { %v3248_v8 = vadd.f32 %v911_v14, %v751_v39  ;;  %v516_v39 = vadd.f32 %v3170_v41, %v3208_v62  ;;  %v524_v41 = vadd.f32 %v3176_v44, %v3212_v63 }
 0x1a0   :  { %v915_v15 = vpop.f32.mrb[42].mxu1 }
 0x1a1   :  { %v3250_v9 = vadd.f32 %v915_v15, %v755_v3  ;;  %v917_v22 = vpop.f32.mrb[43].mxu1 }
 0x1a2   :  { %v3252_v10 = vadd.f32 %v917_v22, %v757_v4  ;;  %v518_v4 = vadd.f32 %v3172_v42, %v3212_v63  ;;  %v530_v22 = vadd.f32 %v3180_v46, %v3212_v63  ;;  %v534_v46 = vadd.f32 %v3182_v47, %v3208_v62 }
 0x1a4   :  { %v921_v23 = vpop.f32.mrb[44].mxu1 }
 0x1a5   :  { %v3254_v11 = vadd.f32 %v921_v23, %v761_v13  ;;  %v923_v30 = vpop.f32.mrb[45].mxu1 }
 0x1a6   :  { %v3256_v12 = vadd.f32 %v923_v30, %v763_v16 }
 0x1a8   :  { %v927_v31 = vpop.f32.mrb[46].mxu1 }
 0x1a9   :  { %v3258_v17 = vadd.f32 %v927_v31, %v767_v25  ;;  %v929_v38 = vpop.f32.mrb[47].mxu1  ;;  %v522_v25 = vadd.f32 %v3174_v43, %v3208_v62 }
 0x1aa   :  { %v3260_v18 = vadd.f32 %v929_v38, %v769_v26  ;;  %v3270_v26 = vrot.slane %v1406_v20, %v392_v57  ;;  %v528_v57 = vadd.f32 %v3178_v45, %v3208_v62 }
 0x1ac   :  { %v1279_v3 = vpop.f32.mrb[48].mxu1 }
 0x1ad   :  { %v998_v19 = vpop.f32.mrb[0].mxu0  ;;  %v1281_v13 = vpop.f32.mrb[49].mxu1 }
 0x1ae   :  { %v1794_v21 = vadd.f32 %v998_v19, %v516_v39  ;;  %v1000_v24 = vpop.f32.mrb[1].mxu0 }
 0x1af   :  { %v1796_v16 = vadd.f32 %v1000_v24, %v518_v4 }
 0x1b0   :  { %v1093_v27 = vmax.f32 %v1794_v21, 0.0  ;;  %v1285_v29 = vpop.f32.mrb[50].mxu1 }
 0x1b1   :  { %v1094_v33 = vmax.f32 %v1796_v16, 0.0  ;;  %v1004_v42 = vpop.f32.mrb[2].mxu0  ;;  %v1287_v37 = vpop.f32.mrb[51].mxu1 }
 0x1b2   :  { %v1798_v51 = vadd.f32 %v1004_v42, %v522_v25  ;;  %v1374_v0 = vadd.f32 %v1279_v3, %v1093_v27  ;;  %v1006_v6 = vpop.f32.mrb[3].mxu0 }
 0x1b3   :  { %v1800_v43 = vadd.f32 %v1006_v6, %v524_v41  ;;  %v1375_v7 = vadd.f32 %v1281_v13, %v1094_v33  ;;  %v536_v13 = vadd.f32 %v3184_v48, %v3212_v63  ;;  %v540_v48 = vadd.f32 %v3186_v49, %v3208_v62 }
 0x1b4   :  { %v1095_v14 = vmax.f32 %v1798_v51, 0.0  ;;  %v1418_v15 = vadd.f32 %v3270_v26, %v1374_v0  ;;  %v1291_v44 = vpop.f32.mrb[52].mxu1  ;;  %v542_v0 = vadd.f32 %v3188_v50, %v3212_v63  ;;  %v546_v50 = vadd.f32 %v3190_v52, %v3208_v62 }
 0x1b5   :  { %v1096_v54 = vmax.f32 %v1800_v43, 0.0  ;;  %v1419_v59 = vadd.f32 %v3276_v35, %v1375_v7  ;;  %v1010_v23 = vpop.f32.mrb[4].mxu0  ;;  %v1293_v30 = vpop.f32.mrb[53].mxu1 }
 0x1b6   :  { %1450 = vst [vmem:[%s3468_s6] sm:$0xff] %v1418_v15  ;;  %v1802_v31 = vadd.f32 %v1010_v23, %v528_v57  ;;  %v1376_v38 = vadd.f32 %v1285_v29, %v1095_v14  ;;  %v1012_v45 = vpop.f32.mrb[5].mxu0 }
 0x1b7   :  { %1452 = vst.msk [vmem:[%s3468_s6 + $0x8] sm:$0xff] %vm1451_vm1, %v1419_v59  ;;  %v1804_v39 = vadd.f32 %v1012_v45, %v530_v22  ;;  %v1377_v3 = vadd.f32 %v1287_v37, %v1096_v54 }
 0x1b8   :  { %v1097_v4 = vmax.f32 %v1802_v31, 0.0  ;;  %v1420_v19 = vadd.f32 %v3270_v26, %v1376_v38  ;;  %v1297_v20 = vpop.f32.mrb[54].mxu1 }
 0x1b9   :  { %v1098_v21 = vmax.f32 %v1804_v39, 0.0  ;;  %v1421_v24 = vadd.f32 %v3276_v35, %v1377_v3  ;;  %v1016_v16 = vpop.f32.mrb[6].mxu0  ;;  %v1299_v25 = vpop.f32.mrb[55].mxu1 }
 0x1ba   :  { %1453 = vst [vmem:[%s3468_s6 + $0x10] sm:$0xff] %v1420_v19  ;;  %v1806_v27 = vadd.f32 %v1016_v16, %v534_v46  ;;  %v1378_v29 = vadd.f32 %v1291_v44, %v1097_v4  ;;  %v1018_v41 = vpop.f32.mrb[7].mxu0 }
 0x1bb   :  { %1454 = vst.msk [vmem:[%s3468_s6 + $0x18] sm:$0xff] %vm1451_vm1, %v1421_v24  ;;  %v1808_v47 = vadd.f32 %v1018_v41, %v536_v13  ;;  %v1379_v33 = vadd.f32 %v1293_v30, %v1098_v21  ;;  %v548_v30 = vadd.f32 %v3192_v53, %v3212_v63  ;;  %v552_v53 = vadd.f32 %v3196_v55, %v3208_v62 }
 0x1bc   :  { %v1099_v42 = vmax.f32 %v1806_v27, 0.0  ;;  %v1422_v37 = vadd.f32 %v3270_v26, %v1378_v29  ;;  %v1303_v51 = vpop.f32.mrb[56].mxu1  ;;  %v554_v24 = vadd.f32 %v3198_v56, %v3212_v63  ;;  %v558_v56 = vadd.f32 %v3202_v60, %v3208_v62 }
 0x1bd   :  { %v1100_v6 = vmax.f32 %v1808_v47, 0.0  ;;  %v1423_v43 = vadd.f32 %v3276_v35, %v1379_v33  ;;  %v1022_v7 = vpop.f32.mrb[8].mxu0  ;;  %v1305_v57 = vpop.f32.mrb[57].mxu1 }
 0x1be   :  { %1455 = vst [vmem:[%s3468_s6 + $0x20] sm:$0xff] %v1422_v37  ;;  %v1810_v14 = vadd.f32 %v1022_v7, %v540_v48  ;;  %v1380_v15 = vadd.f32 %v1297_v20, %v1099_v42  ;;  %v1024_v44 = vpop.f32.mrb[9].mxu0 }
 0x1bf   :  { %1456 = vst.msk [vmem:[%s3468_s6 + $0x28] sm:$0xff] %vm1451_vm1, %v1423_v43  ;;  %v1812_v49 = vadd.f32 %v1024_v44, %v542_v0  ;;  %v1381_v22 = vadd.f32 %v1299_v25, %v1100_v6  ;;  %v560_v0 = vadd.f32 %v3204_v61, %v3212_v63 }
 0x1c0   :  { %v1101_v54 = vmax.f32 %v1810_v14, 0.0  ;;  %v1424_v59 = vadd.f32 %v3270_v26, %v1380_v15  ;;  %v1309_v23 = vpop.f32.mrb[58].mxu1 }
 0x1c1   :  { %v1102_v31 = vmax.f32 %v1812_v49, 0.0  ;;  %v1425_v38 = vadd.f32 %v3276_v35, %v1381_v22  ;;  %v1028_v45 = vpop.f32.mrb[10].mxu0  ;;  %v1311_v39 = vpop.f32.mrb[59].mxu1 }
 0x1c2   :  { %1457 = vst [vmem:[%s3468_s6 + $0x30] sm:$0xff] %v1424_v59  ;;  %v1814_v3 = vadd.f32 %v1028_v45, %v546_v50  ;;  %v1382_v46 = vadd.f32 %v1303_v51, %v1101_v54  ;;  %v1030_v4 = vpop.f32.mrb[11].mxu0 }
 0x1c3   :  { %1458 = vst.msk [vmem:[%s3468_s6 + $0x38] sm:$0xff] %vm1451_vm1, %v1425_v38  ;;  %v1816_v52 = vadd.f32 %v1030_v4, %v548_v30  ;;  %v1383_v19 = vadd.f32 %v1305_v57, %v1102_v31 }
 0x1c4   :  { %v1103_v20 = vmax.f32 %v1814_v3, 0.0  ;;  %v1426_v13 = vadd.f32 %v3270_v26, %v1382_v46  ;;  %v1315_v21 = vpop.f32.mrb[60].mxu1 }
 0x1c5   :  { %v1104_v16 = vmax.f32 %v1816_v52, 0.0  ;;  %v1427_v25 = vadd.f32 %v3276_v35, %v1383_v19  ;;  %v1034_v27 = vpop.f32.mrb[12].mxu0  ;;  %v1317_v29 = vpop.f32.mrb[61].mxu1 }
 0x1c6   :  { %1459 = vst [vmem:[%s3468_s6 + $0x40] sm:$0xff] %v1426_v13  ;;  %v1818_v41 = vadd.f32 %v1034_v27, %v552_v53  ;;  %v1384_v47 = vadd.f32 %v1309_v23, %v1103_v20  ;;  %v1036_v33 = vpop.f32.mrb[13].mxu0 }
 0x1c7   :  { %1460 = vst.msk [vmem:[%s3468_s6 + $0x48] sm:$0xff] %vm1451_vm1, %v1427_v25  ;;  %v1820_v55 = vadd.f32 %v1036_v33, %v554_v24  ;;  %v1385_v48 = vadd.f32 %v1311_v39, %v1104_v16 }
 0x1c8   :  { %v1105_v42 = vmax.f32 %v1818_v41, 0.0  ;;  %v1428_v37 = vadd.f32 %v3270_v26, %v1384_v47  ;;  %v1321_v51 = vpop.f32.mrb[62].mxu1 }
 0x1c9   :  { %v1106_v6 = vmax.f32 %v1820_v55, 0.0  ;;  %v1429_v43 = vadd.f32 %v3276_v35, %v1385_v48  ;;  %v1040_v7 = vpop.f32.mrb[14].mxu0  ;;  %v1323_v57 = vpop.f32.mrb[63].mxu1 }
 0x1ca   :  { %1461 = vst [vmem:[%s3468_s6 + $0x50] sm:$0xff] %v1428_v37  ;;  %v1822_v14 = vadd.f32 %v1040_v7, %v558_v56  ;;  %v1386_v15 = vadd.f32 %v1315_v21, %v1105_v42  ;;  %v1042_v44 = vpop.f32.mrb[15].mxu0 }
 0x1cb   :  { %1462 = vst.msk [vmem:[%s3468_s6 + $0x58] sm:$0xff] %vm1451_vm1, %v1429_v43  ;;  %v1824_v60 = vadd.f32 %v1042_v44, %v560_v0  ;;  %v1387_v62 = vadd.f32 %v1317_v29, %v1106_v6 }
 0x1cc   :  { %v1107_v61 = vmax.f32 %v1822_v14, 0.0  ;;  %v1430_v63 = vadd.f32 %v3270_v26, %v1386_v15  ;;  %v1327_v49 = vpop.f32.mrb[64].mxu1 }
 0x1cd   :  { %v1108_v22 = vmax.f32 %v1824_v60, 0.0  ;;  %v1431_v50 = vadd.f32 %v3276_v35, %v1387_v62  ;;  %v1046_v54 = vpop.f32.mrb[32].mxu0  ;;  %v1329_v59 = vpop.f32.mrb[65].mxu1 }
 0x1ce   :  { %1463 = vst [vmem:[%s3468_s6 + $0x60] sm:$0xff] %v1430_v63  ;;  %v1047_v23 = vadd.f32 %v1046_v54, %v3230_v28  ;;  %v1388_v30 = vadd.f32 %v1321_v51, %v1107_v61  ;;  %v1048_v31 = vpop.f32.mrb[33].mxu0 }
 0x1cf   :  { %1464 = vst.msk [vmem:[%s3468_s6 + $0x68] sm:$0xff] %vm1451_vm1, %v1431_v50  ;;  %v1049_v38 = vadd.f32 %v1048_v31, %v3232_v32  ;;  %v1389_v45 = vadd.f32 %v1323_v57, %v1108_v22 }
 0x1d0   :  { %v1109_v39 = vmax.f32 %v1047_v23, 0.0  ;;  %v1432_v3 = vadd.f32 %v3270_v26, %v1388_v30  ;;  %v1333_v46 = vpop.f32.mrb[66].mxu1 }
 0x1d1   :  { %v1110_v4 = vmax.f32 %v1049_v38, 0.0  ;;  %v1433_v52 = vadd.f32 %v3276_v35, %v1389_v45  ;;  %v1052_v19 = vpop.f32.mrb[34].mxu0  ;;  %v1335_v53 = vpop.f32.mrb[67].mxu1 }
 0x1d2   :  { %1465 = vst [vmem:[%s3468_s6 + $0x70] sm:$0xff] %v1432_v3  ;;  %v1053_v28 = vadd.f32 %v1052_v19, %v3234_v34  ;;  %v1390_v20 = vadd.f32 %v1327_v49, %v1109_v39  ;;  %v1054_v13 = vpop.f32.mrb[35].mxu0 }
 0x1d3   :  { %1466 = vst.msk [vmem:[%s3468_s6 + $0x78] sm:$0xff] %vm1451_vm1, %v1433_v52  ;;  %v1055_v32 = vadd.f32 %v1054_v13, %v3236_v36  ;;  %v1391_v21 = vadd.f32 %v1329_v59, %v1110_v4 }
 0x1d4   :  { %v1111_v24 = vmax.f32 %v1053_v28, 0.0  ;;  %v1434_v16 = vadd.f32 %v3270_v26, %v1390_v20  ;;  %v1339_v25 = vpop.f32.mrb[68].mxu1 }
 0x1d5   :  { %v1112_v27 = vmax.f32 %v1055_v32, 0.0  ;;  %v1435_v29 = vadd.f32 %v3276_v35, %v1391_v21  ;;  %v1058_v41 = vpop.f32.mrb[36].mxu0  ;;  %v1341_v47 = vpop.f32.mrb[69].mxu1 }
 0x1d6   :  { %1467 = vst [vmem:[%s3468_s6 + $0x80] sm:$0xff] %v1434_v16  ;;  %v1059_v34 = vadd.f32 %v1058_v41, %v3238_v40  ;;  %v1392_v33 = vadd.f32 %v1333_v46, %v1111_v24  ;;  %v1060_v55 = vpop.f32.mrb[37].mxu0 }
 0x1d7   :  { %1468 = vst.msk [vmem:[%s3468_s6 + $0x88] sm:$0xff] %vm1451_vm1, %v1435_v29  ;;  %v1061_v36 = vadd.f32 %v1060_v55, %v3240_v58  ;;  %v1393_v48 = vadd.f32 %v1335_v53, %v1112_v27 }
 0x1d8   :  { %v1113_v56 = vmax.f32 %v1059_v34, 0.0  ;;  %v1436_v42 = vadd.f32 %v3270_v26, %v1392_v33  ;;  %v1345_v37 = vpop.f32.mrb[70].mxu1 }
 0x1d9   :  { %v1114_v51 = vmax.f32 %v1061_v36, 0.0  ;;  %v1437_v0 = vadd.f32 %v3276_v35, %v1393_v48  ;;  %v1064_v6 = vpop.f32.mrb[38].mxu0  ;;  %v1347_v43 = vpop.f32.mrb[71].mxu1 }
 0x1da   :  { %1469 = vst [vmem:[%s3468_s6 + $0x90] sm:$0xff] %v1436_v42  ;;  %v1065_v40 = vadd.f32 %v1064_v6, %v3242_v1  ;;  %v1394_v7 = vadd.f32 %v1339_v25, %v1113_v56  ;;  %v1066_v57 = vpop.f32.mrb[39].mxu0 }
 0x1db   :  { %1470 = vst.msk [vmem:[%s3468_s6 + $0x98] sm:$0xff] %vm1451_vm1, %v1437_v0  ;;  %v1067_v58 = vadd.f32 %v1066_v57, %v3244_v2  ;;  %v1395_v14 = vadd.f32 %v1341_v47, %v1114_v51 }
 0x1dc   :  { %v1115_v15 = vmax.f32 %v1065_v40, 0.0  ;;  %v1438_v44 = vadd.f32 %v3270_v26, %v1394_v7  ;;  %v1351_v60 = vpop.f32.mrb[72].mxu1 }
 0x1dd   :  { %v1116_v62 = vmax.f32 %v1067_v58, 0.0  ;;  %v1439_v61 = vadd.f32 %v3276_v35, %v1395_v14  ;;  %v1070_v63 = vpop.f32.mrb[40].mxu0  ;;  %v1353_v49 = vpop.f32.mrb[73].mxu1 }
 0x1de   :  { %1471 = vst [vmem:[%s3468_s6 + $0xa0] sm:$0xff] %v1438_v44  ;;  %v1071_v1 = vadd.f32 %v1070_v63, %v3246_v5  ;;  %v1396_v22 = vadd.f32 %v1345_v37, %v1115_v15  ;;  %v1072_v50 = vpop.f32.mrb[41].mxu0 }
 0x1df   :  { %1472 = vst.msk [vmem:[%s3468_s6 + $0xa8] sm:$0xff] %vm1451_vm1, %v1439_v61  ;;  %v1073_v2 = vadd.f32 %v1072_v50, %v3248_v8  ;;  %v1397_v54 = vadd.f32 %v1347_v43, %v1116_v62 }
 0x1e0   :  { %v1117_v59 = vmax.f32 %v1071_v1, 0.0  ;;  %v1440_v23 = vadd.f32 %v3270_v26, %v1396_v22  ;;  %v1357_v30 = vpop.f32.mrb[74].mxu1 }
 0x1e1   :  { %v1118_v31 = vmax.f32 %v1073_v2, 0.0  ;;  %v1441_v38 = vadd.f32 %v3276_v35, %v1397_v54  ;;  %v1076_v45 = vpop.f32.mrb[42].mxu0  ;;  %v1359_v39 = vpop.f32.mrb[75].mxu1 }
 0x1e2   :  { %1473 = vst [vmem:[%s3468_s6 + $0xb0] sm:$0xff] %v1440_v23  ;;  %v1077_v5 = vadd.f32 %v1076_v45, %v3250_v9  ;;  %v1398_v3 = vadd.f32 %v1351_v60, %v1117_v59  ;;  %v1078_v46 = vpop.f32.mrb[43].mxu0 }
 0x1e3   :  { %1474 = vst.msk [vmem:[%s3468_s6 + $0xb8] sm:$0xff] %vm1451_vm1, %v1441_v38  ;;  %v1079_v8 = vadd.f32 %v1078_v46, %v3252_v10  ;;  %v1399_v4 = vadd.f32 %v1353_v49, %v1118_v31 }
 0x1e4   :  { %v1119_v52 = vmax.f32 %v1077_v5, 0.0  ;;  %v1442_v19 = vadd.f32 %v3270_v26, %v1398_v3  ;;  %v1363_v53 = vpop.f32.mrb[76].mxu1 }
 0x1e5   :  { %v1120_v28 = vmax.f32 %v1079_v8, 0.0  ;;  %v1443_v20 = vadd.f32 %v3276_v35, %v1399_v4  ;;  %v1082_v13 = vpop.f32.mrb[44].mxu0  ;;  %v1365_v32 = vpop.f32.mrb[77].mxu1 }
 0x1e6   :  { %1475 = vst [vmem:[%s3468_s6 + $0xc0] sm:$0xff] %v1442_v19  ;;  %v1083_v9 = vadd.f32 %v1082_v13, %v3254_v11  ;;  %v1400_v21 = vadd.f32 %v1357_v30, %v1119_v52  ;;  %v1084_v24 = vpop.f32.mrb[45].mxu0 }
 0x1e7   :  { %1476 = vst.msk [vmem:[%s3468_s6 + $0xc8] sm:$0xff] %vm1451_vm1, %v1443_v20  ;;  %v1085_v10 = vadd.f32 %v1084_v24, %v3256_v12  ;;  %v1401_v16 = vadd.f32 %v1359_v39, %v1120_v28 }
 0x1e8   :  { %v1121_v25 = vmax.f32 %v1083_v9, 0.0  ;;  %v1444_v27 = vadd.f32 %v3270_v26, %v1400_v21  ;;  %v1369_v29 = vpop.f32.mrb[78].mxu1 }
 0x1e9   :  { %v1122_v41 = vmax.f32 %v1085_v10, 0.0  ;;  %v1445_v47 = vadd.f32 %v3276_v35, %v1401_v16  ;;  %v1088_v34 = vpop.f32.mrb[46].mxu0  ;;  %v1371_v33 = vpop.f32.mrb[79].mxu1 }
 0x1ea   :  { %1477 = vst [vmem:[%s3468_s6 + $0xd0] sm:$0xff] %v1444_v27  ;;  %v1089_v11 = vadd.f32 %v1088_v34, %v3258_v17  ;;  %v1402_v55 = vadd.f32 %v1363_v53, %v1121_v25  ;;  %v1090_v36 = vpop.f32.mrb[47].mxu0 }
 0x1eb   :  { %1478 = vst.msk [vmem:[%s3468_s6 + $0xd8] sm:$0xff] %vm1451_vm1, %v1445_v47  ;;  %v1091_v12 = vadd.f32 %v1090_v36, %v3260_v18  ;;  %v1403_v48 = vadd.f32 %v1365_v32, %v1122_v41 }
 0x1ec   :  { %v1123_v56 = vmax.f32 %v1089_v11, 0.0  ;;  %v1446_v42 = vadd.f32 %v3270_v26, %v1402_v55 }
 0x1ed   :  { %v1124_v37 = vmax.f32 %v1091_v12, 0.0  ;;  %v1447_v51 = vadd.f32 %v3276_v35, %v1403_v48 }
 0x1ee   :  { %1479 = vst [vmem:[%s3468_s6 + $0xe0] sm:$0xff] %v1446_v42  ;;  %v1404_v17 = vadd.f32 %v1369_v29, %v1123_v56 }
 0x1ef   :  { %1480 = vst.msk [vmem:[%s3468_s6 + $0xe8] sm:$0xff] %vm1451_vm1, %v1447_v51  ;;  %v1405_v0 = vadd.f32 %v1371_v33, %v1124_v37 }
 0x1f0   :  { %v1448_v18 = vadd.f32 %v3270_v26, %v1404_v17 }
 0x1f1   :  { %v1449_v6 = vadd.f32 %v3276_v35, %v1405_v0 }
 0x1f2   :  { %1481 = vst [vmem:[%s3468_s6 + $0xf0] sm:$0xff] %v1448_v18 }
 0x1f3   :  { %1482 = vst.msk [vmem:[%s3468_s6 + $0xf8] sm:$0xff] %vm1451_vm1, %v1449_v6 }
 0x1f4   :  { %1487 = vsyncpa [#allocation3], 1 }
 0x1f5   :  { %1488 = vsyncpa [#allocation5], 1 }

// kernel: forward.5
= control target key start
LH: loop header
LB: loop body
LE: loop exit
PB: predicated region body
PF: predicated region fallthrough
CT: control target
= control target key end

     0   :  { %v9071_v47 = vmov 1983009808   ;;  %v1622_v49 = vlaneseq  ;;  %s14229_s0 = inlined_call_operand.vmem [shape: f32[2,12288], index: 0, kind: input, shape index: {}]   ;;  %s14230_s1 = inlined_call_operand.vmem [shape: f32[12288,128], index: 1, kind: input, shape index: {}]   ;;  %s14231_s2 = inlined_call_operand.vmem [shape: f32[1,128], index: 2, kind: input, shape index: {}]   ;;  %s14232_s3 = inlined_call_operand.vmem [shape: f32[128,64], index: 3, kind: input, shape index: {}]   ;;  %s14233_s4 = inlined_call_operand.vmem [shape: f32[1,64], index: 4, kind: input, shape index: {}]   ;;  %s14234_s5 = inlined_call_operand.vmem [shape: f32[64,10], index: 5, kind: input, shape index: {}]   ;;  %s14235_s6 = inlined_call_operand.vmem [shape: f32[1,10], index: 6, kind: input, shape index: {}]   ;;  %s14236_s7 = inlined_call_operand.hbm [shape: f32[2,10], index: 7, kind: output, shape index: {}]  }
   0x1   :  { %v67_v0 = vld [vmem:[%s14230_s1 + $0x80] sm:$0xff]  ;;  %v68_v1 = vld [vmem:[%s14230_s1 + $0x88] sm:$0xff]  ;;  %v69_v11 = vld [vmem:[%s14230_s1 + $0x90] sm:$0xff]  ;;  %v1620_v48 = vunpack.c.l.s4 %v9071_v47 }
   0x2   :  { %v51_v2 = vld [vmem:[%s14230_s1] sm:$0xff]  ;;  %v7446_v3 = vpack.c.bf16 %v68_v1, %v67_v0  ;;  %v52_v4 = vld [vmem:[%s14230_s1 + $0x8] sm:$0xff]  ;;  %v70_v13 = vld [vmem:[%s14230_s1 + $0x98] sm:$0xff]  ;;  %v1623_v0 = vshrl.u32 %v1622_v49, 7 }
   0x3   :  { %v99_v5 = vld [vmem:[%s14230_s1 + $0x180] sm:$0xff]  ;;  %v100_v6 = vld [vmem:[%s14230_s1 + $0x188] sm:$0xff]  ;;  %v7448_v7 = vpack.c.bf16 %v52_v4, %v51_v2  ;;  %v53_v14 = vld [vmem:[%s14230_s1 + $0x10] sm:$0xff]  ;;  %v7450_v16 = vpack.c.bf16 %v70_v13, %v69_v11  ;;  %v1621_v63 = vunpack.c.0.s8 %v1620_v48 }
   0x4   :  { %v7478_v8 = vpack.c.bf16 %v100_v6, %v99_v5  ;;  %v83_v9 = vld [vmem:[%s14230_s1 + $0x100] sm:$0xff]  ;;  %v84_v10 = vld [vmem:[%s14230_s1 + $0x108] sm:$0xff]  ;;  %7447 = vmatprep.subr.bf16.mxu0 %v7446_v3  ;;  %v54_v15 = vld [vmem:[%s14230_s1 + $0x18] sm:$0xff] }
   0x5   :  { %v7480_v12 = vpack.c.bf16 %v84_v10, %v83_v9  ;;  %7449 = vmatpush3.bf16.msra.mxu0 %v7448_v7  ;;  %v7452_v17 = vpack.c.bf16 %v54_v15, %v53_v14  ;;  %v101_v18 = vld [vmem:[%s14230_s1 + $0x190] sm:$0xff]  ;;  %v102_v19 = vld [vmem:[%s14230_s1 + $0x198] sm:$0xff]  ;;  %v71_v23 = vld [vmem:[%s14230_s1 + $0xa0] sm:$0xff]  ;;  %v9266_v13 = vsub.s32 %v1621_v63, %v1623_v0 }
   0x6   :  { %7479 = vmatprep.subr.bf16.mxu1 %v7478_v8  ;;  %v85_v20 = vld [vmem:[%s14230_s1 + $0x110] sm:$0xff]  ;;  %v7482_v21 = vpack.c.bf16 %v102_v19, %v101_v18  ;;  %v86_v22 = vld [vmem:[%s14230_s1 + $0x118] sm:$0xff]  ;;  %v72_v24 = vld [vmem:[%s14230_s1 + $0xa8] sm:$0xff]  ;;  %7451 = vmatprep.subr.bf16.mxu0 %v7450_v16 }
   0x7   :  { %7481 = vmatpush3.bf16.msra.mxu1 %v7480_v12  ;;  %v7484_v25 = vpack.c.bf16 %v86_v22, %v85_v20  ;;  %v7454_v26 = vpack.c.bf16 %v72_v24, %v71_v23  ;;  %v55_v27 = vld [vmem:[%s14230_s1 + $0x20] sm:$0xff]  ;;  %v56_v28 = vld [vmem:[%s14230_s1 + $0x28] sm:$0xff]  ;;  %v73_v35 = vld [vmem:[%s14230_s1 + $0xb0] sm:$0xff] }
   0x8   :  { %v103_v29 = vld [vmem:[%s14230_s1 + $0x1a0] sm:$0xff]  ;;  %7483 = vmatprep.subr.bf16.mxu1 %v7482_v21  ;;  %v104_v30 = vld [vmem:[%s14230_s1 + $0x1a8] sm:$0xff]  ;;  %v7456_v33 = vpack.c.bf16 %v56_v28, %v55_v27  ;;  %v74_v36 = vld [vmem:[%s14230_s1 + $0xb8] sm:$0xff] }
   0x9   :  { %v87_v31 = vld [vmem:[%s14230_s1 + $0x120] sm:$0xff]  ;;  %v88_v32 = vld [vmem:[%s14230_s1 + $0x128] sm:$0xff]  ;;  %7453 = vmatpush3.bf16.msra.mxu0 %v7452_v17  ;;  %v7486_v34 = vpack.c.bf16 %v104_v30, %v103_v29  ;;  %v57_v37 = vld [vmem:[%s14230_s1 + $0x30] sm:$0xff]  ;;  %v7458_v39 = vpack.c.bf16 %v74_v36, %v73_v35 }
   0xa   :  { %7455 = vmatprep.subr.bf16.mxu0 %v7454_v26  ;;  %v7488_v38 = vpack.c.bf16 %v88_v32, %v87_v31  ;;  %v58_v40 = vld [vmem:[%s14230_s1 + $0x38] sm:$0xff]  ;;  %v105_v41 = vld [vmem:[%s14230_s1 + $0x1b0] sm:$0xff]  ;;  %v75_v46 = vld [vmem:[%s14230_s1 + $0xc0] sm:$0xff] }
   0xb   :  { %7485 = vmatpush3.bf16.msra.mxu1 %v7484_v25  ;;  %v106_v42 = vld [vmem:[%s14230_s1 + $0x1b8] sm:$0xff]  ;;  %v89_v44 = vld [vmem:[%s14230_s1 + $0x130] sm:$0xff]  ;;  %v76_v50 = vld [vmem:[%s14230_s1 + $0xc8] sm:$0xff]  ;;  %v7460_v51 = vpack.c.bf16 %v58_v40, %v57_v37 }
   0xc   :  { %7487 = vmatprep.subr.bf16.mxu1 %v7486_v34  ;;  %v7490_v43 = vpack.c.bf16 %v106_v42, %v105_v41  ;;  %v90_v45 = vld [vmem:[%s14230_s1 + $0x138] sm:$0xff]  ;;  %v107_v52 = vld [vmem:[%s14230_s1 + $0x1c0] sm:$0xff]  ;;  %v108_v53 = vld [vmem:[%s14230_s1 + $0x1c8] sm:$0xff]  ;;  %v7462_v55 = vpack.c.bf16 %v76_v50, %v75_v46 }
   0xd   :  { %7457 = vmatpush3.bf16.msra.mxu0 %v7456_v33  ;;  %v7492_v54 = vpack.c.bf16 %v90_v45, %v89_v44  ;;  %v59_v56 = vld [vmem:[%s14230_s1 + $0x40] sm:$0xff]  ;;  %v60_v57 = vld [vmem:[%s14230_s1 + $0x48] sm:$0xff]  ;;  %v7494_v59 = vpack.c.bf16 %v108_v53, %v107_v52  ;;  %v77_v61 = vld [vmem:[%s14230_s1 + $0xd0] sm:$0xff] }
   0xe   :  { %7459 = vmatprep.subr.bf16.mxu0 %v7458_v39  ;;  %v91_v58 = vld [vmem:[%s14230_s1 + $0x140] sm:$0xff]  ;;  %v92_v60 = vld [vmem:[%s14230_s1 + $0x148] sm:$0xff]  ;;  %v78_v62 = vld [vmem:[%s14230_s1 + $0xd8] sm:$0xff]  ;;  %v7464_v3 = vpack.c.bf16 %v60_v57, %v59_v56 }
   0xf   :  { %7489 = vmatpush3.bf16.msra.mxu1 %v7488_v38  ;;  %v109_v1 = vld [vmem:[%s14230_s1 + $0x1d0] sm:$0xff]  ;;  %v110_v2 = vld [vmem:[%s14230_s1 + $0x1d8] sm:$0xff]  ;;  %v7496_v4 = vpack.c.bf16 %v92_v60, %v91_v58  ;;  %v7466_v5 = vpack.c.bf16 %v78_v62, %v77_v61  ;;  %v79_v11 = vld [vmem:[%s14230_s1 + $0xe0] sm:$0xff] }
  0x10   :  { %7491 = vmatprep.subr.bf16.mxu1 %v7490_v43  ;;  %v61_v6 = vld [vmem:[%s14230_s1 + $0x50] sm:$0xff]  ;;  %v62_v7 = vld [vmem:[%s14230_s1 + $0x58] sm:$0xff]  ;;  %v7498_v9 = vpack.c.bf16 %v110_v2, %v109_v1  ;;  %v80_v12 = vld [vmem:[%s14230_s1 + $0xe8] sm:$0xff] }
  0x11   :  { %7461 = vmatpush3.bf16.msra.mxu0 %v7460_v51  ;;  %v93_v8 = vld [vmem:[%s14230_s1 + $0x150] sm:$0xff]  ;;  %v94_v10 = vld [vmem:[%s14230_s1 + $0x158] sm:$0xff]  ;;  %v111_v14 = vld [vmem:[%s14230_s1 + $0x1e0] sm:$0xff]  ;;  %v7468_v16 = vpack.c.bf16 %v62_v7, %v61_v6  ;;  %v7470_v19 = vpack.c.bf16 %v80_v12, %v79_v11 }
  0x12   :  { %7463 = vmatprep.subr.bf16.mxu0 %v7462_v55  ;;  %v112_v15 = vld [vmem:[%s14230_s1 + $0x1e8] sm:$0xff]  ;;  %v63_v17 = vld [vmem:[%s14230_s1 + $0x60] sm:$0xff]  ;;  %v7500_v18 = vpack.c.bf16 %v94_v10, %v93_v8  ;;  %v81_v25 = vld [vmem:[%s14230_s1 + $0xf0] sm:$0xff] }
  0x13   :  { %7493 = vmatpush3.bf16.msra.mxu1 %v7492_v54  ;;  %v64_v20 = vld [vmem:[%s14230_s1 + $0x68] sm:$0xff]  ;;  %v95_v21 = vld [vmem:[%s14230_s1 + $0x160] sm:$0xff]  ;;  %v7502_v23 = vpack.c.bf16 %v112_v15, %v111_v14  ;;  %v82_v26 = vld [vmem:[%s14230_s1 + $0xf8] sm:$0xff] }
  0x14   :  { %7495 = vmatprep.subr.bf16.mxu1 %v7494_v59  ;;  %v27_v22 = vld [vmem:[%s14229_s0] sm:$0xff]  ;;  %v96_v24 = vld [vmem:[%s14230_s1 + $0x168] sm:$0xff]  ;;  %v113_v29 = vld [vmem:[%s14230_s1 + $0x1f0] sm:$0xff]  ;;  %v7472_v31 = vpack.c.bf16 %v64_v20, %v63_v17  ;;  %v7474_v35 = vpack.c.bf16 %v82_v26, %v81_v25 }
  0x15   :  { %7465 = vmatpush3.bf16.msra.mxu0 %v7464_v3  ;;  %v1625_v27 = vrot.slane %v27_v22, %v9266_v13  ;;  %v1618_v28 = vcombine.high %v27_v22, %v27_v22  ;;  %v114_v30 = vld [vmem:[%s14230_s1 + $0x1f8] sm:$0xff]  ;;  %v7504_v34 = vpack.c.bf16 %v96_v24, %v95_v21  ;;  %v65_v36 = vld [vmem:[%s14230_s1 + $0x70] sm:$0xff]  ;;  %v131_v41 = vld [vmem:[%s14230_s1 + $0x280] sm:$0xff] }
  0x16   :  { %7467 = vmatprep.subr.bf16.mxu0 %v7466_v5  ;;  %v66_v37 = vld [vmem:[%s14230_s1 + $0x78] sm:$0xff]  ;;  %v97_v38 = vld [vmem:[%s14230_s1 + $0x170] sm:$0xff]  ;;  %v7506_v39 = vpack.c.bf16 %v114_v30, %v113_v29  ;;  %v132_v42 = vld [vmem:[%s14230_s1 + $0x288] sm:$0xff] }
  0x17   :  { %7497 = vmatpush3.bf16.msra.mxu1 %v7496_v4  ;;  %v1633_v32 = vcombine.high %v1625_v27, %v1625_v27  ;;  %v1632_v33 = vrot.slane %v1618_v28, %v9266_v13  ;;  %v98_v40 = vld [vmem:[%s14230_s1 + $0x178] sm:$0xff]  ;;  %v163_v44 = vld [vmem:[%s14230_s1 + $0x380] sm:$0xff]  ;;  %v164_v45 = vld [vmem:[%s14230_s1 + $0x388] sm:$0xff]  ;;  %v7476_v46 = vpack.c.bf16 %v66_v37, %v65_v36  ;;  %v7510_v48 = vpack.c.bf16 %v132_v42, %v131_v41 }
  0x18   :  { %7499 = vmatprep.subr.bf16.mxu1 %v7498_v9  ;;  %v7508_v47 = vpack.c.bf16 %v98_v40, %v97_v38  ;;  %v115_v49 = vld [vmem:[%s14230_s1 + $0x200] sm:$0xff]  ;;  %v116_v50 = vld [vmem:[%s14230_s1 + $0x208] sm:$0xff]  ;;  %v7542_v52 = vpack.c.bf16 %v164_v45, %v163_v44  ;;  %v133_v54 = vld [vmem:[%s14230_s1 + $0x290] sm:$0xff] }
  0x19   :  { %7469 = vmatpush3.bf16.msra.mxu0 %v7468_v16  ;;  %2186 = vmatprep.mubr.f32.mxu0 %v1633_v32  ;;  %v1634_v43 = vcombine.high %v1632_v33, %v1632_v33  ;;  %v147_v51 = vld [vmem:[%s14230_s1 + $0x300] sm:$0xff]  ;;  %v148_v53 = vld [vmem:[%s14230_s1 + $0x308] sm:$0xff]  ;;  %v134_v55 = vld [vmem:[%s14230_s1 + $0x298] sm:$0xff]  ;;  %v7512_v58 = vpack.c.bf16 %v116_v50, %v115_v49 }
  0x1a   :  { %7471 = vmatprep.subr.bf16.mxu0 %v7470_v19  ;;  %v165_v56 = vld [vmem:[%s14230_s1 + $0x390] sm:$0xff]  ;;  %v166_v57 = vld [vmem:[%s14230_s1 + $0x398] sm:$0xff]  ;;  %v7544_v59 = vpack.c.bf16 %v148_v53, %v147_v51  ;;  %v7514_v60 = vpack.c.bf16 %v134_v55, %v133_v54  ;;  %v135_v2 = vld [vmem:[%s14230_s1 + $0x2a0] sm:$0xff] }
  0x1b   :  { %7501 = vmatpush3.bf16.msra.mxu1 %v7500_v18  ;;  %2256 = vmatprep.mubr.f32.mxu1 %v1634_v43  ;;  %v117_v61 = vld [vmem:[%s14230_s1 + $0x210] sm:$0xff]  ;;  %v118_v62 = vld [vmem:[%s14230_s1 + $0x218] sm:$0xff]  ;;  %v7546_v0 = vpack.c.bf16 %v166_v57, %v165_v56  ;;  %v136_v3 = vld [vmem:[%s14230_s1 + $0x2a8] sm:$0xff] }
  0x1c   :  { %7503 = vmatprep.subr.bf16.mxu1 %v7502_v23  ;;  %v149_v63 = vld [vmem:[%s14230_s1 + $0x310] sm:$0xff]  ;;  %v150_v1 = vld [vmem:[%s14230_s1 + $0x318] sm:$0xff]  ;;  %v167_v4 = vld [vmem:[%s14230_s1 + $0x3a0] sm:$0xff]  ;;  %v7516_v6 = vpack.c.bf16 %v118_v62, %v117_v61  ;;  %v7518_v8 = vpack.c.bf16 %v136_v3, %v135_v2 }
  0x1d   :  { %7473 = vmatpush3.bf16.msra.mxu0 %v7472_v31  ;;  %v168_v5 = vld [vmem:[%s14230_s1 + $0x3a8] sm:$0xff]  ;;  %v7548_v7 = vpack.c.bf16 %v150_v1, %v149_v63  ;;  %v119_v9 = vld [vmem:[%s14230_s1 + $0x220] sm:$0xff]  ;;  %v137_v15 = vld [vmem:[%s14230_s1 + $0x2b0] sm:$0xff] }
  0x1e   :  { %7475 = vmatprep.subr.bf16.mxu0 %v7474_v35  ;;  %v120_v10 = vld [vmem:[%s14230_s1 + $0x228] sm:$0xff]  ;;  %v151_v11 = vld [vmem:[%s14230_s1 + $0x320] sm:$0xff]  ;;  %v7550_v12 = vpack.c.bf16 %v168_v5, %v167_v4  ;;  %v138_v16 = vld [vmem:[%s14230_s1 + $0x2b8] sm:$0xff] }
  0x1f   :  { %7505 = vmatpush3.bf16.msra.mxu1 %v7504_v34  ;;  %v152_v14 = vld [vmem:[%s14230_s1 + $0x328] sm:$0xff]  ;;  %v169_v17 = vld [vmem:[%s14230_s1 + $0x3b0] sm:$0xff]  ;;  %v170_v18 = vld [vmem:[%s14230_s1 + $0x3b8] sm:$0xff]  ;;  %v7520_v19 = vpack.c.bf16 %v120_v10, %v119_v9  ;;  %v7522_v21 = vpack.c.bf16 %v138_v16, %v137_v15 }
  0x20   :  { %7507 = vmatprep.subr.bf16.mxu1 %v7506_v39  ;;  %v7552_v20 = vpack.c.bf16 %v152_v14, %v151_v11  ;;  %v121_v22 = vld [vmem:[%s14230_s1 + $0x230] sm:$0xff]  ;;  %v122_v23 = vld [vmem:[%s14230_s1 + $0x238] sm:$0xff]  ;;  %v7554_v25 = vpack.c.bf16 %v170_v18, %v169_v17  ;;  %v140_v28 = vld [vmem:[%s14230_s1 + $0x2c8] sm:$0xff] }
  0x21   :  { %7477 = vmatpush3.bf16.msra.mxu0 %v7476_v46  ;;  %v153_v24 = vld [vmem:[%s14230_s1 + $0x330] sm:$0xff]  ;;  %v154_v26 = vld [vmem:[%s14230_s1 + $0x338] sm:$0xff]  ;;  %v171_v29 = vld [vmem:[%s14230_s1 + $0x3c0] sm:$0xff]  ;;  %v7524_v32 = vpack.c.bf16 %v122_v23, %v121_v22 }
  0x22   :  { %7511 = vmatprep.subr.bf16.mxu0 %v7510_v48  ;;  %v172_v30 = vld [vmem:[%s14230_s1 + $0x3c8] sm:$0xff]  ;;  %v7556_v35 = vpack.c.bf16 %v154_v26, %v153_v24  ;;  %v123_v37 = vld [vmem:[%s14230_s1 + $0x240] sm:$0xff]  ;;  %v141_v42 = vld [vmem:[%s14230_s1 + $0x2d0] sm:$0xff] }
  0x23   :  { %7509 = vmatpush3.bf16.msra.mxu1 %v7508_v47  ;;  %v28_v31 = vld [vmem:[%s14229_s0 + $0x8] sm:$0xff]  ;;  %v155_v39 = vld [vmem:[%s14230_s1 + $0x340] sm:$0xff]  ;;  %v7558_v40 = vpack.c.bf16 %v172_v30, %v171_v29  ;;  %v142_v43 = vld [vmem:[%s14230_s1 + $0x2d8] sm:$0xff] }
  0x24   :  { %7543 = vmatprep.subr.bf16.mxu1 %v7542_v52  ;;  %2187 = vmatmul.mubr.f32.vlgmr.msra.gmra.mrb[0].mxu0 %v1625_v27  ;;  %v139_v27 = vld [vmem:[%s14230_s1 + $0x2c0] sm:$0xff]  ;;  %v1635_v34 = vcombine.high %v28_v31, %v28_v31  ;;  %v124_v38 = vld [vmem:[%s14230_s1 + $0x248] sm:$0xff]  ;;  %v173_v46 = vld [vmem:[%s14230_s1 + $0x3d0] sm:$0xff]  ;;  %v7530_v51 = vpack.c.bf16 %v142_v43, %v141_v42 }
  0x25   :  { %7513 = vmatpush3.bf16.msra.mxu0 %v7512_v58  ;;  %v7526_v36 = vpack.c.bf16 %v140_v28, %v139_v27  ;;  %v156_v41 = vld [vmem:[%s14230_s1 + $0x348] sm:$0xff]  ;;  %v174_v47 = vld [vmem:[%s14230_s1 + $0x3d8] sm:$0xff]  ;;  %v7528_v48 = vpack.c.bf16 %v124_v38, %v123_v37  ;;  %v125_v52 = vld [vmem:[%s14230_s1 + $0x250] sm:$0xff] }
  0x26   :  { %2257 = vmatmul.mubr.f32.vlgmr.msra.gmra.mrb[0].mxu1 %v1632_v33  ;;  %7515 = vmatprep.subr.bf16.mxu0 %v7514_v60  ;;  %v9427_v33 = vrot.slane %v28_v31, %v9266_v13  ;;  %v9450_v45 = vrot.slane %v1635_v34, %v9266_v13  ;;  %v7560_v50 = vpack.c.bf16 %v156_v41, %v155_v39  ;;  %v126_v53 = vld [vmem:[%s14230_s1 + $0x258] sm:$0xff]  ;;  %v157_v54 = vld [vmem:[%s14230_s1 + $0x350] sm:$0xff]  ;;  %v143_v57 = vld [vmem:[%s14230_s1 + $0x2e0] sm:$0xff] }
  0x27   :  { %7545 = vmatpush3.bf16.msra.mxu1 %v7544_v59  ;;  %v7562_v55 = vpack.c.bf16 %v174_v47, %v173_v46  ;;  %v158_v56 = vld [vmem:[%s14230_s1 + $0x358] sm:$0xff]  ;;  %v144_v58 = vld [vmem:[%s14230_s1 + $0x2e8] sm:$0xff]  ;;  %v175_v59 = vld [vmem:[%s14230_s1 + $0x3e0] sm:$0xff]  ;;  %v7532_v61 = vpack.c.bf16 %v126_v53, %v125_v52 }
  0x28   :  { %7547 = vmatprep.subr.bf16.mxu1 %v7546_v0  ;;  %v1650_v44 = vcombine.high %v9427_v33, %v9427_v33  ;;  %v1651_v49 = vcombine.high %v9450_v45, %v9450_v45  ;;  %v176_v60 = vld [vmem:[%s14230_s1 + $0x3e8] sm:$0xff]  ;;  %v7564_v62 = vpack.c.bf16 %v158_v56, %v157_v54  ;;  %v7534_v63 = vpack.c.bf16 %v144_v58, %v143_v57  ;;  %v127_v0 = vld [vmem:[%s14230_s1 + $0x260] sm:$0xff]  ;;  %v145_v5 = vld [vmem:[%s14230_s1 + $0x2f0] sm:$0xff] }
  0x29   :  { %7517 = vmatpush3.bf16.msra.mxu0 %v7516_v6  ;;  %v128_v1 = vld [vmem:[%s14230_s1 + $0x268] sm:$0xff]  ;;  %v159_v2 = vld [vmem:[%s14230_s1 + $0x360] sm:$0xff]  ;;  %v7566_v3 = vpack.c.bf16 %v176_v60, %v175_v59  ;;  %v146_v6 = vld [vmem:[%s14230_s1 + $0x2f8] sm:$0xff] }
  0x2a   :  { %7519 = vmatprep.subr.bf16.mxu0 %v7518_v8  ;;  %2326 = vmatprep.mubr.f32.mxu0 %v1650_v44  ;;  %v160_v4 = vld [vmem:[%s14230_s1 + $0x368] sm:$0xff]  ;;  %v178_v8 = vld [vmem:[%s14230_s1 + $0x3f8] sm:$0xff]  ;;  %v7536_v9 = vpack.c.bf16 %v128_v1, %v127_v0  ;;  %v7538_v11 = vpack.c.bf16 %v146_v6, %v145_v5  ;;  %v161_v15 = vld [vmem:[%s14230_s1 + $0x370] sm:$0xff] }
  0x2b   :  { %7549 = vmatpush3.bf16.msra.mxu1 %v7548_v7  ;;  %2396 = vmatprep.mubr.f32.mxu1 %v1651_v49  ;;  %v177_v7 = vld [vmem:[%s14230_s1 + $0x3f0] sm:$0xff]  ;;  %v7568_v10 = vpack.c.bf16 %v160_v4, %v159_v2  ;;  %v130_v14 = vld [vmem:[%s14230_s1 + $0x278] sm:$0xff]  ;;  %v195_v18 = vld [vmem:[%s14230_s1 + $0x480] sm:$0xff] }
  0x2c   :  { %7551 = vmatprep.subr.bf16.mxu1 %v7550_v12  ;;  %v129_v12 = vld [vmem:[%s14230_s1 + $0x270] sm:$0xff]  ;;  %v7570_v16 = vpack.c.bf16 %v178_v8, %v177_v7  ;;  %v162_v17 = vld [vmem:[%s14230_s1 + $0x378] sm:$0xff]  ;;  %v179_v23 = vld [vmem:[%s14230_s1 + $0x400] sm:$0xff] }
  0x2d   :  { %7521 = vmatpush3.bf16.msra.mxu0 %v7520_v19  ;;  %v196_v19 = vld [vmem:[%s14230_s1 + $0x488] sm:$0xff]  ;;  %v7540_v22 = vpack.c.bf16 %v130_v14, %v129_v12  ;;  %v7572_v24 = vpack.c.bf16 %v162_v17, %v161_v15  ;;  %v211_v27 = vld [vmem:[%s14230_s1 + $0x500] sm:$0xff]  ;;  %v197_v30 = vld [vmem:[%s14230_s1 + $0x490] sm:$0xff] }
  0x2e   :  { %7523 = vmatprep.subr.bf16.mxu0 %v7522_v21  ;;  %v228_v21 = vld [vmem:[%s14230_s1 + $0x588] sm:$0xff]  ;;  %v198_v31 = vld [vmem:[%s14230_s1 + $0x498] sm:$0xff]  ;;  %v29_v37 = vld [vmem:[%s14229_s0 + $0x10] sm:$0xff] }
  0x2f   :  { %7553 = vmatpush3.bf16.msra.mxu1 %v7552_v20  ;;  %v227_v20 = vld [vmem:[%s14230_s1 + $0x580] sm:$0xff]  ;;  %v180_v26 = vld [vmem:[%s14230_s1 + $0x408] sm:$0xff]  ;;  %v230_v34 = vld [vmem:[%s14230_s1 + $0x598] sm:$0xff]  ;;  %v7578_v38 = vpack.c.bf16 %v198_v31, %v197_v30  ;;  %v9569_v42 = vrot.slane %v29_v37, %v9266_v13  ;;  %v1652_v43 = vcombine.high %v29_v37, %v29_v37 }
  0x30   :  { %7555 = vmatprep.subr.bf16.mxu1 %v7554_v25  ;;  %v7574_v25 = vpack.c.bf16 %v196_v19, %v195_v18  ;;  %v212_v28 = vld [vmem:[%s14230_s1 + $0x508] sm:$0xff]  ;;  %v7606_v29 = vpack.c.bf16 %v228_v21, %v227_v20  ;;  %v181_v39 = vld [vmem:[%s14230_s1 + $0x410] sm:$0xff]  ;;  %v214_v46 = vld [vmem:[%s14230_s1 + $0x518] sm:$0xff] }
  0x31   :  { %7525 = vmatpush3.bf16.msra.mxu0 %v7524_v32  ;;  %v229_v32 = vld [vmem:[%s14230_s1 + $0x590] sm:$0xff]  ;;  %v199_v47 = vld [vmem:[%s14230_s1 + $0x4a0] sm:$0xff]  ;;  %v9590_v52 = vrot.slane %v1652_v43, %v9266_v13  ;;  %v184_v56 = vld [vmem:[%s14230_s1 + $0x428] sm:$0xff] }
  0x32   :  { %7527 = vmatprep.subr.bf16.mxu0 %v7526_v36  ;;  %v7608_v36 = vpack.c.bf16 %v212_v28, %v211_v27  ;;  %v213_v41 = vld [vmem:[%s14230_s1 + $0x510] sm:$0xff]  ;;  %v7610_v44 = vpack.c.bf16 %v230_v34, %v229_v32  ;;  %v231_v49 = vld [vmem:[%s14230_s1 + $0x5a0] sm:$0xff]  ;;  %v216_v59 = vld [vmem:[%s14230_s1 + $0x528] sm:$0xff] }
  0x33   :  { %7557 = vmatpush3.bf16.msra.mxu1 %v7556_v35  ;;  %v7576_v35 = vpack.c.bf16 %v180_v26, %v179_v23  ;;  %v215_v57 = vld [vmem:[%s14230_s1 + $0x520] sm:$0xff]  ;;  %v201_v60 = vld [vmem:[%s14230_s1 + $0x4b0] sm:$0xff]  ;;  %v186_v4 = vld [vmem:[%s14230_s1 + $0x438] sm:$0xff] }
  0x34   :  { %7559 = vmatprep.subr.bf16.mxu1 %v7558_v40  ;;  %v182_v40 = vld [vmem:[%s14230_s1 + $0x418] sm:$0xff]  ;;  %v7616_v1 = vpack.c.bf16 %v216_v59, %v215_v57  ;;  %v217_v5 = vld [vmem:[%s14230_s1 + $0x530] sm:$0xff]  ;;  %v203_v8 = vld [vmem:[%s14230_s1 + $0x4c0] sm:$0xff] }
  0x35   :  { %7529 = vmatpush3.bf16.msra.mxu0 %v7528_v48  ;;  %v200_v48 = vld [vmem:[%s14230_s1 + $0x4a8] sm:$0xff]  ;;  %v7580_v53 = vpack.c.bf16 %v182_v40, %v181_v39  ;;  %v218_v7 = vld [vmem:[%s14230_s1 + $0x538] sm:$0xff]  ;;  %v219_v18 = vld [vmem:[%s14230_s1 + $0x540] sm:$0xff] }
  0x36   :  { %7531 = vmatprep.subr.bf16.mxu0 %v7530_v51  ;;  %v1667_v51 = vcombine.high %v9569_v42, %v9569_v42  ;;  %v7582_v54 = vpack.c.bf16 %v200_v48, %v199_v47  ;;  %v7620_v14 = vpack.c.bf16 %v218_v7, %v217_v5  ;;  %v188_v17 = vld [vmem:[%s14230_s1 + $0x448] sm:$0xff]  ;;  %v205_v21 = vld [vmem:[%s14230_s1 + $0x4d0] sm:$0xff]  ;;  %v222_v32 = vld [vmem:[%s14230_s1 + $0x558] sm:$0xff] }
  0x37   :  { %7561 = vmatpush3.bf16.msra.mxu1 %v7560_v50  ;;  %v232_v50 = vld [vmem:[%s14230_s1 + $0x5a8] sm:$0xff]  ;;  %v237_v23 = vld [vmem:[%s14230_s1 + $0x5d0] sm:$0xff]  ;;  %v207_v34 = vld [vmem:[%s14230_s1 + $0x4e0] sm:$0xff] }
  0x38   :  { %7563 = vmatprep.subr.bf16.mxu1 %v7562_v55  ;;  %v183_v55 = vld [vmem:[%s14230_s1 + $0x420] sm:$0xff]  ;;  %v7614_v58 = vpack.c.bf16 %v232_v50, %v231_v49  ;;  %v220_v20 = vld [vmem:[%s14230_s1 + $0x548] sm:$0xff]  ;;  %v189_v28 = vld [vmem:[%s14230_s1 + $0x450] sm:$0xff] }
  0x39   :  { %7533 = vmatpush3.bf16.msra.mxu0 %v7532_v61  ;;  %v202_v61 = vld [vmem:[%s14230_s1 + $0x4b8] sm:$0xff]  ;;  %v7584_v0 = vpack.c.bf16 %v184_v56, %v183_v55  ;;  %v7624_v26 = vpack.c.bf16 %v220_v20, %v219_v18  ;;  %v221_v30 = vld [vmem:[%s14230_s1 + $0x550] sm:$0xff]  ;;  %v240_v37 = vld [vmem:[%s14230_s1 + $0x5e8] sm:$0xff] }
  0x3a   :  { %7535 = vmatprep.subr.bf16.mxu0 %v7534_v63  ;;  %v234_v63 = vld [vmem:[%s14230_s1 + $0x5b8] sm:$0xff]  ;;  %v7586_v2 = vpack.c.bf16 %v202_v61, %v201_v60  ;;  %v7628_v39 = vpack.c.bf16 %v222_v32, %v221_v30  ;;  %v192_v43 = vld [vmem:[%s14230_s1 + $0x468] sm:$0xff]  ;;  %v209_v48 = vld [vmem:[%s14230_s1 + $0x4f0] sm:$0xff] }
  0x3b   :  { %7565 = vmatpush3.bf16.msra.mxu1 %v7564_v62  ;;  %v233_v62 = vld [vmem:[%s14230_s1 + $0x5b0] sm:$0xff]  ;;  %v224_v47 = vld [vmem:[%s14230_s1 + $0x568] sm:$0xff]  ;;  %v210_v49 = vld [vmem:[%s14230_s1 + $0x4f8] sm:$0xff] }
  0x3c   :  { %7567 = vmatprep.subr.bf16.mxu1 %v7566_v3  ;;  %v185_v3 = vld [vmem:[%s14230_s1 + $0x430] sm:$0xff]  ;;  %v7618_v6 = vpack.c.bf16 %v234_v63, %v233_v62  ;;  %v7602_v55 = vpack.c.bf16 %v210_v49, %v209_v48  ;;  %v194_v57 = vld [vmem:[%s14230_s1 + $0x478] sm:$0xff]  ;;  %v259_v60 = vld [vmem:[%s14230_s1 + $0x680] sm:$0xff] }
  0x3d   :  { %7537 = vmatpush3.bf16.msra.mxu0 %v7536_v9  ;;  %v204_v9 = vld [vmem:[%s14230_s1 + $0x4c8] sm:$0xff]  ;;  %v7588_v12 = vpack.c.bf16 %v186_v4, %v185_v3  ;;  %v241_v50 = vld [vmem:[%s14230_s1 + $0x5f0] sm:$0xff]  ;;  %v226_v59 = vld [vmem:[%s14230_s1 + $0x578] sm:$0xff] }
  0x3e   :  { %7539 = vmatprep.subr.bf16.mxu0 %v7538_v11  ;;  %v236_v11 = vld [vmem:[%s14230_s1 + $0x5c8] sm:$0xff]  ;;  %v7590_v15 = vpack.c.bf16 %v204_v9, %v203_v8  ;;  %v193_v56 = vld [vmem:[%s14230_s1 + $0x470] sm:$0xff]  ;;  %v291_v62 = vld [vmem:[%s14230_s1 + $0x780] sm:$0xff] }
  0x3f   :  { %7569 = vmatpush3.bf16.msra.mxu1 %v7568_v10  ;;  %v235_v10 = vld [vmem:[%s14230_s1 + $0x5c0] sm:$0xff]  ;;  %v260_v61 = vld [vmem:[%s14230_s1 + $0x688] sm:$0xff]  ;;  %v261_v9 = vld [vmem:[%s14230_s1 + $0x690] sm:$0xff] }
  0x40   :  { %7571 = vmatprep.subr.bf16.mxu1 %v7570_v16  ;;  %v187_v16 = vld [vmem:[%s14230_s1 + $0x440] sm:$0xff]  ;;  %v7622_v19 = vpack.c.bf16 %v236_v11, %v235_v10  ;;  %v292_v63 = vld [vmem:[%s14230_s1 + $0x788] sm:$0xff]  ;;  %v7638_v3 = vpack.c.bf16 %v260_v61, %v259_v60  ;;  %v262_v10 = vld [vmem:[%s14230_s1 + $0x698] sm:$0xff] }
  0x41   :  { %7541 = vmatpush3.bf16.msra.mxu0 %v7540_v22  ;;  %v206_v22 = vld [vmem:[%s14230_s1 + $0x4d8] sm:$0xff]  ;;  %v243_v4 = vld [vmem:[%s14230_s1 + $0x600] sm:$0xff]  ;;  %v244_v5 = vld [vmem:[%s14230_s1 + $0x608] sm:$0xff]  ;;  %v7670_v7 = vpack.c.bf16 %v292_v63, %v291_v62  ;;  %v7642_v18 = vpack.c.bf16 %v262_v10, %v261_v9 }
  0x42   :  { %7575 = vmatprep.subr.bf16.mxu0 %v7574_v25  ;;  %v7592_v25 = vpack.c.bf16 %v188_v17, %v187_v16  ;;  %v7594_v27 = vpack.c.bf16 %v206_v22, %v205_v21  ;;  %v276_v8 = vld [vmem:[%s14230_s1 + $0x708] sm:$0xff]  ;;  %v7640_v16 = vpack.c.bf16 %v244_v5, %v243_v4  ;;  %v246_v20 = vld [vmem:[%s14230_s1 + $0x618] sm:$0xff]  ;;  %v277_v21 = vld [vmem:[%s14230_s1 + $0x710] sm:$0xff] }
  0x43   :  { %7573 = vmatpush3.bf16.msra.mxu1 %v7572_v24  ;;  %v238_v24 = vld [vmem:[%s14230_s1 + $0x5d8] sm:$0xff]  ;;  %v281_v48 = vld [vmem:[%s14230_s1 + $0x730] sm:$0xff]  ;;  %v284_v61 = vld [vmem:[%s14230_s1 + $0x748] sm:$0xff] }
  0x44   :  { %7607 = vmatprep.subr.bf16.mxu1 %v7606_v29  ;;  %2327 = vmatmul.mubr.f32.vlgmr.msra.gmra.mrb[2].mxu0 %v9427_v33  ;;  %v7612_v33 = vpack.c.bf16 %v214_v46, %v213_v41  ;;  %v190_v29 = vld [vmem:[%s14230_s1 + $0x458] sm:$0xff]  ;;  %v7626_v31 = vpack.c.bf16 %v238_v24, %v237_v23  ;;  %v191_v41 = vld [vmem:[%s14230_s1 + $0x460] sm:$0xff]  ;;  %v269_v62 = vld [vmem:[%s14230_s1 + $0x6d0] sm:$0xff] }
  0x45   :  { %7577 = vmatpush3.bf16.msra.mxu0 %v7576_v35  ;;  %2466 = vmatprep.mubr.f32.mxu0 %v1667_v51  ;;  %v208_v35 = vld [vmem:[%s14230_s1 + $0x4e8] sm:$0xff]  ;;  %v242_v51 = vld [vmem:[%s14230_s1 + $0x5f8] sm:$0xff]  ;;  %v263_v24 = vld [vmem:[%s14230_s1 + $0x6a0] sm:$0xff] }
  0x46   :  { %2397 = vmatmul.mubr.f32.vlgmr.msra.gmra.mrb[2].mxu1 %v9450_v45  ;;  %7579 = vmatprep.subr.bf16.mxu0 %v7578_v38  ;;  %v1668_v45 = vcombine.high %v9590_v52, %v9590_v52  ;;  %v7596_v38 = vpack.c.bf16 %v190_v29, %v189_v28  ;;  %v7598_v40 = vpack.c.bf16 %v208_v35, %v207_v34  ;;  %v278_v23 = vld [vmem:[%s14230_s1 + $0x718] sm:$0xff]  ;;  %v296_v28 = vld [vmem:[%s14230_s1 + $0x7a8] sm:$0xff]  ;;  %v279_v35 = vld [vmem:[%s14230_s1 + $0x720] sm:$0xff] }
  0x47   :  { %7609 = vmatpush3.bf16.msra.mxu1 %v7608_v36  ;;  %v239_v36 = vld [vmem:[%s14230_s1 + $0x5e0] sm:$0xff]  ;;  %v248_v34 = vld [vmem:[%s14230_s1 + $0x628] sm:$0xff]  ;;  %v270_v63 = vld [vmem:[%s14230_s1 + $0x6d8] sm:$0xff] }
  0x48   :  { %7611 = vmatprep.subr.bf16.mxu1 %v7610_v44  ;;  %2536 = vmatprep.mubr.f32.mxu1 %v1668_v45  ;;  %v223_v44 = vld [vmem:[%s14230_s1 + $0x560] sm:$0xff]  ;;  %v7630_v46 = vpack.c.bf16 %v240_v37, %v239_v36  ;;  %v225_v45 = vld [vmem:[%s14230_s1 + $0x570] sm:$0xff]  ;;  %v7658_v4 = vpack.c.bf16 %v270_v63, %v269_v62  ;;  %v286_v9 = vld [vmem:[%s14230_s1 + $0x758] sm:$0xff] }
  0x49   :  { %7581 = vmatpush3.bf16.msra.mxu0 %v7580_v53  ;;  %v7600_v53 = vpack.c.bf16 %v192_v43, %v191_v41  ;;  %v265_v37 = vld [vmem:[%s14230_s1 + $0x6b0] sm:$0xff]  ;;  %v271_v10 = vld [vmem:[%s14230_s1 + $0x6e0] sm:$0xff] }
  0x4a   :  { %7583 = vmatprep.subr.bf16.mxu0 %v7582_v54  ;;  %v7632_v54 = vpack.c.bf16 %v224_v47, %v223_v44  ;;  %v250_v47 = vld [vmem:[%s14230_s1 + $0x638] sm:$0xff]  ;;  %v253_v5 = vld [vmem:[%s14230_s1 + $0x650] sm:$0xff] }
  0x4b   :  { %7613 = vmatpush3.bf16.msra.mxu1 %v7612_v33  ;;  %v30_v33 = vld [vmem:[%s14229_s0 + $0x18] sm:$0xff]  ;;  %v341_v62 = vld [vmem:[%s14230_s1 + $0x910] sm:$0xff] }
  0x4c   :  { %7615 = vmatprep.subr.bf16.mxu1 %v7614_v58  ;;  %v7634_v58 = vpack.c.bf16 %v242_v51, %v241_v50  ;;  %v9761_v11 = vrot.slane %v30_v33, %v9266_v13  ;;  %v282_v50 = vld [vmem:[%s14230_s1 + $0x738] sm:$0xff]  ;;  %v267_v51 = vld [vmem:[%s14230_s1 + $0x6c0] sm:$0xff] }
  0x4d   :  { %7585 = vmatpush3.bf16.msra.mxu0 %v7584_v0  ;;  %v1669_v0 = vcombine.high %v30_v33, %v30_v33  ;;  %v299_v33 = vld [vmem:[%s14230_s1 + $0x7c0] sm:$0xff] }
  0x4e   :  { %7587 = vmatprep.subr.bf16.mxu0 %v7586_v2  ;;  %v7636_v2 = vpack.c.bf16 %v226_v59, %v225_v45  ;;  %v251_v45 = vld [vmem:[%s14230_s1 + $0x640] sm:$0xff] }
  0x4f   :  { %7617 = vmatpush3.bf16.msra.mxu1 %v7616_v1  ;;  %v7604_v1 = vpack.c.bf16 %v194_v57, %v193_v56  ;;  %v7684_v56 = vpack.c.bf16 %v282_v50, %v281_v48  ;;  %v283_v59 = vld [vmem:[%s14230_s1 + $0x740] sm:$0xff]  ;;  %v308_v48 = vld [vmem:[%s14230_s1 + $0x808] sm:$0xff] }
  0x50   :  { %7619 = vmatprep.subr.bf16.mxu1 %v7618_v6  ;;  %v275_v6 = vld [vmem:[%s14230_s1 + $0x700] sm:$0xff] }
  0x51   :  { %7589 = vmatpush3.bf16.msra.mxu0 %v7588_v12  ;;  %v293_v12 = vld [vmem:[%s14230_s1 + $0x790] sm:$0xff]  ;;  %v7672_v17 = vpack.c.bf16 %v276_v8, %v275_v6  ;;  %v254_v6 = vld [vmem:[%s14230_s1 + $0x658] sm:$0xff] }
  0x52   :  { %7591 = vmatprep.subr.bf16.mxu0 %v7590_v15  ;;  %v9770_v15 = vrot.slane %v1669_v0, %v9266_v13  ;;  %v301_v0 = vld [vmem:[%s14230_s1 + $0x7d0] sm:$0xff] }
  0x53   :  { %7621 = vmatpush3.bf16.msra.mxu1 %v7620_v14  ;;  %v294_v14 = vld [vmem:[%s14230_s1 + $0x798] sm:$0xff] }
  0x54   :  { %7623 = vmatprep.subr.bf16.mxu1 %v7622_v19  ;;  %v245_v19 = vld [vmem:[%s14230_s1 + $0x610] sm:$0xff]  ;;  %v7674_v22 = vpack.c.bf16 %v294_v14, %v293_v12  ;;  %v1685_v29 = vcombine.high %v9770_v15, %v9770_v15  ;;  %v272_v12 = vld [vmem:[%s14230_s1 + $0x6e8] sm:$0xff]  ;;  %v303_v14 = vld [vmem:[%s14230_s1 + $0x7e0] sm:$0xff] }
  0x55   :  { %7593 = vmatpush3.bf16.msra.mxu0 %v7592_v25  ;;  %v264_v25 = vld [vmem:[%s14230_s1 + $0x6a8] sm:$0xff]  ;;  %v7644_v30 = vpack.c.bf16 %v246_v20, %v245_v19  ;;  %v7662_v19 = vpack.c.bf16 %v272_v12, %v271_v10  ;;  %v255_v20 = vld [vmem:[%s14230_s1 + $0x660] sm:$0xff] }
  0x56   :  { %7595 = vmatprep.subr.bf16.mxu0 %v7594_v27  ;;  %v295_v27 = vld [vmem:[%s14230_s1 + $0x7a0] sm:$0xff]  ;;  %v7646_v32 = vpack.c.bf16 %v264_v25, %v263_v24  ;;  %v288_v24 = vld [vmem:[%s14230_s1 + $0x768] sm:$0xff]  ;;  %v273_v25 = vld [vmem:[%s14230_s1 + $0x6f0] sm:$0xff] }
  0x57   :  { %7625 = vmatpush3.bf16.msra.mxu1 %v7624_v26  ;;  %v1684_v26 = vcombine.high %v9761_v11, %v9761_v11  ;;  %v7678_v36 = vpack.c.bf16 %v296_v28, %v295_v27  ;;  %v305_v27 = vld [vmem:[%s14230_s1 + $0x7f0] sm:$0xff]  ;;  %v306_v28 = vld [vmem:[%s14230_s1 + $0x7f8] sm:$0xff]  ;;  %v312_v10 = vld [vmem:[%s14230_s1 + $0x828] sm:$0xff] }
  0x58   :  { %7627 = vmatprep.subr.bf16.mxu1 %v7626_v31  ;;  %v7676_v31 = vpack.c.bf16 %v278_v23, %v277_v21  ;;  %v256_v21 = vld [vmem:[%s14230_s1 + $0x668] sm:$0xff]  ;;  %v343_v12 = vld [vmem:[%s14230_s1 + $0x920] sm:$0xff] }
  0x59   :  { %7597 = vmatpush3.bf16.msra.mxu0 %v7596_v38  ;;  %v266_v38 = vld [vmem:[%s14230_s1 + $0x6b8] sm:$0xff] }
  0x5a   :  { %7599 = vmatprep.subr.bf16.mxu0 %v7598_v40  ;;  %v298_v40 = vld [vmem:[%s14230_s1 + $0x7b8] sm:$0xff]  ;;  %v7650_v44 = vpack.c.bf16 %v266_v38, %v265_v37  ;;  %v323_v37 = vld [vmem:[%s14230_s1 + $0x880] sm:$0xff]  ;;  %v324_v38 = vld [vmem:[%s14230_s1 + $0x888] sm:$0xff] }
  0x5b   :  { %7629 = vmatpush3.bf16.msra.mxu1 %v7628_v39  ;;  %v297_v39 = vld [vmem:[%s14230_s1 + $0x7b0] sm:$0xff] }
  0x5c   :  { %7631 = vmatprep.subr.bf16.mxu1 %v7630_v46  ;;  %v249_v46 = vld [vmem:[%s14230_s1 + $0x630] sm:$0xff]  ;;  %v7682_v49 = vpack.c.bf16 %v298_v40, %v297_v39  ;;  %v355_v39 = vld [vmem:[%s14230_s1 + $0x980] sm:$0xff]  ;;  %v356_v40 = vld [vmem:[%s14230_s1 + $0x988] sm:$0xff] }
  0x5d   :  { %7601 = vmatpush3.bf16.msra.mxu0 %v7600_v53  ;;  %v268_v53 = vld [vmem:[%s14230_s1 + $0x6c8] sm:$0xff]  ;;  %v7734_v50 = vpack.c.bf16 %v356_v40, %v355_v39  ;;  %v333_v39 = vld [vmem:[%s14230_s1 + $0x8d0] sm:$0xff]  ;;  %v334_v40 = vld [vmem:[%s14230_s1 + $0x8d8] sm:$0xff] }
  0x5e   :  { %7603 = vmatprep.subr.bf16.mxu0 %v7602_v55  ;;  %v7652_v55 = vpack.c.bf16 %v250_v47, %v249_v46  ;;  %v7654_v57 = vpack.c.bf16 %v268_v53, %v267_v51  ;;  %v7702_v46 = vpack.c.bf16 %v324_v38, %v323_v37  ;;  %v307_v47 = vld [vmem:[%s14230_s1 + $0x800] sm:$0xff]  ;;  %v340_v51 = vld [vmem:[%s14230_s1 + $0x908] sm:$0xff]  ;;  %v325_v53 = vld [vmem:[%s14230_s1 + $0x890] sm:$0xff] }
  0x5f   :  { %7633 = vmatpush3.bf16.msra.mxu1 %v7632_v54  ;;  %v300_v54 = vld [vmem:[%s14230_s1 + $0x7c8] sm:$0xff] }
  0x60   :  { %7635 = vmatprep.subr.bf16.mxu1 %v7634_v58  ;;  %v252_v58 = vld [vmem:[%s14230_s1 + $0x648] sm:$0xff]  ;;  %v7686_v60 = vpack.c.bf16 %v300_v54, %v299_v33  ;;  %v326_v33 = vld [vmem:[%s14230_s1 + $0x898] sm:$0xff] }
  0x61   :  { %7605 = vmatpush3.bf16.msra.mxu0 %v7604_v1  ;;  %v302_v1 = vld [vmem:[%s14230_s1 + $0x7d8] sm:$0xff]  ;;  %v348_v38 = vld [vmem:[%s14230_s1 + $0x948] sm:$0xff] }
  0x62   :  { %7639 = vmatprep.subr.bf16.mxu0 %v7638_v3  ;;  %v7688_v3 = vpack.c.bf16 %v284_v61, %v283_v59  ;;  %v7690_v8 = vpack.c.bf16 %v302_v1, %v301_v0  ;;  %v7706_v59 = vpack.c.bf16 %v326_v33, %v325_v53  ;;  %v310_v61 = vld [vmem:[%s14230_s1 + $0x818] sm:$0xff]  ;;  %v327_v1 = vld [vmem:[%s14230_s1 + $0x8a0] sm:$0xff] }
  0x63   :  { %7637 = vmatpush3.bf16.msra.mxu1 %v7636_v2  ;;  %v7656_v2 = vpack.c.bf16 %v252_v58, %v251_v45  ;;  %v7704_v45 = vpack.c.bf16 %v308_v48, %v307_v47  ;;  %v342_v0 = vld [vmem:[%s14230_s1 + $0x918] sm:$0xff]  ;;  %v7722_v47 = vpack.c.bf16 %v334_v40, %v333_v39  ;;  %v317_v48 = vld [vmem:[%s14230_s1 + $0x850] sm:$0xff]  ;;  %v335_v33 = vld [vmem:[%s14230_s1 + $0x8e0] sm:$0xff] }
  0x64   :  { %7671 = vmatprep.subr.bf16.mxu1 %v7670_v7  ;;  %2467 = vmatmul.mubr.f32.vlgmr.msra.gmra.mrb[4].mxu0 %v9569_v42  ;;  %v247_v42 = vld [vmem:[%s14230_s1 + $0x620] sm:$0xff]  ;;  %v285_v7 = vld [vmem:[%s14230_s1 + $0x750] sm:$0xff]  ;;  %v350_v53 = vld [vmem:[%s14230_s1 + $0x958] sm:$0xff] }
  0x65   :  { %7641 = vmatpush3.bf16.msra.mxu0 %v7640_v16  ;;  %2606 = vmatprep.mubr.f32.mxu0 %v1684_v26  ;;  %v7648_v41 = vpack.c.bf16 %v248_v34, %v247_v42  ;;  %v304_v16 = vld [vmem:[%s14230_s1 + $0x7e8] sm:$0xff]  ;;  %v274_v26 = vld [vmem:[%s14230_s1 + $0x6f8] sm:$0xff]  ;;  %v257_v42 = vld [vmem:[%s14230_s1 + $0x670] sm:$0xff] }
  0x66   :  { %2537 = vmatmul.mubr.f32.vlgmr.msra.gmra.mrb[4].mxu1 %v9590_v52  ;;  %7643 = vmatprep.subr.bf16.mxu0 %v7642_v18  ;;  %v280_v52 = vld [vmem:[%s14230_s1 + $0x728] sm:$0xff]  ;;  %v7692_v18 = vpack.c.bf16 %v286_v9, %v285_v7  ;;  %v7694_v23 = vpack.c.bf16 %v304_v16, %v303_v14  ;;  %v258_v34 = vld [vmem:[%s14230_s1 + $0x678] sm:$0xff]  ;;  %v329_v16 = vld [vmem:[%s14230_s1 + $0x8b0] sm:$0xff] }
  0x67   :  { %7673 = vmatpush3.bf16.msra.mxu1 %v7672_v17  ;;  %2676 = vmatprep.mubr.f32.mxu1 %v1685_v29  ;;  %v7680_v43 = vpack.c.bf16 %v280_v52, %v279_v35  ;;  %v7660_v17 = vpack.c.bf16 %v254_v6, %v253_v5  ;;  %v7664_v29 = vpack.c.bf16 %v256_v21, %v255_v20  ;;  %v289_v35 = vld [vmem:[%s14230_s1 + $0x770] sm:$0xff]  ;;  %v290_v52 = vld [vmem:[%s14230_s1 + $0x778] sm:$0xff]  ;;  %v360_v5 = vld [vmem:[%s14230_s1 + $0x9a8] sm:$0xff] }
  0x68   :  { %7675 = vmatprep.subr.bf16.mxu1 %v7674_v22  ;;  %v287_v22 = vld [vmem:[%s14230_s1 + $0x760] sm:$0xff]  ;;  %v405_v39 = vld [vmem:[%s14230_s1 + $0xb10] sm:$0xff] }
  0x69   :  { %7645 = vmatpush3.bf16.msra.mxu0 %v7644_v30  ;;  %v31_v30 = vld [vmem:[%s14229_s0 + $0x20] sm:$0xff] }
  0x6a   :  { %7647 = vmatprep.subr.bf16.mxu0 %v7646_v32  ;;  %v7666_v32 = vpack.c.bf16 %v274_v26, %v273_v25  ;;  %v9968_v54 = vrot.slane %v31_v30, %v9266_v13  ;;  %v345_v25 = vld [vmem:[%s14230_s1 + $0x930] sm:$0xff] }
  0x6b   :  { %7677 = vmatpush3.bf16.msra.mxu1 %v7676_v31  ;;  %v7696_v31 = vpack.c.bf16 %v288_v24, %v287_v22  ;;  %v314_v24 = vld [vmem:[%s14230_s1 + $0x838] sm:$0xff] }
  0x6c   :  { %7679 = vmatprep.subr.bf16.mxu1 %v7678_v36  ;;  %v7698_v36 = vpack.c.bf16 %v306_v28, %v305_v27  ;;  %v346_v27 = vld [vmem:[%s14230_s1 + $0x938] sm:$0xff]  ;;  %v331_v28 = vld [vmem:[%s14230_s1 + $0x8c0] sm:$0xff] }
  0x6d   :  { %7649 = vmatpush3.bf16.msra.mxu0 %v7648_v41  ;;  %v1686_v41 = vcombine.high %v31_v30, %v31_v30  ;;  %v363_v30 = vld [vmem:[%s14230_s1 + $0x9c0] sm:$0xff] }
  0x6e   :  { %7651 = vmatprep.subr.bf16.mxu0 %v7650_v44  ;;  %v7700_v44 = vpack.c.bf16 %v290_v52, %v289_v35  ;;  %v315_v35 = vld [vmem:[%s14230_s1 + $0x840] sm:$0xff] }
  0x6f   :  { %7681 = vmatpush3.bf16.msra.mxu1 %v7680_v43  ;;  %v7668_v43 = vpack.c.bf16 %v258_v34, %v257_v42  ;;  %v7748_v42 = vpack.c.bf16 %v346_v27, %v345_v25  ;;  %v347_v52 = vld [vmem:[%s14230_s1 + $0x940] sm:$0xff]  ;;  %v372_v25 = vld [vmem:[%s14230_s1 + $0xa08] sm:$0xff] }
  0x70   :  { %7683 = vmatprep.subr.bf16.mxu1 %v7682_v49  ;;  %v339_v49 = vld [vmem:[%s14230_s1 + $0x900] sm:$0xff] }
  0x71   :  { %7653 = vmatpush3.bf16.msra.mxu0 %v7652_v55  ;;  %v357_v55 = vld [vmem:[%s14230_s1 + $0x990] sm:$0xff]  ;;  %v7736_v58 = vpack.c.bf16 %v340_v51, %v339_v49  ;;  %v318_v49 = vld [vmem:[%s14230_s1 + $0x858] sm:$0xff] }
  0x72   :  { %7655 = vmatprep.subr.bf16.mxu0 %v7654_v57  ;;  %v9977_v57 = vrot.slane %v1686_v41, %v9266_v13  ;;  %v365_v41 = vld [vmem:[%s14230_s1 + $0x9d0] sm:$0xff] }
  0x73   :  { %7685 = vmatpush3.bf16.msra.mxu1 %v7684_v56  ;;  %v358_v56 = vld [vmem:[%s14230_s1 + $0x998] sm:$0xff] }
  0x74   :  { %7687 = vmatprep.subr.bf16.mxu1 %v7686_v60  ;;  %v309_v60 = vld [vmem:[%s14230_s1 + $0x810] sm:$0xff]  ;;  %v7738_v63 = vpack.c.bf16 %v358_v56, %v357_v55  ;;  %v1702_v6 = vcombine.high %v9977_v57, %v9977_v57  ;;  %v336_v55 = vld [vmem:[%s14230_s1 + $0x8e8] sm:$0xff]  ;;  %v367_v56 = vld [vmem:[%s14230_s1 + $0x9e0] sm:$0xff] }
  0x75   :  { %7657 = vmatpush3.bf16.msra.mxu0 %v7656_v2  ;;  %v328_v2 = vld [vmem:[%s14230_s1 + $0x8a8] sm:$0xff]  ;;  %v7708_v7 = vpack.c.bf16 %v310_v61, %v309_v60  ;;  %v7726_v60 = vpack.c.bf16 %v336_v55, %v335_v33  ;;  %v319_v61 = vld [vmem:[%s14230_s1 + $0x860] sm:$0xff] }
  0x76   :  { %7659 = vmatprep.subr.bf16.mxu0 %v7658_v4  ;;  %v359_v4 = vld [vmem:[%s14230_s1 + $0x9a0] sm:$0xff]  ;;  %v7710_v9 = vpack.c.bf16 %v328_v2, %v327_v1  ;;  %v352_v1 = vld [vmem:[%s14230_s1 + $0x968] sm:$0xff]  ;;  %v337_v2 = vld [vmem:[%s14230_s1 + $0x8f0] sm:$0xff] }
  0x77   :  { %7689 = vmatpush3.bf16.msra.mxu1 %v7688_v3  ;;  %v1701_v3 = vcombine.high %v9968_v54, %v9968_v54  ;;  %v7742_v14 = vpack.c.bf16 %v360_v5, %v359_v4  ;;  %v369_v4 = vld [vmem:[%s14230_s1 + $0x9f0] sm:$0xff]  ;;  %v370_v5 = vld [vmem:[%s14230_s1 + $0x9f8] sm:$0xff]  ;;  %v376_v33 = vld [vmem:[%s14230_s1 + $0xa28] sm:$0xff] }
  0x78   :  { %7691 = vmatprep.subr.bf16.mxu1 %v7690_v8  ;;  %v7740_v8 = vpack.c.bf16 %v342_v0, %v341_v62  ;;  %v320_v62 = vld [vmem:[%s14230_s1 + $0x868] sm:$0xff]  ;;  %v407_v55 = vld [vmem:[%s14230_s1 + $0xb20] sm:$0xff] }
  0x79   :  { %7661 = vmatpush3.bf16.msra.mxu0 %v7660_v17  ;;  %v330_v17 = vld [vmem:[%s14230_s1 + $0x8b8] sm:$0xff] }
  0x7a   :  { %7663 = vmatprep.subr.bf16.mxu0 %v7662_v19  ;;  %v362_v19 = vld [vmem:[%s14230_s1 + $0x9b8] sm:$0xff]  ;;  %v7714_v22 = vpack.c.bf16 %v330_v17, %v329_v16  ;;  %v387_v16 = vld [vmem:[%s14230_s1 + $0xa80] sm:$0xff]  ;;  %v388_v17 = vld [vmem:[%s14230_s1 + $0xa88] sm:$0xff] }
  0x7b   :  { %7693 = vmatpush3.bf16.msra.mxu1 %v7692_v18  ;;  %v361_v18 = vld [vmem:[%s14230_s1 + $0x9b0] sm:$0xff] }
  0x7c   :  { %7695 = vmatprep.subr.bf16.mxu1 %v7694_v23  ;;  %v313_v23 = vld [vmem:[%s14230_s1 + $0x830] sm:$0xff]  ;;  %v7746_v26 = vpack.c.bf16 %v362_v19, %v361_v18  ;;  %v419_v18 = vld [vmem:[%s14230_s1 + $0xb80] sm:$0xff]  ;;  %v420_v19 = vld [vmem:[%s14230_s1 + $0xb88] sm:$0xff] }
  0x7d   :  { %7665 = vmatpush3.bf16.msra.mxu0 %v7664_v29  ;;  %v332_v29 = vld [vmem:[%s14230_s1 + $0x8c8] sm:$0xff]  ;;  %v7798_v27 = vpack.c.bf16 %v420_v19, %v419_v18  ;;  %v397_v18 = vld [vmem:[%s14230_s1 + $0xad0] sm:$0xff]  ;;  %v398_v19 = vld [vmem:[%s14230_s1 + $0xad8] sm:$0xff] }
  0x7e   :  { %7667 = vmatprep.subr.bf16.mxu0 %v7666_v32  ;;  %v7716_v32 = vpack.c.bf16 %v314_v24, %v313_v23  ;;  %v7718_v34 = vpack.c.bf16 %v332_v29, %v331_v28  ;;  %v7766_v23 = vpack.c.bf16 %v388_v17, %v387_v16  ;;  %v371_v24 = vld [vmem:[%s14230_s1 + $0xa00] sm:$0xff]  ;;  %v404_v28 = vld [vmem:[%s14230_s1 + $0xb08] sm:$0xff]  ;;  %v389_v29 = vld [vmem:[%s14230_s1 + $0xa90] sm:$0xff] }
  0x7f   :  { %7697 = vmatpush3.bf16.msra.mxu1 %v7696_v31  ;;  %v364_v31 = vld [vmem:[%s14230_s1 + $0x9c8] sm:$0xff] }
  0x80   :  { %7699 = vmatprep.subr.bf16.mxu1 %v7698_v36  ;;  %v316_v36 = vld [vmem:[%s14230_s1 + $0x848] sm:$0xff]  ;;  %v7750_v37 = vpack.c.bf16 %v364_v31, %v363_v30  ;;  %v390_v30 = vld [vmem:[%s14230_s1 + $0xa98] sm:$0xff] }
  0x81   :  { %7669 = vmatpush3.bf16.msra.mxu0 %v7668_v43  ;;  %v366_v43 = vld [vmem:[%s14230_s1 + $0x9d8] sm:$0xff]  ;;  %v412_v17 = vld [vmem:[%s14230_s1 + $0xb48] sm:$0xff] }
  0x82   :  { %7703 = vmatprep.subr.bf16.mxu0 %v7702_v46  ;;  %v7752_v46 = vpack.c.bf16 %v348_v38, %v347_v52  ;;  %v7754_v51 = vpack.c.bf16 %v366_v43, %v365_v41  ;;  %v7770_v52 = vpack.c.bf16 %v390_v30, %v389_v29  ;;  %v374_v38 = vld [vmem:[%s14230_s1 + $0xa18] sm:$0xff]  ;;  %v391_v43 = vld [vmem:[%s14230_s1 + $0xaa0] sm:$0xff] }
  0x83   :  { %7701 = vmatpush3.bf16.msra.mxu1 %v7700_v44  ;;  %v7720_v44 = vpack.c.bf16 %v316_v36, %v315_v35  ;;  %v7768_v35 = vpack.c.bf16 %v372_v25, %v371_v24  ;;  %v406_v41 = vld [vmem:[%s14230_s1 + $0xb18] sm:$0xff]  ;;  %v7786_v24 = vpack.c.bf16 %v398_v19, %v397_v18  ;;  %v381_v25 = vld [vmem:[%s14230_s1 + $0xa50] sm:$0xff]  ;;  %v399_v30 = vld [vmem:[%s14230_s1 + $0xae0] sm:$0xff] }
  0x84   :  { %7735 = vmatprep.subr.bf16.mxu1 %v7734_v50  ;;  %2607 = vmatmul.mubr.f32.vlgmr.msra.gmra.mrb[6].mxu0 %v9761_v11  ;;  %v311_v11 = vld [vmem:[%s14230_s1 + $0x820] sm:$0xff]  ;;  %v349_v50 = vld [vmem:[%s14230_s1 + $0x950] sm:$0xff]  ;;  %v414_v29 = vld [vmem:[%s14230_s1 + $0xb58] sm:$0xff] }
  0x85   :  { %7705 = vmatpush3.bf16.msra.mxu0 %v7704_v45  ;;  %2746 = vmatprep.mubr.f32.mxu0 %v1701_v3  ;;  %v7712_v20 = vpack.c.bf16 %v312_v10, %v311_v11  ;;  %v368_v45 = vld [vmem:[%s14230_s1 + $0x9e8] sm:$0xff]  ;;  %v338_v3 = vld [vmem:[%s14230_s1 + $0x8f8] sm:$0xff]  ;;  %v321_v11 = vld [vmem:[%s14230_s1 + $0x870] sm:$0xff] }
  0x86   :  { %2677 = vmatmul.mubr.f32.vlgmr.msra.gmra.mrb[6].mxu1 %v9770_v15  ;;  %7707 = vmatprep.subr.bf16.mxu0 %v7706_v59  ;;  %v344_v15 = vld [vmem:[%s14230_s1 + $0x928] sm:$0xff]  ;;  %v7756_v59 = vpack.c.bf16 %v350_v53, %v349_v50  ;;  %v7758_v0 = vpack.c.bf16 %v368_v45, %v367_v56  ;;  %v322_v10 = vld [vmem:[%s14230_s1 + $0x878] sm:$0xff]  ;;  %v393_v45 = vld [vmem:[%s14230_s1 + $0xab0] sm:$0xff] }
  0x87   :  { %7737 = vmatpush3.bf16.msra.mxu1 %v7736_v58  ;;  %2816 = vmatprep.mubr.f32.mxu1 %v1702_v6  ;;  %v7744_v21 = vpack.c.bf16 %v344_v15, %v343_v12  ;;  %v7724_v58 = vpack.c.bf16 %v318_v49, %v317_v48  ;;  %v7728_v6 = vpack.c.bf16 %v320_v62, %v319_v61  ;;  %v353_v12 = vld [vmem:[%s14230_s1 + $0x970] sm:$0xff]  ;;  %v354_v15 = vld [vmem:[%s14230_s1 + $0x978] sm:$0xff]  ;;  %v424_v48 = vld [vmem:[%s14230_s1 + $0xba8] sm:$0xff] }
  0x88   :  { %7739 = vmatprep.subr.bf16.mxu1 %v7738_v63  ;;  %v351_v63 = vld [vmem:[%s14230_s1 + $0x960] sm:$0xff]  ;;  %v469_v18 = vld [vmem:[%s14230_s1 + $0xd10] sm:$0xff] }
  0x89   :  { %7709 = vmatpush3.bf16.msra.mxu0 %v7708_v7  ;;  %v32_v7 = vld [vmem:[%s14229_s0 + $0x28] sm:$0xff] }
  0x8a   :  { %7711 = vmatprep.subr.bf16.mxu0 %v7710_v9  ;;  %v7730_v9 = vpack.c.bf16 %v338_v3, %v337_v2  ;;  %v10175_v31 = vrot.slane %v32_v7, %v9266_v13  ;;  %v409_v2 = vld [vmem:[%s14230_s1 + $0xb30] sm:$0xff] }
  0x8b   :  { %7741 = vmatpush3.bf16.msra.mxu1 %v7740_v8  ;;  %v7760_v8 = vpack.c.bf16 %v352_v1, %v351_v63  ;;  %v378_v1 = vld [vmem:[%s14230_s1 + $0xa38] sm:$0xff] }
  0x8c   :  { %7743 = vmatprep.subr.bf16.mxu1 %v7742_v14  ;;  %v7762_v14 = vpack.c.bf16 %v370_v5, %v369_v4  ;;  %v410_v4 = vld [vmem:[%s14230_s1 + $0xb38] sm:$0xff]  ;;  %v395_v5 = vld [vmem:[%s14230_s1 + $0xac0] sm:$0xff] }
  0x8d   :  { %7713 = vmatpush3.bf16.msra.mxu0 %v7712_v20  ;;  %v1703_v20 = vcombine.high %v32_v7, %v32_v7  ;;  %v427_v7 = vld [vmem:[%s14230_s1 + $0xbc0] sm:$0xff] }
  0x8e   :  { %7715 = vmatprep.subr.bf16.mxu0 %v7714_v22  ;;  %v7764_v22 = vpack.c.bf16 %v354_v15, %v353_v12  ;;  %v379_v12 = vld [vmem:[%s14230_s1 + $0xa40] sm:$0xff] }
  0x8f   :  { %7745 = vmatpush3.bf16.msra.mxu1 %v7744_v21  ;;  %v7732_v21 = vpack.c.bf16 %v322_v10, %v321_v11  ;;  %v7812_v11 = vpack.c.bf16 %v410_v4, %v409_v2  ;;  %v411_v15 = vld [vmem:[%s14230_s1 + $0xb40] sm:$0xff]  ;;  %v436_v2 = vld [vmem:[%s14230_s1 + $0xc08] sm:$0xff] }
  0x90   :  { %7747 = vmatprep.subr.bf16.mxu1 %v7746_v26  ;;  %v403_v26 = vld [vmem:[%s14230_s1 + $0xb00] sm:$0xff] }
  0x91   :  { %7717 = vmatpush3.bf16.msra.mxu0 %v7716_v32  ;;  %v421_v32 = vld [vmem:[%s14230_s1 + $0xb90] sm:$0xff]  ;;  %v7800_v36 = vpack.c.bf16 %v404_v28, %v403_v26  ;;  %v382_v26 = vld [vmem:[%s14230_s1 + $0xa58] sm:$0xff] }
  0x92   :  { %7719 = vmatprep.subr.bf16.mxu0 %v7718_v34  ;;  %v10184_v34 = vrot.slane %v1703_v20, %v9266_v13  ;;  %v429_v20 = vld [vmem:[%s14230_s1 + $0xbd0] sm:$0xff] }
  0x93   :  { %7749 = vmatpush3.bf16.msra.mxu1 %v7748_v42  ;;  %v422_v42 = vld [vmem:[%s14230_s1 + $0xb98] sm:$0xff] }
  0x94   :  { %7751 = vmatprep.subr.bf16.mxu1 %v7750_v37  ;;  %v373_v37 = vld [vmem:[%s14230_s1 + $0xa10] sm:$0xff]  ;;  %v7802_v40 = vpack.c.bf16 %v422_v42, %v421_v32  ;;  %v1719_v49 = vcombine.high %v10184_v34, %v10184_v34  ;;  %v400_v32 = vld [vmem:[%s14230_s1 + $0xae8] sm:$0xff]  ;;  %v431_v42 = vld [vmem:[%s14230_s1 + $0xbe0] sm:$0xff] }
  0x95   :  { %7721 = vmatpush3.bf16.msra.mxu0 %v7720_v44  ;;  %v392_v44 = vld [vmem:[%s14230_s1 + $0xaa8] sm:$0xff]  ;;  %v7772_v50 = vpack.c.bf16 %v374_v38, %v373_v37  ;;  %v7790_v37 = vpack.c.bf16 %v400_v32, %v399_v30  ;;  %v383_v38 = vld [vmem:[%s14230_s1 + $0xa60] sm:$0xff] }
  0x96   :  { %7723 = vmatprep.subr.bf16.mxu0 %v7722_v47  ;;  %v423_v47 = vld [vmem:[%s14230_s1 + $0xba0] sm:$0xff]  ;;  %v7774_v53 = vpack.c.bf16 %v392_v44, %v391_v43  ;;  %v416_v43 = vld [vmem:[%s14230_s1 + $0xb68] sm:$0xff]  ;;  %v401_v44 = vld [vmem:[%s14230_s1 + $0xaf0] sm:$0xff] }
  0x97   :  { %7753 = vmatpush3.bf16.msra.mxu1 %v7752_v46  ;;  %v1718_v46 = vcombine.high %v10175_v31, %v10175_v31  ;;  %v7806_v56 = vpack.c.bf16 %v424_v48, %v423_v47  ;;  %v433_v47 = vld [vmem:[%s14230_s1 + $0xbf0] sm:$0xff]  ;;  %v434_v48 = vld [vmem:[%s14230_s1 + $0xbf8] sm:$0xff]  ;;  %v440_v30 = vld [vmem:[%s14230_s1 + $0xc28] sm:$0xff] }
  0x98   :  { %7755 = vmatprep.subr.bf16.mxu1 %v7754_v51  ;;  %v7804_v51 = vpack.c.bf16 %v406_v41, %v405_v39  ;;  %v384_v39 = vld [vmem:[%s14230_s1 + $0xa68] sm:$0xff]  ;;  %v471_v32 = vld [vmem:[%s14230_s1 + $0xd20] sm:$0xff] }
  0x99   :  { %7725 = vmatpush3.bf16.msra.mxu0 %v7724_v58  ;;  %v394_v58 = vld [vmem:[%s14230_s1 + $0xab8] sm:$0xff] }
  0x9a   :  { %7727 = vmatprep.subr.bf16.mxu0 %v7726_v60  ;;  %v426_v60 = vld [vmem:[%s14230_s1 + $0xbb8] sm:$0xff]  ;;  %v7778_v63 = vpack.c.bf16 %v394_v58, %v393_v45  ;;  %v451_v45 = vld [vmem:[%s14230_s1 + $0xc80] sm:$0xff]  ;;  %v452_v58 = vld [vmem:[%s14230_s1 + $0xc88] sm:$0xff] }
  0x9b   :  { %7757 = vmatpush3.bf16.msra.mxu1 %v7756_v59  ;;  %v425_v59 = vld [vmem:[%s14230_s1 + $0xbb0] sm:$0xff] }
  0x9c   :  { %7759 = vmatprep.subr.bf16.mxu1 %v7758_v0  ;;  %v377_v0 = vld [vmem:[%s14230_s1 + $0xa30] sm:$0xff]  ;;  %v7810_v3 = vpack.c.bf16 %v426_v60, %v425_v59  ;;  %v483_v59 = vld [vmem:[%s14230_s1 + $0xd80] sm:$0xff]  ;;  %v484_v60 = vld [vmem:[%s14230_s1 + $0xd88] sm:$0xff] }
  0x9d   :  { %7729 = vmatpush3.bf16.msra.mxu0 %v7728_v6  ;;  %v396_v6 = vld [vmem:[%s14230_s1 + $0xac8] sm:$0xff]  ;;  %v7862_v4 = vpack.c.bf16 %v484_v60, %v483_v59  ;;  %v461_v59 = vld [vmem:[%s14230_s1 + $0xcd0] sm:$0xff]  ;;  %v462_v60 = vld [vmem:[%s14230_s1 + $0xcd8] sm:$0xff] }
  0x9e   :  { %7731 = vmatprep.subr.bf16.mxu0 %v7730_v9  ;;  %v7780_v9 = vpack.c.bf16 %v378_v1, %v377_v0  ;;  %v7782_v10 = vpack.c.bf16 %v396_v6, %v395_v5  ;;  %v7830_v0 = vpack.c.bf16 %v452_v58, %v451_v45  ;;  %v435_v1 = vld [vmem:[%s14230_s1 + $0xc00] sm:$0xff]  ;;  %v468_v5 = vld [vmem:[%s14230_s1 + $0xd08] sm:$0xff]  ;;  %v453_v6 = vld [vmem:[%s14230_s1 + $0xc90] sm:$0xff] }
  0x9f   :  { %7761 = vmatpush3.bf16.msra.mxu1 %v7760_v8  ;;  %v428_v8 = vld [vmem:[%s14230_s1 + $0xbc8] sm:$0xff] }
  0xa0   :  { %7763 = vmatprep.subr.bf16.mxu1 %v7762_v14  ;;  %v380_v14 = vld [vmem:[%s14230_s1 + $0xa48] sm:$0xff]  ;;  %v7814_v16 = vpack.c.bf16 %v428_v8, %v427_v7  ;;  %v454_v7 = vld [vmem:[%s14230_s1 + $0xc98] sm:$0xff] }
  0xa1   :  { %7733 = vmatpush3.bf16.msra.mxu0 %v7732_v21  ;;  %v430_v21 = vld [vmem:[%s14230_s1 + $0xbd8] sm:$0xff]  ;;  %v476_v58 = vld [vmem:[%s14230_s1 + $0xd48] sm:$0xff] }
  0xa2   :  { %7767 = vmatprep.subr.bf16.mxu0 %v7766_v23  ;;  %v7816_v23 = vpack.c.bf16 %v412_v17, %v411_v15  ;;  %v7818_v28 = vpack.c.bf16 %v430_v21, %v429_v20  ;;  %v7834_v15 = vpack.c.bf16 %v454_v7, %v453_v6  ;;  %v438_v17 = vld [vmem:[%s14230_s1 + $0xc18] sm:$0xff]  ;;  %v455_v21 = vld [vmem:[%s14230_s1 + $0xca0] sm:$0xff] }
  0xa3   :  { %7765 = vmatpush3.bf16.msra.mxu1 %v7764_v22  ;;  %v7784_v22 = vpack.c.bf16 %v380_v14, %v379_v12  ;;  %v7832_v12 = vpack.c.bf16 %v436_v2, %v435_v1  ;;  %v470_v20 = vld [vmem:[%s14230_s1 + $0xd18] sm:$0xff]  ;;  %v7850_v1 = vpack.c.bf16 %v462_v60, %v461_v59  ;;  %v445_v2 = vld [vmem:[%s14230_s1 + $0xc50] sm:$0xff]  ;;  %v463_v7 = vld [vmem:[%s14230_s1 + $0xce0] sm:$0xff] }
  0xa4   :  { %7799 = vmatprep.subr.bf16.mxu1 %v7798_v27  ;;  %2747 = vmatmul.mubr.f32.vlgmr.msra.gmra.mrb[8].mxu0 %v9968_v54  ;;  %v375_v54 = vld [vmem:[%s14230_s1 + $0xa20] sm:$0xff]  ;;  %v413_v27 = vld [vmem:[%s14230_s1 + $0xb50] sm:$0xff]  ;;  %v478_v6 = vld [vmem:[%s14230_s1 + $0xd58] sm:$0xff] }
  0xa5   :  { %7769 = vmatpush3.bf16.msra.mxu0 %v7768_v35  ;;  %2886 = vmatprep.mubr.f32.mxu0 %v1718_v46  ;;  %v7776_v61 = vpack.c.bf16 %v376_v33, %v375_v54  ;;  %v432_v35 = vld [vmem:[%s14230_s1 + $0xbe8] sm:$0xff]  ;;  %v402_v46 = vld [vmem:[%s14230_s1 + $0xaf8] sm:$0xff]  ;;  %v385_v54 = vld [vmem:[%s14230_s1 + $0xa70] sm:$0xff] }
  0xa6   :  { %2817 = vmatmul.mubr.f32.vlgmr.msra.gmra.mrb[8].mxu1 %v9977_v57  ;;  %7771 = vmatprep.subr.bf16.mxu0 %v7770_v52  ;;  %v408_v57 = vld [vmem:[%s14230_s1 + $0xb28] sm:$0xff]  ;;  %v7820_v52 = vpack.c.bf16 %v414_v29, %v413_v27  ;;  %v7822_v41 = vpack.c.bf16 %v432_v35, %v431_v42  ;;  %v386_v33 = vld [vmem:[%s14230_s1 + $0xa78] sm:$0xff]  ;;  %v457_v35 = vld [vmem:[%s14230_s1 + $0xcb0] sm:$0xff] }
  0xa7   :  { %7801 = vmatpush3.bf16.msra.mxu1 %v7800_v36  ;;  %2956 = vmatprep.mubr.f32.mxu1 %v1719_v49  ;;  %v7808_v62 = vpack.c.bf16 %v408_v57, %v407_v55  ;;  %v7788_v36 = vpack.c.bf16 %v382_v26, %v381_v25  ;;  %v7792_v49 = vpack.c.bf16 %v384_v39, %v383_v38  ;;  %v417_v55 = vld [vmem:[%s14230_s1 + $0xb70] sm:$0xff]  ;;  %v418_v57 = vld [vmem:[%s14230_s1 + $0xb78] sm:$0xff]  ;;  %v488_v25 = vld [vmem:[%s14230_s1 + $0xda8] sm:$0xff] }
  0xa8   :  { %7803 = vmatprep.subr.bf16.mxu1 %v7802_v40  ;;  %v415_v40 = vld [vmem:[%s14230_s1 + $0xb60] sm:$0xff]  ;;  %v533_v59 = vld [vmem:[%s14230_s1 + $0xf10] sm:$0xff] }
  0xa9   :  { %7773 = vmatpush3.bf16.msra.mxu0 %v7772_v50  ;;  %v33_v50 = vld [vmem:[%s14229_s0 + $0x30] sm:$0xff] }
  0xaa   :  { %7775 = vmatprep.subr.bf16.mxu0 %v7774_v53  ;;  %v7794_v53 = vpack.c.bf16 %v402_v46, %v401_v44  ;;  %v10382_v8 = vrot.slane %v33_v50, %v9266_v13  ;;  %v473_v44 = vld [vmem:[%s14230_s1 + $0xd30] sm:$0xff] }
  0xab   :  { %7805 = vmatpush3.bf16.msra.mxu1 %v7804_v51  ;;  %v7824_v51 = vpack.c.bf16 %v416_v43, %v415_v40  ;;  %v442_v43 = vld [vmem:[%s14230_s1 + $0xc38] sm:$0xff] }
  0xac   :  { %7807 = vmatprep.subr.bf16.mxu1 %v7806_v56  ;;  %v7826_v56 = vpack.c.bf16 %v434_v48, %v433_v47  ;;  %v474_v47 = vld [vmem:[%s14230_s1 + $0xd38] sm:$0xff]  ;;  %v459_v48 = vld [vmem:[%s14230_s1 + $0xcc0] sm:$0xff] }
  0xad   :  { %7777 = vmatpush3.bf16.msra.mxu0 %v7776_v61  ;;  %v1720_v61 = vcombine.high %v33_v50, %v33_v50  ;;  %v491_v50 = vld [vmem:[%s14230_s1 + $0xdc0] sm:$0xff] }
  0xae   :  { %7779 = vmatprep.subr.bf16.mxu0 %v7778_v63  ;;  %v7828_v63 = vpack.c.bf16 %v418_v57, %v417_v55  ;;  %v443_v55 = vld [vmem:[%s14230_s1 + $0xc40] sm:$0xff] }
  0xaf   :  { %7809 = vmatpush3.bf16.msra.mxu1 %v7808_v62  ;;  %v7796_v62 = vpack.c.bf16 %v386_v33, %v385_v54  ;;  %v7876_v54 = vpack.c.bf16 %v474_v47, %v473_v44  ;;  %v475_v57 = vld [vmem:[%s14230_s1 + $0xd40] sm:$0xff]  ;;  %v500_v44 = vld [vmem:[%s14230_s1 + $0xe08] sm:$0xff] }
  0xb0   :  { %7811 = vmatprep.subr.bf16.mxu1 %v7810_v3  ;;  %v467_v3 = vld [vmem:[%s14230_s1 + $0xd00] sm:$0xff] }
  0xb1   :  { %7781 = vmatpush3.bf16.msra.mxu0 %v7780_v9  ;;  %v485_v9 = vld [vmem:[%s14230_s1 + $0xd90] sm:$0xff]  ;;  %v7864_v14 = vpack.c.bf16 %v468_v5, %v467_v3  ;;  %v446_v3 = vld [vmem:[%s14230_s1 + $0xc58] sm:$0xff] }
  0xb2   :  { %7783 = vmatprep.subr.bf16.mxu0 %v7782_v10  ;;  %v10391_v10 = vrot.slane %v1720_v61, %v9266_v13  ;;  %v493_v61 = vld [vmem:[%s14230_s1 + $0xdd0] sm:$0xff] }
  0xb3   :  { %7813 = vmatpush3.bf16.msra.mxu1 %v7812_v11  ;;  %v486_v11 = vld [vmem:[%s14230_s1 + $0xd98] sm:$0xff] }
  0xb4   :  { %7815 = vmatprep.subr.bf16.mxu1 %v7814_v16  ;;  %v437_v16 = vld [vmem:[%s14230_s1 + $0xc10] sm:$0xff]  ;;  %v7866_v19 = vpack.c.bf16 %v486_v11, %v485_v9  ;;  %v1736_v26 = vcombine.high %v10391_v10, %v10391_v10  ;;  %v464_v9 = vld [vmem:[%s14230_s1 + $0xce8] sm:$0xff]  ;;  %v495_v11 = vld [vmem:[%s14230_s1 + $0xde0] sm:$0xff] }
  0xb5   :  { %7785 = vmatpush3.bf16.msra.mxu0 %v7784_v22  ;;  %v456_v22 = vld [vmem:[%s14230_s1 + $0xca8] sm:$0xff]  ;;  %v7836_v27 = vpack.c.bf16 %v438_v17, %v437_v16  ;;  %v7854_v16 = vpack.c.bf16 %v464_v9, %v463_v7  ;;  %v447_v17 = vld [vmem:[%s14230_s1 + $0xc60] sm:$0xff] }
  0xb6   :  { %7787 = vmatprep.subr.bf16.mxu0 %v7786_v24  ;;  %v487_v24 = vld [vmem:[%s14230_s1 + $0xda0] sm:$0xff]  ;;  %v7838_v29 = vpack.c.bf16 %v456_v22, %v455_v21  ;;  %v480_v21 = vld [vmem:[%s14230_s1 + $0xd68] sm:$0xff]  ;;  %v465_v22 = vld [vmem:[%s14230_s1 + $0xcf0] sm:$0xff] }
  0xb7   :  { %7817 = vmatpush3.bf16.msra.mxu1 %v7816_v23  ;;  %v1735_v23 = vcombine.high %v10382_v8, %v10382_v8  ;;  %v7870_v42 = vpack.c.bf16 %v488_v25, %v487_v24  ;;  %v497_v24 = vld [vmem:[%s14230_s1 + $0xdf0] sm:$0xff]  ;;  %v498_v25 = vld [vmem:[%s14230_s1 + $0xdf8] sm:$0xff]  ;;  %v504_v7 = vld [vmem:[%s14230_s1 + $0xe28] sm:$0xff] }
  0xb8   :  { %7819 = vmatprep.subr.bf16.mxu1 %v7818_v28  ;;  %v7868_v28 = vpack.c.bf16 %v470_v20, %v469_v18  ;;  %v448_v18 = vld [vmem:[%s14230_s1 + $0xc68] sm:$0xff]  ;;  %v535_v9 = vld [vmem:[%s14230_s1 + $0xf20] sm:$0xff] }
  0xb9   :  { %7789 = vmatpush3.bf16.msra.mxu0 %v7788_v36  ;;  %v458_v36 = vld [vmem:[%s14230_s1 + $0xcb8] sm:$0xff] }
  0xba   :  { %7791 = vmatprep.subr.bf16.mxu0 %v7790_v37  ;;  %v490_v37 = vld [vmem:[%s14230_s1 + $0xdb8] sm:$0xff]  ;;  %v7842_v40 = vpack.c.bf16 %v458_v36, %v457_v35  ;;  %v515_v35 = vld [vmem:[%s14230_s1 + $0xe80] sm:$0xff]  ;;  %v516_v36 = vld [vmem:[%s14230_s1 + $0xe88] sm:$0xff] }
  0xbb   :  { %7821 = vmatpush3.bf16.msra.mxu1 %v7820_v52  ;;  %v489_v52 = vld [vmem:[%s14230_s1 + $0xdb0] sm:$0xff] }
  0xbc   :  { %7823 = vmatprep.subr.bf16.mxu1 %v7822_v41  ;;  %v441_v41 = vld [vmem:[%s14230_s1 + $0xc30] sm:$0xff]  ;;  %v7874_v46 = vpack.c.bf16 %v490_v37, %v489_v52  ;;  %v547_v52 = vld [vmem:[%s14230_s1 + $0xf80] sm:$0xff]  ;;  %v548_v37 = vld [vmem:[%s14230_s1 + $0xf88] sm:$0xff] }
  0xbd   :  { %7793 = vmatpush3.bf16.msra.mxu0 %v7792_v49  ;;  %v460_v49 = vld [vmem:[%s14230_s1 + $0xcc8] sm:$0xff]  ;;  %v7926_v47 = vpack.c.bf16 %v548_v37, %v547_v52  ;;  %v525_v52 = vld [vmem:[%s14230_s1 + $0xed0] sm:$0xff]  ;;  %v526_v37 = vld [vmem:[%s14230_s1 + $0xed8] sm:$0xff] }
  0xbe   :  { %7795 = vmatprep.subr.bf16.mxu0 %v7794_v53  ;;  %v7844_v53 = vpack.c.bf16 %v442_v43, %v441_v41  ;;  %v7846_v33 = vpack.c.bf16 %v460_v49, %v459_v48  ;;  %v7894_v41 = vpack.c.bf16 %v516_v36, %v515_v35  ;;  %v499_v43 = vld [vmem:[%s14230_s1 + $0xe00] sm:$0xff]  ;;  %v532_v48 = vld [vmem:[%s14230_s1 + $0xf08] sm:$0xff]  ;;  %v517_v49 = vld [vmem:[%s14230_s1 + $0xe90] sm:$0xff] }
  0xbf   :  { %7825 = vmatpush3.bf16.msra.mxu1 %v7824_v51  ;;  %v492_v51 = vld [vmem:[%s14230_s1 + $0xdc8] sm:$0xff] }
  0xc0   :  { %7827 = vmatprep.subr.bf16.mxu1 %v7826_v56  ;;  %v444_v56 = vld [vmem:[%s14230_s1 + $0xc48] sm:$0xff]  ;;  %v7878_v45 = vpack.c.bf16 %v492_v51, %v491_v50  ;;  %v518_v50 = vld [vmem:[%s14230_s1 + $0xe98] sm:$0xff] }
  0xc1   :  { %7797 = vmatpush3.bf16.msra.mxu0 %v7796_v62  ;;  %v494_v62 = vld [vmem:[%s14230_s1 + $0xdd8] sm:$0xff]  ;;  %v540_v36 = vld [vmem:[%s14230_s1 + $0xf48] sm:$0xff] }
  0xc2   :  { %7831 = vmatprep.subr.bf16.mxu0 %v7830_v0  ;;  %v7880_v0 = vpack.c.bf16 %v476_v58, %v475_v57  ;;  %v7882_v5 = vpack.c.bf16 %v494_v62, %v493_v61  ;;  %v7898_v57 = vpack.c.bf16 %v518_v50, %v517_v49  ;;  %v502_v58 = vld [vmem:[%s14230_s1 + $0xe18] sm:$0xff]  ;;  %v519_v62 = vld [vmem:[%s14230_s1 + $0xea0] sm:$0xff] }
  0xc3   :  { %7829 = vmatpush3.bf16.msra.mxu1 %v7828_v63  ;;  %v7848_v63 = vpack.c.bf16 %v444_v56, %v443_v55  ;;  %v7896_v55 = vpack.c.bf16 %v500_v44, %v499_v43  ;;  %v534_v61 = vld [vmem:[%s14230_s1 + $0xf18] sm:$0xff]  ;;  %v7914_v43 = vpack.c.bf16 %v526_v37, %v525_v52  ;;  %v509_v44 = vld [vmem:[%s14230_s1 + $0xe50] sm:$0xff]  ;;  %v527_v50 = vld [vmem:[%s14230_s1 + $0xee0] sm:$0xff] }
  0xc4   :  { %7863 = vmatprep.subr.bf16.mxu1 %v7862_v4  ;;  %2887 = vmatmul.mubr.f32.vlgmr.msra.gmra.mrb[10].mxu0 %v10175_v31  ;;  %v439_v31 = vld [vmem:[%s14230_s1 + $0xc20] sm:$0xff]  ;;  %v477_v4 = vld [vmem:[%s14230_s1 + $0xd50] sm:$0xff]  ;;  %v542_v49 = vld [vmem:[%s14230_s1 + $0xf58] sm:$0xff] }
  0xc5   :  { %7833 = vmatpush3.bf16.msra.mxu0 %v7832_v12  ;;  %3026 = vmatprep.mubr.f32.mxu0 %v1735_v23  ;;  %v7840_v38 = vpack.c.bf16 %v440_v30, %v439_v31  ;;  %v496_v12 = vld [vmem:[%s14230_s1 + $0xde8] sm:$0xff]  ;;  %v466_v23 = vld [vmem:[%s14230_s1 + $0xcf8] sm:$0xff]  ;;  %v449_v31 = vld [vmem:[%s14230_s1 + $0xc70] sm:$0xff] }
  0xc6   :  { %2957 = vmatmul.mubr.f32.vlgmr.msra.gmra.mrb[10].mxu1 %v10184_v34  ;;  %7835 = vmatprep.subr.bf16.mxu0 %v7834_v15  ;;  %v472_v34 = vld [vmem:[%s14230_s1 + $0xd28] sm:$0xff]  ;;  %v7884_v15 = vpack.c.bf16 %v478_v6, %v477_v4  ;;  %v7886_v20 = vpack.c.bf16 %v496_v12, %v495_v11  ;;  %v450_v30 = vld [vmem:[%s14230_s1 + $0xc78] sm:$0xff]  ;;  %v521_v12 = vld [vmem:[%s14230_s1 + $0xeb0] sm:$0xff] }
  0xc7   :  { %7865 = vmatpush3.bf16.msra.mxu1 %v7864_v14  ;;  %3096 = vmatprep.mubr.f32.mxu1 %v1736_v26  ;;  %v7872_v39 = vpack.c.bf16 %v472_v34, %v471_v32  ;;  %v7852_v14 = vpack.c.bf16 %v446_v3, %v445_v2  ;;  %v7856_v26 = vpack.c.bf16 %v448_v18, %v447_v17  ;;  %v481_v32 = vld [vmem:[%s14230_s1 + $0xd70] sm:$0xff]  ;;  %v482_v34 = vld [vmem:[%s14230_s1 + $0xd78] sm:$0xff]  ;;  %v552_v2 = vld [vmem:[%s14230_s1 + $0xfa8] sm:$0xff] }
  0xc8   :  { %7867 = vmatprep.subr.bf16.mxu1 %v7866_v19  ;;  %v479_v19 = vld [vmem:[%s14230_s1 + $0xd60] sm:$0xff]  ;;  %v613_v37 = vld [vmem:[%s14230_s1 + $0x1190] sm:$0xff] }
  0xc9   :  { %7837 = vmatpush3.bf16.msra.mxu0 %v7836_v27  ;;  %v34_v27 = vld [vmem:[%s14229_s0 + $0x38] sm:$0xff] }
  0xca   :  { %7839 = vmatprep.subr.bf16.mxu0 %v7838_v29  ;;  %v7858_v29 = vpack.c.bf16 %v466_v23, %v465_v22  ;;  %v10589_v51 = vrot.slane %v34_v27, %v9266_v13  ;;  %v537_v22 = vld [vmem:[%s14230_s1 + $0xf30] sm:$0xff] }
  0xcb   :  { %7869 = vmatpush3.bf16.msra.mxu1 %v7868_v28  ;;  %v7888_v28 = vpack.c.bf16 %v480_v21, %v479_v19  ;;  %v506_v21 = vld [vmem:[%s14230_s1 + $0xe38] sm:$0xff] }
  0xcc   :  { %7871 = vmatprep.subr.bf16.mxu1 %v7870_v42  ;;  %v7890_v42 = vpack.c.bf16 %v498_v25, %v497_v24  ;;  %v538_v24 = vld [vmem:[%s14230_s1 + $0xf38] sm:$0xff]  ;;  %v523_v25 = vld [vmem:[%s14230_s1 + $0xec0] sm:$0xff] }
  0xcd   :  { %7841 = vmatpush3.bf16.msra.mxu0 %v7840_v38  ;;  %v1737_v38 = vcombine.high %v34_v27, %v34_v27  ;;  %v555_v27 = vld [vmem:[%s14230_s1 + $0xfc0] sm:$0xff] }
  0xce   :  { %7843 = vmatprep.subr.bf16.mxu0 %v7842_v40  ;;  %v7892_v40 = vpack.c.bf16 %v482_v34, %v481_v32  ;;  %v507_v32 = vld [vmem:[%s14230_s1 + $0xe40] sm:$0xff] }
  0xcf   :  { %7873 = vmatpush3.bf16.msra.mxu1 %v7872_v39  ;;  %v7860_v39 = vpack.c.bf16 %v450_v30, %v449_v31  ;;  %v7940_v31 = vpack.c.bf16 %v538_v24, %v537_v22  ;;  %v539_v34 = vld [vmem:[%s14230_s1 + $0xf40] sm:$0xff]  ;;  %v580_v22 = vld [vmem:[%s14230_s1 + $0x1088] sm:$0xff] }
  0xd0   :  { %7875 = vmatprep.subr.bf16.mxu1 %v7874_v46  ;;  %v531_v46 = vld [vmem:[%s14230_s1 + $0xf00] sm:$0xff]  ;;  %v612_v24 = vld [vmem:[%s14230_s1 + $0x1188] sm:$0xff] }
  0xd1   :  { %7845 = vmatpush3.bf16.msra.mxu0 %v7844_v53  ;;  %v549_v53 = vld [vmem:[%s14230_s1 + $0xf90] sm:$0xff]  ;;  %v7928_v56 = vpack.c.bf16 %v532_v48, %v531_v46  ;;  %v510_v46 = vld [vmem:[%s14230_s1 + $0xe58] sm:$0xff] }
  0xd2   :  { %7847 = vmatprep.subr.bf16.mxu0 %v7846_v33  ;;  %v10598_v33 = vrot.slane %v1737_v38, %v9266_v13  ;;  %v557_v38 = vld [vmem:[%s14230_s1 + $0xfd0] sm:$0xff] }
  0xd3   :  { %7877 = vmatpush3.bf16.msra.mxu1 %v7876_v54  ;;  %v550_v54 = vld [vmem:[%s14230_s1 + $0xf98] sm:$0xff] }
  0xd4   :  { %7879 = vmatprep.subr.bf16.mxu1 %v7878_v45  ;;  %v501_v45 = vld [vmem:[%s14230_s1 + $0xe10] sm:$0xff]  ;;  %v7930_v60 = vpack.c.bf16 %v550_v54, %v549_v53  ;;  %v1753_v3 = vcombine.high %v10598_v33, %v10598_v33  ;;  %v528_v53 = vld [vmem:[%s14230_s1 + $0xee8] sm:$0xff]  ;;  %v559_v54 = vld [vmem:[%s14230_s1 + $0xfe0] sm:$0xff] }
  0xd5   :  { %7849 = vmatpush3.bf16.msra.mxu0 %v7848_v63  ;;  %v520_v63 = vld [vmem:[%s14230_s1 + $0xea8] sm:$0xff]  ;;  %v7900_v4 = vpack.c.bf16 %v502_v58, %v501_v45  ;;  %v7918_v45 = vpack.c.bf16 %v528_v53, %v527_v50  ;;  %v511_v58 = vld [vmem:[%s14230_s1 + $0xe60] sm:$0xff] }
  0xd6   :  { %7851 = vmatprep.subr.bf16.mxu0 %v7850_v1  ;;  %v551_v1 = vld [vmem:[%s14230_s1 + $0xfa0] sm:$0xff]  ;;  %v7902_v6 = vpack.c.bf16 %v520_v63, %v519_v62  ;;  %v544_v63 = vld [vmem:[%s14230_s1 + $0xf68] sm:$0xff] }
  0xd7   :  { %7881 = vmatpush3.bf16.msra.mxu1 %v7880_v0  ;;  %v1752_v0 = vcombine.high %v10589_v51, %v10589_v51  ;;  %v7934_v11 = vpack.c.bf16 %v552_v2, %v551_v1  ;;  %v530_v1 = vld [vmem:[%s14230_s1 + $0xef8] sm:$0xff]  ;;  %v5682_v2 = vld [vmem:[%s14231_s2] ss:$0 sm:$0xff]  ;;  %v584_v53 = vld [vmem:[%s14230_s1 + $0x10a8] sm:$0xff] }
  0xd8   :  { %7883 = vmatprep.subr.bf16.mxu1 %v7882_v5  ;;  %v7932_v5 = vpack.c.bf16 %v534_v61, %v533_v59  ;;  %v512_v59 = vld [vmem:[%s14230_s1 + $0xe68] sm:$0xff]  ;;  %v583_v50 = vld [vmem:[%s14230_s1 + $0x10a0] sm:$0xff] }
  0xd9   :  { %7853 = vmatpush3.bf16.msra.mxu0 %v7852_v14  ;;  %v522_v14 = vld [vmem:[%s14230_s1 + $0xeb8] sm:$0xff] }
  0xda   :  { %7855 = vmatprep.subr.bf16.mxu0 %v7854_v16  ;;  %v554_v16 = vld [vmem:[%s14230_s1 + $0xfb8] sm:$0xff]  ;;  %v7906_v19 = vpack.c.bf16 %v522_v14, %v521_v12 }
  0xdb   :  { %7885 = vmatpush3.bf16.msra.mxu1 %v7884_v15  ;;  %v553_v15 = vld [vmem:[%s14230_s1 + $0xfb0] sm:$0xff] }
  0xdc   :  { %7887 = vmatprep.subr.bf16.mxu1 %v7886_v20  ;;  %v505_v20 = vld [vmem:[%s14230_s1 + $0xe30] sm:$0xff]  ;;  %v7938_v23 = vpack.c.bf16 %v554_v16, %v553_v15  ;;  %v514_v16 = vld [vmem:[%s14230_s1 + $0xe78] sm:$0xff] }
  0xdd   :  { %7857 = vmatpush3.bf16.msra.mxu0 %v7856_v26  ;;  %v524_v26 = vld [vmem:[%s14230_s1 + $0xec8] sm:$0xff]  ;;  %v513_v15 = vld [vmem:[%s14230_s1 + $0xe70] sm:$0xff] }
  0xde   :  { %7859 = vmatprep.subr.bf16.mxu0 %v7858_v29  ;;  %v7908_v29 = vpack.c.bf16 %v506_v21, %v505_v20  ;;  %v7910_v30 = vpack.c.bf16 %v524_v26, %v523_v25  ;;  %v546_v20 = vld [vmem:[%s14230_s1 + $0xf78] sm:$0xff]  ;;  %v579_v21 = vld [vmem:[%s14230_s1 + $0x1080] sm:$0xff] }
  0xdf   :  { %7889 = vmatpush3.bf16.msra.mxu1 %v7888_v28  ;;  %v556_v28 = vld [vmem:[%s14230_s1 + $0xfc8] sm:$0xff] }
  0xe0   :  { %7891 = vmatprep.subr.bf16.mxu1 %v7890_v42  ;;  %v508_v42 = vld [vmem:[%s14230_s1 + $0xe48] sm:$0xff]  ;;  %v7942_v35 = vpack.c.bf16 %v556_v28, %v555_v27  ;;  %v7924_v27 = vpack.c.bf16 %v514_v16, %v513_v15 }
  0xe1   :  { %7861 = vmatpush3.bf16.msra.mxu0 %v7860_v39  ;;  %v558_v39 = vld [vmem:[%s14230_s1 + $0xfd8] sm:$0xff]  ;;  %v620_v15 = vld [vmem:[%s14230_s1 + $0x11c8] sm:$0xff] }
  0xe2   :  { %7895 = vmatprep.subr.bf16.mxu0 %v7894_v41  ;;  %v7944_v41 = vpack.c.bf16 %v540_v36, %v539_v34  ;;  %v7946_v48 = vpack.c.bf16 %v558_v39, %v557_v38  ;;  %v596_v34 = vld [vmem:[%s14230_s1 + $0x1108] sm:$0xff]  ;;  %v582_v36 = vld [vmem:[%s14230_s1 + $0x1098] sm:$0xff] }
  0xe3   :  { %7893 = vmatpush3.bf16.msra.mxu1 %v7892_v40  ;;  %v7912_v40 = vpack.c.bf16 %v508_v42, %v507_v32  ;;  %v595_v32 = vld [vmem:[%s14230_s1 + $0x1100] sm:$0xff]  ;;  %v614_v38 = vld [vmem:[%s14230_s1 + $0x1198] sm:$0xff] }
  0xe4   :  { %7927 = vmatprep.subr.bf16.mxu1 %v7926_v47  ;;  %3027 = vmatmul.mubr.f32.vlgmr.msra.gmra.mrb[12].mxu0 %v10382_v8  ;;  %v503_v8 = vld [vmem:[%s14230_s1 + $0xe20] sm:$0xff]  ;;  %v541_v47 = vld [vmem:[%s14230_s1 + $0xf50] sm:$0xff] }
  0xe5   :  { %7897 = vmatpush3.bf16.msra.mxu0 %v7896_v55  ;;  %3166 = vmatprep.mubr.f32.mxu0 %v1752_v0  ;;  %v7904_v17 = vpack.c.bf16 %v504_v7, %v503_v8  ;;  %v560_v55 = vld [vmem:[%s14230_s1 + $0xfe8] sm:$0xff]  ;;  %v529_v0 = vld [vmem:[%s14230_s1 + $0xef0] sm:$0xff] }
  0xe6   :  { %3097 = vmatmul.mubr.f32.vlgmr.msra.gmra.mrb[12].mxu1 %v10391_v10  ;;  %7899 = vmatprep.subr.bf16.mxu0 %v7898_v57  ;;  %v536_v10 = vld [vmem:[%s14230_s1 + $0xf28] sm:$0xff]  ;;  %v7948_v57 = vpack.c.bf16 %v542_v49, %v541_v47  ;;  %v7950_v62 = vpack.c.bf16 %v560_v55, %v559_v54  ;;  %v7922_v14 = vpack.c.bf16 %v530_v1, %v529_v0  ;;  %v597_v47 = vld [vmem:[%s14230_s1 + $0x1110] sm:$0xff]  ;;  %v598_v49 = vld [vmem:[%s14230_s1 + $0x1118] sm:$0xff] }
  0xe7   :  { %7929 = vmatpush3.bf16.msra.mxu1 %v7928_v56  ;;  %3236 = vmatprep.mubr.f32.mxu1 %v1753_v3  ;;  %v7936_v18 = vpack.c.bf16 %v536_v10, %v535_v9  ;;  %v7916_v56 = vpack.c.bf16 %v510_v46, %v509_v44  ;;  %v7920_v9 = vpack.c.bf16 %v512_v59, %v511_v58  ;;  %v565_v44 = vld [vmem:[%s14230_s1 + $0x1010] sm:$0xff]  ;;  %v566_v46 = vld [vmem:[%s14230_s1 + $0x1018] sm:$0xff]  ;;  %v615_v55 = vld [vmem:[%s14230_s1 + $0x11a0] sm:$0xff] }
  0xe8   :  { %7931 = vmatprep.subr.bf16.mxu1 %v7930_v60  ;;  %v543_v60 = vld [vmem:[%s14230_s1 + $0xf60] sm:$0xff]  ;;  %v7996_v58 = vpack.c.bf16 %v598_v49, %v597_v47  ;;  %v7966_v59 = vpack.c.bf16 %v584_v53, %v583_v50  ;;  %v586_v0 = vld [vmem:[%s14230_s1 + $0x10b8] sm:$0xff]  ;;  %v617_v1 = vld [vmem:[%s14230_s1 + $0x11b0] sm:$0xff] }
  0xe9   :  { %7901 = vmatpush3.bf16.msra.mxu0 %v7900_v4  ;;  %v7952_v12 = vpack.c.bf16 %v544_v63, %v543_v60  ;;  %v568_v60 = vld [vmem:[%s14230_s1 + $0x1028] sm:$0xff]  ;;  %v585_v63 = vld [vmem:[%s14230_s1 + $0x10b0] sm:$0xff] }
  0xea   :  { %7903 = vmatprep.subr.bf16.mxu0 %v7902_v6  ;;  %v562_v6 = vld [vmem:[%s14230_s1 + $0xff8] sm:$0xff] }
  0xeb   :  { %7933 = vmatpush3.bf16.msra.mxu1 %v7932_v5  ;;  %v561_v5 = vld [vmem:[%s14230_s1 + $0xff0] sm:$0xff] }
  0xec   :  { %7935 = vmatprep.subr.bf16.mxu1 %v7934_v11  ;;  %v35_v11 = vld [vmem:[%s14229_s0 + $0x40] sm:$0xff] }
  0xed   :  { %7905 = vmatpush3.bf16.msra.mxu0 %v7904_v17  ;;  %v545_v17 = vld [vmem:[%s14230_s1 + $0xf70] sm:$0xff]  ;;  %v1754_v25 = vcombine.high %v35_v11, %v35_v11  ;;  %v10801_v52 = vrot.slane %v35_v11, %v9266_v13  ;;  %v602_v11 = vld [vmem:[%s14230_s1 + $0x1138] sm:$0xff] }
  0xee   :  { %7907 = vmatprep.subr.bf16.mxu0 %v7906_v19  ;;  %v7954_v19 = vpack.c.bf16 %v562_v6, %v561_v5  ;;  %v7956_v28 = vpack.c.bf16 %v546_v20, %v545_v17  ;;  %v7970_v5 = vpack.c.bf16 %v586_v0, %v585_v63  ;;  %v569_v6 = vld [vmem:[%s14230_s1 + $0x1030] sm:$0xff]  ;;  %v572_v20 = vld [vmem:[%s14230_s1 + $0x1048] sm:$0xff] }
  0xef   :  { %7937 = vmatpush3.bf16.msra.mxu1 %v7936_v18  ;;  %v10810_v39 = vrot.slane %v1754_v25, %v9266_v13  ;;  %v1769_v54 = vcombine.high %v10801_v52, %v10801_v52  ;;  %v590_v25 = vld [vmem:[%s14230_s1 + $0x10d8] sm:$0xff] }
  0xf0   :  { %7939 = vmatprep.subr.bf16.mxu1 %v7938_v23  ;;  %v611_v23 = vld [vmem:[%s14230_s1 + $0x1180] sm:$0xff] }
  0xf1   :  { %7909 = vmatpush3.bf16.msra.mxu0 %v7908_v29  ;;  %v7958_v29 = vpack.c.bf16 %v580_v22, %v579_v21  ;;  %v7990_v42 = vpack.c.bf16 %v612_v24, %v611_v23  ;;  %v603_v21 = vld [vmem:[%s14230_s1 + $0x1140] sm:$0xff]  ;;  %v604_v23 = vld [vmem:[%s14230_s1 + $0x1148] sm:$0xff]  ;;  %v589_v24 = vld [vmem:[%s14230_s1 + $0x10d0] sm:$0xff] }
  0xf2   :  { %7911 = vmatprep.subr.bf16.mxu0 %v7910_v30  ;;  %v564_v30 = vld [vmem:[%s14230_s1 + $0x1008] sm:$0xff] }
  0xf3   :  { %7941 = vmatpush3.bf16.msra.mxu1 %v7940_v31  ;;  %v563_v31 = vld [vmem:[%s14230_s1 + $0x1000] sm:$0xff] }
  0xf4   :  { %7943 = vmatprep.subr.bf16.mxu1 %v7942_v35  ;;  %v581_v35 = vld [vmem:[%s14230_s1 + $0x1090] sm:$0xff] }
  0xf5   :  { %7913 = vmatpush3.bf16.msra.mxu0 %v7912_v40  ;;  %v7960_v40 = vpack.c.bf16 %v564_v30, %v563_v31 }
  0xf6   :  { %7915 = vmatprep.subr.bf16.mxu0 %v7914_v43  ;;  %v7962_v43 = vpack.c.bf16 %v582_v36, %v581_v35 }
  0xf7   :  { %7945 = vmatpush3.bf16.msra.mxu1 %v7944_v41  ;;  %v5718_v61 = vpop.f32.mrb[0].mxu0  ;;  %v7992_v41 = vpack.c.bf16 %v596_v34, %v595_v32 }
  0xf8   :  { %7947 = vmatprep.subr.bf16.mxu1 %v7946_v48  ;;  %v5719_v3 = vpop.f32.mrb[1].mxu0  ;;  %v7994_v48 = vpack.c.bf16 %v614_v38, %v613_v37 }
  0xf9   :  { %v5753_v4 = vpop.f32.mrb[0].mxu1  ;;  %v5720_v8 = vadd.f32 %v5719_v3, %v5718_v61  ;;  %7917 = vmatpush3.bf16.msra.mxu0 %v7916_v56  ;;  %v616_v56 = vld [vmem:[%s14230_s1 + $0x11a8] sm:$0xff]  ;;  %v599_v61 = vld [vmem:[%s14230_s1 + $0x1120] sm:$0xff] }
  0xfa   :  { %v5754_v7 = vpop.f32.mrb[1].mxu1  ;;  %7919 = vmatprep.subr.bf16.mxu0 %v7918_v45  ;;  %v7964_v45 = vpack.c.bf16 %v566_v46, %v565_v44 }
  0xfb   :  { %v5755_v10 = vadd.f32 %v5754_v7, %v5753_v4  ;;  %7949 = vmatpush3.bf16.msra.mxu1 %v7948_v57  ;;  %v2189_v18 = vadd.f32 %v5720_v8, %v5682_v2  ;;  %v1770_v57 = vcombine.high %v10810_v39, %v10810_v39  ;;  %v618_v2 = vld [vmem:[%s14230_s1 + $0x11b8] sm:$0xff]  ;;  %v601_v7 = vld [vmem:[%s14230_s1 + $0x1130] sm:$0xff] }
  0xfc   :  { %7951 = vmatprep.subr.bf16.mxu1 %v7950_v62  ;;  %v7998_v62 = vpack.c.bf16 %v616_v56, %v615_v55  ;;  %v570_v8 = vld [vmem:[%s14230_s1 + $0x1038] sm:$0xff]  ;;  %v8004_v17 = vpack.c.bf16 %v602_v11, %v601_v7 }
  0xfd   :  { %v10780_v26 = vadd.f32 %v5755_v10, %v2189_v18  ;;  %7921 = vmatpush3.bf16.msra.mxu0 %v7920_v9  ;;  %v8002_v9 = vpack.c.bf16 %v618_v2, %v617_v1  ;;  %v587_v10 = vld [vmem:[%s14230_s1 + $0x10c0] sm:$0xff]  ;;  %v7972_v16 = vpack.c.bf16 %v570_v8, %v569_v6 }
  0xfe   :  { %7923 = vmatprep.subr.bf16.mxu0 %v7922_v14  ;;  %v619_v14 = vld [vmem:[%s14230_s1 + $0x11c0] sm:$0xff] }
  0xff   :  { %7953 = vmatpush3.bf16.msra.mxu1 %v7952_v12  ;;  %v588_v12 = vld [vmem:[%s14230_s1 + $0x10c8] sm:$0xff]  ;;  %v8006_v22 = vpack.c.bf16 %v620_v15, %v619_v14 }
 0x100   :  { %7955 = vmatprep.subr.bf16.mxu1 %v7954_v19  ;;  %v7974_v18 = vpack.c.bf16 %v588_v12, %v587_v10  ;;  %v571_v19 = vld [vmem:[%s14230_s1 + $0x1040] sm:$0xff] }
 0x101   :  { %7925 = vmatpush3.bf16.msra.mxu0 %v7924_v27  ;;  %v621_v27 = vld [vmem:[%s14230_s1 + $0x11d0] sm:$0xff] }
 0x102   :  { %7959 = vmatprep.subr.bf16.mxu0 %v7958_v29 }
 0x103   :  { %7957 = vmatpush3.bf16.msra.mxu1 %v7956_v28  ;;  %v622_v28 = vld [vmem:[%s14230_s1 + $0x11d8] sm:$0xff] }
 0x104   :  { %7991 = vmatprep.subr.bf16.mxu1 %v7990_v42  ;;  %3167 = vmatmul.mubr.f32.vlgmr.msra.gmra.mrb[14].mxu0 %v10589_v51  ;;  %v567_v51 = vld [vmem:[%s14230_s1 + $0x1020] sm:$0xff] }
 0x105   :  { %7961 = vmatpush3.bf16.msra.mxu0 %v7960_v40  ;;  %3306 = vmatprep.mubr.f32.mxu0 %v1769_v54  ;;  %v7968_v3 = vpack.c.bf16 %v568_v60, %v567_v51 }
 0x106   :  { %3237 = vmatmul.mubr.f32.vlgmr.msra.gmra.mrb[14].mxu1 %v10598_v33  ;;  %7963 = vmatprep.subr.bf16.mxu0 %v7962_v43  ;;  %v600_v33 = vld [vmem:[%s14230_s1 + $0x1128] sm:$0xff] }
 0x107   :  { %7993 = vmatpush3.bf16.msra.mxu1 %v7992_v41  ;;  %3376 = vmatprep.mubr.f32.mxu1 %v1770_v57  ;;  %v8000_v4 = vpack.c.bf16 %v600_v33, %v599_v61 }
 0x108   :  { %7995 = vmatprep.subr.bf16.mxu1 %v7994_v48 }
 0x109   :  { %7965 = vmatpush3.bf16.msra.mxu0 %v7964_v45 }
 0x10a   :  { %7967 = vmatprep.subr.bf16.mxu0 %v7966_v59 }
 0x10b   :  { %7997 = vmatpush3.bf16.msra.mxu1 %v7996_v58 }
 0x10c   :  { %7999 = vmatprep.subr.bf16.mxu1 %v7998_v62 }
 0x10d   :  { %7969 = vmatpush3.bf16.msra.mxu0 %v7968_v3 }
 0x10e   :  { %7971 = vmatprep.subr.bf16.mxu0 %v7970_v5 }
 0x10f   :  { %8001 = vmatpush3.bf16.msra.mxu1 %v8000_v4 }
 0x110   :  { %8003 = vmatprep.subr.bf16.mxu1 %v8002_v9 }
 0x111   :  { %12 = vsyncpa [#allocation3], 0  ;;  %7973 = vmatpush3.bf16.msra.mxu0 %v7972_v16  ;;  %v7976_v29 = vpack.c.bf16 %v572_v20, %v571_v19  ;;  %v8008_v31 = vpack.c.bf16 %v604_v23, %v603_v21  ;;  %v7978_v30 = vpack.c.bf16 %v590_v25, %v589_v24  ;;  %v573_v32 = vld [vmem:[%s14230_s1 + $0x1050] sm:$0xff]  ;;  %v574_v42 = vld [vmem:[%s14230_s1 + $0x1058] sm:$0xff]  ;;  %v8010_v35 = vpack.c.bf16 %v622_v28, %v621_v27  ;;  %s9075_s16 = smov [#allocation2]  }
 0x112   :  { %7975 = vmatprep.subr.bf16.mxu0 %v7974_v18  ;;  %v605_v34 = vld [vmem:[%s14230_s1 + $0x1150] sm:$0xff]  ;;  %v606_v36 = vld [vmem:[%s14230_s1 + $0x1158] sm:$0xff]  ;;  %v591_v37 = vld [vmem:[%s14230_s1 + $0x10e0] sm:$0xff]  ;;  %v7980_v43 = vpack.c.bf16 %v574_v42, %v573_v32  ;;  %vm9073_vm0 = vmmov 0   ;;  %vm5592_vm1 = vcmask 523264   ;;  %vm5666_vm2 = vcmask 74752  }
 0x113   :  { %8005 = vmatpush3.bf16.msra.mxu1 %v8004_v17  ;;  %v592_v38 = vld [vmem:[%s14230_s1 + $0x10e8] sm:$0xff]  ;;  %v623_v40 = vld [vmem:[%s14230_s1 + $0x11e0] sm:$0xff]  ;;  %v8012_v44 = vpack.c.bf16 %v606_v36, %v605_v34  ;;  %v593_v55 = vld [vmem:[%s14230_s1 + $0x10f0] sm:$0xff] }
 0x114   :  { %8007 = vmatprep.subr.bf16.mxu1 %v8006_v22  ;;  %v624_v41 = vld [vmem:[%s14230_s1 + $0x11e8] sm:$0xff]  ;;  %v7982_v46 = vpack.c.bf16 %v592_v38, %v591_v37  ;;  %v575_v47 = vld [vmem:[%s14230_s1 + $0x1060] sm:$0xff]  ;;  %v594_v56 = vld [vmem:[%s14230_s1 + $0x10f8] sm:$0xff] }
 0x115   :  { %7977 = vmatpush3.bf16.msra.mxu0 %v7976_v29  ;;  %v576_v48 = vld [vmem:[%s14230_s1 + $0x1068] sm:$0xff]  ;;  %v607_v49 = vld [vmem:[%s14230_s1 + $0x1160] sm:$0xff]  ;;  %v8014_v53 = vpack.c.bf16 %v624_v41, %v623_v40  ;;  %v625_v58 = vld [vmem:[%s14230_s1 + $0x11f0] sm:$0xff]  ;;  %v7986_v0 = vpack.c.bf16 %v594_v56, %v593_v55 }
 0x116   :  { %7979 = vmatprep.subr.bf16.mxu0 %v7978_v30  ;;  %v608_v54 = vld [vmem:[%s14230_s1 + $0x1168] sm:$0xff]  ;;  %v626_v59 = vld [vmem:[%s14230_s1 + $0x11f8] sm:$0xff]  ;;  %v7984_v61 = vpack.c.bf16 %v576_v48, %v575_v47  ;;  %v577_v1 = vld [vmem:[%s14230_s1 + $0x1070] sm:$0xff] }
 0x117   :  { %8009 = vmatpush3.bf16.msra.mxu1 %v8008_v31  ;;  %v5788_v50 = vpop.f32.mrb[2].mxu0  ;;  %v36_v62 = vld [vmem:[%s14229_s0 + $0x48] sm:$0xff]  ;;  %v8016_v63 = vpack.c.bf16 %v608_v54, %v607_v49  ;;  %v578_v2 = vld [vmem:[%s14230_s1 + $0x1078] sm:$0xff]  ;;  %v609_v3 = vld [vmem:[%s14230_s1 + $0x1170] sm:$0xff]  ;;  %v8018_v5 = vpack.c.bf16 %v626_v59, %v625_v58 }
 0x118   :  { %8011 = vmatprep.subr.bf16.mxu1 %v8010_v35  ;;  %v5789_v57 = vpop.f32.mrb[3].mxu0  ;;  %v610_v6 = vld [vmem:[%s14230_s1 + $0x1178] sm:$0xff]  ;;  %v643_v8 = vld [vmem:[%s14230_s1 + $0x1280] sm:$0xff]  ;;  %v644_v7 = vld [vmem:[%s14230_s1 + $0x1288] sm:$0xff]  ;;  %v1771_v11 = vcombine.high %v36_v62, %v36_v62  ;;  %v7988_v12 = vpack.c.bf16 %v578_v2, %v577_v1  ;;  %v11011_v23 = vrot.slane %v36_v62, %v9266_v13 }
 0x119   :  { %v5823_v45 = vpop.f32.mrb[2].mxu1  ;;  %v5790_v51 = vadd.f32 %v5789_v57, %v5788_v50  ;;  %7981 = vmatpush3.bf16.msra.mxu0 %v7980_v43  ;;  %v675_v9 = vld [vmem:[%s14230_s1 + $0x1380] sm:$0xff]  ;;  %v8020_v14 = vpack.c.bf16 %v610_v6, %v609_v3  ;;  %v8022_v15 = vpack.c.bf16 %v644_v7, %v643_v8  ;;  %v628_v17 = vld [vmem:[%s14230_s1 + $0x1208] sm:$0xff]  ;;  %v645_v21 = vld [vmem:[%s14230_s1 + $0x1290] sm:$0xff] }
 0x11a   :  { %v5824_v60 = vpop.f32.mrb[3].mxu1  ;;  %7983 = vmatprep.subr.bf16.mxu0 %v7982_v46  ;;  %v627_v16 = vld [vmem:[%s14230_s1 + $0x1200] sm:$0xff]  ;;  %v660_v20 = vld [vmem:[%s14230_s1 + $0x1308] sm:$0xff]  ;;  %v646_v22 = vld [vmem:[%s14230_s1 + $0x1298] sm:$0xff]  ;;  %v11020_v27 = vrot.slane %v1771_v11, %v9266_v13  ;;  %v1786_v38 = vcombine.high %v11011_v23, %v11011_v23 }
 0x11b   :  { %v5825_v33 = vadd.f32 %v5824_v60, %v5823_v45  ;;  %8013 = vmatpush3.bf16.msra.mxu1 %v8012_v44  ;;  %v2329_v4 = vadd.f32 %v5790_v51, %v10780_v26  ;;  %v676_v26 = vld [vmem:[%s14230_s1 + $0x1388] sm:$0xff]  ;;  %v659_v18 = vld [vmem:[%s14230_s1 + $0x1300] sm:$0xff]  ;;  %v677_v24 = vld [vmem:[%s14230_s1 + $0x1390] sm:$0xff]  ;;  %v8024_v28 = vpack.c.bf16 %v628_v17, %v627_v16  ;;  %v8026_v31 = vpack.c.bf16 %v646_v22, %v645_v21 }
 0x11c   :  { %8015 = vmatprep.subr.bf16.mxu1 %v8014_v53  ;;  %v8054_v19 = vpack.c.bf16 %v676_v26, %v675_v9  ;;  %v678_v25 = vld [vmem:[%s14230_s1 + $0x1398] sm:$0xff]  ;;  %v8056_v29 = vpack.c.bf16 %v660_v20, %v659_v18  ;;  %v629_v30 = vld [vmem:[%s14230_s1 + $0x1210] sm:$0xff]  ;;  %v647_v36 = vld [vmem:[%s14230_s1 + $0x12a0] sm:$0xff]  ;;  %v1787_v43 = vcombine.high %v11020_v27, %v11020_v27 }
 0x11d   :  { %v10990_v10 = vadd.f32 %v5825_v33, %v2329_v4  ;;  %7985 = vmatpush3.bf16.msra.mxu0 %v7984_v61  ;;  %v630_v32 = vld [vmem:[%s14230_s1 + $0x1218] sm:$0xff]  ;;  %v661_v42 = vld [vmem:[%s14230_s1 + $0x1310] sm:$0xff]  ;;  %v8058_v34 = vpack.c.bf16 %v678_v25, %v677_v24  ;;  %v648_v37 = vld [vmem:[%s14230_s1 + $0x12a8] sm:$0xff] }
 0x11e   :  { %7987 = vmatprep.subr.bf16.mxu0 %v7986_v0  ;;  %v662_v35 = vld [vmem:[%s14230_s1 + $0x1318] sm:$0xff]  ;;  %v679_v40 = vld [vmem:[%s14230_s1 + $0x13a0] sm:$0xff]  ;;  %v680_v41 = vld [vmem:[%s14230_s1 + $0x13a8] sm:$0xff]  ;;  %v8028_v44 = vpack.c.bf16 %v630_v32, %v629_v30  ;;  %v8030_v47 = vpack.c.bf16 %v648_v37, %v647_v36 }
 0x11f   :  { %8017 = vmatpush3.bf16.msra.mxu1 %v8016_v63  ;;  %v8060_v46 = vpack.c.bf16 %v662_v35, %v661_v42  ;;  %v632_v48 = vld [vmem:[%s14230_s1 + $0x1228] sm:$0xff]  ;;  %v663_v49 = vld [vmem:[%s14230_s1 + $0x1320] sm:$0xff]  ;;  %v8062_v50 = vpack.c.bf16 %v680_v41, %v679_v40  ;;  %v649_v53 = vld [vmem:[%s14230_s1 + $0x12b0] sm:$0xff] }
 0x120   :  { %8019 = vmatprep.subr.bf16.mxu1 %v8018_v5  ;;  %v650_v54 = vld [vmem:[%s14230_s1 + $0x12b8] sm:$0xff]  ;;  %v681_v55 = vld [vmem:[%s14230_s1 + $0x13b0] sm:$0xff]  ;;  %v651_v33 = vld [vmem:[%s14230_s1 + $0x12c0] sm:$0xff] }
 0x121   :  { %7989 = vmatpush3.bf16.msra.mxu0 %v7988_v12  ;;  %v682_v56 = vld [vmem:[%s14230_s1 + $0x13b8] sm:$0xff]  ;;  %v8034_v58 = vpack.c.bf16 %v650_v54, %v649_v53  ;;  %v633_v59 = vld [vmem:[%s14230_s1 + $0x1230] sm:$0xff]  ;;  %v652_v63 = vld [vmem:[%s14230_s1 + $0x12c8] sm:$0xff] }
 0x122   :  { %8023 = vmatprep.subr.bf16.mxu0 %v8022_v15  ;;  %v634_v51 = vld [vmem:[%s14230_s1 + $0x1238] sm:$0xff]  ;;  %v665_v60 = vld [vmem:[%s14230_s1 + $0x1330] sm:$0xff]  ;;  %v8066_v61 = vpack.c.bf16 %v682_v56, %v681_v55  ;;  %v683_v0 = vld [vmem:[%s14230_s1 + $0x13c0] sm:$0xff]  ;;  %v8038_v4 = vpack.c.bf16 %v652_v63, %v651_v33 }
 0x123   :  { %8021 = vmatpush3.bf16.msra.mxu1 %v8020_v14  ;;  %v666_v62 = vld [vmem:[%s14230_s1 + $0x1338] sm:$0xff]  ;;  %v684_v1 = vld [vmem:[%s14230_s1 + $0x13c8] sm:$0xff]  ;;  %v8036_v2 = vpack.c.bf16 %v634_v51, %v633_v59  ;;  %v635_v5 = vld [vmem:[%s14230_s1 + $0x1240] sm:$0xff] }
 0x124   :  { %8055 = vmatprep.subr.bf16.mxu1 %v8054_v19  ;;  %3307 = vmatmul.mubr.f32.vlgmr.msra.gmra.mrb[16].mxu0 %v10801_v52  ;;  %v631_v52 = vld [vmem:[%s14230_s1 + $0x1220] sm:$0xff]  ;;  %v8068_v3 = vpack.c.bf16 %v666_v62, %v665_v60  ;;  %v636_v6 = vld [vmem:[%s14230_s1 + $0x1248] sm:$0xff]  ;;  %v8070_v7 = vpack.c.bf16 %v684_v1, %v683_v0  ;;  %v653_v26 = vld [vmem:[%s14230_s1 + $0x12d0] sm:$0xff] }
 0x125   :  { %8025 = vmatpush3.bf16.msra.mxu0 %v8024_v28  ;;  %3446 = vmatprep.mubr.f32.mxu0 %v1786_v38  ;;  %v8032_v57 = vpack.c.bf16 %v632_v48, %v631_v52  ;;  %v667_v8 = vld [vmem:[%s14230_s1 + $0x1340] sm:$0xff]  ;;  %v668_v9 = vld [vmem:[%s14230_s1 + $0x1348] sm:$0xff]  ;;  %v654_v11 = vld [vmem:[%s14230_s1 + $0x12d8] sm:$0xff]  ;;  %v8040_v15 = vpack.c.bf16 %v636_v6, %v635_v5 }
 0x126   :  { %3377 = vmatmul.mubr.f32.vlgmr.msra.gmra.mrb[16].mxu1 %v10810_v39  ;;  %8027 = vmatprep.subr.bf16.mxu0 %v8026_v31  ;;  %v664_v39 = vld [vmem:[%s14230_s1 + $0x1328] sm:$0xff]  ;;  %v685_v12 = vld [vmem:[%s14230_s1 + $0x13d0] sm:$0xff]  ;;  %v686_v14 = vld [vmem:[%s14230_s1 + $0x13d8] sm:$0xff]  ;;  %v8072_v16 = vpack.c.bf16 %v668_v9, %v667_v8  ;;  %v8042_v17 = vpack.c.bf16 %v654_v11, %v653_v26 }
 0x127   :  { %8057 = vmatpush3.bf16.msra.mxu1 %v8056_v29  ;;  %3516 = vmatprep.mubr.f32.mxu1 %v1787_v43  ;;  %v8064_v45 = vpack.c.bf16 %v664_v39, %v663_v49  ;;  %v637_v18 = vld [vmem:[%s14230_s1 + $0x1250] sm:$0xff]  ;;  %v638_v19 = vld [vmem:[%s14230_s1 + $0x1258] sm:$0xff]  ;;  %v8074_v21 = vpack.c.bf16 %v686_v14, %v685_v12  ;;  %v655_v24 = vld [vmem:[%s14230_s1 + $0x12e0] sm:$0xff] }
 0x128   :  { %8059 = vmatprep.subr.bf16.mxu1 %v8058_v34  ;;  %v669_v20 = vld [vmem:[%s14230_s1 + $0x1350] sm:$0xff]  ;;  %v670_v22 = vld [vmem:[%s14230_s1 + $0x1358] sm:$0xff]  ;;  %v656_v25 = vld [vmem:[%s14230_s1 + $0x12e8] sm:$0xff]  ;;  %v8044_v31 = vpack.c.bf16 %v638_v19, %v637_v18 }
 0x129   :  { %8029 = vmatpush3.bf16.msra.mxu0 %v8028_v44  ;;  %v687_v28 = vld [vmem:[%s14230_s1 + $0x13e0] sm:$0xff]  ;;  %v688_v29 = vld [vmem:[%s14230_s1 + $0x13e8] sm:$0xff]  ;;  %v8076_v30 = vpack.c.bf16 %v670_v22, %v669_v20  ;;  %v8046_v32 = vpack.c.bf16 %v656_v25, %v655_v24  ;;  %v657_v40 = vld [vmem:[%s14230_s1 + $0x12f0] sm:$0xff] }
 0x12a   :  { %8031 = vmatprep.subr.bf16.mxu0 %v8030_v47  ;;  %v639_v42 = vld [vmem:[%s14230_s1 + $0x1260] sm:$0xff]  ;;  %v640_v34 = vld [vmem:[%s14230_s1 + $0x1268] sm:$0xff]  ;;  %v8078_v37 = vpack.c.bf16 %v688_v29, %v687_v28  ;;  %v658_v41 = vld [vmem:[%s14230_s1 + $0x12f8] sm:$0xff] }
 0x12b   :  { %8061 = vmatpush3.bf16.msra.mxu1 %v8060_v46  ;;  %v671_v35 = vld [vmem:[%s14230_s1 + $0x1360] sm:$0xff]  ;;  %v672_v38 = vld [vmem:[%s14230_s1 + $0x1368] sm:$0xff]  ;;  %v689_v46 = vld [vmem:[%s14230_s1 + $0x13f0] sm:$0xff]  ;;  %v8048_v49 = vpack.c.bf16 %v640_v34, %v639_v42  ;;  %v8050_v54 = vpack.c.bf16 %v658_v41, %v657_v40 }
 0x12c   :  { %8063 = vmatprep.subr.bf16.mxu1 %v8062_v50  ;;  %v690_v47 = vld [vmem:[%s14230_s1 + $0x13f8] sm:$0xff]  ;;  %v37_v50 = vld [vmem:[%s14229_s0 + $0x50] sm:$0xff]  ;;  %v8080_v53 = vpack.c.bf16 %v672_v38, %v671_v35  ;;  %v707_v51 = vld [vmem:[%s14230_s1 + $0x1480] sm:$0xff] }
 0x12d   :  { %8033 = vmatpush3.bf16.msra.mxu0 %v8032_v57  ;;  %v641_v55 = vld [vmem:[%s14230_s1 + $0x1270] sm:$0xff]  ;;  %v642_v56 = vld [vmem:[%s14230_s1 + $0x1278] sm:$0xff]  ;;  %v708_v60 = vld [vmem:[%s14230_s1 + $0x1488] sm:$0xff]  ;;  %v1788_v62 = vcombine.high %v37_v50, %v37_v50  ;;  %v11221_v9 = vrot.slane %v37_v50, %v9266_v13 }
 0x12e   :  { %8035 = vmatprep.subr.bf16.mxu0 %v8034_v58  ;;  %v673_v57 = vld [vmem:[%s14230_s1 + $0x1370] sm:$0xff]  ;;  %v8082_v58 = vpack.c.bf16 %v690_v47, %v689_v46  ;;  %v674_v59 = vld [vmem:[%s14230_s1 + $0x1378] sm:$0xff]  ;;  %v8052_v63 = vpack.c.bf16 %v642_v56, %v641_v55  ;;  %v8086_v1 = vpack.c.bf16 %v708_v60, %v707_v51  ;;  %v724_v6 = vld [vmem:[%s14230_s1 + $0x1508] sm:$0xff] }
 0x12f   :  { %8065 = vmatpush3.bf16.msra.mxu1 %v8064_v45  ;;  %v8084_v0 = vpack.c.bf16 %v674_v59, %v673_v57  ;;  %v709_v8 = vld [vmem:[%s14230_s1 + $0x1490] sm:$0xff]  ;;  %v742_v11 = vld [vmem:[%s14230_s1 + $0x1598] sm:$0xff]  ;;  %v11230_v12 = vrot.slane %v1788_v62, %v9266_v13  ;;  %v711_v22 = vld [vmem:[%s14230_s1 + $0x14a0] sm:$0xff]  ;;  %v1803_v25 = vcombine.high %v11221_v9, %v11221_v9 }
 0x130   :  { %8067 = vmatprep.subr.bf16.mxu1 %v8066_v61  ;;  %v739_v61 = vld [vmem:[%s14230_s1 + $0x1580] sm:$0xff]  ;;  %v741_v26 = vld [vmem:[%s14230_s1 + $0x1590] sm:$0xff]  ;;  %v694_v18 = vld [vmem:[%s14230_s1 + $0x1418] sm:$0xff] }
 0x131   :  { %8037 = vmatpush3.bf16.msra.mxu0 %v8036_v2  ;;  %v691_v2 = vld [vmem:[%s14230_s1 + $0x1400] sm:$0xff]  ;;  %v725_v19 = vld [vmem:[%s14230_s1 + $0x1510] sm:$0xff]  ;;  %v8122_v20 = vpack.c.bf16 %v742_v11, %v741_v26  ;;  %v712_v24 = vld [vmem:[%s14230_s1 + $0x14a8] sm:$0xff] }
 0x132   :  { %8039 = vmatprep.subr.bf16.mxu0 %v8038_v4  ;;  %v723_v4 = vld [vmem:[%s14230_s1 + $0x1500] sm:$0xff]  ;;  %v744_v29 = vld [vmem:[%s14230_s1 + $0x15a8] sm:$0xff]  ;;  %v8094_v42 = vpack.c.bf16 %v712_v24, %v711_v22  ;;  %v714_v38 = vld [vmem:[%s14230_s1 + $0x14b8] sm:$0xff] }
 0x133   :  { %8069 = vmatpush3.bf16.msra.mxu1 %v8068_v3  ;;  %v692_v3 = vld [vmem:[%s14230_s1 + $0x1408] sm:$0xff]  ;;  %v743_v28 = vld [vmem:[%s14230_s1 + $0x15a0] sm:$0xff]  ;;  %v745_v40 = vld [vmem:[%s14230_s1 + $0x15b0] sm:$0xff] }
 0x134   :  { %8071 = vmatprep.subr.bf16.mxu1 %v8070_v7  ;;  %v710_v7 = vld [vmem:[%s14230_s1 + $0x1498] sm:$0xff]  ;;  %v8088_v14 = vpack.c.bf16 %v692_v3, %v691_v2  ;;  %v696_v34 = vld [vmem:[%s14230_s1 + $0x1428] sm:$0xff]  ;;  %v727_v35 = vld [vmem:[%s14230_s1 + $0x1520] sm:$0xff] }
 0x135   :  { %8041 = vmatpush3.bf16.msra.mxu0 %v8040_v15  ;;  %v8120_v15 = vpack.c.bf16 %v724_v6, %v723_v4  ;;  %v746_v41 = vld [vmem:[%s14230_s1 + $0x15b8] sm:$0xff]  ;;  %v697_v47 = vld [vmem:[%s14230_s1 + $0x1430] sm:$0xff]  ;;  %v748_v55 = vld [vmem:[%s14230_s1 + $0x15c8] sm:$0xff] }
 0x136   :  { %8043 = vmatprep.subr.bf16.mxu0 %v8042_v17  ;;  %v693_v17 = vld [vmem:[%s14230_s1 + $0x1410] sm:$0xff]  ;;  %v730_v50 = vld [vmem:[%s14230_s1 + $0x1538] sm:$0xff]  ;;  %v700_v59 = vld [vmem:[%s14230_s1 + $0x1448] sm:$0xff] }
 0x137   :  { %8073 = vmatpush3.bf16.msra.mxu1 %v8072_v16  ;;  %v5858_v36 = vpop.f32.mrb[4].mxu0  ;;  %v8090_v16 = vpack.c.bf16 %v710_v7, %v709_v8  ;;  %v731_v51 = vld [vmem:[%s14230_s1 + $0x1540] sm:$0xff]  ;;  %v718_v62 = vld [vmem:[%s14230_s1 + $0x14d8] sm:$0xff]  ;;  %v701_v4 = vld [vmem:[%s14230_s1 + $0x1450] sm:$0xff] }
 0x138   :  { %8075 = vmatprep.subr.bf16.mxu1 %v8074_v21  ;;  %v5859_v43 = vpop.f32.mrb[5].mxu0  ;;  %v726_v21 = vld [vmem:[%s14230_s1 + $0x1518] sm:$0xff]  ;;  %v733_v6 = vld [vmem:[%s14230_s1 + $0x1550] sm:$0xff]  ;;  %v719_v26 = vld [vmem:[%s14230_s1 + $0x14e0] sm:$0xff] }
 0x139   :  { %v5893_v44 = vpop.f32.mrb[4].mxu1  ;;  %v5860_v52 = vadd.f32 %v5859_v43, %v5858_v36  ;;  %8045 = vmatpush3.bf16.msra.mxu0 %v8044_v31  ;;  %v1804_v31 = vcombine.high %v11230_v12, %v11230_v12  ;;  %v8126_v36 = vpack.c.bf16 %v744_v29, %v743_v28  ;;  %v734_v7 = vld [vmem:[%s14230_s1 + $0x1558] sm:$0xff]  ;;  %v720_v11 = vld [vmem:[%s14230_s1 + $0x14e8] sm:$0xff]  ;;  %v721_v28 = vld [vmem:[%s14230_s1 + $0x14f0] sm:$0xff] }
 0x13a   :  { %v5894_v48 = vpop.f32.mrb[5].mxu1  ;;  %8047 = vmatprep.subr.bf16.mxu0 %v8046_v32  ;;  %v8124_v32 = vpack.c.bf16 %v726_v21, %v725_v19  ;;  %v703_v19 = vld [vmem:[%s14230_s1 + $0x1460] sm:$0xff]  ;;  %v722_v29 = vld [vmem:[%s14230_s1 + $0x14f8] sm:$0xff] }
 0x13b   :  { %v5895_v39 = vadd.f32 %v5894_v48, %v5893_v44  ;;  %8077 = vmatpush3.bf16.msra.mxu1 %v8076_v30  ;;  %v2469_v45 = vadd.f32 %v5860_v52, %v10990_v10  ;;  %v740_v10 = vld [vmem:[%s14230_s1 + $0x1588] sm:$0xff]  ;;  %v8092_v30 = vpack.c.bf16 %v694_v18, %v693_v17  ;;  %v698_v52 = vld [vmem:[%s14230_s1 + $0x1438] sm:$0xff]  ;;  %v729_v48 = vld [vmem:[%s14230_s1 + $0x1530] sm:$0xff]  ;;  %v8140_v17 = vpack.c.bf16 %v734_v7, %v733_v6 }
 0x13c   :  { %8079 = vmatprep.subr.bf16.mxu1 %v8078_v37  ;;  %v8118_v5 = vpack.c.bf16 %v740_v10, %v739_v61  ;;  %v713_v37 = vld [vmem:[%s14230_s1 + $0x14b0] sm:$0xff]  ;;  %v8100_v56 = vpack.c.bf16 %v698_v52, %v697_v47  ;;  %v8132_v57 = vpack.c.bf16 %v730_v50, %v729_v48  ;;  %v732_v61 = vld [vmem:[%s14230_s1 + $0x1548] sm:$0xff]  ;;  %v8110_v18 = vpack.c.bf16 %v720_v11, %v719_v26  ;;  %v735_v21 = vld [vmem:[%s14230_s1 + $0x1560] sm:$0xff] }
 0x13d   :  { %v11200_v33 = vadd.f32 %v5895_v39, %v2469_v45  ;;  %8049 = vmatpush3.bf16.msra.mxu0 %v8048_v49  ;;  %v8098_v46 = vpack.c.bf16 %v714_v38, %v713_v37  ;;  %v8130_v49 = vpack.c.bf16 %v746_v41, %v745_v40  ;;  %v715_v39 = vld [vmem:[%s14230_s1 + $0x14c0] sm:$0xff]  ;;  %v717_v10 = vld [vmem:[%s14230_s1 + $0x14d0] sm:$0xff]  ;;  %v8136_v2 = vpack.c.bf16 %v732_v61, %v731_v51  ;;  %v706_v41 = vld [vmem:[%s14230_s1 + $0x1478] sm:$0xff] }
 0x13e   :  { %8051 = vmatprep.subr.bf16.mxu0 %v8050_v54  ;;  %v747_v54 = vld [vmem:[%s14230_s1 + $0x15c0] sm:$0xff]  ;;  %v8106_v3 = vpack.c.bf16 %v718_v62, %v717_v10  ;;  %v8114_v38 = vpack.c.bf16 %v722_v29, %v721_v28  ;;  %v705_v40 = vld [vmem:[%s14230_s1 + $0x1470] sm:$0xff]  ;;  %v738_v47 = vld [vmem:[%s14230_s1 + $0x1578] sm:$0xff] }
 0x13f   :  { %8081 = vmatpush3.bf16.msra.mxu1 %v8080_v53  ;;  %v716_v53 = vld [vmem:[%s14230_s1 + $0x14c8] sm:$0xff]  ;;  %v8134_v60 = vpack.c.bf16 %v748_v55, %v747_v54  ;;  %v771_v52 = vld [vmem:[%s14230_s1 + $0x1680] sm:$0xff]  ;;  %v773_v51 = vld [vmem:[%s14230_s1 + $0x1690] sm:$0xff] }
 0x140   :  { %8083 = vmatprep.subr.bf16.mxu1 %v8082_v58  ;;  %v8102_v45 = vpack.c.bf16 %v716_v53, %v715_v39  ;;  %v699_v58 = vld [vmem:[%s14230_s1 + $0x1440] sm:$0xff]  ;;  %v772_v48 = vld [vmem:[%s14230_s1 + $0x1688] sm:$0xff]  ;;  %v8116_v53 = vpack.c.bf16 %v706_v41, %v705_v40  ;;  %v805_v10 = vld [vmem:[%s14230_s1 + $0x1790] sm:$0xff] }
 0x141   :  { %8053 = vmatpush3.bf16.msra.mxu0 %v8052_v63  ;;  %v749_v63 = vld [vmem:[%s14230_s1 + $0x15d0] sm:$0xff]  ;;  %v8150_v55 = vpack.c.bf16 %v772_v48, %v771_v52  ;;  %v806_v62 = vld [vmem:[%s14230_s1 + $0x1798] sm:$0xff]  ;;  %v775_v7 = vld [vmem:[%s14230_s1 + $0x16a0] sm:$0xff] }
 0x142   :  { %8087 = vmatprep.subr.bf16.mxu0 %v8086_v1  ;;  %v8104_v1 = vpack.c.bf16 %v700_v59, %v699_v58  ;;  %v788_v59 = vld [vmem:[%s14230_s1 + $0x1708] sm:$0xff]  ;;  %v8186_v6 = vpack.c.bf16 %v806_v62, %v805_v10  ;;  %v809_v28 = vld [vmem:[%s14230_s1 + $0x17b0] sm:$0xff]  ;;  %v810_v29 = vld [vmem:[%s14230_s1 + $0x17b8] sm:$0xff] }
 0x143   :  { %8085 = vmatpush3.bf16.msra.mxu1 %v8084_v0  ;;  %v750_v0 = vld [vmem:[%s14230_s1 + $0x15d8] sm:$0xff]  ;;  %v776_v26 = vld [vmem:[%s14230_s1 + $0x16a8] sm:$0xff]  ;;  %v795_v52 = vld [vmem:[%s14230_s1 + $0x1740] sm:$0xff] }
 0x144   :  { %8119 = vmatprep.subr.bf16.mxu1 %v8118_v5  ;;  %3447 = vmatmul.mubr.f32.vlgmr.msra.gmra.mrb[18].mxu0 %v11011_v23  ;;  %v695_v23 = vld [vmem:[%s14230_s1 + $0x1420] sm:$0xff]  ;;  %v702_v5 = vld [vmem:[%s14230_s1 + $0x1458] sm:$0xff]  ;;  %v8138_v8 = vpack.c.bf16 %v750_v0, %v749_v63  ;;  %v812_v40 = vld [vmem:[%s14230_s1 + $0x17c8] sm:$0xff] }
 0x145   :  { %8089 = vmatpush3.bf16.msra.mxu0 %v8088_v14  ;;  %3586 = vmatprep.mubr.f32.mxu0 %v1803_v25  ;;  %v8096_v43 = vpack.c.bf16 %v696_v34, %v695_v23  ;;  %v751_v14 = vld [vmem:[%s14230_s1 + $0x15e0] sm:$0xff]  ;;  %v736_v25 = vld [vmem:[%s14230_s1 + $0x1568] sm:$0xff] }
 0x146   :  { %3517 = vmatmul.mubr.f32.vlgmr.msra.gmra.mrb[18].mxu1 %v11020_v27  ;;  %8091 = vmatprep.subr.bf16.mxu0 %v8090_v16  ;;  %v728_v27 = vld [vmem:[%s14230_s1 + $0x1528] sm:$0xff]  ;;  %v8108_v16 = vpack.c.bf16 %v702_v5, %v701_v4  ;;  %v8144_v37 = vpack.c.bf16 %v736_v25, %v735_v21  ;;  %v758_v4 = vld [vmem:[%s14230_s1 + $0x1618] sm:$0xff]  ;;  %v789_v5 = vld [vmem:[%s14230_s1 + $0x1710] sm:$0xff] }
 0x147   :  { %8121 = vmatpush3.bf16.msra.mxu1 %v8120_v15  ;;  %3656 = vmatprep.mubr.f32.mxu1 %v1804_v31  ;;  %v8128_v44 = vpack.c.bf16 %v728_v27, %v727_v35  ;;  %v752_v15 = vld [vmem:[%s14230_s1 + $0x15e8] sm:$0xff]  ;;  %v791_v21 = vld [vmem:[%s14230_s1 + $0x1720] sm:$0xff]  ;;  %v778_v25 = vld [vmem:[%s14230_s1 + $0x16b8] sm:$0xff] }
 0x148   :  { %8123 = vmatprep.subr.bf16.mxu1 %v8122_v20  ;;  %v704_v20 = vld [vmem:[%s14230_s1 + $0x1468] sm:$0xff]  ;;  %v8142_v24 = vpack.c.bf16 %v752_v15, %v751_v14  ;;  %v807_v14 = vld [vmem:[%s14230_s1 + $0x17a0] sm:$0xff] }
 0x149   :  { %8093 = vmatpush3.bf16.msra.mxu0 %v8092_v30  ;;  %v8112_v35 = vpack.c.bf16 %v704_v20, %v703_v19  ;;  %v808_v15 = vld [vmem:[%s14230_s1 + $0x17a8] sm:$0xff]  ;;  %v8158_v19 = vpack.c.bf16 %v776_v26, %v775_v7  ;;  %v783_v10 = vld [vmem:[%s14230_s1 + $0x16e0] sm:$0xff] }
 0x14a   :  { %8095 = vmatprep.subr.bf16.mxu0 %v8094_v42  ;;  %v754_v42 = vld [vmem:[%s14230_s1 + $0x15f8] sm:$0xff]  ;;  %v760_v20 = vld [vmem:[%s14230_s1 + $0x1628] sm:$0xff] }
 0x14b   :  { %8125 = vmatpush3.bf16.msra.mxu1 %v8124_v32  ;;  %v753_v32 = vld [vmem:[%s14230_s1 + $0x15f0] sm:$0xff]  ;;  %v784_v62 = vld [vmem:[%s14230_s1 + $0x16e8] sm:$0xff] }
 0x14c   :  { %8127 = vmatprep.subr.bf16.mxu1 %v8126_v36  ;;  %v38_v36 = vld [vmem:[%s14229_s0 + $0x58] sm:$0xff] }
 0x14d   :  { %8097 = vmatpush3.bf16.msra.mxu0 %v8096_v43  ;;  %v737_v43 = vld [vmem:[%s14230_s1 + $0x1570] sm:$0xff]  ;;  %v1805_v50 = vcombine.high %v38_v36, %v38_v36  ;;  %v11431_v61 = vrot.slane %v38_v36, %v9266_v13  ;;  %v794_v36 = vld [vmem:[%s14230_s1 + $0x1738] sm:$0xff] }
 0x14e   :  { %8099 = vmatprep.subr.bf16.mxu0 %v8098_v46  ;;  %v8146_v46 = vpack.c.bf16 %v754_v42, %v753_v32  ;;  %v8148_v54 = vpack.c.bf16 %v738_v47, %v737_v43  ;;  %v761_v42 = vld [vmem:[%s14230_s1 + $0x1630] sm:$0xff]  ;;  %v764_v47 = vld [vmem:[%s14230_s1 + $0x1648] sm:$0xff] }
 0x14f   :  { %8129 = vmatpush3.bf16.msra.mxu1 %v8128_v44  ;;  %v11440_v63 = vrot.slane %v1805_v50, %v9266_v13  ;;  %v1820_v11 = vcombine.high %v11431_v61, %v11431_v61  ;;  %v782_v50 = vld [vmem:[%s14230_s1 + $0x16d8] sm:$0xff] }
 0x150   :  { %8131 = vmatprep.subr.bf16.mxu1 %v8130_v49  ;;  %v803_v49 = vld [vmem:[%s14230_s1 + $0x1780] sm:$0xff] }
 0x151   :  { %8101 = vmatpush3.bf16.msra.mxu0 %v8100_v56  ;;  %v755_v56 = vld [vmem:[%s14230_s1 + $0x1600] sm:$0xff] }
 0x152   :  { %8103 = vmatprep.subr.bf16.mxu0 %v8102_v45  ;;  %v787_v45 = vld [vmem:[%s14230_s1 + $0x1700] sm:$0xff] }
 0x153   :  { %8133 = vmatpush3.bf16.msra.mxu1 %v8132_v57  ;;  %v756_v57 = vld [vmem:[%s14230_s1 + $0x1608] sm:$0xff] }
 0x154   :  { %8135 = vmatprep.subr.bf16.mxu1 %v8134_v60  ;;  %v774_v60 = vld [vmem:[%s14230_s1 + $0x1698] sm:$0xff]  ;;  %v8152_v0 = vpack.c.bf16 %v756_v57, %v755_v56 }
 0x155   :  { %8105 = vmatpush3.bf16.msra.mxu0 %v8104_v1  ;;  %v8184_v1 = vpack.c.bf16 %v788_v59, %v787_v45  ;;  %v765_v45 = vld [vmem:[%s14230_s1 + $0x1650] sm:$0xff] }
 0x156   :  { %8107 = vmatprep.subr.bf16.mxu0 %v8106_v3  ;;  %v757_v3 = vld [vmem:[%s14230_s1 + $0x1610] sm:$0xff] }
 0x157   :  { %8137 = vmatpush3.bf16.msra.mxu1 %v8136_v2  ;;  %v5928_v22 = vpop.f32.mrb[6].mxu0  ;;  %v8154_v2 = vpack.c.bf16 %v774_v60, %v773_v51  ;;  %v797_v59 = vld [vmem:[%s14230_s1 + $0x1750] sm:$0xff]  ;;  %v798_v60 = vld [vmem:[%s14230_s1 + $0x1758] sm:$0xff] }
 0x158   :  { %8139 = vmatprep.subr.bf16.mxu1 %v8138_v8  ;;  %v5929_v31 = vpop.f32.mrb[7].mxu0  ;;  %v790_v8 = vld [vmem:[%s14230_s1 + $0x1718] sm:$0xff] }
 0x159   :  { %v5963_v30 = vpop.f32.mrb[6].mxu1  ;;  %v5930_v23 = vadd.f32 %v5929_v31, %v5928_v22  ;;  %8109 = vmatpush3.bf16.msra.mxu0 %v8108_v16  ;;  %v1821_v16 = vcombine.high %v11440_v63, %v11440_v63  ;;  %v8190_v22 = vpack.c.bf16 %v808_v15, %v807_v14  ;;  %v785_v14 = vld [vmem:[%s14230_s1 + $0x16f0] sm:$0xff]  ;;  %v786_v15 = vld [vmem:[%s14230_s1 + $0x16f8] sm:$0xff] }
 0x15a   :  { %v5964_v34 = vpop.f32.mrb[7].mxu1  ;;  %8111 = vmatprep.subr.bf16.mxu0 %v8110_v18  ;;  %v8188_v18 = vpack.c.bf16 %v790_v8, %v789_v5  ;;  %v767_v5 = vld [vmem:[%s14230_s1 + $0x1660] sm:$0xff] }
 0x15b   :  { %v5965_v27 = vadd.f32 %v5964_v34, %v5963_v30  ;;  %8141 = vmatpush3.bf16.msra.mxu1 %v8140_v17  ;;  %v2609_v44 = vadd.f32 %v5930_v23, %v11200_v33  ;;  %v804_v33 = vld [vmem:[%s14230_s1 + $0x1788] sm:$0xff]  ;;  %v8156_v17 = vpack.c.bf16 %v758_v4, %v757_v3  ;;  %v762_v23 = vld [vmem:[%s14230_s1 + $0x1638] sm:$0xff]  ;;  %v793_v34 = vld [vmem:[%s14230_s1 + $0x1730] sm:$0xff]  ;;  %v8204_v3 = vpack.c.bf16 %v798_v60, %v797_v59 }
 0x15c   :  { %8143 = vmatprep.subr.bf16.mxu1 %v8142_v24  ;;  %v8182_v58 = vpack.c.bf16 %v804_v33, %v803_v49  ;;  %v777_v24 = vld [vmem:[%s14230_s1 + $0x16b0] sm:$0xff]  ;;  %v8164_v41 = vpack.c.bf16 %v762_v23, %v761_v42  ;;  %v8196_v43 = vpack.c.bf16 %v794_v36, %v793_v34  ;;  %v796_v49 = vld [vmem:[%s14230_s1 + $0x1748] sm:$0xff]  ;;  %v8174_v4 = vpack.c.bf16 %v784_v62, %v783_v10  ;;  %v799_v8 = vld [vmem:[%s14230_s1 + $0x1760] sm:$0xff] }
 0x15d   :  { %v11410_v39 = vadd.f32 %v5965_v27, %v2609_v44  ;;  %8113 = vmatpush3.bf16.msra.mxu0 %v8112_v35  ;;  %v8162_v32 = vpack.c.bf16 %v778_v25, %v777_v24  ;;  %v8194_v35 = vpack.c.bf16 %v810_v29, %v809_v28  ;;  %v779_v27 = vld [vmem:[%s14230_s1 + $0x16c0] sm:$0xff]  ;;  %v781_v33 = vld [vmem:[%s14230_s1 + $0x16d0] sm:$0xff]  ;;  %v8200_v56 = vpack.c.bf16 %v796_v49, %v795_v52  ;;  %v770_v29 = vld [vmem:[%s14230_s1 + $0x1678] sm:$0xff] }
 0x15e   :  { %8115 = vmatprep.subr.bf16.mxu0 %v8114_v38  ;;  %v811_v38 = vld [vmem:[%s14230_s1 + $0x17c0] sm:$0xff]  ;;  %v8170_v57 = vpack.c.bf16 %v782_v50, %v781_v33  ;;  %v8178_v25 = vpack.c.bf16 %v786_v15, %v785_v14  ;;  %v769_v28 = vld [vmem:[%s14230_s1 + $0x1670] sm:$0xff]  ;;  %v802_v42 = vld [vmem:[%s14230_s1 + $0x1778] sm:$0xff] }
 0x15f   :  { %8145 = vmatpush3.bf16.msra.mxu1 %v8144_v37  ;;  %v780_v37 = vld [vmem:[%s14230_s1 + $0x16c8] sm:$0xff]  ;;  %v8198_v48 = vpack.c.bf16 %v812_v40, %v811_v38  ;;  %v835_v23 = vld [vmem:[%s14230_s1 + $0x1880] sm:$0xff]  ;;  %v837_v52 = vld [vmem:[%s14230_s1 + $0x1890] sm:$0xff] }
 0x160   :  { %8147 = vmatprep.subr.bf16.mxu1 %v8146_v46  ;;  %v8166_v44 = vpack.c.bf16 %v780_v37, %v779_v27  ;;  %v763_v46 = vld [vmem:[%s14230_s1 + $0x1640] sm:$0xff]  ;;  %v836_v34 = vld [vmem:[%s14230_s1 + $0x1888] sm:$0xff]  ;;  %v8180_v37 = vpack.c.bf16 %v770_v29, %v769_v28  ;;  %v869_v33 = vld [vmem:[%s14230_s1 + $0x1990] sm:$0xff] }
 0x161   :  { %8117 = vmatpush3.bf16.msra.mxu0 %v8116_v53  ;;  %v813_v53 = vld [vmem:[%s14230_s1 + $0x17d0] sm:$0xff]  ;;  %v8214_v40 = vpack.c.bf16 %v836_v34, %v835_v23  ;;  %v870_v50 = vld [vmem:[%s14230_s1 + $0x1998] sm:$0xff]  ;;  %v839_v60 = vld [vmem:[%s14230_s1 + $0x18a0] sm:$0xff] }
 0x162   :  { %8151 = vmatprep.subr.bf16.mxu0 %v8150_v55  ;;  %v8168_v55 = vpack.c.bf16 %v764_v47, %v763_v46  ;;  %v852_v47 = vld [vmem:[%s14230_s1 + $0x1908] sm:$0xff]  ;;  %v8250_v59 = vpack.c.bf16 %v870_v50, %v869_v33  ;;  %v873_v14 = vld [vmem:[%s14230_s1 + $0x19b0] sm:$0xff]  ;;  %v874_v15 = vld [vmem:[%s14230_s1 + $0x19b8] sm:$0xff] }
 0x163   :  { %8149 = vmatpush3.bf16.msra.mxu1 %v8148_v54  ;;  %v814_v54 = vld [vmem:[%s14230_s1 + $0x17d8] sm:$0xff]  ;;  %v840_v10 = vld [vmem:[%s14230_s1 + $0x18a8] sm:$0xff]  ;;  %v859_v23 = vld [vmem:[%s14230_s1 + $0x1940] sm:$0xff] }
 0x164   :  { %8183 = vmatprep.subr.bf16.mxu1 %v8182_v58  ;;  %3587 = vmatmul.mubr.f32.vlgmr.msra.gmra.mrb[20].mxu0 %v11221_v9  ;;  %v759_v9 = vld [vmem:[%s14230_s1 + $0x1620] sm:$0xff]  ;;  %v766_v58 = vld [vmem:[%s14230_s1 + $0x1658] sm:$0xff]  ;;  %v8202_v51 = vpack.c.bf16 %v814_v54, %v813_v53  ;;  %v876_v28 = vld [vmem:[%s14230_s1 + $0x19c8] sm:$0xff] }
 0x165   :  { %8153 = vmatpush3.bf16.msra.mxu0 %v8152_v0  ;;  %3726 = vmatprep.mubr.f32.mxu0 %v1820_v11  ;;  %v8160_v31 = vpack.c.bf16 %v760_v20, %v759_v9  ;;  %v815_v0 = vld [vmem:[%s14230_s1 + $0x17e0] sm:$0xff]  ;;  %v800_v11 = vld [vmem:[%s14230_s1 + $0x1768] sm:$0xff] }
 0x166   :  { %3657 = vmatmul.mubr.f32.vlgmr.msra.gmra.mrb[20].mxu1 %v11230_v12  ;;  %8155 = vmatprep.subr.bf16.mxu0 %v8154_v2  ;;  %v792_v12 = vld [vmem:[%s14230_s1 + $0x1728] sm:$0xff]  ;;  %v8172_v2 = vpack.c.bf16 %v766_v58, %v765_v45  ;;  %v8208_v24 = vpack.c.bf16 %v800_v11, %v799_v8  ;;  %v822_v45 = vld [vmem:[%s14230_s1 + $0x1818] sm:$0xff]  ;;  %v853_v58 = vld [vmem:[%s14230_s1 + $0x1910] sm:$0xff] }
 0x167   :  { %8185 = vmatpush3.bf16.msra.mxu1 %v8184_v1  ;;  %3796 = vmatprep.mubr.f32.mxu1 %v1821_v16  ;;  %v8192_v30 = vpack.c.bf16 %v792_v12, %v791_v21  ;;  %v816_v1 = vld [vmem:[%s14230_s1 + $0x17e8] sm:$0xff]  ;;  %v855_v8 = vld [vmem:[%s14230_s1 + $0x1920] sm:$0xff]  ;;  %v842_v11 = vld [vmem:[%s14230_s1 + $0x18b8] sm:$0xff] }
 0x168   :  { %8187 = vmatprep.subr.bf16.mxu1 %v8186_v6  ;;  %v768_v6 = vld [vmem:[%s14230_s1 + $0x1668] sm:$0xff]  ;;  %v8206_v26 = vpack.c.bf16 %v816_v1, %v815_v0  ;;  %v871_v0 = vld [vmem:[%s14230_s1 + $0x19a0] sm:$0xff] }
 0x169   :  { %8157 = vmatpush3.bf16.msra.mxu0 %v8156_v17  ;;  %v8176_v21 = vpack.c.bf16 %v768_v6, %v767_v5  ;;  %v872_v1 = vld [vmem:[%s14230_s1 + $0x19a8] sm:$0xff]  ;;  %v8222_v5 = vpack.c.bf16 %v840_v10, %v839_v60  ;;  %v847_v33 = vld [vmem:[%s14230_s1 + $0x18e0] sm:$0xff] }
 0x16a   :  { %8159 = vmatprep.subr.bf16.mxu0 %v8158_v19  ;;  %v818_v19 = vld [vmem:[%s14230_s1 + $0x17f8] sm:$0xff]  ;;  %v824_v6 = vld [vmem:[%s14230_s1 + $0x1828] sm:$0xff] }
 0x16b   :  { %8189 = vmatpush3.bf16.msra.mxu1 %v8188_v18  ;;  %v817_v18 = vld [vmem:[%s14230_s1 + $0x17f0] sm:$0xff]  ;;  %v848_v50 = vld [vmem:[%s14230_s1 + $0x18e8] sm:$0xff] }
 0x16c   :  { %8191 = vmatprep.subr.bf16.mxu1 %v8190_v22  ;;  %v39_v22 = vld [vmem:[%s14229_s0 + $0x60] sm:$0xff] }
 0x16d   :  { %8161 = vmatpush3.bf16.msra.mxu0 %v8160_v31  ;;  %v801_v31 = vld [vmem:[%s14230_s1 + $0x1770] sm:$0xff]  ;;  %v1822_v36 = vcombine.high %v39_v22, %v39_v22  ;;  %v11641_v49 = vrot.slane %v39_v22, %v9266_v13  ;;  %v858_v22 = vld [vmem:[%s14230_s1 + $0x1938] sm:$0xff] }
 0x16e   :  { %8163 = vmatprep.subr.bf16.mxu0 %v8162_v32  ;;  %v8210_v32 = vpack.c.bf16 %v818_v19, %v817_v18  ;;  %v8212_v38 = vpack.c.bf16 %v802_v42, %v801_v31  ;;  %v825_v19 = vld [vmem:[%s14230_s1 + $0x1830] sm:$0xff]  ;;  %v828_v42 = vld [vmem:[%s14230_s1 + $0x1848] sm:$0xff] }
 0x16f   :  { %8193 = vmatpush3.bf16.msra.mxu1 %v8192_v30  ;;  %v11650_v53 = vrot.slane %v1822_v36, %v9266_v13  ;;  %v1837_v62 = vcombine.high %v11641_v49, %v11641_v49  ;;  %v846_v36 = vld [vmem:[%s14230_s1 + $0x18d8] sm:$0xff] }
 0x170   :  { %8195 = vmatprep.subr.bf16.mxu1 %v8194_v35  ;;  %v867_v35 = vld [vmem:[%s14230_s1 + $0x1980] sm:$0xff] }
 0x171   :  { %8165 = vmatpush3.bf16.msra.mxu0 %v8164_v41  ;;  %v819_v41 = vld [vmem:[%s14230_s1 + $0x1800] sm:$0xff] }
 0x172   :  { %8167 = vmatprep.subr.bf16.mxu0 %v8166_v44  ;;  %v851_v44 = vld [vmem:[%s14230_s1 + $0x1900] sm:$0xff] }
 0x173   :  { %8197 = vmatpush3.bf16.msra.mxu1 %v8196_v43  ;;  %v820_v43 = vld [vmem:[%s14230_s1 + $0x1808] sm:$0xff] }
 0x174   :  { %8199 = vmatprep.subr.bf16.mxu1 %v8198_v48  ;;  %v838_v48 = vld [vmem:[%s14230_s1 + $0x1898] sm:$0xff]  ;;  %v8216_v54 = vpack.c.bf16 %v820_v43, %v819_v41 }
 0x175   :  { %8169 = vmatpush3.bf16.msra.mxu0 %v8168_v55  ;;  %v8248_v55 = vpack.c.bf16 %v852_v47, %v851_v44  ;;  %v829_v44 = vld [vmem:[%s14230_s1 + $0x1850] sm:$0xff] }
 0x176   :  { %8171 = vmatprep.subr.bf16.mxu0 %v8170_v57  ;;  %v821_v57 = vld [vmem:[%s14230_s1 + $0x1810] sm:$0xff] }
 0x177   :  { %8201 = vmatpush3.bf16.msra.mxu1 %v8200_v56  ;;  %v5998_v7 = vpop.f32.mrb[8].mxu0  ;;  %v8218_v56 = vpack.c.bf16 %v838_v48, %v837_v52  ;;  %v861_v47 = vld [vmem:[%s14230_s1 + $0x1950] sm:$0xff]  ;;  %v862_v48 = vld [vmem:[%s14230_s1 + $0x1958] sm:$0xff] }
 0x178   :  { %8203 = vmatprep.subr.bf16.mxu1 %v8202_v51  ;;  %v5999_v16 = vpop.f32.mrb[9].mxu0  ;;  %v854_v51 = vld [vmem:[%s14230_s1 + $0x1918] sm:$0xff] }
 0x179   :  { %v6033_v17 = vpop.f32.mrb[8].mxu1  ;;  %v6000_v9 = vadd.f32 %v5999_v16, %v5998_v7  ;;  %8173 = vmatpush3.bf16.msra.mxu0 %v8172_v2  ;;  %v1838_v2 = vcombine.high %v11650_v53, %v11650_v53  ;;  %v8254_v7 = vpack.c.bf16 %v872_v1, %v871_v0  ;;  %v849_v0 = vld [vmem:[%s14230_s1 + $0x18f0] sm:$0xff]  ;;  %v850_v1 = vld [vmem:[%s14230_s1 + $0x18f8] sm:$0xff] }
 0x17a   :  { %v6034_v20 = vpop.f32.mrb[9].mxu1  ;;  %8175 = vmatprep.subr.bf16.mxu0 %v8174_v4  ;;  %v8252_v4 = vpack.c.bf16 %v854_v51, %v853_v58  ;;  %v831_v58 = vld [vmem:[%s14230_s1 + $0x1860] sm:$0xff] }
 0x17b   :  { %v6035_v12 = vadd.f32 %v6034_v20, %v6033_v17  ;;  %8205 = vmatpush3.bf16.msra.mxu1 %v8204_v3  ;;  %v2749_v30 = vadd.f32 %v6000_v9, %v11410_v39  ;;  %v868_v39 = vld [vmem:[%s14230_s1 + $0x1988] sm:$0xff]  ;;  %v8220_v3 = vpack.c.bf16 %v822_v45, %v821_v57  ;;  %v826_v9 = vld [vmem:[%s14230_s1 + $0x1838] sm:$0xff]  ;;  %v857_v20 = vld [vmem:[%s14230_s1 + $0x1930] sm:$0xff]  ;;  %v8268_v57 = vpack.c.bf16 %v862_v48, %v861_v47 }
 0x17c   :  { %8207 = vmatprep.subr.bf16.mxu1 %v8206_v26  ;;  %v8246_v46 = vpack.c.bf16 %v868_v39, %v867_v35  ;;  %v841_v26 = vld [vmem:[%s14230_s1 + $0x18b0] sm:$0xff]  ;;  %v8228_v29 = vpack.c.bf16 %v826_v9, %v825_v19  ;;  %v8260_v31 = vpack.c.bf16 %v858_v22, %v857_v20  ;;  %v860_v35 = vld [vmem:[%s14230_s1 + $0x1948] sm:$0xff]  ;;  %v8238_v45 = vpack.c.bf16 %v848_v50, %v847_v33  ;;  %v863_v51 = vld [vmem:[%s14230_s1 + $0x1960] sm:$0xff] }
 0x17d   :  { %v11620_v27 = vadd.f32 %v6035_v12, %v2749_v30  ;;  %8177 = vmatpush3.bf16.msra.mxu0 %v8176_v21  ;;  %v8226_v18 = vpack.c.bf16 %v842_v11, %v841_v26  ;;  %v8258_v21 = vpack.c.bf16 %v874_v15, %v873_v14  ;;  %v843_v12 = vld [vmem:[%s14230_s1 + $0x18c0] sm:$0xff]  ;;  %v845_v39 = vld [vmem:[%s14230_s1 + $0x18d0] sm:$0xff]  ;;  %v8264_v41 = vpack.c.bf16 %v860_v35, %v859_v23  ;;  %v834_v15 = vld [vmem:[%s14230_s1 + $0x1878] sm:$0xff] }
 0x17e   :  { %8179 = vmatprep.subr.bf16.mxu0 %v8178_v25  ;;  %v875_v25 = vld [vmem:[%s14230_s1 + $0x19c0] sm:$0xff]  ;;  %v8234_v43 = vpack.c.bf16 %v846_v36, %v845_v39  ;;  %v8242_v11 = vpack.c.bf16 %v850_v1, %v849_v0  ;;  %v833_v14 = vld [vmem:[%s14230_s1 + $0x1870] sm:$0xff]  ;;  %v866_v19 = vld [vmem:[%s14230_s1 + $0x1978] sm:$0xff] }
 0x17f   :  { %8209 = vmatpush3.bf16.msra.mxu1 %v8208_v24  ;;  %v844_v24 = vld [vmem:[%s14230_s1 + $0x18c8] sm:$0xff]  ;;  %v8262_v34 = vpack.c.bf16 %v876_v28, %v875_v25  ;;  %v899_v9 = vld [vmem:[%s14230_s1 + $0x1a80] sm:$0xff]  ;;  %v901_v23 = vld [vmem:[%s14230_s1 + $0x1a90] sm:$0xff] }
 0x180   :  { %8211 = vmatprep.subr.bf16.mxu1 %v8210_v32  ;;  %v8230_v30 = vpack.c.bf16 %v844_v24, %v843_v12  ;;  %v827_v32 = vld [vmem:[%s14230_s1 + $0x1840] sm:$0xff]  ;;  %v900_v20 = vld [vmem:[%s14230_s1 + $0x1a88] sm:$0xff]  ;;  %v8244_v24 = vpack.c.bf16 %v834_v15, %v833_v14  ;;  %v933_v39 = vld [vmem:[%s14230_s1 + $0x1b90] sm:$0xff] }
 0x181   :  { %8181 = vmatpush3.bf16.msra.mxu0 %v8180_v37  ;;  %v877_v37 = vld [vmem:[%s14230_s1 + $0x19d0] sm:$0xff]  ;;  %v8278_v28 = vpack.c.bf16 %v900_v20, %v899_v9  ;;  %v934_v36 = vld [vmem:[%s14230_s1 + $0x1b98] sm:$0xff]  ;;  %v903_v48 = vld [vmem:[%s14230_s1 + $0x1aa0] sm:$0xff] }
 0x182   :  { %8215 = vmatprep.subr.bf16.mxu0 %v8214_v40  ;;  %v8232_v40 = vpack.c.bf16 %v828_v42, %v827_v32  ;;  %v916_v42 = vld [vmem:[%s14230_s1 + $0x1b08] sm:$0xff]  ;;  %v8314_v47 = vpack.c.bf16 %v934_v36, %v933_v39  ;;  %v937_v0 = vld [vmem:[%s14230_s1 + $0x1bb0] sm:$0xff]  ;;  %v938_v1 = vld [vmem:[%s14230_s1 + $0x1bb8] sm:$0xff] }
 0x183   :  { %8213 = vmatpush3.bf16.msra.mxu1 %v8212_v38  ;;  %v878_v38 = vld [vmem:[%s14230_s1 + $0x19d8] sm:$0xff]  ;;  %v904_v33 = vld [vmem:[%s14230_s1 + $0x1aa8] sm:$0xff]  ;;  %v923_v9 = vld [vmem:[%s14230_s1 + $0x1b40] sm:$0xff] }
 0x184   :  { %8247 = vmatprep.subr.bf16.mxu1 %v8246_v46  ;;  %3727 = vmatmul.mubr.f32.vlgmr.msra.gmra.mrb[22].mxu0 %v11431_v61  ;;  %v823_v61 = vld [vmem:[%s14230_s1 + $0x1820] sm:$0xff]  ;;  %v830_v46 = vld [vmem:[%s14230_s1 + $0x1858] sm:$0xff]  ;;  %v8266_v52 = vpack.c.bf16 %v878_v38, %v877_v37  ;;  %v940_v14 = vld [vmem:[%s14230_s1 + $0x1bc8] sm:$0xff] }
 0x185   :  { %8217 = vmatpush3.bf16.msra.mxu0 %v8216_v54  ;;  %3866 = vmatprep.mubr.f32.mxu0 %v1837_v62  ;;  %v8224_v16 = vpack.c.bf16 %v824_v6, %v823_v61  ;;  %v879_v54 = vld [vmem:[%s14230_s1 + $0x19e0] sm:$0xff]  ;;  %v864_v62 = vld [vmem:[%s14230_s1 + $0x1968] sm:$0xff] }
 0x186   :  { %3797 = vmatmul.mubr.f32.vlgmr.msra.gmra.mrb[22].mxu1 %v11440_v63  ;;  %8219 = vmatprep.subr.bf16.mxu0 %v8218_v56  ;;  %v856_v63 = vld [vmem:[%s14230_s1 + $0x1928] sm:$0xff]  ;;  %v8236_v56 = vpack.c.bf16 %v830_v46, %v829_v44  ;;  %v8272_v26 = vpack.c.bf16 %v864_v62, %v863_v51  ;;  %v886_v44 = vld [vmem:[%s14230_s1 + $0x1a18] sm:$0xff]  ;;  %v917_v46 = vld [vmem:[%s14230_s1 + $0x1b10] sm:$0xff] }
 0x187   :  { %8249 = vmatpush3.bf16.msra.mxu1 %v8248_v55  ;;  %3936 = vmatprep.mubr.f32.mxu1 %v1838_v2  ;;  %v8256_v17 = vpack.c.bf16 %v856_v63, %v855_v8  ;;  %v880_v55 = vld [vmem:[%s14230_s1 + $0x19e8] sm:$0xff]  ;;  %v919_v51 = vld [vmem:[%s14230_s1 + $0x1b20] sm:$0xff]  ;;  %v906_v62 = vld [vmem:[%s14230_s1 + $0x1ab8] sm:$0xff] }
 0x188   :  { %8251 = vmatprep.subr.bf16.mxu1 %v8250_v59  ;;  %v832_v59 = vld [vmem:[%s14230_s1 + $0x1868] sm:$0xff]  ;;  %v8270_v10 = vpack.c.bf16 %v880_v55, %v879_v54  ;;  %v935_v54 = vld [vmem:[%s14230_s1 + $0x1ba0] sm:$0xff] }
 0x189   :  { %8221 = vmatpush3.bf16.msra.mxu0 %v8220_v3  ;;  %v8240_v8 = vpack.c.bf16 %v832_v59, %v831_v58  ;;  %v936_v55 = vld [vmem:[%s14230_s1 + $0x1ba8] sm:$0xff]  ;;  %v8286_v58 = vpack.c.bf16 %v904_v33, %v903_v48  ;;  %v911_v39 = vld [vmem:[%s14230_s1 + $0x1ae0] sm:$0xff] }
 0x18a   :  { %8223 = vmatprep.subr.bf16.mxu0 %v8222_v5  ;;  %v882_v5 = vld [vmem:[%s14230_s1 + $0x19f8] sm:$0xff]  ;;  %v888_v59 = vld [vmem:[%s14230_s1 + $0x1a28] sm:$0xff] }
 0x18b   :  { %8253 = vmatpush3.bf16.msra.mxu1 %v8252_v4  ;;  %v881_v4 = vld [vmem:[%s14230_s1 + $0x19f0] sm:$0xff]  ;;  %v912_v36 = vld [vmem:[%s14230_s1 + $0x1ae8] sm:$0xff] }
 0x18c   :  { %8255 = vmatprep.subr.bf16.mxu1 %v8254_v7  ;;  %v40_v7 = vld [vmem:[%s14229_s0 + $0x68] sm:$0xff] }
 0x18d   :  { %8225 = vmatpush3.bf16.msra.mxu0 %v8224_v16  ;;  %v865_v16 = vld [vmem:[%s14230_s1 + $0x1970] sm:$0xff]  ;;  %v1839_v22 = vcombine.high %v40_v7, %v40_v7  ;;  %v11851_v35 = vrot.slane %v40_v7, %v9266_v13  ;;  %v922_v7 = vld [vmem:[%s14230_s1 + $0x1b38] sm:$0xff] }
 0x18e   :  { %8227 = vmatprep.subr.bf16.mxu0 %v8226_v18  ;;  %v8274_v18 = vpack.c.bf16 %v882_v5, %v881_v4  ;;  %v8276_v25 = vpack.c.bf16 %v866_v19, %v865_v16  ;;  %v889_v5 = vld [vmem:[%s14230_s1 + $0x1a30] sm:$0xff]  ;;  %v892_v19 = vld [vmem:[%s14230_s1 + $0x1a48] sm:$0xff] }
 0x18f   :  { %8257 = vmatpush3.bf16.msra.mxu1 %v8256_v17  ;;  %v11860_v37 = vrot.slane %v1839_v22, %v9266_v13  ;;  %v1854_v50 = vcombine.high %v11851_v35, %v11851_v35  ;;  %v910_v22 = vld [vmem:[%s14230_s1 + $0x1ad8] sm:$0xff] }
 0x190   :  { %8259 = vmatprep.subr.bf16.mxu1 %v8258_v21  ;;  %v931_v21 = vld [vmem:[%s14230_s1 + $0x1b80] sm:$0xff] }
 0x191   :  { %8229 = vmatpush3.bf16.msra.mxu0 %v8228_v29  ;;  %v883_v29 = vld [vmem:[%s14230_s1 + $0x1a00] sm:$0xff] }
 0x192   :  { %8231 = vmatprep.subr.bf16.mxu0 %v8230_v30  ;;  %v915_v30 = vld [vmem:[%s14230_s1 + $0x1b00] sm:$0xff] }
 0x193   :  { %8261 = vmatpush3.bf16.msra.mxu1 %v8260_v31  ;;  %v884_v31 = vld [vmem:[%s14230_s1 + $0x1a08] sm:$0xff] }
 0x194   :  { %8263 = vmatprep.subr.bf16.mxu1 %v8262_v34  ;;  %v902_v34 = vld [vmem:[%s14230_s1 + $0x1a98] sm:$0xff]  ;;  %v8280_v38 = vpack.c.bf16 %v884_v31, %v883_v29 }
 0x195   :  { %8233 = vmatpush3.bf16.msra.mxu0 %v8232_v40  ;;  %v8312_v40 = vpack.c.bf16 %v916_v42, %v915_v30  ;;  %v893_v30 = vld [vmem:[%s14230_s1 + $0x1a50] sm:$0xff] }
 0x196   :  { %8235 = vmatprep.subr.bf16.mxu0 %v8234_v43  ;;  %v885_v43 = vld [vmem:[%s14230_s1 + $0x1a10] sm:$0xff] }
 0x197   :  { %8265 = vmatpush3.bf16.msra.mxu1 %v8264_v41  ;;  %v6068_v60 = vpop.f32.mrb[10].mxu0  ;;  %v8282_v41 = vpack.c.bf16 %v902_v34, %v901_v23  ;;  %v925_v42 = vld [vmem:[%s14230_s1 + $0x1b50] sm:$0xff]  ;;  %v926_v34 = vld [vmem:[%s14230_s1 + $0x1b58] sm:$0xff] }
 0x198   :  { %8267 = vmatprep.subr.bf16.mxu1 %v8266_v52  ;;  %v6069_v2 = vpop.f32.mrb[11].mxu0  ;;  %v918_v52 = vld [vmem:[%s14230_s1 + $0x1b18] sm:$0xff] }
 0x199   :  { %v6103_v3 = vpop.f32.mrb[10].mxu1  ;;  %v6070_v61 = vadd.f32 %v6069_v2, %v6068_v60  ;;  %8237 = vmatpush3.bf16.msra.mxu0 %v8236_v56  ;;  %v1855_v56 = vcombine.high %v11860_v37, %v11860_v37  ;;  %v8318_v60 = vpack.c.bf16 %v936_v55, %v935_v54  ;;  %v913_v54 = vld [vmem:[%s14230_s1 + $0x1af0] sm:$0xff]  ;;  %v914_v55 = vld [vmem:[%s14230_s1 + $0x1af8] sm:$0xff] }
 0x19a   :  { %v6104_v6 = vpop.f32.mrb[11].mxu1  ;;  %8239 = vmatprep.subr.bf16.mxu0 %v8238_v45  ;;  %v8316_v45 = vpack.c.bf16 %v918_v52, %v917_v46  ;;  %v895_v46 = vld [vmem:[%s14230_s1 + $0x1a60] sm:$0xff] }
 0x19b   :  { %v6105_v63 = vadd.f32 %v6104_v6, %v6103_v3  ;;  %8269 = vmatpush3.bf16.msra.mxu1 %v8268_v57  ;;  %v2889_v17 = vadd.f32 %v6070_v61, %v11620_v27  ;;  %v932_v27 = vld [vmem:[%s14230_s1 + $0x1b88] sm:$0xff]  ;;  %v8284_v57 = vpack.c.bf16 %v886_v44, %v885_v43  ;;  %v890_v61 = vld [vmem:[%s14230_s1 + $0x1a38] sm:$0xff]  ;;  %v921_v6 = vld [vmem:[%s14230_s1 + $0x1b30] sm:$0xff]  ;;  %v8332_v43 = vpack.c.bf16 %v926_v34, %v925_v42 }
 0x19c   :  { %8271 = vmatprep.subr.bf16.mxu1 %v8270_v10  ;;  %v8310_v32 = vpack.c.bf16 %v932_v27, %v931_v21  ;;  %v905_v10 = vld [vmem:[%s14230_s1 + $0x1ab0] sm:$0xff]  ;;  %v8292_v15 = vpack.c.bf16 %v890_v61, %v889_v5  ;;  %v8324_v16 = vpack.c.bf16 %v922_v7, %v921_v6  ;;  %v924_v21 = vld [vmem:[%s14230_s1 + $0x1b48] sm:$0xff]  ;;  %v8302_v44 = vpack.c.bf16 %v912_v36, %v911_v39  ;;  %v927_v52 = vld [vmem:[%s14230_s1 + $0x1b60] sm:$0xff] }
 0x19d   :  { %v11830_v12 = vadd.f32 %v6105_v63, %v2889_v17  ;;  %8241 = vmatpush3.bf16.msra.mxu0 %v8240_v8  ;;  %v8290_v4 = vpack.c.bf16 %v906_v62, %v905_v10  ;;  %v8322_v8 = vpack.c.bf16 %v938_v1, %v937_v0  ;;  %v907_v63 = vld [vmem:[%s14230_s1 + $0x1ac0] sm:$0xff]  ;;  %v909_v27 = vld [vmem:[%s14230_s1 + $0x1ad0] sm:$0xff]  ;;  %v8328_v29 = vpack.c.bf16 %v924_v21, %v923_v9  ;;  %v898_v1 = vld [vmem:[%s14230_s1 + $0x1a78] sm:$0xff] }
 0x19e   :  { %8243 = vmatprep.subr.bf16.mxu0 %v8242_v11  ;;  %v939_v11 = vld [vmem:[%s14230_s1 + $0x1bc0] sm:$0xff]  ;;  %v8298_v31 = vpack.c.bf16 %v910_v22, %v909_v27  ;;  %v8306_v62 = vpack.c.bf16 %v914_v55, %v913_v54  ;;  %v897_v0 = vld [vmem:[%s14230_s1 + $0x1a70] sm:$0xff]  ;;  %v930_v5 = vld [vmem:[%s14230_s1 + $0x1b78] sm:$0xff] }
 0x19f   :  { %8273 = vmatpush3.bf16.msra.mxu1 %v8272_v26  ;;  %v908_v26 = vld [vmem:[%s14230_s1 + $0x1ac8] sm:$0xff]  ;;  %v8326_v20 = vpack.c.bf16 %v940_v14, %v939_v11  ;;  %v963_v61 = vld [vmem:[%s14230_s1 + $0x1c80] sm:$0xff]  ;;  %v965_v9 = vld [vmem:[%s14230_s1 + $0x1c90] sm:$0xff] }
 0x1a0   :  { %8275 = vmatprep.subr.bf16.mxu1 %v8274_v18  ;;  %v8294_v17 = vpack.c.bf16 %v908_v26, %v907_v63  ;;  %v891_v18 = vld [vmem:[%s14230_s1 + $0x1a40] sm:$0xff]  ;;  %v964_v6 = vld [vmem:[%s14230_s1 + $0x1c88] sm:$0xff]  ;;  %v8308_v26 = vpack.c.bf16 %v898_v1, %v897_v0  ;;  %v997_v27 = vld [vmem:[%s14230_s1 + $0x1d90] sm:$0xff] }
 0x1a1   :  { %8245 = vmatpush3.bf16.msra.mxu0 %v8244_v24  ;;  %v941_v24 = vld [vmem:[%s14230_s1 + $0x1bd0] sm:$0xff]  ;;  %v8342_v14 = vpack.c.bf16 %v964_v6, %v963_v61  ;;  %v998_v22 = vld [vmem:[%s14230_s1 + $0x1d98] sm:$0xff]  ;;  %v967_v34 = vld [vmem:[%s14230_s1 + $0x1ca0] sm:$0xff] }
 0x1a2   :  { %8279 = vmatprep.subr.bf16.mxu0 %v8278_v28  ;;  %v8296_v28 = vpack.c.bf16 %v892_v19, %v891_v18  ;;  %v980_v19 = vld [vmem:[%s14230_s1 + $0x1d08] sm:$0xff]  ;;  %v8378_v42 = vpack.c.bf16 %v998_v22, %v997_v27  ;;  %v1001_v54 = vld [vmem:[%s14230_s1 + $0x1db0] sm:$0xff]  ;;  %v1002_v55 = vld [vmem:[%s14230_s1 + $0x1db8] sm:$0xff] }
 0x1a3   :  { %8277 = vmatpush3.bf16.msra.mxu1 %v8276_v25  ;;  %v942_v25 = vld [vmem:[%s14230_s1 + $0x1bd8] sm:$0xff]  ;;  %v968_v39 = vld [vmem:[%s14230_s1 + $0x1ca8] sm:$0xff]  ;;  %v987_v61 = vld [vmem:[%s14230_s1 + $0x1d40] sm:$0xff] }
 0x1a4   :  { %8311 = vmatprep.subr.bf16.mxu1 %v8310_v32  ;;  %3867 = vmatmul.mubr.f32.vlgmr.msra.gmra.mrb[24].mxu0 %v11641_v49  ;;  %v887_v49 = vld [vmem:[%s14230_s1 + $0x1a20] sm:$0xff]  ;;  %v894_v32 = vld [vmem:[%s14230_s1 + $0x1a58] sm:$0xff]  ;;  %v8330_v23 = vpack.c.bf16 %v942_v25, %v941_v24  ;;  %v1004_v0 = vld [vmem:[%s14230_s1 + $0x1dc8] sm:$0xff] }
 0x1a5   :  { %8281 = vmatpush3.bf16.msra.mxu0 %v8280_v38  ;;  %4006 = vmatprep.mubr.f32.mxu0 %v1854_v50  ;;  %v8288_v2 = vpack.c.bf16 %v888_v59, %v887_v49  ;;  %v943_v38 = vld [vmem:[%s14230_s1 + $0x1be0] sm:$0xff]  ;;  %v928_v50 = vld [vmem:[%s14230_s1 + $0x1b68] sm:$0xff] }
 0x1a6   :  { %3937 = vmatmul.mubr.f32.vlgmr.msra.gmra.mrb[24].mxu1 %v11650_v53  ;;  %8283 = vmatprep.subr.bf16.mxu0 %v8282_v41  ;;  %v920_v53 = vld [vmem:[%s14230_s1 + $0x1b28] sm:$0xff]  ;;  %v8300_v41 = vpack.c.bf16 %v894_v32, %v893_v30  ;;  %v8336_v10 = vpack.c.bf16 %v928_v50, %v927_v52  ;;  %v950_v30 = vld [vmem:[%s14230_s1 + $0x1c18] sm:$0xff]  ;;  %v981_v32 = vld [vmem:[%s14230_s1 + $0x1d10] sm:$0xff] }
 0x1a7   :  { %8313 = vmatpush3.bf16.msra.mxu1 %v8312_v40  ;;  %4076 = vmatprep.mubr.f32.mxu1 %v1855_v56  ;;  %v8320_v3 = vpack.c.bf16 %v920_v53, %v919_v51  ;;  %v944_v40 = vld [vmem:[%s14230_s1 + $0x1be8] sm:$0xff]  ;;  %v983_v52 = vld [vmem:[%s14230_s1 + $0x1d20] sm:$0xff]  ;;  %v970_v50 = vld [vmem:[%s14230_s1 + $0x1cb8] sm:$0xff] }
 0x1a8   :  { %8315 = vmatprep.subr.bf16.mxu1 %v8314_v47  ;;  %v896_v47 = vld [vmem:[%s14230_s1 + $0x1a68] sm:$0xff]  ;;  %v8334_v33 = vpack.c.bf16 %v944_v40, %v943_v38  ;;  %v999_v38 = vld [vmem:[%s14230_s1 + $0x1da0] sm:$0xff] }
 0x1a9   :  { %8285 = vmatpush3.bf16.msra.mxu0 %v8284_v57  ;;  %v8304_v51 = vpack.c.bf16 %v896_v47, %v895_v46  ;;  %v1000_v40 = vld [vmem:[%s14230_s1 + $0x1da8] sm:$0xff]  ;;  %v8350_v46 = vpack.c.bf16 %v968_v39, %v967_v34  ;;  %v975_v27 = vld [vmem:[%s14230_s1 + $0x1ce0] sm:$0xff] }
 0x1aa   :  { %8287 = vmatprep.subr.bf16.mxu0 %v8286_v58  ;;  %v946_v58 = vld [vmem:[%s14230_s1 + $0x1bf8] sm:$0xff]  ;;  %v952_v47 = vld [vmem:[%s14230_s1 + $0x1c28] sm:$0xff] }
 0x1ab   :  { %8317 = vmatpush3.bf16.msra.mxu1 %v8316_v45  ;;  %v945_v45 = vld [vmem:[%s14230_s1 + $0x1bf0] sm:$0xff]  ;;  %v976_v22 = vld [vmem:[%s14230_s1 + $0x1ce8] sm:$0xff] }
 0x1ac   :  { %8319 = vmatprep.subr.bf16.mxu1 %v8318_v60  ;;  %v41_v60 = vld [vmem:[%s14229_s0 + $0x70] sm:$0xff] }
 0x1ad   :  { %8289 = vmatpush3.bf16.msra.mxu0 %v8288_v2  ;;  %v929_v2 = vld [vmem:[%s14230_s1 + $0x1b70] sm:$0xff]  ;;  %v1856_v7 = vcombine.high %v41_v60, %v41_v60  ;;  %v12061_v21 = vrot.slane %v41_v60, %v9266_v13  ;;  %v986_v60 = vld [vmem:[%s14230_s1 + $0x1d38] sm:$0xff] }
 0x1ae   :  { %8291 = vmatprep.subr.bf16.mxu0 %v8290_v4  ;;  %v8338_v4 = vpack.c.bf16 %v946_v58, %v945_v45  ;;  %v8340_v11 = vpack.c.bf16 %v930_v5, %v929_v2  ;;  %v953_v58 = vld [vmem:[%s14230_s1 + $0x1c30] sm:$0xff]  ;;  %v956_v5 = vld [vmem:[%s14230_s1 + $0x1c48] sm:$0xff] }
 0x1af   :  { %8321 = vmatpush3.bf16.msra.mxu1 %v8320_v3  ;;  %v12070_v24 = vrot.slane %v1856_v7, %v9266_v13  ;;  %v1871_v36 = vcombine.high %v12061_v21, %v12061_v21  ;;  %v974_v7 = vld [vmem:[%s14230_s1 + $0x1cd8] sm:$0xff] }
 0x1b0   :  { %8323 = vmatprep.subr.bf16.mxu1 %v8322_v8  ;;  %v995_v8 = vld [vmem:[%s14230_s1 + $0x1d80] sm:$0xff] }
 0x1b1   :  { %8293 = vmatpush3.bf16.msra.mxu0 %v8292_v15  ;;  %v947_v15 = vld [vmem:[%s14230_s1 + $0x1c00] sm:$0xff] }
 0x1b2   :  { %8295 = vmatprep.subr.bf16.mxu0 %v8294_v17  ;;  %v979_v17 = vld [vmem:[%s14230_s1 + $0x1d00] sm:$0xff] }
 0x1b3   :  { %8325 = vmatpush3.bf16.msra.mxu1 %v8324_v16  ;;  %v948_v16 = vld [vmem:[%s14230_s1 + $0x1c08] sm:$0xff] }
 0x1b4   :  { %8327 = vmatprep.subr.bf16.mxu1 %v8326_v20  ;;  %v966_v20 = vld [vmem:[%s14230_s1 + $0x1c98] sm:$0xff]  ;;  %v8344_v25 = vpack.c.bf16 %v948_v16, %v947_v15 }
 0x1b5   :  { %8297 = vmatpush3.bf16.msra.mxu0 %v8296_v28  ;;  %v8376_v28 = vpack.c.bf16 %v980_v19, %v979_v17  ;;  %v957_v17 = vld [vmem:[%s14230_s1 + $0x1c50] sm:$0xff] }
 0x1b6   :  { %8299 = vmatprep.subr.bf16.mxu0 %v8298_v31  ;;  %v949_v31 = vld [vmem:[%s14230_s1 + $0x1c10] sm:$0xff] }
 0x1b7   :  { %8329 = vmatpush3.bf16.msra.mxu1 %v8328_v29  ;;  %v6138_v48 = vpop.f32.mrb[12].mxu0  ;;  %v8346_v29 = vpack.c.bf16 %v966_v20, %v965_v9  ;;  %v989_v19 = vld [vmem:[%s14230_s1 + $0x1d50] sm:$0xff]  ;;  %v990_v20 = vld [vmem:[%s14230_s1 + $0x1d58] sm:$0xff] }
 0x1b8   :  { %8331 = vmatprep.subr.bf16.mxu1 %v8330_v23  ;;  %v6139_v56 = vpop.f32.mrb[13].mxu0  ;;  %v982_v23 = vld [vmem:[%s14230_s1 + $0x1d18] sm:$0xff] }
 0x1b9   :  { %v6173_v57 = vpop.f32.mrb[12].mxu1  ;;  %v6140_v49 = vadd.f32 %v6139_v56, %v6138_v48  ;;  %8301 = vmatpush3.bf16.msra.mxu0 %v8300_v41  ;;  %v1872_v41 = vcombine.high %v12070_v24, %v12070_v24  ;;  %v8382_v48 = vpack.c.bf16 %v1000_v40, %v999_v38  ;;  %v977_v38 = vld [vmem:[%s14230_s1 + $0x1cf0] sm:$0xff]  ;;  %v978_v40 = vld [vmem:[%s14230_s1 + $0x1cf8] sm:$0xff] }
 0x1ba   :  { %v6174_v59 = vpop.f32.mrb[13].mxu1  ;;  %8303 = vmatprep.subr.bf16.mxu0 %v8302_v44  ;;  %v8380_v44 = vpack.c.bf16 %v982_v23, %v981_v32  ;;  %v959_v32 = vld [vmem:[%s14230_s1 + $0x1c60] sm:$0xff] }
 0x1bb   :  { %v6175_v53 = vadd.f32 %v6174_v59, %v6173_v57  ;;  %8333 = vmatpush3.bf16.msra.mxu1 %v8332_v43  ;;  %v3029_v3 = vadd.f32 %v6140_v49, %v11830_v12  ;;  %v996_v12 = vld [vmem:[%s14230_s1 + $0x1d88] sm:$0xff]  ;;  %v8348_v43 = vpack.c.bf16 %v950_v30, %v949_v31  ;;  %v954_v49 = vld [vmem:[%s14230_s1 + $0x1c38] sm:$0xff]  ;;  %v985_v59 = vld [vmem:[%s14230_s1 + $0x1d30] sm:$0xff]  ;;  %v8396_v31 = vpack.c.bf16 %v990_v20, %v989_v19 }
 0x1bc   :  { %8335 = vmatprep.subr.bf16.mxu1 %v8334_v33  ;;  %v8374_v18 = vpack.c.bf16 %v996_v12, %v995_v8  ;;  %v969_v33 = vld [vmem:[%s14230_s1 + $0x1cb0] sm:$0xff]  ;;  %v8356_v1 = vpack.c.bf16 %v954_v49, %v953_v58  ;;  %v8388_v2 = vpack.c.bf16 %v986_v60, %v985_v59  ;;  %v988_v8 = vld [vmem:[%s14230_s1 + $0x1d48] sm:$0xff]  ;;  %v8366_v30 = vpack.c.bf16 %v976_v22, %v975_v27  ;;  %v991_v23 = vld [vmem:[%s14230_s1 + $0x1d60] sm:$0xff] }
 0x1bd   :  { %v12040_v63 = vadd.f32 %v6175_v53, %v3029_v3  ;;  %8305 = vmatpush3.bf16.msra.mxu0 %v8304_v51  ;;  %v8354_v45 = vpack.c.bf16 %v970_v50, %v969_v33  ;;  %v8386_v51 = vpack.c.bf16 %v1002_v55, %v1001_v54  ;;  %v971_v53 = vld [vmem:[%s14230_s1 + $0x1cc0] sm:$0xff]  ;;  %v973_v12 = vld [vmem:[%s14230_s1 + $0x1cd0] sm:$0xff]  ;;  %v8392_v15 = vpack.c.bf16 %v988_v8, %v987_v61  ;;  %v962_v55 = vld [vmem:[%s14230_s1 + $0x1c78] sm:$0xff] }
 0x1be   :  { %8307 = vmatprep.subr.bf16.mxu0 %v8306_v62  ;;  %v1003_v62 = vld [vmem:[%s14230_s1 + $0x1dc0] sm:$0xff]  ;;  %v8362_v16 = vpack.c.bf16 %v974_v7, %v973_v12  ;;  %v8370_v50 = vpack.c.bf16 %v978_v40, %v977_v38  ;;  %v961_v54 = vld [vmem:[%s14230_s1 + $0x1c70] sm:$0xff]  ;;  %v994_v58 = vld [vmem:[%s14230_s1 + $0x1d78] sm:$0xff] }
 0x1bf   :  { %8337 = vmatpush3.bf16.msra.mxu1 %v8336_v10  ;;  %v972_v10 = vld [vmem:[%s14230_s1 + $0x1cc8] sm:$0xff]  ;;  %v8390_v6 = vpack.c.bf16 %v1004_v0, %v1003_v62  ;;  %v1027_v49 = vld [vmem:[%s14230_s1 + $0x1e80] sm:$0xff]  ;;  %v1029_v61 = vld [vmem:[%s14230_s1 + $0x1e90] sm:$0xff] }
 0x1c0   :  { %8339 = vmatprep.subr.bf16.mxu1 %v8338_v4  ;;  %v8358_v3 = vpack.c.bf16 %v972_v10, %v971_v53  ;;  %v955_v4 = vld [vmem:[%s14230_s1 + $0x1c40] sm:$0xff]  ;;  %v1028_v59 = vld [vmem:[%s14230_s1 + $0x1e88] sm:$0xff]  ;;  %v8372_v10 = vpack.c.bf16 %v962_v55, %v961_v54  ;;  %v1061_v12 = vld [vmem:[%s14230_s1 + $0x1f90] sm:$0xff] }
 0x1c1   :  { %8309 = vmatpush3.bf16.msra.mxu0 %v8308_v26  ;;  %v1005_v26 = vld [vmem:[%s14230_s1 + $0x1dd0] sm:$0xff]  ;;  %v8406_v0 = vpack.c.bf16 %v1028_v59, %v1027_v49  ;;  %v1062_v7 = vld [vmem:[%s14230_s1 + $0x1f98] sm:$0xff]  ;;  %v1031_v20 = vld [vmem:[%s14230_s1 + $0x1ea0] sm:$0xff] }
 0x1c2   :  { %8343 = vmatprep.subr.bf16.mxu0 %v8342_v14  ;;  %v8360_v14 = vpack.c.bf16 %v956_v5, %v955_v4  ;;  %v1044_v5 = vld [vmem:[%s14230_s1 + $0x1f08] sm:$0xff]  ;;  %v8442_v19 = vpack.c.bf16 %v1062_v7, %v1061_v12  ;;  %v1065_v38 = vld [vmem:[%s14230_s1 + $0x1fb0] sm:$0xff]  ;;  %v1066_v40 = vld [vmem:[%s14230_s1 + $0x1fb8] sm:$0xff] }
 0x1c3   :  { %8341 = vmatpush3.bf16.msra.mxu1 %v8340_v11  ;;  %v1006_v11 = vld [vmem:[%s14230_s1 + $0x1dd8] sm:$0xff]  ;;  %v1032_v27 = vld [vmem:[%s14230_s1 + $0x1ea8] sm:$0xff]  ;;  %v1051_v49 = vld [vmem:[%s14230_s1 + $0x1f40] sm:$0xff] }
 0x1c4   :  { %8375 = vmatprep.subr.bf16.mxu1 %v8374_v18  ;;  %4007 = vmatmul.mubr.f32.vlgmr.msra.gmra.mrb[26].mxu0 %v11851_v35  ;;  %v951_v35 = vld [vmem:[%s14230_s1 + $0x1c20] sm:$0xff]  ;;  %v958_v18 = vld [vmem:[%s14230_s1 + $0x1c58] sm:$0xff]  ;;  %v8394_v9 = vpack.c.bf16 %v1006_v11, %v1005_v26  ;;  %v1068_v54 = vld [vmem:[%s14230_s1 + $0x1fc8] sm:$0xff] }
 0x1c5   :  { %8345 = vmatpush3.bf16.msra.mxu0 %v8344_v25  ;;  %4146 = vmatprep.mubr.f32.mxu0 %v1871_v36  ;;  %v8352_v56 = vpack.c.bf16 %v952_v47, %v951_v35  ;;  %v1007_v25 = vld [vmem:[%s14230_s1 + $0x1de0] sm:$0xff]  ;;  %v992_v36 = vld [vmem:[%s14230_s1 + $0x1d68] sm:$0xff] }
 0x1c6   :  { %4077 = vmatmul.mubr.f32.vlgmr.msra.gmra.mrb[26].mxu1 %v11860_v37  ;;  %8347 = vmatprep.subr.bf16.mxu0 %v8346_v29  ;;  %v984_v37 = vld [vmem:[%s14230_s1 + $0x1d28] sm:$0xff]  ;;  %v8364_v29 = vpack.c.bf16 %v958_v18, %v957_v17  ;;  %v8400_v33 = vpack.c.bf16 %v992_v36, %v991_v23  ;;  %v1014_v17 = vld [vmem:[%s14230_s1 + $0x1e18] sm:$0xff]  ;;  %v1045_v18 = vld [vmem:[%s14230_s1 + $0x1f10] sm:$0xff] }
 0x1c7   :  { %8377 = vmatpush3.bf16.msra.mxu1 %v8376_v28  ;;  %4216 = vmatprep.mubr.f32.mxu1 %v1872_v41  ;;  %v8384_v57 = vpack.c.bf16 %v984_v37, %v983_v52  ;;  %v1008_v28 = vld [vmem:[%s14230_s1 + $0x1de8] sm:$0xff]  ;;  %v1047_v23 = vld [vmem:[%s14230_s1 + $0x1f20] sm:$0xff]  ;;  %v1034_v36 = vld [vmem:[%s14230_s1 + $0x1eb8] sm:$0xff] }
 0x1c8   :  { %8379 = vmatprep.subr.bf16.mxu1 %v8378_v42  ;;  %v960_v42 = vld [vmem:[%s14230_s1 + $0x1c68] sm:$0xff]  ;;  %v8398_v39 = vpack.c.bf16 %v1008_v28, %v1007_v25  ;;  %v1063_v25 = vld [vmem:[%s14230_s1 + $0x1fa0] sm:$0xff] }
 0x1c9   :  { %8349 = vmatpush3.bf16.msra.mxu0 %v8348_v43  ;;  %v8368_v52 = vpack.c.bf16 %v960_v42, %v959_v32  ;;  %v1064_v28 = vld [vmem:[%s14230_s1 + $0x1fa8] sm:$0xff]  ;;  %v8414_v32 = vpack.c.bf16 %v1032_v27, %v1031_v20  ;;  %v1039_v12 = vld [vmem:[%s14230_s1 + $0x1ee0] sm:$0xff] }
 0x1ca   :  { %8351 = vmatprep.subr.bf16.mxu0 %v8350_v46  ;;  %v1010_v46 = vld [vmem:[%s14230_s1 + $0x1df8] sm:$0xff]  ;;  %v1016_v42 = vld [vmem:[%s14230_s1 + $0x1e28] sm:$0xff] }
 0x1cb   :  { %8381 = vmatpush3.bf16.msra.mxu1 %v8380_v44  ;;  %v1009_v44 = vld [vmem:[%s14230_s1 + $0x1df0] sm:$0xff]  ;;  %v1040_v7 = vld [vmem:[%s14230_s1 + $0x1ee8] sm:$0xff] }
 0x1cc   :  { %8383 = vmatprep.subr.bf16.mxu1 %v8382_v48  ;;  %v42_v48 = vld [vmem:[%s14229_s0 + $0x78] sm:$0xff] }
 0x1cd   :  { %8353 = vmatpush3.bf16.msra.mxu0 %v8352_v56  ;;  %v993_v56 = vld [vmem:[%s14230_s1 + $0x1d70] sm:$0xff]  ;;  %v1873_v60 = vcombine.high %v42_v48, %v42_v48  ;;  %v12271_v8 = vrot.slane %v42_v48, %v9266_v13  ;;  %v1050_v48 = vld [vmem:[%s14230_s1 + $0x1f38] sm:$0xff] }
 0x1ce   :  { %8355 = vmatprep.subr.bf16.mxu0 %v8354_v45  ;;  %v8402_v45 = vpack.c.bf16 %v1010_v46, %v1009_v44  ;;  %v8404_v62 = vpack.c.bf16 %v994_v58, %v993_v56  ;;  %v1017_v46 = vld [vmem:[%s14230_s1 + $0x1e30] sm:$0xff]  ;;  %v1020_v58 = vld [vmem:[%s14230_s1 + $0x1e48] sm:$0xff] }
 0x1cf   :  { %8385 = vmatpush3.bf16.msra.mxu1 %v8384_v57  ;;  %v12280_v26 = vrot.slane %v1873_v60, %v9266_v13  ;;  %v1888_v22 = vcombine.high %v12271_v8, %v12271_v8  ;;  %v1038_v60 = vld [vmem:[%s14230_s1 + $0x1ed8] sm:$0xff] }
 0x1d0   :  { %8387 = vmatprep.subr.bf16.mxu1 %v8386_v51  ;;  %v1059_v51 = vld [vmem:[%s14230_s1 + $0x1f80] sm:$0xff] }
 0x1d1   :  { %8357 = vmatpush3.bf16.msra.mxu0 %v8356_v1  ;;  %v1011_v1 = vld [vmem:[%s14230_s1 + $0x1e00] sm:$0xff] }
 0x1d2   :  { %8359 = vmatprep.subr.bf16.mxu0 %v8358_v3  ;;  %v1043_v3 = vld [vmem:[%s14230_s1 + $0x1f00] sm:$0xff] }
 0x1d3   :  { %8389 = vmatpush3.bf16.msra.mxu1 %v8388_v2  ;;  %v1012_v2 = vld [vmem:[%s14230_s1 + $0x1e08] sm:$0xff] }
 0x1d4   :  { %8391 = vmatprep.subr.bf16.mxu1 %v8390_v6  ;;  %v1030_v6 = vld [vmem:[%s14230_s1 + $0x1e98] sm:$0xff]  ;;  %v8408_v11 = vpack.c.bf16 %v1012_v2, %v1011_v1 }
 0x1d5   :  { %8361 = vmatpush3.bf16.msra.mxu0 %v8360_v14  ;;  %v8440_v14 = vpack.c.bf16 %v1044_v5, %v1043_v3  ;;  %v1021_v3 = vld [vmem:[%s14230_s1 + $0x1e50] sm:$0xff] }
 0x1d6   :  { %8363 = vmatprep.subr.bf16.mxu0 %v8362_v16  ;;  %v1013_v16 = vld [vmem:[%s14230_s1 + $0x1e10] sm:$0xff] }
 0x1d7   :  { %8393 = vmatpush3.bf16.msra.mxu1 %v8392_v15  ;;  %v6208_v34 = vpop.f32.mrb[14].mxu0  ;;  %v8410_v15 = vpack.c.bf16 %v1030_v6, %v1029_v61  ;;  %v1053_v5 = vld [vmem:[%s14230_s1 + $0x1f50] sm:$0xff]  ;;  %v1054_v6 = vld [vmem:[%s14230_s1 + $0x1f58] sm:$0xff] }
 0x1d8   :  { %8395 = vmatprep.subr.bf16.mxu1 %v8394_v9  ;;  %v6209_v41 = vpop.f32.mrb[15].mxu0  ;;  %v1046_v9 = vld [vmem:[%s14230_s1 + $0x1f18] sm:$0xff] }
 0x1d9   :  { %v6243_v43 = vpop.f32.mrb[14].mxu1  ;;  %v6210_v35 = vadd.f32 %v6209_v41, %v6208_v34  ;;  %8365 = vmatpush3.bf16.msra.mxu0 %v8364_v29  ;;  %v1889_v29 = vcombine.high %v12280_v26, %v12280_v26  ;;  %v8446_v34 = vpack.c.bf16 %v1064_v28, %v1063_v25  ;;  %v1041_v25 = vld [vmem:[%s14230_s1 + $0x1ef0] sm:$0xff]  ;;  %v1042_v28 = vld [vmem:[%s14230_s1 + $0x1ef8] sm:$0xff] }
 0x1da   :  { %v6244_v47 = vpop.f32.mrb[15].mxu1  ;;  %8367 = vmatprep.subr.bf16.mxu0 %v8366_v30  ;;  %v8444_v30 = vpack.c.bf16 %v1046_v9, %v1045_v18  ;;  %v1023_v18 = vld [vmem:[%s14230_s1 + $0x1e60] sm:$0xff] }
 0x1db   :  { %v6245_v37 = vadd.f32 %v6244_v47, %v6243_v43  ;;  %8397 = vmatpush3.bf16.msra.mxu1 %v8396_v31  ;;  %v3169_v57 = vadd.f32 %v6210_v35, %v12040_v63  ;;  %v1060_v63 = vld [vmem:[%s14230_s1 + $0x1f88] sm:$0xff]  ;;  %v8412_v31 = vpack.c.bf16 %v1014_v17, %v1013_v16  ;;  %v1018_v35 = vld [vmem:[%s14230_s1 + $0x1e38] sm:$0xff]  ;;  %v1049_v47 = vld [vmem:[%s14230_s1 + $0x1f30] sm:$0xff]  ;;  %v8460_v16 = vpack.c.bf16 %v1054_v6, %v1053_v5 }
 0x1dc   :  { %8399 = vmatprep.subr.bf16.mxu1 %v8398_v39  ;;  %v8438_v4 = vpack.c.bf16 %v1060_v63, %v1059_v51  ;;  %v1033_v39 = vld [vmem:[%s14230_s1 + $0x1eb0] sm:$0xff]  ;;  %v8420_v55 = vpack.c.bf16 %v1018_v35, %v1017_v46  ;;  %v8452_v56 = vpack.c.bf16 %v1050_v48, %v1049_v47  ;;  %v1052_v51 = vld [vmem:[%s14230_s1 + $0x1f48] sm:$0xff]  ;;  %v8430_v17 = vpack.c.bf16 %v1040_v7, %v1039_v12  ;;  %v1055_v9 = vld [vmem:[%s14230_s1 + $0x1f60] sm:$0xff] }
 0x1dd   :  { %v12250_v53 = vadd.f32 %v6245_v37, %v3169_v57  ;;  %8369 = vmatpush3.bf16.msra.mxu0 %v8368_v52  ;;  %v8418_v44 = vpack.c.bf16 %v1034_v36, %v1033_v39  ;;  %v8450_v52 = vpack.c.bf16 %v1066_v40, %v1065_v38  ;;  %v1035_v37 = vld [vmem:[%s14230_s1 + $0x1ec0] sm:$0xff]  ;;  %v1037_v63 = vld [vmem:[%s14230_s1 + $0x1ed0] sm:$0xff]  ;;  %v8456_v1 = vpack.c.bf16 %v1052_v51, %v1051_v49  ;;  %v1026_v40 = vld [vmem:[%s14230_s1 + $0x1e78] sm:$0xff] }
 0x1de   :  { %8371 = vmatprep.subr.bf16.mxu0 %v8370_v50  ;;  %v1067_v50 = vld [vmem:[%s14230_s1 + $0x1fc0] sm:$0xff]  ;;  %v8426_v2 = vpack.c.bf16 %v1038_v60, %v1037_v63  ;;  %v8434_v36 = vpack.c.bf16 %v1042_v28, %v1041_v25  ;;  %v1025_v38 = vld [vmem:[%s14230_s1 + $0x1e70] sm:$0xff]  ;;  %v1058_v46 = vld [vmem:[%s14230_s1 + $0x1f78] sm:$0xff] }
 0x1df   :  { %8401 = vmatpush3.bf16.msra.mxu1 %v8400_v33  ;;  %v1036_v33 = vld [vmem:[%s14230_s1 + $0x1ec8] sm:$0xff]  ;;  %v8454_v59 = vpack.c.bf16 %v1068_v54, %v1067_v50  ;;  %v1091_v35 = vld [vmem:[%s14230_s1 + $0x2080] sm:$0xff]  ;;  %v1093_v49 = vld [vmem:[%s14230_s1 + $0x2090] sm:$0xff] }
 0x1e0   :  { %8403 = vmatprep.subr.bf16.mxu1 %v8402_v45  ;;  %v8422_v57 = vpack.c.bf16 %v1036_v33, %v1035_v37  ;;  %v1019_v45 = vld [vmem:[%s14230_s1 + $0x1e40] sm:$0xff]  ;;  %v1092_v47 = vld [vmem:[%s14230_s1 + $0x2088] sm:$0xff]  ;;  %v8436_v33 = vpack.c.bf16 %v1026_v40, %v1025_v38  ;;  %v1125_v63 = vld [vmem:[%s14230_s1 + $0x2190] sm:$0xff] }
 0x1e1   :  { %8373 = vmatpush3.bf16.msra.mxu0 %v8372_v10  ;;  %v1069_v10 = vld [vmem:[%s14230_s1 + $0x1fd0] sm:$0xff]  ;;  %v8470_v54 = vpack.c.bf16 %v1092_v47, %v1091_v35  ;;  %v1126_v60 = vld [vmem:[%s14230_s1 + $0x2198] sm:$0xff]  ;;  %v1095_v6 = vld [vmem:[%s14230_s1 + $0x20a0] sm:$0xff] }
 0x1e2   :  { %8407 = vmatprep.subr.bf16.mxu0 %v8406_v0  ;;  %v8424_v0 = vpack.c.bf16 %v1020_v58, %v1019_v45  ;;  %v1108_v58 = vld [vmem:[%s14230_s1 + $0x2108] sm:$0xff]  ;;  %v8506_v5 = vpack.c.bf16 %v1126_v60, %v1125_v63  ;;  %v1129_v25 = vld [vmem:[%s14230_s1 + $0x21b0] sm:$0xff]  ;;  %v1130_v28 = vld [vmem:[%s14230_s1 + $0x21b8] sm:$0xff] }
 0x1e3   :  { %8405 = vmatpush3.bf16.msra.mxu1 %v8404_v62  ;;  %v1070_v62 = vld [vmem:[%s14230_s1 + $0x1fd8] sm:$0xff]  ;;  %v1096_v12 = vld [vmem:[%s14230_s1 + $0x20a8] sm:$0xff]  ;;  %v1115_v35 = vld [vmem:[%s14230_s1 + $0x2140] sm:$0xff] }
 0x1e4   :  { %8439 = vmatprep.subr.bf16.mxu1 %v8438_v4  ;;  %4147 = vmatmul.mubr.f32.vlgmr.msra.gmra.mrb[28].mxu0 %v12061_v21  ;;  %v1015_v21 = vld [vmem:[%s14230_s1 + $0x1e20] sm:$0xff]  ;;  %v1022_v4 = vld [vmem:[%s14230_s1 + $0x1e58] sm:$0xff]  ;;  %v8458_v61 = vpack.c.bf16 %v1070_v62, %v1069_v10  ;;  %v1132_v38 = vld [vmem:[%s14230_s1 + $0x21c8] sm:$0xff] }
 0x1e5   :  { %8409 = vmatpush3.bf16.msra.mxu0 %v8408_v11  ;;  %4286 = vmatprep.mubr.f32.mxu0 %v1888_v22  ;;  %v8416_v41 = vpack.c.bf16 %v1016_v42, %v1015_v21  ;;  %v1071_v11 = vld [vmem:[%s14230_s1 + $0x1fe0] sm:$0xff]  ;;  %v1056_v22 = vld [vmem:[%s14230_s1 + $0x1f68] sm:$0xff] }
 0x1e6   :  { %4217 = vmatmul.mubr.f32.vlgmr.msra.gmra.mrb[28].mxu1 %v12070_v24  ;;  %8411 = vmatprep.subr.bf16.mxu0 %v8410_v15  ;;  %v1048_v24 = vld [vmem:[%s14230_s1 + $0x1f28] sm:$0xff]  ;;  %v8428_v15 = vpack.c.bf16 %v1022_v4, %v1021_v3  ;;  %v8464_v39 = vpack.c.bf16 %v1056_v22, %v1055_v9  ;;  %v1078_v3 = vld [vmem:[%s14230_s1 + $0x2018] sm:$0xff]  ;;  %v1109_v4 = vld [vmem:[%s14230_s1 + $0x2110] sm:$0xff] }
 0x1e7   :  { %8441 = vmatpush3.bf16.msra.mxu1 %v8440_v14  ;;  %4356 = vmatprep.mubr.f32.mxu1 %v1889_v29  ;;  %v8448_v43 = vpack.c.bf16 %v1048_v24, %v1047_v23  ;;  %v1072_v14 = vld [vmem:[%s14230_s1 + $0x1fe8] sm:$0xff]  ;;  %v1111_v9 = vld [vmem:[%s14230_s1 + $0x2120] sm:$0xff]  ;;  %v1098_v22 = vld [vmem:[%s14230_s1 + $0x20b8] sm:$0xff] }
 0x1e8   :  { %8443 = vmatprep.subr.bf16.mxu1 %v8442_v19  ;;  %v1024_v19 = vld [vmem:[%s14230_s1 + $0x1e68] sm:$0xff]  ;;  %v8462_v27 = vpack.c.bf16 %v1072_v14, %v1071_v11  ;;  %v1127_v11 = vld [vmem:[%s14230_s1 + $0x21a0] sm:$0xff] }
 0x1e9   :  { %8413 = vmatpush3.bf16.msra.mxu0 %v8412_v31  ;;  %v8432_v23 = vpack.c.bf16 %v1024_v19, %v1023_v18  ;;  %v1128_v14 = vld [vmem:[%s14230_s1 + $0x21a8] sm:$0xff]  ;;  %v8478_v18 = vpack.c.bf16 %v1096_v12, %v1095_v6  ;;  %v1103_v63 = vld [vmem:[%s14230_s1 + $0x20e0] sm:$0xff] }
 0x1ea   :  { %8415 = vmatprep.subr.bf16.mxu0 %v8414_v32  ;;  %v1074_v32 = vld [vmem:[%s14230_s1 + $0x1ff8] sm:$0xff]  ;;  %v1080_v19 = vld [vmem:[%s14230_s1 + $0x2028] sm:$0xff] }
 0x1eb   :  { %8445 = vmatpush3.bf16.msra.mxu1 %v8444_v30  ;;  %v1073_v30 = vld [vmem:[%s14230_s1 + $0x1ff0] sm:$0xff]  ;;  %v1104_v60 = vld [vmem:[%s14230_s1 + $0x20e8] sm:$0xff] }
 0x1ec   :  { %8447 = vmatprep.subr.bf16.mxu1 %v8446_v34  ;;  %v43_v34 = vld [vmem:[%s14229_s0 + $0x80] sm:$0xff] }
 0x1ed   :  { %8417 = vmatpush3.bf16.msra.mxu0 %v8416_v41  ;;  %v1057_v41 = vld [vmem:[%s14230_s1 + $0x1f70] sm:$0xff]  ;;  %v1890_v48 = vcombine.high %v43_v34, %v43_v34  ;;  %v12481_v51 = vrot.slane %v43_v34, %v9266_v13  ;;  %v1114_v34 = vld [vmem:[%s14230_s1 + $0x2138] sm:$0xff] }
 0x1ee   :  { %8419 = vmatprep.subr.bf16.mxu0 %v8418_v44  ;;  %v8466_v44 = vpack.c.bf16 %v1074_v32, %v1073_v30  ;;  %v8468_v50 = vpack.c.bf16 %v1058_v46, %v1057_v41  ;;  %v1081_v32 = vld [vmem:[%s14230_s1 + $0x2030] sm:$0xff]  ;;  %v1084_v46 = vld [vmem:[%s14230_s1 + $0x2048] sm:$0xff] }
 0x1ef   :  { %8449 = vmatpush3.bf16.msra.mxu1 %v8448_v43  ;;  %v12490_v10 = vrot.slane %v1890_v48, %v9266_v13  ;;  %v1905_v7 = vcombine.high %v12481_v51, %v12481_v51  ;;  %v1102_v48 = vld [vmem:[%s14230_s1 + $0x20d8] sm:$0xff] }
 0x1f0   :  { %8451 = vmatprep.subr.bf16.mxu1 %v8450_v52  ;;  %v1123_v52 = vld [vmem:[%s14230_s1 + $0x2180] sm:$0xff] }
 0x1f1   :  { %8421 = vmatpush3.bf16.msra.mxu0 %v8420_v55  ;;  %v1075_v55 = vld [vmem:[%s14230_s1 + $0x2000] sm:$0xff] }
 0x1f2   :  { %8423 = vmatprep.subr.bf16.mxu0 %v8422_v57  ;;  %v1107_v57 = vld [vmem:[%s14230_s1 + $0x2100] sm:$0xff] }
 0x1f3   :  { %8453 = vmatpush3.bf16.msra.mxu1 %v8452_v56  ;;  %v1076_v56 = vld [vmem:[%s14230_s1 + $0x2008] sm:$0xff] }
 0x1f4   :  { %8455 = vmatprep.subr.bf16.mxu1 %v8454_v59  ;;  %v1094_v59 = vld [vmem:[%s14230_s1 + $0x2098] sm:$0xff]  ;;  %v8472_v62 = vpack.c.bf16 %v1076_v56, %v1075_v55 }
 0x1f5   :  { %8425 = vmatpush3.bf16.msra.mxu0 %v8424_v0  ;;  %v8504_v0 = vpack.c.bf16 %v1108_v58, %v1107_v57  ;;  %v1085_v57 = vld [vmem:[%s14230_s1 + $0x2050] sm:$0xff] }
 0x1f6   :  { %8427 = vmatprep.subr.bf16.mxu0 %v8426_v2  ;;  %v1077_v2 = vld [vmem:[%s14230_s1 + $0x2010] sm:$0xff] }
 0x1f7   :  { %8457 = vmatpush3.bf16.msra.mxu1 %v8456_v1  ;;  %v6278_v20 = vpop.f32.mrb[16].mxu0  ;;  %v8474_v1 = vpack.c.bf16 %v1094_v59, %v1093_v49  ;;  %v1117_v58 = vld [vmem:[%s14230_s1 + $0x2150] sm:$0xff]  ;;  %v1118_v59 = vld [vmem:[%s14230_s1 + $0x2158] sm:$0xff] }
 0x1f8   :  { %8459 = vmatprep.subr.bf16.mxu1 %v8458_v61  ;;  %v6279_v29 = vpop.f32.mrb[17].mxu0  ;;  %v1110_v61 = vld [vmem:[%s14230_s1 + $0x2118] sm:$0xff] }
 0x1f9   :  { %v6313_v31 = vpop.f32.mrb[16].mxu1  ;;  %v6280_v21 = vadd.f32 %v6279_v29, %v6278_v20  ;;  %8429 = vmatpush3.bf16.msra.mxu0 %v8428_v15  ;;  %v1906_v15 = vcombine.high %v12490_v10, %v12490_v10  ;;  %v8510_v20 = vpack.c.bf16 %v1128_v14, %v1127_v11  ;;  %v1105_v11 = vld [vmem:[%s14230_s1 + $0x20f0] sm:$0xff]  ;;  %v1106_v14 = vld [vmem:[%s14230_s1 + $0x20f8] sm:$0xff] }
 0x1fa   :  { %v6314_v42 = vpop.f32.mrb[17].mxu1  ;;  %8431 = vmatprep.subr.bf16.mxu0 %v8430_v17  ;;  %v8508_v17 = vpack.c.bf16 %v1110_v61, %v1109_v4  ;;  %v1087_v4 = vld [vmem:[%s14230_s1 + $0x2060] sm:$0xff] }
 0x1fb   :  { %v6315_v24 = vadd.f32 %v6314_v42, %v6313_v31  ;;  %8461 = vmatpush3.bf16.msra.mxu1 %v8460_v16  ;;  %v3309_v43 = vadd.f32 %v6280_v21, %v12250_v53  ;;  %v1124_v53 = vld [vmem:[%s14230_s1 + $0x2188] sm:$0xff]  ;;  %v8476_v16 = vpack.c.bf16 %v1078_v3, %v1077_v2  ;;  %v1082_v21 = vld [vmem:[%s14230_s1 + $0x2038] sm:$0xff]  ;;  %v1113_v42 = vld [vmem:[%s14230_s1 + $0x2130] sm:$0xff]  ;;  %v8524_v2 = vpack.c.bf16 %v1118_v59, %v1117_v58 }
 0x1fc   :  { %8463 = vmatprep.subr.bf16.mxu1 %v8462_v27  ;;  %v8502_v45 = vpack.c.bf16 %v1124_v53, %v1123_v52  ;;  %v1097_v27 = vld [vmem:[%s14230_s1 + $0x20b0] sm:$0xff]  ;;  %v8484_v40 = vpack.c.bf16 %v1082_v21, %v1081_v32  ;;  %v8516_v41 = vpack.c.bf16 %v1114_v34, %v1113_v42  ;;  %v1116_v52 = vld [vmem:[%s14230_s1 + $0x2148] sm:$0xff]  ;;  %v8494_v3 = vpack.c.bf16 %v1104_v60, %v1103_v63  ;;  %v1119_v61 = vld [vmem:[%s14230_s1 + $0x2160] sm:$0xff] }
 0x1fd   :  { %v12460_v37 = vadd.f32 %v6315_v24, %v3309_v43  ;;  %8433 = vmatpush3.bf16.msra.mxu0 %v8432_v23  ;;  %v8482_v30 = vpack.c.bf16 %v1098_v22, %v1097_v27  ;;  %v8514_v23 = vpack.c.bf16 %v1130_v28, %v1129_v25  ;;  %v1099_v24 = vld [vmem:[%s14230_s1 + $0x20c0] sm:$0xff]  ;;  %v1101_v53 = vld [vmem:[%s14230_s1 + $0x20d0] sm:$0xff]  ;;  %v8520_v55 = vpack.c.bf16 %v1116_v52, %v1115_v35  ;;  %v1090_v28 = vld [vmem:[%s14230_s1 + $0x2078] sm:$0xff] }
 0x1fe   :  { %8435 = vmatprep.subr.bf16.mxu0 %v8434_v36  ;;  %v1131_v36 = vld [vmem:[%s14230_s1 + $0x21c0] sm:$0xff]  ;;  %v8490_v56 = vpack.c.bf16 %v1102_v48, %v1101_v53  ;;  %v8498_v22 = vpack.c.bf16 %v1106_v14, %v1105_v11  ;;  %v1089_v25 = vld [vmem:[%s14230_s1 + $0x2070] sm:$0xff]  ;;  %v1122_v32 = vld [vmem:[%s14230_s1 + $0x2178] sm:$0xff] }
 0x1ff   :  { %8465 = vmatpush3.bf16.msra.mxu1 %v8464_v39  ;;  %v1100_v39 = vld [vmem:[%s14230_s1 + $0x20c8] sm:$0xff]  ;;  %v8518_v47 = vpack.c.bf16 %v1132_v38, %v1131_v36  ;;  %v1155_v21 = vld [vmem:[%s14230_s1 + $0x2280] sm:$0xff]  ;;  %v1157_v35 = vld [vmem:[%s14230_s1 + $0x2290] sm:$0xff] }
 0x200   :  { %8467 = vmatprep.subr.bf16.mxu1 %v8466_v44  ;;  %v8486_v43 = vpack.c.bf16 %v1100_v39, %v1099_v24  ;;  %v1083_v44 = vld [vmem:[%s14230_s1 + $0x2040] sm:$0xff]  ;;  %v1156_v42 = vld [vmem:[%s14230_s1 + $0x2288] sm:$0xff]  ;;  %v8500_v39 = vpack.c.bf16 %v1090_v28, %v1089_v25  ;;  %v1189_v53 = vld [vmem:[%s14230_s1 + $0x2390] sm:$0xff] }
 0x201   :  { %8437 = vmatpush3.bf16.msra.mxu0 %v8436_v33  ;;  %v1133_v33 = vld [vmem:[%s14230_s1 + $0x21d0] sm:$0xff]  ;;  %v8534_v38 = vpack.c.bf16 %v1156_v42, %v1155_v21  ;;  %v1190_v48 = vld [vmem:[%s14230_s1 + $0x2398] sm:$0xff]  ;;  %v1159_v59 = vld [vmem:[%s14230_s1 + $0x22a0] sm:$0xff] }
 0x202   :  { %8471 = vmatprep.subr.bf16.mxu0 %v8470_v54  ;;  %v8488_v54 = vpack.c.bf16 %v1084_v46, %v1083_v44  ;;  %v1172_v46 = vld [vmem:[%s14230_s1 + $0x2308] sm:$0xff]  ;;  %v8570_v58 = vpack.c.bf16 %v1190_v48, %v1189_v53  ;;  %v1193_v11 = vld [vmem:[%s14230_s1 + $0x23b0] sm:$0xff]  ;;  %v1194_v14 = vld [vmem:[%s14230_s1 + $0x23b8] sm:$0xff] }
 0x203   :  { %8469 = vmatpush3.bf16.msra.mxu1 %v8468_v50  ;;  %v1134_v50 = vld [vmem:[%s14230_s1 + $0x21d8] sm:$0xff]  ;;  %v1160_v63 = vld [vmem:[%s14230_s1 + $0x22a8] sm:$0xff]  ;;  %v1179_v21 = vld [vmem:[%s14230_s1 + $0x2340] sm:$0xff] }
 0x204   :  { %8503 = vmatprep.subr.bf16.mxu1 %v8502_v45  ;;  %4287 = vmatmul.mubr.f32.vlgmr.msra.gmra.mrb[30].mxu0 %v12271_v8  ;;  %v1079_v8 = vld [vmem:[%s14230_s1 + $0x2020] sm:$0xff]  ;;  %v1086_v45 = vld [vmem:[%s14230_s1 + $0x2058] sm:$0xff]  ;;  %v8522_v49 = vpack.c.bf16 %v1134_v50, %v1133_v33  ;;  %v1196_v25 = vld [vmem:[%s14230_s1 + $0x23c8] sm:$0xff] }
 0x205   :  { %8473 = vmatpush3.bf16.msra.mxu0 %v8472_v62  ;;  %4426 = vmatprep.mubr.f32.mxu0 %v1905_v7  ;;  %v8480_v29 = vpack.c.bf16 %v1080_v19, %v1079_v8  ;;  %v1135_v62 = vld [vmem:[%s14230_s1 + $0x21e0] sm:$0xff]  ;;  %v1120_v7 = vld [vmem:[%s14230_s1 + $0x2168] sm:$0xff] }
 0x206   :  { %4357 = vmatmul.mubr.f32.vlgmr.msra.gmra.mrb[30].mxu1 %v12280_v26  ;;  %8475 = vmatprep.subr.bf16.mxu0 %v8474_v1  ;;  %v1112_v26 = vld [vmem:[%s14230_s1 + $0x2128] sm:$0xff]  ;;  %v8492_v1 = vpack.c.bf16 %v1086_v45, %v1085_v57  ;;  %v8528_v27 = vpack.c.bf16 %v1120_v7, %v1119_v61  ;;  %v1142_v57 = vld [vmem:[%s14230_s1 + $0x2218] sm:$0xff]  ;;  %v1173_v45 = vld [vmem:[%s14230_s1 + $0x2310] sm:$0xff] }
 0x207   :  { %8505 = vmatpush3.bf16.msra.mxu1 %v8504_v0  ;;  %4496 = vmatprep.mubr.f32.mxu1 %v1906_v15  ;;  %v8512_v31 = vpack.c.bf16 %v1112_v26, %v1111_v9  ;;  %v1136_v0 = vld [vmem:[%s14230_s1 + $0x21e8] sm:$0xff]  ;;  %v1175_v61 = vld [vmem:[%s14230_s1 + $0x2320] sm:$0xff]  ;;  %v1162_v7 = vld [vmem:[%s14230_s1 + $0x22b8] sm:$0xff] }
 0x208   :  { %8507 = vmatprep.subr.bf16.mxu1 %v8506_v5  ;;  %v1088_v5 = vld [vmem:[%s14230_s1 + $0x2068] sm:$0xff]  ;;  %v8526_v12 = vpack.c.bf16 %v1136_v0, %v1135_v62  ;;  %v1191_v62 = vld [vmem:[%s14230_s1 + $0x23a0] sm:$0xff] }
 0x209   :  { %8477 = vmatpush3.bf16.msra.mxu0 %v8476_v16  ;;  %v8496_v9 = vpack.c.bf16 %v1088_v5, %v1087_v4  ;;  %v1192_v0 = vld [vmem:[%s14230_s1 + $0x23a8] sm:$0xff]  ;;  %v8542_v4 = vpack.c.bf16 %v1160_v63, %v1159_v59  ;;  %v1167_v53 = vld [vmem:[%s14230_s1 + $0x22e0] sm:$0xff] }
 0x20a   :  { %8479 = vmatprep.subr.bf16.mxu0 %v8478_v18  ;;  %v1138_v18 = vld [vmem:[%s14230_s1 + $0x21f8] sm:$0xff]  ;;  %v1144_v5 = vld [vmem:[%s14230_s1 + $0x2228] sm:$0xff] }
 0x20b   :  { %8509 = vmatpush3.bf16.msra.mxu1 %v8508_v17  ;;  %v1137_v17 = vld [vmem:[%s14230_s1 + $0x21f0] sm:$0xff]  ;;  %v1168_v48 = vld [vmem:[%s14230_s1 + $0x22e8] sm:$0xff] }
 0x20c   :  { %8511 = vmatprep.subr.bf16.mxu1 %v8510_v20  ;;  %v44_v20 = vld [vmem:[%s14229_s0 + $0x88] sm:$0xff] }
 0x20d   :  { %8481 = vmatpush3.bf16.msra.mxu0 %v8480_v29  ;;  %v1121_v29 = vld [vmem:[%s14230_s1 + $0x2170] sm:$0xff]  ;;  %v1907_v34 = vcombine.high %v44_v20, %v44_v20  ;;  %v12691_v52 = vrot.slane %v44_v20, %v9266_v13  ;;  %v1178_v20 = vld [vmem:[%s14230_s1 + $0x2338] sm:$0xff] }
 0x20e   :  { %8483 = vmatprep.subr.bf16.mxu0 %v8482_v30  ;;  %v8530_v30 = vpack.c.bf16 %v1138_v18, %v1137_v17  ;;  %v8532_v36 = vpack.c.bf16 %v1122_v32, %v1121_v29  ;;  %v1145_v18 = vld [vmem:[%s14230_s1 + $0x2230] sm:$0xff]  ;;  %v1148_v32 = vld [vmem:[%s14230_s1 + $0x2248] sm:$0xff] }
 0x20f   :  { %8513 = vmatpush3.bf16.msra.mxu1 %v8512_v31  ;;  %v12700_v33 = vrot.slane %v1907_v34, %v9266_v13  ;;  %v1922_v60 = vcombine.high %v12691_v52, %v12691_v52  ;;  %v1166_v34 = vld [vmem:[%s14230_s1 + $0x22d8] sm:$0xff] }
 0x210   :  { %8515 = vmatprep.subr.bf16.mxu1 %v8514_v23  ;;  %v1187_v23 = vld [vmem:[%s14230_s1 + $0x2380] sm:$0xff] }
 0x211   :  { %8485 = vmatpush3.bf16.msra.mxu0 %v8484_v40  ;;  %v1139_v40 = vld [vmem:[%s14230_s1 + $0x2200] sm:$0xff] }
 0x212   :  { %8487 = vmatprep.subr.bf16.mxu0 %v8486_v43  ;;  %v1171_v43 = vld [vmem:[%s14230_s1 + $0x2300] sm:$0xff] }
 0x213   :  { %8517 = vmatpush3.bf16.msra.mxu1 %v8516_v41  ;;  %v1140_v41 = vld [vmem:[%s14230_s1 + $0x2208] sm:$0xff] }
 0x214   :  { %8519 = vmatprep.subr.bf16.mxu1 %v8518_v47  ;;  %v1158_v47 = vld [vmem:[%s14230_s1 + $0x2298] sm:$0xff]  ;;  %v8536_v50 = vpack.c.bf16 %v1140_v41, %v1139_v40 }
 0x215   :  { %8489 = vmatpush3.bf16.msra.mxu0 %v8488_v54  ;;  %v8568_v54 = vpack.c.bf16 %v1172_v46, %v1171_v43  ;;  %v1149_v43 = vld [vmem:[%s14230_s1 + $0x2250] sm:$0xff] }
 0x216   :  { %8491 = vmatprep.subr.bf16.mxu0 %v8490_v56  ;;  %v1141_v56 = vld [vmem:[%s14230_s1 + $0x2210] sm:$0xff] }
 0x217   :  { %8521 = vmatpush3.bf16.msra.mxu1 %v8520_v55  ;;  %v6348_v6 = vpop.f32.mrb[18].mxu0  ;;  %v8538_v55 = vpack.c.bf16 %v1158_v47, %v1157_v35  ;;  %v1181_v46 = vld [vmem:[%s14230_s1 + $0x2350] sm:$0xff]  ;;  %v1182_v47 = vld [vmem:[%s14230_s1 + $0x2358] sm:$0xff] }
 0x218   :  { %8523 = vmatprep.subr.bf16.mxu1 %v8522_v49  ;;  %v6349_v15 = vpop.f32.mrb[19].mxu0  ;;  %v1174_v49 = vld [vmem:[%s14230_s1 + $0x2318] sm:$0xff] }
 0x219   :  { %v6383_v16 = vpop.f32.mrb[18].mxu1  ;;  %v6350_v8 = vadd.f32 %v6349_v15, %v6348_v6  ;;  %8493 = vmatpush3.bf16.msra.mxu0 %v8492_v1  ;;  %v1923_v1 = vcombine.high %v12700_v33, %v12700_v33  ;;  %v8574_v6 = vpack.c.bf16 %v1192_v0, %v1191_v62  ;;  %v1169_v62 = vld [vmem:[%s14230_s1 + $0x22f0] sm:$0xff]  ;;  %v1170_v0 = vld [vmem:[%s14230_s1 + $0x22f8] sm:$0xff] }
 0x21a   :  { %v6384_v19 = vpop.f32.mrb[19].mxu1  ;;  %8495 = vmatprep.subr.bf16.mxu0 %v8494_v3  ;;  %v8572_v3 = vpack.c.bf16 %v1174_v49, %v1173_v45  ;;  %v1151_v45 = vld [vmem:[%s14230_s1 + $0x2260] sm:$0xff] }
 0x21b   :  { %v6385_v26 = vadd.f32 %v6384_v19, %v6383_v16  ;;  %8525 = vmatpush3.bf16.msra.mxu1 %v8524_v2  ;;  %v3449_v31 = vadd.f32 %v6350_v8, %v12460_v37  ;;  %v1188_v37 = vld [vmem:[%s14230_s1 + $0x2388] sm:$0xff]  ;;  %v8540_v2 = vpack.c.bf16 %v1142_v57, %v1141_v56  ;;  %v1146_v8 = vld [vmem:[%s14230_s1 + $0x2238] sm:$0xff]  ;;  %v1177_v19 = vld [vmem:[%s14230_s1 + $0x2330] sm:$0xff]  ;;  %v8588_v56 = vpack.c.bf16 %v1182_v47, %v1181_v46 }
 0x21c   :  { %8527 = vmatprep.subr.bf16.mxu1 %v8526_v12  ;;  %v8566_v44 = vpack.c.bf16 %v1188_v37, %v1187_v23  ;;  %v1161_v12 = vld [vmem:[%s14230_s1 + $0x22b0] sm:$0xff]  ;;  %v8548_v28 = vpack.c.bf16 %v1146_v8, %v1145_v18  ;;  %v8580_v29 = vpack.c.bf16 %v1178_v20, %v1177_v19  ;;  %v1180_v23 = vld [vmem:[%s14230_s1 + $0x2348] sm:$0xff]  ;;  %v8558_v57 = vpack.c.bf16 %v1168_v48, %v1167_v53  ;;  %v1183_v49 = vld [vmem:[%s14230_s1 + $0x2360] sm:$0xff] }
 0x21d   :  { %v12670_v24 = vadd.f32 %v6385_v26, %v3449_v31  ;;  %8497 = vmatpush3.bf16.msra.mxu0 %v8496_v9  ;;  %v8546_v17 = vpack.c.bf16 %v1162_v7, %v1161_v12  ;;  %v8578_v9 = vpack.c.bf16 %v1194_v14, %v1193_v11  ;;  %v1163_v26 = vld [vmem:[%s14230_s1 + $0x22c0] sm:$0xff]  ;;  %v1165_v37 = vld [vmem:[%s14230_s1 + $0x22d0] sm:$0xff]  ;;  %v8584_v40 = vpack.c.bf16 %v1180_v23, %v1179_v21  ;;  %v1154_v14 = vld [vmem:[%s14230_s1 + $0x2278] sm:$0xff] }
 0x21e   :  { %8499 = vmatprep.subr.bf16.mxu0 %v8498_v22  ;;  %v1195_v22 = vld [vmem:[%s14230_s1 + $0x23c0] sm:$0xff]  ;;  %v8554_v41 = vpack.c.bf16 %v1166_v34, %v1165_v37  ;;  %v8562_v7 = vpack.c.bf16 %v1170_v0, %v1169_v62  ;;  %v1153_v11 = vld [vmem:[%s14230_s1 + $0x2270] sm:$0xff]  ;;  %v1186_v18 = vld [vmem:[%s14230_s1 + $0x2378] sm:$0xff] }
 0x21f   :  { %8529 = vmatpush3.bf16.msra.mxu1 %v8528_v27  ;;  %v1164_v27 = vld [vmem:[%s14230_s1 + $0x22c8] sm:$0xff]  ;;  %v8582_v42 = vpack.c.bf16 %v1196_v25, %v1195_v22  ;;  %v1219_v8 = vld [vmem:[%s14230_s1 + $0x2480] sm:$0xff]  ;;  %v1221_v21 = vld [vmem:[%s14230_s1 + $0x2490] sm:$0xff] }
 0x220   :  { %8531 = vmatprep.subr.bf16.mxu1 %v8530_v30  ;;  %v8550_v31 = vpack.c.bf16 %v1164_v27, %v1163_v26  ;;  %v1147_v30 = vld [vmem:[%s14230_s1 + $0x2240] sm:$0xff]  ;;  %v1220_v19 = vld [vmem:[%s14230_s1 + $0x2488] sm:$0xff]  ;;  %v8564_v27 = vpack.c.bf16 %v1154_v14, %v1153_v11  ;;  %v1253_v37 = vld [vmem:[%s14230_s1 + $0x2590] sm:$0xff] }
 0x221   :  { %8501 = vmatpush3.bf16.msra.mxu0 %v8500_v39  ;;  %v1197_v39 = vld [vmem:[%s14230_s1 + $0x23d0] sm:$0xff]  ;;  %v8598_v25 = vpack.c.bf16 %v1220_v19, %v1219_v8  ;;  %v1254_v34 = vld [vmem:[%s14230_s1 + $0x2598] sm:$0xff]  ;;  %v1223_v47 = vld [vmem:[%s14230_s1 + $0x24a0] sm:$0xff] }
 0x222   :  { %8535 = vmatprep.subr.bf16.mxu0 %v8534_v38  ;;  %v8552_v38 = vpack.c.bf16 %v1148_v32, %v1147_v30  ;;  %v1236_v32 = vld [vmem:[%s14230_s1 + $0x2508] sm:$0xff]  ;;  %v8634_v46 = vpack.c.bf16 %v1254_v34, %v1253_v37  ;;  %v1257_v62 = vld [vmem:[%s14230_s1 + $0x25b0] sm:$0xff]  ;;  %v1258_v0 = vld [vmem:[%s14230_s1 + $0x25b8] sm:$0xff] }
 0x223   :  { %8533 = vmatpush3.bf16.msra.mxu1 %v8532_v36  ;;  %v1198_v36 = vld [vmem:[%s14230_s1 + $0x23d8] sm:$0xff]  ;;  %v1224_v53 = vld [vmem:[%s14230_s1 + $0x24a8] sm:$0xff]  ;;  %v1243_v8 = vld [vmem:[%s14230_s1 + $0x2540] sm:$0xff] }
 0x224   :  { %8567 = vmatprep.subr.bf16.mxu1 %v8566_v44  ;;  %4427 = vmatmul.mubr.f32.vlgmr.msra.gmra.mrb[32].mxu0 %v12481_v51  ;;  %v1143_v51 = vld [vmem:[%s14230_s1 + $0x2220] sm:$0xff]  ;;  %v1150_v44 = vld [vmem:[%s14230_s1 + $0x2258] sm:$0xff]  ;;  %v8586_v35 = vpack.c.bf16 %v1198_v36, %v1197_v39  ;;  %v1260_v11 = vld [vmem:[%s14230_s1 + $0x25c8] sm:$0xff] }
 0x225   :  { %8537 = vmatpush3.bf16.msra.mxu0 %v8536_v50  ;;  %4566 = vmatprep.mubr.f32.mxu0 %v1922_v60  ;;  %v8544_v15 = vpack.c.bf16 %v1144_v5, %v1143_v51  ;;  %v1199_v50 = vld [vmem:[%s14230_s1 + $0x23e0] sm:$0xff]  ;;  %v1184_v60 = vld [vmem:[%s14230_s1 + $0x2368] sm:$0xff] }
 0x226   :  { %4497 = vmatmul.mubr.f32.vlgmr.msra.gmra.mrb[32].mxu1 %v12490_v10  ;;  %8539 = vmatprep.subr.bf16.mxu0 %v8538_v55  ;;  %v1176_v10 = vld [vmem:[%s14230_s1 + $0x2328] sm:$0xff]  ;;  %v8556_v55 = vpack.c.bf16 %v1150_v44, %v1149_v43  ;;  %v8592_v12 = vpack.c.bf16 %v1184_v60, %v1183_v49  ;;  %v1206_v43 = vld [vmem:[%s14230_s1 + $0x2418] sm:$0xff]  ;;  %v1237_v44 = vld [vmem:[%s14230_s1 + $0x2510] sm:$0xff] }
 0x227   :  { %8569 = vmatpush3.bf16.msra.mxu1 %v8568_v54  ;;  %4636 = vmatprep.mubr.f32.mxu1 %v1923_v1  ;;  %v8576_v16 = vpack.c.bf16 %v1176_v10, %v1175_v61  ;;  %v1200_v54 = vld [vmem:[%s14230_s1 + $0x23e8] sm:$0xff]  ;;  %v1239_v49 = vld [vmem:[%s14230_s1 + $0x2520] sm:$0xff]  ;;  %v1226_v60 = vld [vmem:[%s14230_s1 + $0x24b8] sm:$0xff] }
 0x228   :  { %8571 = vmatprep.subr.bf16.mxu1 %v8570_v58  ;;  %v1152_v58 = vld [vmem:[%s14230_s1 + $0x2268] sm:$0xff]  ;;  %v8590_v63 = vpack.c.bf16 %v1200_v54, %v1199_v50  ;;  %v1255_v50 = vld [vmem:[%s14230_s1 + $0x25a0] sm:$0xff] }
 0x229   :  { %8541 = vmatpush3.bf16.msra.mxu0 %v8540_v2  ;;  %v8560_v61 = vpack.c.bf16 %v1152_v58, %v1151_v45  ;;  %v1256_v54 = vld [vmem:[%s14230_s1 + $0x25a8] sm:$0xff]  ;;  %v8606_v45 = vpack.c.bf16 %v1224_v53, %v1223_v47  ;;  %v1231_v37 = vld [vmem:[%s14230_s1 + $0x24e0] sm:$0xff] }
 0x22a   :  { %8543 = vmatprep.subr.bf16.mxu0 %v8542_v4  ;;  %v1202_v4 = vld [vmem:[%s14230_s1 + $0x23f8] sm:$0xff]  ;;  %v1208_v58 = vld [vmem:[%s14230_s1 + $0x2428] sm:$0xff] }
 0x22b   :  { %8573 = vmatpush3.bf16.msra.mxu1 %v8572_v3  ;;  %v1201_v3 = vld [vmem:[%s14230_s1 + $0x23f0] sm:$0xff]  ;;  %v1232_v34 = vld [vmem:[%s14230_s1 + $0x24e8] sm:$0xff] }
 0x22c   :  { %8575 = vmatprep.subr.bf16.mxu1 %v8574_v6  ;;  %v45_v6 = vld [vmem:[%s14229_s0 + $0x90] sm:$0xff] }
 0x22d   :  { %8545 = vmatpush3.bf16.msra.mxu0 %v8544_v15  ;;  %v1185_v15 = vld [vmem:[%s14230_s1 + $0x2370] sm:$0xff]  ;;  %v1924_v20 = vcombine.high %v45_v6, %v45_v6  ;;  %v12901_v23 = vrot.slane %v45_v6, %v9266_v13  ;;  %v1242_v6 = vld [vmem:[%s14230_s1 + $0x2538] sm:$0xff] }
 0x22e   :  { %8547 = vmatprep.subr.bf16.mxu0 %v8546_v17  ;;  %v8594_v17 = vpack.c.bf16 %v1202_v4, %v1201_v3  ;;  %v8596_v22 = vpack.c.bf16 %v1186_v18, %v1185_v15  ;;  %v1209_v4 = vld [vmem:[%s14230_s1 + $0x2430] sm:$0xff]  ;;  %v1212_v18 = vld [vmem:[%s14230_s1 + $0x2448] sm:$0xff] }
 0x22f   :  { %8577 = vmatpush3.bf16.msra.mxu1 %v8576_v16  ;;  %v12910_v39 = vrot.slane %v1924_v20, %v9266_v13  ;;  %v1939_v48 = vcombine.high %v12901_v23, %v12901_v23  ;;  %v1230_v20 = vld [vmem:[%s14230_s1 + $0x24d8] sm:$0xff] }
 0x230   :  { %8579 = vmatprep.subr.bf16.mxu1 %v8578_v9  ;;  %v1251_v9 = vld [vmem:[%s14230_s1 + $0x2580] sm:$0xff] }
 0x231   :  { %8549 = vmatpush3.bf16.msra.mxu0 %v8548_v28  ;;  %v1203_v28 = vld [vmem:[%s14230_s1 + $0x2400] sm:$0xff] }
 0x232   :  { %8551 = vmatprep.subr.bf16.mxu0 %v8550_v31  ;;  %v1235_v31 = vld [vmem:[%s14230_s1 + $0x2500] sm:$0xff] }
 0x233   :  { %8581 = vmatpush3.bf16.msra.mxu1 %v8580_v29  ;;  %v1204_v29 = vld [vmem:[%s14230_s1 + $0x2408] sm:$0xff] }
 0x234   :  { %8583 = vmatprep.subr.bf16.mxu1 %v8582_v42  ;;  %v1222_v42 = vld [vmem:[%s14230_s1 + $0x2498] sm:$0xff]  ;;  %v8600_v36 = vpack.c.bf16 %v1204_v29, %v1203_v28 }
 0x235   :  { %8553 = vmatpush3.bf16.msra.mxu0 %v8552_v38  ;;  %v8632_v38 = vpack.c.bf16 %v1236_v32, %v1235_v31  ;;  %v1213_v31 = vld [vmem:[%s14230_s1 + $0x2450] sm:$0xff] }
 0x236   :  { %8555 = vmatprep.subr.bf16.mxu0 %v8554_v41  ;;  %v1205_v41 = vld [vmem:[%s14230_s1 + $0x2410] sm:$0xff] }
 0x237   :  { %8585 = vmatpush3.bf16.msra.mxu1 %v8584_v40  ;;  %v6418_v59 = vpop.f32.mrb[20].mxu0  ;;  %v8602_v40 = vpack.c.bf16 %v1222_v42, %v1221_v21  ;;  %v1245_v32 = vld [vmem:[%s14230_s1 + $0x2550] sm:$0xff]  ;;  %v1246_v42 = vld [vmem:[%s14230_s1 + $0x2558] sm:$0xff] }
 0x238   :  { %8587 = vmatprep.subr.bf16.mxu1 %v8586_v35  ;;  %v6419_v1 = vpop.f32.mrb[21].mxu0  ;;  %v1238_v35 = vld [vmem:[%s14230_s1 + $0x2518] sm:$0xff] }
 0x239   :  { %v6453_v2 = vpop.f32.mrb[20].mxu1  ;;  %v6420_v51 = vadd.f32 %v6419_v1, %v6418_v59  ;;  %8557 = vmatpush3.bf16.msra.mxu0 %v8556_v55  ;;  %v1940_v55 = vcombine.high %v12910_v39, %v12910_v39  ;;  %v8638_v59 = vpack.c.bf16 %v1256_v54, %v1255_v50  ;;  %v1233_v50 = vld [vmem:[%s14230_s1 + $0x24f0] sm:$0xff]  ;;  %v1234_v54 = vld [vmem:[%s14230_s1 + $0x24f8] sm:$0xff] }
 0x23a   :  { %v6454_v5 = vpop.f32.mrb[21].mxu1  ;;  %8559 = vmatprep.subr.bf16.mxu0 %v8558_v57  ;;  %v8636_v57 = vpack.c.bf16 %v1238_v35, %v1237_v44  ;;  %v1215_v44 = vld [vmem:[%s14230_s1 + $0x2460] sm:$0xff] }
 0x23b   :  { %v6455_v10 = vadd.f32 %v6454_v5, %v6453_v2  ;;  %8589 = vmatpush3.bf16.msra.mxu1 %v8588_v56  ;;  %v3589_v16 = vadd.f32 %v6420_v51, %v12670_v24  ;;  %v1252_v24 = vld [vmem:[%s14230_s1 + $0x2588] sm:$0xff]  ;;  %v8604_v56 = vpack.c.bf16 %v1206_v43, %v1205_v41  ;;  %v1210_v51 = vld [vmem:[%s14230_s1 + $0x2438] sm:$0xff]  ;;  %v1241_v5 = vld [vmem:[%s14230_s1 + $0x2530] sm:$0xff]  ;;  %v8652_v41 = vpack.c.bf16 %v1246_v42, %v1245_v32 }
 0x23c   :  { %8591 = vmatprep.subr.bf16.mxu1 %v8590_v63  ;;  %v8630_v30 = vpack.c.bf16 %v1252_v24, %v1251_v9  ;;  %v1225_v63 = vld [vmem:[%s14230_s1 + $0x24b0] sm:$0xff]  ;;  %v8612_v14 = vpack.c.bf16 %v1210_v51, %v1209_v4  ;;  %v8644_v15 = vpack.c.bf16 %v1242_v6, %v1241_v5  ;;  %v1244_v9 = vld [vmem:[%s14230_s1 + $0x2548] sm:$0xff]  ;;  %v8622_v43 = vpack.c.bf16 %v1232_v34, %v1231_v37  ;;  %v1247_v35 = vld [vmem:[%s14230_s1 + $0x2560] sm:$0xff] }
 0x23d   :  { %v12880_v26 = vadd.f32 %v6455_v10, %v3589_v16  ;;  %8561 = vmatpush3.bf16.msra.mxu0 %v8560_v61  ;;  %v8610_v3 = vpack.c.bf16 %v1226_v60, %v1225_v63  ;;  %v8642_v61 = vpack.c.bf16 %v1258_v0, %v1257_v62  ;;  %v1227_v10 = vld [vmem:[%s14230_s1 + $0x24c0] sm:$0xff]  ;;  %v1229_v24 = vld [vmem:[%s14230_s1 + $0x24d0] sm:$0xff]  ;;  %v8648_v28 = vpack.c.bf16 %v1244_v9, %v1243_v8  ;;  %v1218_v0 = vld [vmem:[%s14230_s1 + $0x2478] sm:$0xff] }
 0x23e   :  { %8563 = vmatprep.subr.bf16.mxu0 %v8562_v7  ;;  %v1259_v7 = vld [vmem:[%s14230_s1 + $0x25c0] sm:$0xff]  ;;  %v8618_v29 = vpack.c.bf16 %v1230_v20, %v1229_v24  ;;  %v8626_v60 = vpack.c.bf16 %v1234_v54, %v1233_v50  ;;  %v1217_v62 = vld [vmem:[%s14230_s1 + $0x2470] sm:$0xff]  ;;  %v1250_v4 = vld [vmem:[%s14230_s1 + $0x2578] sm:$0xff] }
 0x23f   :  { %8593 = vmatpush3.bf16.msra.mxu1 %v8592_v12  ;;  %v1228_v12 = vld [vmem:[%s14230_s1 + $0x24c8] sm:$0xff]  ;;  %v8646_v19 = vpack.c.bf16 %v1260_v11, %v1259_v7  ;;  %v1283_v51 = vld [vmem:[%s14230_s1 + $0x2680] sm:$0xff]  ;;  %v1285_v8 = vld [vmem:[%s14230_s1 + $0x2690] sm:$0xff] }
 0x240   :  { %8595 = vmatprep.subr.bf16.mxu1 %v8594_v17  ;;  %v8614_v16 = vpack.c.bf16 %v1228_v12, %v1227_v10  ;;  %v1211_v17 = vld [vmem:[%s14230_s1 + $0x2440] sm:$0xff]  ;;  %v1284_v5 = vld [vmem:[%s14230_s1 + $0x2688] sm:$0xff]  ;;  %v8628_v12 = vpack.c.bf16 %v1218_v0, %v1217_v62  ;;  %v1317_v24 = vld [vmem:[%s14230_s1 + $0x2790] sm:$0xff] }
 0x241   :  { %8565 = vmatpush3.bf16.msra.mxu0 %v8564_v27  ;;  %v1261_v27 = vld [vmem:[%s14230_s1 + $0x25d0] sm:$0xff]  ;;  %v8662_v11 = vpack.c.bf16 %v1284_v5, %v1283_v51  ;;  %v1318_v20 = vld [vmem:[%s14230_s1 + $0x2798] sm:$0xff]  ;;  %v1287_v42 = vld [vmem:[%s14230_s1 + $0x26a0] sm:$0xff] }
 0x242   :  { %8599 = vmatprep.subr.bf16.mxu0 %v8598_v25  ;;  %v8616_v25 = vpack.c.bf16 %v1212_v18, %v1211_v17  ;;  %v1300_v18 = vld [vmem:[%s14230_s1 + $0x2708] sm:$0xff]  ;;  %v8698_v32 = vpack.c.bf16 %v1318_v20, %v1317_v24  ;;  %v1321_v50 = vld [vmem:[%s14230_s1 + $0x27b0] sm:$0xff]  ;;  %v1322_v54 = vld [vmem:[%s14230_s1 + $0x27b8] sm:$0xff] }
 0x243   :  { %8597 = vmatpush3.bf16.msra.mxu1 %v8596_v22  ;;  %v1262_v22 = vld [vmem:[%s14230_s1 + $0x25d8] sm:$0xff]  ;;  %v1288_v37 = vld [vmem:[%s14230_s1 + $0x26a8] sm:$0xff]  ;;  %v1307_v51 = vld [vmem:[%s14230_s1 + $0x2740] sm:$0xff] }
 0x244   :  { %8631 = vmatprep.subr.bf16.mxu1 %v8630_v30  ;;  %4567 = vmatmul.mubr.f32.vlgmr.msra.gmra.mrb[34].mxu0 %v12691_v52  ;;  %v1207_v52 = vld [vmem:[%s14230_s1 + $0x2420] sm:$0xff]  ;;  %v1214_v30 = vld [vmem:[%s14230_s1 + $0x2458] sm:$0xff]  ;;  %v8650_v21 = vpack.c.bf16 %v1262_v22, %v1261_v27  ;;  %v1324_v62 = vld [vmem:[%s14230_s1 + $0x27c8] sm:$0xff] }
 0x245   :  { %8601 = vmatpush3.bf16.msra.mxu0 %v8600_v36  ;;  %4706 = vmatprep.mubr.f32.mxu0 %v1939_v48  ;;  %v8608_v1 = vpack.c.bf16 %v1208_v58, %v1207_v52  ;;  %v1263_v36 = vld [vmem:[%s14230_s1 + $0x25e0] sm:$0xff]  ;;  %v1248_v48 = vld [vmem:[%s14230_s1 + $0x2568] sm:$0xff] }
 0x246   :  { %4637 = vmatmul.mubr.f32.vlgmr.msra.gmra.mrb[34].mxu1 %v12700_v33  ;;  %8603 = vmatprep.subr.bf16.mxu0 %v8602_v40  ;;  %v1240_v33 = vld [vmem:[%s14230_s1 + $0x2528] sm:$0xff]  ;;  %v8620_v40 = vpack.c.bf16 %v1214_v30, %v1213_v31  ;;  %v8656_v63 = vpack.c.bf16 %v1248_v48, %v1247_v35  ;;  %v1270_v31 = vld [vmem:[%s14230_s1 + $0x2618] sm:$0xff]  ;;  %v1301_v30 = vld [vmem:[%s14230_s1 + $0x2710] sm:$0xff] }
 0x247   :  { %8633 = vmatpush3.bf16.msra.mxu1 %v8632_v38  ;;  %4776 = vmatprep.mubr.f32.mxu1 %v1940_v55  ;;  %v8640_v2 = vpack.c.bf16 %v1240_v33, %v1239_v49  ;;  %v1264_v38 = vld [vmem:[%s14230_s1 + $0x25e8] sm:$0xff]  ;;  %v1303_v35 = vld [vmem:[%s14230_s1 + $0x2720] sm:$0xff]  ;;  %v1290_v48 = vld [vmem:[%s14230_s1 + $0x26b8] sm:$0xff] }
 0x248   :  { %8635 = vmatprep.subr.bf16.mxu1 %v8634_v46  ;;  %v1216_v46 = vld [vmem:[%s14230_s1 + $0x2468] sm:$0xff]  ;;  %v8654_v53 = vpack.c.bf16 %v1264_v38, %v1263_v36  ;;  %v1319_v36 = vld [vmem:[%s14230_s1 + $0x27a0] sm:$0xff] }
 0x249   :  { %8605 = vmatpush3.bf16.msra.mxu0 %v8604_v56  ;;  %v8624_v49 = vpack.c.bf16 %v1216_v46, %v1215_v44  ;;  %v1320_v38 = vld [vmem:[%s14230_s1 + $0x27a8] sm:$0xff]  ;;  %v8670_v44 = vpack.c.bf16 %v1288_v37, %v1287_v42  ;;  %v1295_v24 = vld [vmem:[%s14230_s1 + $0x26e0] sm:$0xff] }
 0x24a   :  { %8607 = vmatprep.subr.bf16.mxu0 %v8606_v45  ;;  %v1266_v45 = vld [vmem:[%s14230_s1 + $0x25f8] sm:$0xff]  ;;  %v1272_v46 = vld [vmem:[%s14230_s1 + $0x2628] sm:$0xff] }
 0x24b   :  { %8637 = vmatpush3.bf16.msra.mxu1 %v8636_v57  ;;  %v1265_v57 = vld [vmem:[%s14230_s1 + $0x25f0] sm:$0xff]  ;;  %v1296_v20 = vld [vmem:[%s14230_s1 + $0x26e8] sm:$0xff] }
 0x24c   :  { %8639 = vmatprep.subr.bf16.mxu1 %v8638_v59  ;;  %v46_v59 = vld [vmem:[%s14229_s0 + $0x98] sm:$0xff] }
 0x24d   :  { %8609 = vmatpush3.bf16.msra.mxu0 %v8608_v1  ;;  %v1249_v1 = vld [vmem:[%s14230_s1 + $0x2570] sm:$0xff]  ;;  %v1941_v6 = vcombine.high %v46_v59, %v46_v59  ;;  %v13111_v9 = vrot.slane %v46_v59, %v9266_v13  ;;  %v1306_v59 = vld [vmem:[%s14230_s1 + $0x2738] sm:$0xff] }
 0x24e   :  { %8611 = vmatprep.subr.bf16.mxu0 %v8610_v3  ;;  %v8658_v3 = vpack.c.bf16 %v1266_v45, %v1265_v57  ;;  %v8660_v7 = vpack.c.bf16 %v1250_v4, %v1249_v1  ;;  %v1273_v45 = vld [vmem:[%s14230_s1 + $0x2630] sm:$0xff]  ;;  %v1276_v4 = vld [vmem:[%s14230_s1 + $0x2648] sm:$0xff] }
 0x24f   :  { %8641 = vmatpush3.bf16.msra.mxu1 %v8640_v2  ;;  %v13120_v27 = vrot.slane %v1941_v6, %v9266_v13  ;;  %v1956_v34 = vcombine.high %v13111_v9, %v13111_v9  ;;  %v1294_v6 = vld [vmem:[%s14230_s1 + $0x26d8] sm:$0xff] }
 0x250   :  { %8643 = vmatprep.subr.bf16.mxu1 %v8642_v61  ;;  %v1315_v61 = vld [vmem:[%s14230_s1 + $0x2780] sm:$0xff] }
 0x251   :  { %8613 = vmatpush3.bf16.msra.mxu0 %v8612_v14  ;;  %v1267_v14 = vld [vmem:[%s14230_s1 + $0x2600] sm:$0xff] }
 0x252   :  { %8615 = vmatprep.subr.bf16.mxu0 %v8614_v16  ;;  %v1299_v16 = vld [vmem:[%s14230_s1 + $0x2700] sm:$0xff] }
 0x253   :  { %8645 = vmatpush3.bf16.msra.mxu1 %v8644_v15  ;;  %v1268_v15 = vld [vmem:[%s14230_s1 + $0x2608] sm:$0xff] }
 0x254   :  { %8647 = vmatprep.subr.bf16.mxu1 %v8646_v19  ;;  %v1286_v19 = vld [vmem:[%s14230_s1 + $0x2698] sm:$0xff]  ;;  %v8664_v22 = vpack.c.bf16 %v1268_v15, %v1267_v14 }
 0x255   :  { %8617 = vmatpush3.bf16.msra.mxu0 %v8616_v25  ;;  %v8696_v25 = vpack.c.bf16 %v1300_v18, %v1299_v16  ;;  %v1277_v16 = vld [vmem:[%s14230_s1 + $0x2650] sm:$0xff] }
 0x256   :  { %8619 = vmatprep.subr.bf16.mxu0 %v8618_v29  ;;  %v1269_v29 = vld [vmem:[%s14230_s1 + $0x2610] sm:$0xff] }
 0x257   :  { %8649 = vmatpush3.bf16.msra.mxu1 %v8648_v28  ;;  %v6488_v47 = vpop.f32.mrb[22].mxu0  ;;  %v8666_v28 = vpack.c.bf16 %v1286_v19, %v1285_v8  ;;  %v1309_v18 = vld [vmem:[%s14230_s1 + $0x2750] sm:$0xff]  ;;  %v1310_v19 = vld [vmem:[%s14230_s1 + $0x2758] sm:$0xff] }
 0x258   :  { %8651 = vmatprep.subr.bf16.mxu1 %v8650_v21  ;;  %v6489_v55 = vpop.f32.mrb[23].mxu0  ;;  %v1302_v21 = vld [vmem:[%s14230_s1 + $0x2718] sm:$0xff] }
 0x259   :  { %v6523_v56 = vpop.f32.mrb[22].mxu1  ;;  %v6490_v52 = vadd.f32 %v6489_v55, %v6488_v47  ;;  %8621 = vmatpush3.bf16.msra.mxu0 %v8620_v40  ;;  %v1957_v40 = vcombine.high %v13120_v27, %v13120_v27  ;;  %v8702_v47 = vpack.c.bf16 %v1320_v38, %v1319_v36  ;;  %v1297_v36 = vld [vmem:[%s14230_s1 + $0x26f0] sm:$0xff]  ;;  %v1298_v38 = vld [vmem:[%s14230_s1 + $0x26f8] sm:$0xff] }
 0x25a   :  { %v6524_v58 = vpop.f32.mrb[23].mxu1  ;;  %8623 = vmatprep.subr.bf16.mxu0 %v8622_v43  ;;  %v8700_v43 = vpack.c.bf16 %v1302_v21, %v1301_v30  ;;  %v1279_v30 = vld [vmem:[%s14230_s1 + $0x2660] sm:$0xff] }
 0x25b   :  { %v6525_v33 = vadd.f32 %v6524_v58, %v6523_v56  ;;  %8653 = vmatpush3.bf16.msra.mxu1 %v8652_v41  ;;  %v3729_v2 = vadd.f32 %v6490_v52, %v12880_v26  ;;  %v1316_v26 = vld [vmem:[%s14230_s1 + $0x2788] sm:$0xff]  ;;  %v8668_v41 = vpack.c.bf16 %v1270_v31, %v1269_v29  ;;  %v1274_v52 = vld [vmem:[%s14230_s1 + $0x2638] sm:$0xff]  ;;  %v1305_v58 = vld [vmem:[%s14230_s1 + $0x2730] sm:$0xff]  ;;  %v8716_v29 = vpack.c.bf16 %v1310_v19, %v1309_v18 }
 0x25c   :  { %8655 = vmatprep.subr.bf16.mxu1 %v8654_v53  ;;  %v8694_v17 = vpack.c.bf16 %v1316_v26, %v1315_v61  ;;  %v1289_v53 = vld [vmem:[%s14230_s1 + $0x26b0] sm:$0xff]  ;;  %v8676_v0 = vpack.c.bf16 %v1274_v52, %v1273_v45  ;;  %v8708_v1 = vpack.c.bf16 %v1306_v59, %v1305_v58  ;;  %v1308_v61 = vld [vmem:[%s14230_s1 + $0x2748] sm:$0xff]  ;;  %v8686_v31 = vpack.c.bf16 %v1296_v20, %v1295_v24  ;;  %v1311_v21 = vld [vmem:[%s14230_s1 + $0x2760] sm:$0xff] }
 0x25d   :  { %v13090_v10 = vadd.f32 %v6525_v33, %v3729_v2  ;;  %8625 = vmatpush3.bf16.msra.mxu0 %v8624_v49  ;;  %v8674_v57 = vpack.c.bf16 %v1290_v48, %v1289_v53  ;;  %v8706_v49 = vpack.c.bf16 %v1322_v54, %v1321_v50  ;;  %v1291_v33 = vld [vmem:[%s14230_s1 + $0x26c0] sm:$0xff]  ;;  %v1293_v26 = vld [vmem:[%s14230_s1 + $0x26d0] sm:$0xff]  ;;  %v8712_v14 = vpack.c.bf16 %v1308_v61, %v1307_v51  ;;  %v1282_v54 = vld [vmem:[%s14230_s1 + $0x2678] sm:$0xff] }
 0x25e   :  { %8627 = vmatprep.subr.bf16.mxu0 %v8626_v60  ;;  %v1323_v60 = vld [vmem:[%s14230_s1 + $0x27c0] sm:$0xff]  ;;  %v8682_v15 = vpack.c.bf16 %v1294_v6, %v1293_v26  ;;  %v8690_v48 = vpack.c.bf16 %v1298_v38, %v1297_v36  ;;  %v1281_v50 = vld [vmem:[%s14230_s1 + $0x2670] sm:$0xff]  ;;  %v1314_v45 = vld [vmem:[%s14230_s1 + $0x2778] sm:$0xff] }
 0x25f   :  { %8657 = vmatpush3.bf16.msra.mxu1 %v8656_v63  ;;  %v1292_v63 = vld [vmem:[%s14230_s1 + $0x26c8] sm:$0xff]  ;;  %v8710_v5 = vpack.c.bf16 %v1324_v62, %v1323_v60  ;;  %v1347_v52 = vld [vmem:[%s14230_s1 + $0x2880] sm:$0xff]  ;;  %v1349_v51 = vld [vmem:[%s14230_s1 + $0x2890] sm:$0xff] }
 0x260   :  { %8659 = vmatprep.subr.bf16.mxu1 %v8658_v3  ;;  %v8678_v2 = vpack.c.bf16 %v1292_v63, %v1291_v33  ;;  %v1275_v3 = vld [vmem:[%s14230_s1 + $0x2640] sm:$0xff]  ;;  %v1348_v58 = vld [vmem:[%s14230_s1 + $0x2888] sm:$0xff]  ;;  %v8692_v63 = vpack.c.bf16 %v1282_v54, %v1281_v50  ;;  %v1381_v26 = vld [vmem:[%s14230_s1 + $0x2990] sm:$0xff] }
 0x261   :  { %8629 = vmatpush3.bf16.msra.mxu0 %v8628_v12  ;;  %v1325_v12 = vld [vmem:[%s14230_s1 + $0x27d0] sm:$0xff]  ;;  %v8726_v62 = vpack.c.bf16 %v1348_v58, %v1347_v52  ;;  %v1382_v6 = vld [vmem:[%s14230_s1 + $0x2998] sm:$0xff]  ;;  %v1351_v19 = vld [vmem:[%s14230_s1 + $0x28a0] sm:$0xff] }
 0x262   :  { %8663 = vmatprep.subr.bf16.mxu0 %v8662_v11  ;;  %v8680_v11 = vpack.c.bf16 %v1276_v4, %v1275_v3  ;;  %v1364_v4 = vld [vmem:[%s14230_s1 + $0x2908] sm:$0xff]  ;;  %v8762_v18 = vpack.c.bf16 %v1382_v6, %v1381_v26  ;;  %v1385_v36 = vld [vmem:[%s14230_s1 + $0x29b0] sm:$0xff]  ;;  %v1386_v38 = vld [vmem:[%s14230_s1 + $0x29b8] sm:$0xff] }
 0x263   :  { %8661 = vmatpush3.bf16.msra.mxu1 %v8660_v7  ;;  %v1326_v7 = vld [vmem:[%s14230_s1 + $0x27d8] sm:$0xff]  ;;  %v1352_v24 = vld [vmem:[%s14230_s1 + $0x28a8] sm:$0xff]  ;;  %v1371_v52 = vld [vmem:[%s14230_s1 + $0x2940] sm:$0xff] }
 0x264   :  { %8695 = vmatprep.subr.bf16.mxu1 %v8694_v17  ;;  %4707 = vmatmul.mubr.f32.vlgmr.msra.gmra.mrb[36].mxu0 %v12901_v23  ;;  %v1271_v23 = vld [vmem:[%s14230_s1 + $0x2620] sm:$0xff]  ;;  %v1278_v17 = vld [vmem:[%s14230_s1 + $0x2658] sm:$0xff]  ;;  %v8714_v8 = vpack.c.bf16 %v1326_v7, %v1325_v12  ;;  %v1388_v50 = vld [vmem:[%s14230_s1 + $0x29c8] sm:$0xff] }
 0x265   :  { %8665 = vmatpush3.bf16.msra.mxu0 %v8664_v22  ;;  %4846 = vmatprep.mubr.f32.mxu0 %v1956_v34  ;;  %v8672_v55 = vpack.c.bf16 %v1272_v46, %v1271_v23  ;;  %v1327_v22 = vld [vmem:[%s14230_s1 + $0x27e0] sm:$0xff]  ;;  %v1312_v34 = vld [vmem:[%s14230_s1 + $0x2768] sm:$0xff] }
 0x266   :  { %4777 = vmatmul.mubr.f32.vlgmr.msra.gmra.mrb[36].mxu1 %v12910_v39  ;;  %8667 = vmatprep.subr.bf16.mxu0 %v8666_v28  ;;  %v1304_v39 = vld [vmem:[%s14230_s1 + $0x2728] sm:$0xff]  ;;  %v8684_v28 = vpack.c.bf16 %v1278_v17, %v1277_v16  ;;  %v8720_v53 = vpack.c.bf16 %v1312_v34, %v1311_v21  ;;  %v1334_v16 = vld [vmem:[%s14230_s1 + $0x2818] sm:$0xff]  ;;  %v1365_v17 = vld [vmem:[%s14230_s1 + $0x2910] sm:$0xff] }
 0x267   :  { %8697 = vmatpush3.bf16.msra.mxu1 %v8696_v25  ;;  %4916 = vmatprep.mubr.f32.mxu1 %v1957_v40  ;;  %v8704_v56 = vpack.c.bf16 %v1304_v39, %v1303_v35  ;;  %v1328_v25 = vld [vmem:[%s14230_s1 + $0x27e8] sm:$0xff]  ;;  %v1367_v21 = vld [vmem:[%s14230_s1 + $0x2920] sm:$0xff]  ;;  %v1354_v34 = vld [vmem:[%s14230_s1 + $0x28b8] sm:$0xff] }
 0x268   :  { %8699 = vmatprep.subr.bf16.mxu1 %v8698_v32  ;;  %v1280_v32 = vld [vmem:[%s14230_s1 + $0x2668] sm:$0xff]  ;;  %v8718_v37 = vpack.c.bf16 %v1328_v25, %v1327_v22  ;;  %v1383_v22 = vld [vmem:[%s14230_s1 + $0x29a0] sm:$0xff] }
 0x269   :  { %8669 = vmatpush3.bf16.msra.mxu0 %v8668_v41  ;;  %v8688_v35 = vpack.c.bf16 %v1280_v32, %v1279_v30  ;;  %v1384_v25 = vld [vmem:[%s14230_s1 + $0x29a8] sm:$0xff]  ;;  %v8734_v30 = vpack.c.bf16 %v1352_v24, %v1351_v19  ;;  %v1359_v26 = vld [vmem:[%s14230_s1 + $0x28e0] sm:$0xff] }
 0x26a   :  { %8671 = vmatprep.subr.bf16.mxu0 %v8670_v44  ;;  %v1330_v44 = vld [vmem:[%s14230_s1 + $0x27f8] sm:$0xff]  ;;  %v1336_v32 = vld [vmem:[%s14230_s1 + $0x2828] sm:$0xff] }
 0x26b   :  { %8701 = vmatpush3.bf16.msra.mxu1 %v8700_v43  ;;  %v1329_v43 = vld [vmem:[%s14230_s1 + $0x27f0] sm:$0xff]  ;;  %v1360_v6 = vld [vmem:[%s14230_s1 + $0x28e8] sm:$0xff] }
 0x26c   :  { %8703 = vmatprep.subr.bf16.mxu1 %v8702_v47  ;;  %v47_v47 = vld [vmem:[%s14229_s0 + $0xa0] sm:$0xff] }
 0x26d   :  { %8673 = vmatpush3.bf16.msra.mxu0 %v8672_v55  ;;  %v1313_v55 = vld [vmem:[%s14230_s1 + $0x2770] sm:$0xff]  ;;  %v1958_v59 = vcombine.high %v47_v47, %v47_v47  ;;  %v13321_v61 = vrot.slane %v47_v47, %v9266_v13  ;;  %v1370_v47 = vld [vmem:[%s14230_s1 + $0x2938] sm:$0xff] }
 0x26e   :  { %8675 = vmatprep.subr.bf16.mxu0 %v8674_v57  ;;  %v8722_v57 = vpack.c.bf16 %v1330_v44, %v1329_v43  ;;  %v8724_v60 = vpack.c.bf16 %v1314_v45, %v1313_v55  ;;  %v1337_v44 = vld [vmem:[%s14230_s1 + $0x2830] sm:$0xff]  ;;  %v1340_v45 = vld [vmem:[%s14230_s1 + $0x2848] sm:$0xff] }
 0x26f   :  { %8705 = vmatpush3.bf16.msra.mxu1 %v8704_v56  ;;  %v13330_v12 = vrot.slane %v1958_v59, %v9266_v13  ;;  %v1973_v20 = vcombine.high %v13321_v61, %v13321_v61  ;;  %v1358_v59 = vld [vmem:[%s14230_s1 + $0x28d8] sm:$0xff] }
 0x270   :  { %8707 = vmatprep.subr.bf16.mxu1 %v8706_v49  ;;  %v1379_v49 = vld [vmem:[%s14230_s1 + $0x2980] sm:$0xff] }
 0x271   :  { %8677 = vmatpush3.bf16.msra.mxu0 %v8676_v0  ;;  %v1331_v0 = vld [vmem:[%s14230_s1 + $0x2800] sm:$0xff] }
 0x272   :  { %8679 = vmatprep.subr.bf16.mxu0 %v8678_v2  ;;  %v1363_v2 = vld [vmem:[%s14230_s1 + $0x2900] sm:$0xff] }
 0x273   :  { %8709 = vmatpush3.bf16.msra.mxu1 %v8708_v1  ;;  %v1332_v1 = vld [vmem:[%s14230_s1 + $0x2808] sm:$0xff] }
 0x274   :  { %8711 = vmatprep.subr.bf16.mxu1 %v8710_v5  ;;  %v1350_v5 = vld [vmem:[%s14230_s1 + $0x2898] sm:$0xff]  ;;  %v8728_v7 = vpack.c.bf16 %v1332_v1, %v1331_v0 }
 0x275   :  { %8681 = vmatpush3.bf16.msra.mxu0 %v8680_v11  ;;  %v8760_v11 = vpack.c.bf16 %v1364_v4, %v1363_v2  ;;  %v1341_v2 = vld [vmem:[%s14230_s1 + $0x2850] sm:$0xff] }
 0x276   :  { %8683 = vmatprep.subr.bf16.mxu0 %v8682_v15  ;;  %v1333_v15 = vld [vmem:[%s14230_s1 + $0x2810] sm:$0xff] }
 0x277   :  { %8713 = vmatpush3.bf16.msra.mxu1 %v8712_v14  ;;  %v6558_v42 = vpop.f32.mrb[24].mxu0  ;;  %v8730_v14 = vpack.c.bf16 %v1350_v5, %v1349_v51  ;;  %v1373_v4 = vld [vmem:[%s14230_s1 + $0x2950] sm:$0xff]  ;;  %v1374_v5 = vld [vmem:[%s14230_s1 + $0x2958] sm:$0xff] }
 0x278   :  { %8715 = vmatprep.subr.bf16.mxu1 %v8714_v8  ;;  %v6559_v40 = vpop.f32.mrb[25].mxu0  ;;  %v1366_v8 = vld [vmem:[%s14230_s1 + $0x2918] sm:$0xff] }
 0x279   :  { %v6593_v41 = vpop.f32.mrb[24].mxu1  ;;  %v6560_v23 = vadd.f32 %v6559_v40, %v6558_v42  ;;  %8685 = vmatpush3.bf16.msra.mxu0 %v8684_v28  ;;  %v1974_v28 = vcombine.high %v13330_v12, %v13330_v12  ;;  %v8766_v42 = vpack.c.bf16 %v1384_v25, %v1383_v22  ;;  %v1361_v22 = vld [vmem:[%s14230_s1 + $0x28f0] sm:$0xff]  ;;  %v1362_v25 = vld [vmem:[%s14230_s1 + $0x28f8] sm:$0xff] }
 0x27a   :  { %v6594_v46 = vpop.f32.mrb[25].mxu1  ;;  %8687 = vmatprep.subr.bf16.mxu0 %v8686_v31  ;;  %v8764_v31 = vpack.c.bf16 %v1366_v8, %v1365_v17  ;;  %v1343_v17 = vld [vmem:[%s14230_s1 + $0x2860] sm:$0xff] }
 0x27b   :  { %v6595_v39 = vadd.f32 %v6594_v46, %v6593_v41  ;;  %8717 = vmatpush3.bf16.msra.mxu1 %v8716_v29  ;;  %v3869_v56 = vadd.f32 %v6560_v23, %v13090_v10  ;;  %v1380_v10 = vld [vmem:[%s14230_s1 + $0x2988] sm:$0xff]  ;;  %v8732_v29 = vpack.c.bf16 %v1334_v16, %v1333_v15  ;;  %v1338_v23 = vld [vmem:[%s14230_s1 + $0x2838] sm:$0xff]  ;;  %v1369_v46 = vld [vmem:[%s14230_s1 + $0x2930] sm:$0xff]  ;;  %v8780_v15 = vpack.c.bf16 %v1374_v5, %v1373_v4 }
 0x27c   :  { %8719 = vmatprep.subr.bf16.mxu1 %v8718_v37  ;;  %v8758_v3 = vpack.c.bf16 %v1380_v10, %v1379_v49  ;;  %v1353_v37 = vld [vmem:[%s14230_s1 + $0x28b0] sm:$0xff]  ;;  %v8740_v54 = vpack.c.bf16 %v1338_v23, %v1337_v44  ;;  %v8772_v55 = vpack.c.bf16 %v1370_v47, %v1369_v46  ;;  %v1372_v49 = vld [vmem:[%s14230_s1 + $0x2948] sm:$0xff]  ;;  %v8750_v16 = vpack.c.bf16 %v1360_v6, %v1359_v26  ;;  %v1375_v8 = vld [vmem:[%s14230_s1 + $0x2960] sm:$0xff] }
 0x27d   :  { %v13300_v33 = vadd.f32 %v6595_v39, %v3869_v56  ;;  %8689 = vmatpush3.bf16.msra.mxu0 %v8688_v35  ;;  %v8738_v43 = vpack.c.bf16 %v1354_v34, %v1353_v37  ;;  %v8770_v35 = vpack.c.bf16 %v1386_v38, %v1385_v36  ;;  %v1355_v39 = vld [vmem:[%s14230_s1 + $0x28c0] sm:$0xff]  ;;  %v1357_v10 = vld [vmem:[%s14230_s1 + $0x28d0] sm:$0xff]  ;;  %v8776_v0 = vpack.c.bf16 %v1372_v49, %v1371_v52  ;;  %v1346_v38 = vld [vmem:[%s14230_s1 + $0x2878] sm:$0xff] }
 0x27e   :  { %8691 = vmatprep.subr.bf16.mxu0 %v8690_v48  ;;  %v1387_v48 = vld [vmem:[%s14230_s1 + $0x29c0] sm:$0xff]  ;;  %v8746_v1 = vpack.c.bf16 %v1358_v59, %v1357_v10  ;;  %v8754_v34 = vpack.c.bf16 %v1362_v25, %v1361_v22  ;;  %v1345_v36 = vld [vmem:[%s14230_s1 + $0x2870] sm:$0xff]  ;;  %v1378_v44 = vld [vmem:[%s14230_s1 + $0x2978] sm:$0xff] }
 0x27f   :  { %8721 = vmatpush3.bf16.msra.mxu1 %v8720_v53  ;;  %v1356_v53 = vld [vmem:[%s14230_s1 + $0x28c8] sm:$0xff]  ;;  %v8774_v58 = vpack.c.bf16 %v1388_v50, %v1387_v48  ;;  %v1411_v23 = vld [vmem:[%s14230_s1 + $0x2a80] sm:$0xff]  ;;  %v1413_v52 = vld [vmem:[%s14230_s1 + $0x2a90] sm:$0xff] }
 0x280   :  { %8723 = vmatprep.subr.bf16.mxu1 %v8722_v57  ;;  %v8742_v56 = vpack.c.bf16 %v1356_v53, %v1355_v39  ;;  %v1339_v57 = vld [vmem:[%s14230_s1 + $0x2840] sm:$0xff]  ;;  %v1412_v46 = vld [vmem:[%s14230_s1 + $0x2a88] sm:$0xff]  ;;  %v8756_v53 = vpack.c.bf16 %v1346_v38, %v1345_v36  ;;  %v1445_v10 = vld [vmem:[%s14230_s1 + $0x2b90] sm:$0xff] }
 0x281   :  { %8693 = vmatpush3.bf16.msra.mxu0 %v8692_v63  ;;  %v1389_v63 = vld [vmem:[%s14230_s1 + $0x29d0] sm:$0xff]  ;;  %v8790_v50 = vpack.c.bf16 %v1412_v46, %v1411_v23  ;;  %v1446_v59 = vld [vmem:[%s14230_s1 + $0x2b98] sm:$0xff]  ;;  %v1415_v5 = vld [vmem:[%s14230_s1 + $0x2aa0] sm:$0xff] }
 0x282   :  { %8727 = vmatprep.subr.bf16.mxu0 %v8726_v62  ;;  %v8744_v62 = vpack.c.bf16 %v1340_v45, %v1339_v57  ;;  %v1428_v45 = vld [vmem:[%s14230_s1 + $0x2b08] sm:$0xff]  ;;  %v8826_v4 = vpack.c.bf16 %v1446_v59, %v1445_v10  ;;  %v1449_v22 = vld [vmem:[%s14230_s1 + $0x2bb0] sm:$0xff]  ;;  %v1450_v25 = vld [vmem:[%s14230_s1 + $0x2bb8] sm:$0xff] }
 0x283   :  { %8725 = vmatpush3.bf16.msra.mxu1 %v8724_v60  ;;  %v1390_v60 = vld [vmem:[%s14230_s1 + $0x29d8] sm:$0xff]  ;;  %v1416_v26 = vld [vmem:[%s14230_s1 + $0x2aa8] sm:$0xff]  ;;  %v1435_v23 = vld [vmem:[%s14230_s1 + $0x2b40] sm:$0xff] }
 0x284   :  { %8759 = vmatprep.subr.bf16.mxu1 %v8758_v3  ;;  %4847 = vmatmul.mubr.f32.vlgmr.msra.gmra.mrb[38].mxu0 %v13111_v9  ;;  %v1335_v9 = vld [vmem:[%s14230_s1 + $0x2820] sm:$0xff]  ;;  %v1342_v3 = vld [vmem:[%s14230_s1 + $0x2858] sm:$0xff]  ;;  %v8778_v51 = vpack.c.bf16 %v1390_v60, %v1389_v63  ;;  %v1452_v36 = vld [vmem:[%s14230_s1 + $0x2bc8] sm:$0xff] }
 0x285   :  { %8729 = vmatpush3.bf16.msra.mxu0 %v8728_v7  ;;  %4986 = vmatprep.mubr.f32.mxu0 %v1973_v20  ;;  %v8736_v40 = vpack.c.bf16 %v1336_v32, %v1335_v9  ;;  %v1391_v7 = vld [vmem:[%s14230_s1 + $0x29e0] sm:$0xff]  ;;  %v1376_v20 = vld [vmem:[%s14230_s1 + $0x2968] sm:$0xff] }
 0x286   :  { %4917 = vmatmul.mubr.f32.vlgmr.msra.gmra.mrb[38].mxu1 %v13120_v27  ;;  %8731 = vmatprep.subr.bf16.mxu0 %v8730_v14  ;;  %v1368_v27 = vld [vmem:[%s14230_s1 + $0x2928] sm:$0xff]  ;;  %v8748_v14 = vpack.c.bf16 %v1342_v3, %v1341_v2  ;;  %v8784_v37 = vpack.c.bf16 %v1376_v20, %v1375_v8  ;;  %v1398_v2 = vld [vmem:[%s14230_s1 + $0x2a18] sm:$0xff]  ;;  %v1429_v3 = vld [vmem:[%s14230_s1 + $0x2b10] sm:$0xff] }
 0x287   :  { %8761 = vmatpush3.bf16.msra.mxu1 %v8760_v11  ;;  %5056 = vmatprep.mubr.f32.mxu1 %v1974_v28  ;;  %v8768_v41 = vpack.c.bf16 %v1368_v27, %v1367_v21  ;;  %v1392_v11 = vld [vmem:[%s14230_s1 + $0x29e8] sm:$0xff]  ;;  %v1431_v8 = vld [vmem:[%s14230_s1 + $0x2b20] sm:$0xff]  ;;  %v1418_v20 = vld [vmem:[%s14230_s1 + $0x2ab8] sm:$0xff] }
 0x288   :  { %8763 = vmatprep.subr.bf16.mxu1 %v8762_v18  ;;  %v1344_v18 = vld [vmem:[%s14230_s1 + $0x2868] sm:$0xff]  ;;  %v8782_v24 = vpack.c.bf16 %v1392_v11, %v1391_v7  ;;  %v1447_v7 = vld [vmem:[%s14230_s1 + $0x2ba0] sm:$0xff] }
 0x289   :  { %8733 = vmatpush3.bf16.msra.mxu0 %v8732_v29  ;;  %v8752_v21 = vpack.c.bf16 %v1344_v18, %v1343_v17  ;;  %v1448_v11 = vld [vmem:[%s14230_s1 + $0x2ba8] sm:$0xff]  ;;  %v8798_v17 = vpack.c.bf16 %v1416_v26, %v1415_v5  ;;  %v1423_v10 = vld [vmem:[%s14230_s1 + $0x2ae0] sm:$0xff] }
 0x28a   :  { %8735 = vmatprep.subr.bf16.mxu0 %v8734_v30  ;;  %v1394_v30 = vld [vmem:[%s14230_s1 + $0x29f8] sm:$0xff]  ;;  %v1400_v18 = vld [vmem:[%s14230_s1 + $0x2a28] sm:$0xff] }
 0x28b   :  { %8765 = vmatpush3.bf16.msra.mxu1 %v8764_v31  ;;  %v1393_v31 = vld [vmem:[%s14230_s1 + $0x29f0] sm:$0xff]  ;;  %v1424_v59 = vld [vmem:[%s14230_s1 + $0x2ae8] sm:$0xff] }
 0x28c   :  { %8767 = vmatprep.subr.bf16.mxu1 %v8766_v42  ;;  %v48_v42 = vld [vmem:[%s14229_s0 + $0xa8] sm:$0xff] }
 0x28d   :  { %8737 = vmatpush3.bf16.msra.mxu0 %v8736_v40  ;;  %v1377_v40 = vld [vmem:[%s14230_s1 + $0x2970] sm:$0xff]  ;;  %v1975_v47 = vcombine.high %v48_v42, %v48_v42  ;;  %v13531_v49 = vrot.slane %v48_v42, %v9266_v13  ;;  %v1434_v42 = vld [vmem:[%s14230_s1 + $0x2b38] sm:$0xff] }
 0x28e   :  { %8739 = vmatprep.subr.bf16.mxu0 %v8738_v43  ;;  %v8786_v43 = vpack.c.bf16 %v1394_v30, %v1393_v31  ;;  %v8788_v48 = vpack.c.bf16 %v1378_v44, %v1377_v40  ;;  %v1401_v30 = vld [vmem:[%s14230_s1 + $0x2a30] sm:$0xff]  ;;  %v1404_v44 = vld [vmem:[%s14230_s1 + $0x2a48] sm:$0xff] }
 0x28f   :  { %8769 = vmatpush3.bf16.msra.mxu1 %v8768_v41  ;;  %v13540_v63 = vrot.slane %v1975_v47, %v9266_v13  ;;  %v1990_v6 = vcombine.high %v13531_v49, %v13531_v49  ;;  %v1422_v47 = vld [vmem:[%s14230_s1 + $0x2ad8] sm:$0xff] }
 0x290   :  { %8771 = vmatprep.subr.bf16.mxu1 %v8770_v35  ;;  %v1443_v35 = vld [vmem:[%s14230_s1 + $0x2b80] sm:$0xff] }
 0x291   :  { %8741 = vmatpush3.bf16.msra.mxu0 %v8740_v54  ;;  %v1395_v54 = vld [vmem:[%s14230_s1 + $0x2a00] sm:$0xff] }
 0x292   :  { %8743 = vmatprep.subr.bf16.mxu0 %v8742_v56  ;;  %v1427_v56 = vld [vmem:[%s14230_s1 + $0x2b00] sm:$0xff] }
 0x293   :  { %8773 = vmatpush3.bf16.msra.mxu1 %v8772_v55  ;;  %v1396_v55 = vld [vmem:[%s14230_s1 + $0x2a08] sm:$0xff] }
 0x294   :  { %8775 = vmatprep.subr.bf16.mxu1 %v8774_v58  ;;  %v1414_v58 = vld [vmem:[%s14230_s1 + $0x2a98] sm:$0xff]  ;;  %v8792_v60 = vpack.c.bf16 %v1396_v55, %v1395_v54 }
 0x295   :  { %8745 = vmatpush3.bf16.msra.mxu0 %v8744_v62  ;;  %v8824_v62 = vpack.c.bf16 %v1428_v45, %v1427_v56  ;;  %v1405_v56 = vld [vmem:[%s14230_s1 + $0x2a50] sm:$0xff] }
 0x296   :  { %8747 = vmatprep.subr.bf16.mxu0 %v8746_v1  ;;  %v1397_v1 = vld [vmem:[%s14230_s1 + $0x2a10] sm:$0xff] }
 0x297   :  { %8777 = vmatpush3.bf16.msra.mxu1 %v8776_v0  ;;  %v6628_v19 = vpop.f32.mrb[26].mxu0  ;;  %v8794_v0 = vpack.c.bf16 %v1414_v58, %v1413_v52  ;;  %v1437_v45 = vld [vmem:[%s14230_s1 + $0x2b50] sm:$0xff]  ;;  %v1438_v58 = vld [vmem:[%s14230_s1 + $0x2b58] sm:$0xff] }
 0x298   :  { %8779 = vmatprep.subr.bf16.mxu1 %v8778_v51  ;;  %v6629_v28 = vpop.f32.mrb[27].mxu0  ;;  %v1430_v51 = vld [vmem:[%s14230_s1 + $0x2b18] sm:$0xff] }
 0x299   :  { %v6663_v29 = vpop.f32.mrb[26].mxu1  ;;  %v6630_v9 = vadd.f32 %v6629_v28, %v6628_v19  ;;  %8749 = vmatpush3.bf16.msra.mxu0 %v8748_v14  ;;  %v1991_v14 = vcombine.high %v13540_v63, %v13540_v63  ;;  %v8830_v19 = vpack.c.bf16 %v1448_v11, %v1447_v7  ;;  %v1425_v7 = vld [vmem:[%s14230_s1 + $0x2af0] sm:$0xff]  ;;  %v1426_v11 = vld [vmem:[%s14230_s1 + $0x2af8] sm:$0xff] }
 0x29a   :  { %v6664_v32 = vpop.f32.mrb[27].mxu1  ;;  %8751 = vmatprep.subr.bf16.mxu0 %v8750_v16  ;;  %v8828_v16 = vpack.c.bf16 %v1430_v51, %v1429_v3  ;;  %v1407_v3 = vld [vmem:[%s14230_s1 + $0x2a60] sm:$0xff] }
 0x29b   :  { %v6665_v27 = vadd.f32 %v6664_v32, %v6663_v29  ;;  %8781 = vmatpush3.bf16.msra.mxu1 %v8780_v15  ;;  %v4009_v41 = vadd.f32 %v6630_v9, %v13300_v33  ;;  %v1444_v33 = vld [vmem:[%s14230_s1 + $0x2b88] sm:$0xff]  ;;  %v8796_v15 = vpack.c.bf16 %v1398_v2, %v1397_v1  ;;  %v1402_v9 = vld [vmem:[%s14230_s1 + $0x2a38] sm:$0xff]  ;;  %v1433_v32 = vld [vmem:[%s14230_s1 + $0x2b30] sm:$0xff]  ;;  %v8844_v1 = vpack.c.bf16 %v1438_v58, %v1437_v45 }
 0x29c   :  { %8783 = vmatprep.subr.bf16.mxu1 %v8782_v24  ;;  %v8822_v57 = vpack.c.bf16 %v1444_v33, %v1443_v35  ;;  %v1417_v24 = vld [vmem:[%s14230_s1 + $0x2ab0] sm:$0xff]  ;;  %v8804_v38 = vpack.c.bf16 %v1402_v9, %v1401_v30  ;;  %v8836_v40 = vpack.c.bf16 %v1434_v42, %v1433_v32  ;;  %v1436_v35 = vld [vmem:[%s14230_s1 + $0x2b48] sm:$0xff]  ;;  %v8814_v2 = vpack.c.bf16 %v1424_v59, %v1423_v10  ;;  %v1439_v51 = vld [vmem:[%s14230_s1 + $0x2b60] sm:$0xff] }
 0x29d   :  { %v13510_v39 = vadd.f32 %v6665_v27, %v4009_v41  ;;  %8753 = vmatpush3.bf16.msra.mxu0 %v8752_v21  ;;  %v8802_v31 = vpack.c.bf16 %v1418_v20, %v1417_v24  ;;  %v8834_v21 = vpack.c.bf16 %v1450_v25, %v1449_v22  ;;  %v1419_v27 = vld [vmem:[%s14230_s1 + $0x2ac0] sm:$0xff]  ;;  %v1421_v33 = vld [vmem:[%s14230_s1 + $0x2ad0] sm:$0xff]  ;;  %v8840_v54 = vpack.c.bf16 %v1436_v35, %v1435_v23  ;;  %v1410_v25 = vld [vmem:[%s14230_s1 + $0x2a78] sm:$0xff] }
 0x29e   :  { %8755 = vmatprep.subr.bf16.mxu0 %v8754_v34  ;;  %v1451_v34 = vld [vmem:[%s14230_s1 + $0x2bc0] sm:$0xff]  ;;  %v8810_v55 = vpack.c.bf16 %v1422_v47, %v1421_v33  ;;  %v8818_v20 = vpack.c.bf16 %v1426_v11, %v1425_v7  ;;  %v1409_v22 = vld [vmem:[%s14230_s1 + $0x2a70] sm:$0xff]  ;;  %v1442_v30 = vld [vmem:[%s14230_s1 + $0x2b78] sm:$0xff] }
 0x29f   :  { %8785 = vmatpush3.bf16.msra.mxu1 %v8784_v37  ;;  %v1420_v37 = vld [vmem:[%s14230_s1 + $0x2ac8] sm:$0xff]  ;;  %v8838_v46 = vpack.c.bf16 %v1452_v36, %v1451_v34  ;;  %v1475_v9 = vld [vmem:[%s14230_s1 + $0x2c80] sm:$0xff]  ;;  %v1477_v23 = vld [vmem:[%s14230_s1 + $0x2c90] sm:$0xff] }
 0x2a0   :  { %8787 = vmatprep.subr.bf16.mxu1 %v8786_v43  ;;  %v8806_v41 = vpack.c.bf16 %v1420_v37, %v1419_v27  ;;  %v1403_v43 = vld [vmem:[%s14230_s1 + $0x2a40] sm:$0xff]  ;;  %v1476_v32 = vld [vmem:[%s14230_s1 + $0x2c88] sm:$0xff]  ;;  %v8820_v37 = vpack.c.bf16 %v1410_v25, %v1409_v22  ;;  %v1509_v33 = vld [vmem:[%s14230_s1 + $0x2d90] sm:$0xff] }
 0x2a1   :  { %8757 = vmatpush3.bf16.msra.mxu0 %v8756_v53  ;;  %v1453_v53 = vld [vmem:[%s14230_s1 + $0x2bd0] sm:$0xff]  ;;  %v8854_v36 = vpack.c.bf16 %v1476_v32, %v1475_v9  ;;  %v1510_v47 = vld [vmem:[%s14230_s1 + $0x2d98] sm:$0xff]  ;;  %v1479_v58 = vld [vmem:[%s14230_s1 + $0x2ca0] sm:$0xff] }
 0x2a2   :  { %8791 = vmatprep.subr.bf16.mxu0 %v8790_v50  ;;  %v8808_v50 = vpack.c.bf16 %v1404_v44, %v1403_v43  ;;  %v1492_v44 = vld [vmem:[%s14230_s1 + $0x2d08] sm:$0xff]  ;;  %v8890_v45 = vpack.c.bf16 %v1510_v47, %v1509_v33  ;;  %v1513_v7 = vld [vmem:[%s14230_s1 + $0x2db0] sm:$0xff]  ;;  %v1514_v11 = vld [vmem:[%s14230_s1 + $0x2db8] sm:$0xff] }
 0x2a3   :  { %8789 = vmatpush3.bf16.msra.mxu1 %v8788_v48  ;;  %v1454_v48 = vld [vmem:[%s14230_s1 + $0x2bd8] sm:$0xff]  ;;  %v1480_v10 = vld [vmem:[%s14230_s1 + $0x2ca8] sm:$0xff]  ;;  %v1499_v9 = vld [vmem:[%s14230_s1 + $0x2d40] sm:$0xff] }
 0x2a4   :  { %8823 = vmatprep.subr.bf16.mxu1 %v8822_v57  ;;  %4987 = vmatmul.mubr.f32.vlgmr.msra.gmra.mrb[40].mxu0 %v13321_v61  ;;  %v1399_v61 = vld [vmem:[%s14230_s1 + $0x2a20] sm:$0xff]  ;;  %v1406_v57 = vld [vmem:[%s14230_s1 + $0x2a58] sm:$0xff]  ;;  %v8842_v52 = vpack.c.bf16 %v1454_v48, %v1453_v53  ;;  %v1516_v22 = vld [vmem:[%s14230_s1 + $0x2dc8] sm:$0xff] }
 0x2a5   :  { %8793 = vmatpush3.bf16.msra.mxu0 %v8792_v60  ;;  %5126 = vmatprep.mubr.f32.mxu0 %v1990_v6  ;;  %v8800_v28 = vpack.c.bf16 %v1400_v18, %v1399_v61  ;;  %v1455_v60 = vld [vmem:[%s14230_s1 + $0x2be0] sm:$0xff]  ;;  %v1440_v6 = vld [vmem:[%s14230_s1 + $0x2b68] sm:$0xff] }
 0x2a6   :  { %5057 = vmatmul.mubr.f32.vlgmr.msra.gmra.mrb[40].mxu1 %v13330_v12  ;;  %8795 = vmatprep.subr.bf16.mxu0 %v8794_v0  ;;  %v1432_v12 = vld [vmem:[%s14230_s1 + $0x2b28] sm:$0xff]  ;;  %v8812_v0 = vpack.c.bf16 %v1406_v57, %v1405_v56  ;;  %v8848_v24 = vpack.c.bf16 %v1440_v6, %v1439_v51  ;;  %v1462_v56 = vld [vmem:[%s14230_s1 + $0x2c18] sm:$0xff]  ;;  %v1493_v57 = vld [vmem:[%s14230_s1 + $0x2d10] sm:$0xff] }
 0x2a7   :  { %8825 = vmatpush3.bf16.msra.mxu1 %v8824_v62  ;;  %5196 = vmatprep.mubr.f32.mxu1 %v1991_v14  ;;  %v8832_v29 = vpack.c.bf16 %v1432_v12, %v1431_v8  ;;  %v1456_v62 = vld [vmem:[%s14230_s1 + $0x2be8] sm:$0xff]  ;;  %v1495_v51 = vld [vmem:[%s14230_s1 + $0x2d20] sm:$0xff]  ;;  %v1482_v6 = vld [vmem:[%s14230_s1 + $0x2cb8] sm:$0xff] }
 0x2a8   :  { %8827 = vmatprep.subr.bf16.mxu1 %v8826_v4  ;;  %v1408_v4 = vld [vmem:[%s14230_s1 + $0x2a68] sm:$0xff]  ;;  %v8846_v26 = vpack.c.bf16 %v1456_v62, %v1455_v60  ;;  %v1511_v60 = vld [vmem:[%s14230_s1 + $0x2da0] sm:$0xff] }
 0x2a9   :  { %8797 = vmatpush3.bf16.msra.mxu0 %v8796_v15  ;;  %v8816_v8 = vpack.c.bf16 %v1408_v4, %v1407_v3  ;;  %v1512_v62 = vld [vmem:[%s14230_s1 + $0x2da8] sm:$0xff]  ;;  %v8862_v3 = vpack.c.bf16 %v1480_v10, %v1479_v58  ;;  %v1487_v33 = vld [vmem:[%s14230_s1 + $0x2ce0] sm:$0xff] }
 0x2aa   :  { %8799 = vmatprep.subr.bf16.mxu0 %v8798_v17  ;;  %v1458_v17 = vld [vmem:[%s14230_s1 + $0x2bf8] sm:$0xff]  ;;  %v1464_v4 = vld [vmem:[%s14230_s1 + $0x2c28] sm:$0xff] }
 0x2ab   :  { %8829 = vmatpush3.bf16.msra.mxu1 %v8828_v16  ;;  %v1457_v16 = vld [vmem:[%s14230_s1 + $0x2bf0] sm:$0xff]  ;;  %v1488_v47 = vld [vmem:[%s14230_s1 + $0x2ce8] sm:$0xff] }
 0x2ac   :  { %8831 = vmatprep.subr.bf16.mxu1 %v8830_v19  ;;  %v49_v19 = vld [vmem:[%s14229_s0 + $0xb0] sm:$0xff] }
 0x2ad   :  { %8801 = vmatpush3.bf16.msra.mxu0 %v8800_v28  ;;  %v1441_v28 = vld [vmem:[%s14230_s1 + $0x2b70] sm:$0xff]  ;;  %v1992_v42 = vcombine.high %v49_v19, %v49_v19  ;;  %v13741_v35 = vrot.slane %v49_v19, %v9266_v13  ;;  %v1498_v19 = vld [vmem:[%s14230_s1 + $0x2d38] sm:$0xff] }
 0x2ae   :  { %8803 = vmatprep.subr.bf16.mxu0 %v8802_v31  ;;  %v8850_v31 = vpack.c.bf16 %v1458_v17, %v1457_v16  ;;  %v8852_v34 = vpack.c.bf16 %v1442_v30, %v1441_v28  ;;  %v1465_v17 = vld [vmem:[%s14230_s1 + $0x2c30] sm:$0xff]  ;;  %v1468_v30 = vld [vmem:[%s14230_s1 + $0x2c48] sm:$0xff] }
 0x2af   :  { %8833 = vmatpush3.bf16.msra.mxu1 %v8832_v29  ;;  %v13750_v53 = vrot.slane %v1992_v42, %v9266_v13  ;;  %v2007_v59 = vcombine.high %v13741_v35, %v13741_v35  ;;  %v1486_v42 = vld [vmem:[%s14230_s1 + $0x2cd8] sm:$0xff] }
 0x2b0   :  { %8835 = vmatprep.subr.bf16.mxu1 %v8834_v21  ;;  %v1507_v21 = vld [vmem:[%s14230_s1 + $0x2d80] sm:$0xff] }
 0x2b1   :  { %8805 = vmatpush3.bf16.msra.mxu0 %v8804_v38  ;;  %v1459_v38 = vld [vmem:[%s14230_s1 + $0x2c00] sm:$0xff] }
 0x2b2   :  { %8807 = vmatprep.subr.bf16.mxu0 %v8806_v41  ;;  %v1491_v41 = vld [vmem:[%s14230_s1 + $0x2d00] sm:$0xff] }
 0x2b3   :  { %8837 = vmatpush3.bf16.msra.mxu1 %v8836_v40  ;;  %v1460_v40 = vld [vmem:[%s14230_s1 + $0x2c08] sm:$0xff] }
 0x2b4   :  { %8839 = vmatprep.subr.bf16.mxu1 %v8838_v46  ;;  %v1478_v46 = vld [vmem:[%s14230_s1 + $0x2c98] sm:$0xff]  ;;  %v8856_v48 = vpack.c.bf16 %v1460_v40, %v1459_v38 }
 0x2b5   :  { %8809 = vmatpush3.bf16.msra.mxu0 %v8808_v50  ;;  %v8888_v50 = vpack.c.bf16 %v1492_v44, %v1491_v41  ;;  %v1469_v41 = vld [vmem:[%s14230_s1 + $0x2c50] sm:$0xff] }
 0x2b6   :  { %8811 = vmatprep.subr.bf16.mxu0 %v8810_v55  ;;  %v1461_v55 = vld [vmem:[%s14230_s1 + $0x2c10] sm:$0xff] }
 0x2b7   :  { %8841 = vmatpush3.bf16.msra.mxu1 %v8840_v54  ;;  %v6698_v5 = vpop.f32.mrb[28].mxu0  ;;  %v8858_v54 = vpack.c.bf16 %v1478_v46, %v1477_v23  ;;  %v1501_v44 = vld [vmem:[%s14230_s1 + $0x2d50] sm:$0xff]  ;;  %v1502_v46 = vld [vmem:[%s14230_s1 + $0x2d58] sm:$0xff] }
 0x2b8   :  { %8843 = vmatprep.subr.bf16.mxu1 %v8842_v52  ;;  %v6699_v14 = vpop.f32.mrb[29].mxu0  ;;  %v1494_v52 = vld [vmem:[%s14230_s1 + $0x2d18] sm:$0xff] }
 0x2b9   :  { %v6733_v15 = vpop.f32.mrb[28].mxu1  ;;  %v6700_v61 = vadd.f32 %v6699_v14, %v6698_v5  ;;  %8813 = vmatpush3.bf16.msra.mxu0 %v8812_v0  ;;  %v2008_v0 = vcombine.high %v13750_v53, %v13750_v53  ;;  %v8894_v5 = vpack.c.bf16 %v1512_v62, %v1511_v60  ;;  %v1489_v60 = vld [vmem:[%s14230_s1 + $0x2cf0] sm:$0xff]  ;;  %v1490_v62 = vld [vmem:[%s14230_s1 + $0x2cf8] sm:$0xff] }
 0x2ba   :  { %v6734_v18 = vpop.f32.mrb[29].mxu1  ;;  %8815 = vmatprep.subr.bf16.mxu0 %v8814_v2  ;;  %v8892_v2 = vpack.c.bf16 %v1494_v52, %v1493_v57  ;;  %v1471_v57 = vld [vmem:[%s14230_s1 + $0x2c60] sm:$0xff] }
 0x2bb   :  { %v6735_v12 = vadd.f32 %v6734_v18, %v6733_v15  ;;  %8845 = vmatpush3.bf16.msra.mxu1 %v8844_v1  ;;  %v4149_v29 = vadd.f32 %v6700_v61, %v13510_v39  ;;  %v1508_v39 = vld [vmem:[%s14230_s1 + $0x2d88] sm:$0xff]  ;;  %v8860_v1 = vpack.c.bf16 %v1462_v56, %v1461_v55  ;;  %v1466_v61 = vld [vmem:[%s14230_s1 + $0x2c38] sm:$0xff]  ;;  %v1497_v18 = vld [vmem:[%s14230_s1 + $0x2d30] sm:$0xff]  ;;  %v8908_v55 = vpack.c.bf16 %v1502_v46, %v1501_v44 }
 0x2bc   :  { %8847 = vmatprep.subr.bf16.mxu1 %v8846_v26  ;;  %v8886_v43 = vpack.c.bf16 %v1508_v39, %v1507_v21  ;;  %v1481_v26 = vld [vmem:[%s14230_s1 + $0x2cb0] sm:$0xff]  ;;  %v8868_v25 = vpack.c.bf16 %v1466_v61, %v1465_v17  ;;  %v8900_v28 = vpack.c.bf16 %v1498_v19, %v1497_v18  ;;  %v1500_v21 = vld [vmem:[%s14230_s1 + $0x2d48] sm:$0xff]  ;;  %v8878_v56 = vpack.c.bf16 %v1488_v47, %v1487_v33  ;;  %v1503_v52 = vld [vmem:[%s14230_s1 + $0x2d60] sm:$0xff] }
 0x2bd   :  { %v13720_v27 = vadd.f32 %v6735_v12, %v4149_v29  ;;  %8817 = vmatpush3.bf16.msra.mxu0 %v8816_v8  ;;  %v8866_v16 = vpack.c.bf16 %v1482_v6, %v1481_v26  ;;  %v8898_v8 = vpack.c.bf16 %v1514_v11, %v1513_v7  ;;  %v1483_v12 = vld [vmem:[%s14230_s1 + $0x2cc0] sm:$0xff]  ;;  %v1485_v39 = vld [vmem:[%s14230_s1 + $0x2cd0] sm:$0xff]  ;;  %v8904_v38 = vpack.c.bf16 %v1500_v21, %v1499_v9  ;;  %v1474_v11 = vld [vmem:[%s14230_s1 + $0x2c78] sm:$0xff] }
 0x2be   :  { %8819 = vmatprep.subr.bf16.mxu0 %v8818_v20  ;;  %v1515_v20 = vld [vmem:[%s14230_s1 + $0x2dc0] sm:$0xff]  ;;  %v8874_v40 = vpack.c.bf16 %v1486_v42, %v1485_v39  ;;  %v8882_v6 = vpack.c.bf16 %v1490_v62, %v1489_v60  ;;  %v1473_v7 = vld [vmem:[%s14230_s1 + $0x2c70] sm:$0xff]  ;;  %v1506_v17 = vld [vmem:[%s14230_s1 + $0x2d78] sm:$0xff] }
 0x2bf   :  { %8849 = vmatpush3.bf16.msra.mxu1 %v8848_v24  ;;  %v1484_v24 = vld [vmem:[%s14230_s1 + $0x2cc8] sm:$0xff]  ;;  %v8902_v32 = vpack.c.bf16 %v1516_v22, %v1515_v20  ;;  %v1539_v61 = vld [vmem:[%s14230_s1 + $0x2e80] sm:$0xff]  ;;  %v1541_v9 = vld [vmem:[%s14230_s1 + $0x2e90] sm:$0xff] }
 0x2c0   :  { %8851 = vmatprep.subr.bf16.mxu1 %v8850_v31  ;;  %v8870_v29 = vpack.c.bf16 %v1484_v24, %v1483_v12  ;;  %v1467_v31 = vld [vmem:[%s14230_s1 + $0x2c40] sm:$0xff]  ;;  %v1540_v18 = vld [vmem:[%s14230_s1 + $0x2e88] sm:$0xff]  ;;  %v8884_v24 = vpack.c.bf16 %v1474_v11, %v1473_v7  ;;  %v1573_v39 = vld [vmem:[%s14230_s1 + $0x2f90] sm:$0xff] }
 0x2c1   :  { %8821 = vmatpush3.bf16.msra.mxu0 %v8820_v37  ;;  %v1517_v37 = vld [vmem:[%s14230_s1 + $0x2dd0] sm:$0xff]  ;;  %v8918_v22 = vpack.c.bf16 %v1540_v18, %v1539_v61  ;;  %v1574_v42 = vld [vmem:[%s14230_s1 + $0x2f98] sm:$0xff]  ;;  %v1544_v46 = vld [vmem:[%s14230_s1 + $0x2ea8] sm:$0xff] }
 0x2c2   :  { %8855 = vmatprep.subr.bf16.mxu0 %v8854_v36  ;;  %v8872_v36 = vpack.c.bf16 %v1468_v30, %v1467_v31  ;;  %v1556_v30 = vld [vmem:[%s14230_s1 + $0x2f08] sm:$0xff]  ;;  %v1558_v44 = vld [vmem:[%s14230_s1 + $0x2f18] sm:$0xff]  ;;  %v1575_v47 = vld [vmem:[%s14230_s1 + $0x2fa0] sm:$0xff] }
 0x2c3   :  { %8853 = vmatpush3.bf16.msra.mxu1 %v8852_v34  ;;  %v1518_v34 = vld [vmem:[%s14230_s1 + $0x2dd8] sm:$0xff]  ;;  %v1564_v18 = vld [vmem:[%s14230_s1 + $0x2f48] sm:$0xff] }
 0x2c4   :  { %8887 = vmatprep.subr.bf16.mxu1 %v8886_v43  ;;  %5127 = vmatmul.mubr.f32.vlgmr.msra.gmra.mrb[42].mxu0 %v13531_v49  ;;  %v1463_v49 = vld [vmem:[%s14230_s1 + $0x2c20] sm:$0xff]  ;;  %v1470_v43 = vld [vmem:[%s14230_s1 + $0x2c58] sm:$0xff]  ;;  %v8906_v23 = vpack.c.bf16 %v1518_v34, %v1517_v37 }
 0x2c5   :  { %8857 = vmatpush3.bf16.msra.mxu0 %v8856_v48  ;;  %5266 = vmatprep.mubr.f32.mxu0 %v2007_v59  ;;  %v8864_v14 = vpack.c.bf16 %v1464_v4, %v1463_v49  ;;  %v1519_v48 = vld [vmem:[%s14230_s1 + $0x2de0] sm:$0xff]  ;;  %v1504_v59 = vld [vmem:[%s14230_s1 + $0x2d68] sm:$0xff]  ;;  %v1578_v60 = vld [vmem:[%s14230_s1 + $0x2fb8] sm:$0xff] }
 0x2c6   :  { %5197 = vmatmul.mubr.f32.vlgmr.msra.gmra.mrb[42].mxu1 %v13540_v63  ;;  %8859 = vmatprep.subr.bf16.mxu0 %v8858_v54  ;;  %v1496_v63 = vld [vmem:[%s14230_s1 + $0x2d28] sm:$0xff]  ;;  %v8876_v54 = vpack.c.bf16 %v1470_v43, %v1469_v41  ;;  %v8912_v26 = vpack.c.bf16 %v1504_v59, %v1503_v52  ;;  %v1526_v41 = vld [vmem:[%s14230_s1 + $0x2e18] sm:$0xff]  ;;  %v1557_v43 = vld [vmem:[%s14230_s1 + $0x2f10] sm:$0xff] }
 0x2c7   :  { %8889 = vmatpush3.bf16.msra.mxu1 %v8888_v50  ;;  %5336 = vmatprep.mubr.f32.mxu1 %v2008_v0  ;;  %v8896_v15 = vpack.c.bf16 %v1496_v63, %v1495_v51  ;;  %v1520_v50 = vld [vmem:[%s14230_s1 + $0x2de8] sm:$0xff]  ;;  %v1577_v59 = vld [vmem:[%s14230_s1 + $0x2fb0] sm:$0xff] }
 0x2c8   :  { %8891 = vmatprep.subr.bf16.mxu1 %v8890_v45  ;;  %v1472_v45 = vld [vmem:[%s14230_s1 + $0x2c68] sm:$0xff]  ;;  %v8910_v10 = vpack.c.bf16 %v1520_v50, %v1519_v48 }
 0x2c9   :  { %8861 = vmatpush3.bf16.msra.mxu0 %v8860_v1  ;;  %v8880_v51 = vpack.c.bf16 %v1472_v45, %v1471_v57  ;;  %v1576_v48 = vld [vmem:[%s14230_s1 + $0x2fa8] sm:$0xff]  ;;  %v1559_v45 = vld [vmem:[%s14230_s1 + $0x2f20] sm:$0xff] }
 0x2ca   :  { %8863 = vmatprep.subr.bf16.mxu0 %v8862_v3  ;;  %v1522_v3 = vld [vmem:[%s14230_s1 + $0x2df8] sm:$0xff]  ;;  %v1528_v57 = vld [vmem:[%s14230_s1 + $0x2e28] sm:$0xff]  ;;  %v8958_v52 = vpack.c.bf16 %v1576_v48, %v1575_v47 }
 0x2cb   :  { %8893 = vmatpush3.bf16.msra.mxu1 %v8892_v2  ;;  %v1521_v2 = vld [vmem:[%s14230_s1 + $0x2df0] sm:$0xff]  ;;  %v1554_v47 = vld [vmem:[%s14230_s1 + $0x2ef8] sm:$0xff] }
 0x2cc   :  { %8895 = vmatprep.subr.bf16.mxu1 %v8894_v5  ;;  %v50_v5 = vld [vmem:[%s14229_s0 + $0xb8] sm:$0xff] }
 0x2cd   :  { %8865 = vmatpush3.bf16.msra.mxu0 %v8864_v14  ;;  %v1505_v14 = vld [vmem:[%s14230_s1 + $0x2d70] sm:$0xff]  ;;  %v2009_v19 = vcombine.high %v50_v5, %v50_v5  ;;  %v13951_v21 = vrot.slane %v50_v5, %v9266_v13  ;;  %v1547_v5 = vld [vmem:[%s14230_s1 + $0x2ec0] sm:$0xff] }
 0x2ce   :  { %8867 = vmatprep.subr.bf16.mxu0 %v8866_v16  ;;  %v8914_v16 = vpack.c.bf16 %v1522_v3, %v1521_v2  ;;  %v8916_v20 = vpack.c.bf16 %v1506_v17, %v1505_v14  ;;  %v1529_v2 = vld [vmem:[%s14230_s1 + $0x2e30] sm:$0xff]  ;;  %v1530_v3 = vld [vmem:[%s14230_s1 + $0x2e38] sm:$0xff]  ;;  %v1563_v17 = vld [vmem:[%s14230_s1 + $0x2f40] sm:$0xff] }
 0x2cf   :  { %8897 = vmatpush3.bf16.msra.mxu1 %v8896_v15  ;;  %v13960_v37 = vrot.slane %v2009_v19, %v9266_v13  ;;  %v8954_v13 = vpack.c.bf16 %v1574_v42, %v1573_v39  ;;  %v2024_v33 = vcombine.high %v13951_v21, %v13951_v21  ;;  %v8932_v7 = vpack.c.bf16 %v1530_v3, %v1529_v2  ;;  %v1581_v19 = vld [vmem:[%s14230_s1 + $0x2fd0] sm:$0xff]  ;;  %v1552_v39 = vld [vmem:[%s14230_s1 + $0x2ee8] sm:$0xff]  ;;  %v1583_v42 = vld [vmem:[%s14230_s1 + $0x2fe0] sm:$0xff] }
 0x2d0   :  { %8899 = vmatprep.subr.bf16.mxu1 %v8898_v8  ;;  %v1571_v8 = vld [vmem:[%s14230_s1 + $0x2f80] sm:$0xff] }
 0x2d1   :  { %8869 = vmatpush3.bf16.msra.mxu0 %v8868_v25  ;;  %v1523_v25 = vld [vmem:[%s14230_s1 + $0x2e00] sm:$0xff]  ;;  %v2025_v50 = vcombine.high %v13960_v37, %v13960_v37 }
 0x2d2   :  { %8871 = vmatprep.subr.bf16.mxu0 %v8870_v29  ;;  %v1555_v29 = vld [vmem:[%s14230_s1 + $0x2f00] sm:$0xff] }
 0x2d3   :  { %8901 = vmatpush3.bf16.msra.mxu1 %v8900_v28  ;;  %v1524_v28 = vld [vmem:[%s14230_s1 + $0x2e08] sm:$0xff] }
 0x2d4   :  { %8903 = vmatprep.subr.bf16.mxu1 %v8902_v32  ;;  %v1542_v32 = vld [vmem:[%s14230_s1 + $0x2e98] sm:$0xff]  ;;  %v8920_v34 = vpack.c.bf16 %v1524_v28, %v1523_v25  ;;  %v1533_v28 = vld [vmem:[%s14230_s1 + $0x2e50] sm:$0xff] }
 0x2d5   :  { %8873 = vmatpush3.bf16.msra.mxu0 %v8872_v36  ;;  %v8952_v36 = vpack.c.bf16 %v1556_v30, %v1555_v29  ;;  %v1534_v29 = vld [vmem:[%s14230_s1 + $0x2e58] sm:$0xff] }
 0x2d6   :  { %8875 = vmatprep.subr.bf16.mxu0 %v8874_v40  ;;  %v1525_v40 = vld [vmem:[%s14230_s1 + $0x2e10] sm:$0xff] }
 0x2d7   :  { %8905 = vmatpush3.bf16.msra.mxu1 %v8904_v38  ;;  %v6768_v58 = vpop.f32.mrb[30].mxu0  ;;  %v8922_v38 = vpack.c.bf16 %v1542_v32, %v1541_v9  ;;  %v1566_v9 = vld [vmem:[%s14230_s1 + $0x2f58] sm:$0xff]  ;;  %v1551_v32 = vld [vmem:[%s14230_s1 + $0x2ee0] sm:$0xff] }
 0x2d8   :  { %8907 = vmatprep.subr.bf16.mxu1 %v8906_v23  ;;  %v6769_v0 = vpop.f32.mrb[31].mxu0  ;;  %v1543_v23 = vld [vmem:[%s14230_s1 + $0x2ea0] sm:$0xff] }
 0x2d9   :  { %v6803_v1 = vpop.f32.mrb[30].mxu1  ;;  %v6770_v49 = vadd.f32 %v6769_v0, %v6768_v58  ;;  %8877 = vmatpush3.bf16.msra.mxu0 %v8876_v54  ;;  %v8924_v54 = vpack.c.bf16 %v1526_v41, %v1525_v40  ;;  %v1545_v58 = vld [vmem:[%s14230_s1 + $0x2eb0] sm:$0xff]  ;;  %v8942_v40 = vpack.c.bf16 %v1552_v39, %v1551_v32  ;;  %v1535_v41 = vld [vmem:[%s14230_s1 + $0x2e60] sm:$0xff]  ;;  %v5492_v32 = vld [vmem:[%s14232_s3 + $0x48] sm:$0xff] }
 0x2da   :  { %v6804_v4 = vpop.f32.mrb[31].mxu1  ;;  %8879 = vmatprep.subr.bf16.mxu0 %v8878_v56  ;;  %v8926_v56 = vpack.c.bf16 %v1544_v46, %v1543_v23  ;;  %v1568_v46 = vld [vmem:[%s14230_s1 + $0x2f68] sm:$0xff] }
 0x2db   :  { %v6805_v63 = vadd.f32 %v6804_v4, %v6803_v1  ;;  %8909 = vmatpush3.bf16.msra.mxu1 %v8908_v55  ;;  %v4289_v15 = vadd.f32 %v6770_v49, %v13720_v27  ;;  %v1572_v27 = vld [vmem:[%s14230_s1 + $0x2f88] sm:$0xff]  ;;  %v8956_v55 = vpack.c.bf16 %v1558_v44, %v1557_v43  ;;  %v1561_v49 = vld [vmem:[%s14230_s1 + $0x2f30] sm:$0xff]  ;;  %v8962_v4 = vpack.c.bf16 %v1578_v60, %v1577_v59 }
 0x2dc   :  { %8911 = vmatprep.subr.bf16.mxu1 %v8910_v10  ;;  %v8950_v31 = vpack.c.bf16 %v1572_v27, %v1571_v8  ;;  %v1546_v10 = vld [vmem:[%s14230_s1 + $0x2eb8] sm:$0xff]  ;;  %v1549_v8 = vld [vmem:[%s14230_s1 + $0x2ed0] sm:$0xff]  ;;  %v1536_v43 = vld [vmem:[%s14230_s1 + $0x2e68] sm:$0xff] }
 0x2dd   :  { %v13930_v12 = vadd.f32 %v6805_v63, %v4289_v15  ;;  %8881 = vmatpush3.bf16.msra.mxu0 %v8880_v51  ;;  %v8930_v1 = vpack.c.bf16 %v1546_v10, %v1545_v58  ;;  %v1562_v51 = vld [vmem:[%s14230_s1 + $0x2f38] sm:$0xff]  ;;  %v1548_v63 = vld [vmem:[%s14230_s1 + $0x2ec8] sm:$0xff]  ;;  %v1531_v15 = vld [vmem:[%s14230_s1 + $0x2e40] sm:$0xff] }
 0x2de   :  { %8883 = vmatprep.subr.bf16.mxu0 %v8882_v6  ;;  %v1580_v6 = vld [vmem:[%s14230_s1 + $0x2fc8] sm:$0xff]  ;;  %v8964_v11 = vpack.c.bf16 %v1562_v51, %v1561_v49  ;;  %v8934_v14 = vpack.c.bf16 %v1548_v63, %v1547_v5  ;;  %v1550_v27 = vld [vmem:[%s14230_s1 + $0x2ed8] sm:$0xff]  ;;  %v1537_v58 = vld [vmem:[%s14230_s1 + $0x2e70] sm:$0xff] }
 0x2df   :  { %8913 = vmatpush3.bf16.msra.mxu1 %v8912_v26  ;;  %v1579_v26 = vld [vmem:[%s14230_s1 + $0x2fc0] sm:$0xff]  ;;  %v8938_v25 = vpack.c.bf16 %v1550_v27, %v1549_v8  ;;  %v1538_v10 = vld [vmem:[%s14230_s1 + $0x2e78] sm:$0xff]  ;;  %v5485_v8 = vld [vmem:[%s14232_s3 + $0x10] sm:$0xff]  ;;  %v9072_v27 = vmov 0.0|0.0  }
 0x2e0   :  { %8915 = vmatprep.subr.bf16.mxu1 %v8914_v16  ;;  %v1532_v16 = vld [vmem:[%s14230_s1 + $0x2e48] sm:$0xff]  ;;  %v8966_v61 = vpack.c.bf16 %v1580_v6, %v1579_v26  ;;  %v8948_v2 = vpack.c.bf16 %v1538_v10, %v1537_v58  ;;  %v5581_v10 = vld [vmem:[%s14234_s5 + $0x20] sm:$0xff] }
 0x2e1   :  { %8885 = vmatpush3.bf16.msra.mxu0 %v8884_v24  ;;  %v1582_v24 = vld [vmem:[%s14230_s1 + $0x2fd8] sm:$0xff] }
 0x2e2   :  { %8919 = vmatprep.subr.bf16.mxu0 %v8918_v22  ;;  %v8968_v22 = vpack.c.bf16 %v1564_v18, %v1563_v17  ;;  %v8970_v30 = vpack.c.bf16 %v1582_v24, %v1581_v19  ;;  %v5486_v24 = vld [vmem:[%s14232_s3 + $0x18] sm:$0xff] }
 0x2e3   :  { %8917 = vmatpush3.bf16.msra.mxu1 %v8916_v20  ;;  %v8936_v20 = vpack.c.bf16 %v1532_v16, %v1531_v15 }
 0x2e4   :  { %8951 = vmatprep.subr.bf16.mxu1 %v8950_v31  ;;  %5267 = vmatmul.mubr.f32.vlgmr.msra.gmra.mrb[44].mxu0 %v13741_v35  ;;  %v1527_v35 = vld [vmem:[%s14230_s1 + $0x2e20] sm:$0xff]  ;;  %v1565_v31 = vld [vmem:[%s14230_s1 + $0x2f50] sm:$0xff] }
 0x2e5   :  { %8921 = vmatpush3.bf16.msra.mxu0 %v8920_v34  ;;  %5406 = vmatprep.mubr.f32.mxu0 %v2024_v33  ;;  %v8928_v62 = vpack.c.bf16 %v1528_v57, %v1527_v35  ;;  %v1584_v34 = vld [vmem:[%s14230_s1 + $0x2fe8] sm:$0xff]  ;;  %v1553_v33 = vld [vmem:[%s14230_s1 + $0x2ef0] sm:$0xff]  ;;  %v8944_v57 = vpack.c.bf16 %v1536_v43, %v1535_v41 }
 0x2e6   :  { %5337 = vmatmul.mubr.f32.vlgmr.msra.gmra.mrb[44].mxu1 %v13750_v53  ;;  %8923 = vmatprep.subr.bf16.mxu0 %v8922_v38  ;;  %v1560_v53 = vld [vmem:[%s14230_s1 + $0x2f28] sm:$0xff]  ;;  %v8972_v38 = vpack.c.bf16 %v1566_v9, %v1565_v31  ;;  %v8974_v23 = vpack.c.bf16 %v1584_v34, %v1583_v42  ;;  %v5490_v31 = vld [vmem:[%s14232_s3 + $0x38] sm:$0xff]  ;;  %v5491_v9 = vld [vmem:[%s14232_s3 + $0x40] sm:$0xff] }
 0x2e7   :  { %8953 = vmatpush3.bf16.msra.mxu1 %v8952_v36  ;;  %5476 = vmatprep.mubr.f32.mxu1 %v2025_v50  ;;  %v8960_v0 = vpack.c.bf16 %v1560_v53, %v1559_v45  ;;  %v8940_v36 = vpack.c.bf16 %v1534_v29, %v1533_v28  ;;  %v8946_v53 = vpack.c.bf16 %v1554_v47, %v1553_v33  ;;  %v5489_v29 = vld [vmem:[%s14232_s3 + $0x30] sm:$0xff]  ;;  %v5494_v34 = vld [vmem:[%s14232_s3 + $0x58] sm:$0xff]  ;;  %v5496_v41 = vld [vmem:[%s14232_s3 + $0x68] sm:$0xff] }
 0x2e8   :  { %8955 = vmatprep.subr.bf16.mxu1 %v8954_v13  ;;  %v1567_v13 = vld [vmem:[%s14230_s1 + $0x2f60] sm:$0xff]  ;;  %v8995_v39 = vpack.c.bf16 %v5492_v32, %v5491_v9  ;;  %v5493_v42 = vld [vmem:[%s14232_s3 + $0x50] sm:$0xff]  ;;  %v5584_v9 = vld [vmem:[%s14234_s5 + $0x38] sm:$0xff] }
 0x2e9   :  { %8925 = vmatpush3.bf16.msra.mxu0 %v8924_v54  ;;  %v1585_v54 = vld [vmem:[%s14230_s1 + $0x2ff0] sm:$0xff] }
 0x2ea   :  { %8927 = vmatprep.subr.bf16.mxu0 %v8926_v56 }
 0x2eb   :  { %8957 = vmatpush3.bf16.msra.mxu1 %v8956_v55  ;;  %v1586_v55 = vld [vmem:[%s14230_s1 + $0x2ff8] sm:$0xff] }
 0x2ec   :  { %8959 = vmatprep.subr.bf16.mxu1 %v8958_v52  ;;  %v8976_v52 = vpack.c.bf16 %v1568_v46, %v1567_v13  ;;  %v8978_v60 = vpack.c.bf16 %v1586_v55, %v1585_v54 }
 0x2ed   :  { %8929 = vmatpush3.bf16.msra.mxu0 %v8928_v62  ;;  %v1569_v62 = vld [vmem:[%s14230_s1 + $0x2f70] sm:$0xff] }
 0x2ee   :  { %8931 = vmatprep.subr.bf16.mxu0 %v8930_v1 }
 0x2ef   :  { %8961 = vmatpush3.bf16.msra.mxu1 %v8960_v0  ;;  %v1570_v0 = vld [vmem:[%s14230_s1 + $0x2f78] sm:$0xff]  ;;  %s5674_s1 = sshll.u32 %s9075_s16, 4  ;;  %s5675_s1 = int_to_ptr.vmem [resolvable:$true] %s5674_s1 }
 0x2f0   :  { %8963 = vmatprep.subr.bf16.mxu1 %v8962_v4  ;;  %v8980_v3 = vpack.c.bf16 %v1570_v0, %v1569_v62  ;;  %p9052_p1 = scmp.lt.s32.totalorder %s5675_s1, %s5675_s1 }
 0x2f1   :  { %8933 = vmatpush3.bf16.msra.mxu0 %v8932_v7 }
 0x2f2   :  { %8935 = vmatprep.subr.bf16.mxu0 %v8934_v14 }
 0x2f3   :  { %8965 = vmatpush3.bf16.msra.mxu1 %v8964_v11 }
 0x2f4   :  { %8967 = vmatprep.subr.bf16.mxu1 %v8966_v61 }
 0x2f5   :  { %8937 = vmatpush3.bf16.msra.mxu0 %v8936_v20  ;;  %v8986_v20 = vpack.c.bf16 %v5486_v24, %v5485_v8 }
 0x2f6   :  { %8939 = vmatprep.subr.bf16.mxu0 %v8938_v25  ;;  %v5488_v25 = vld [vmem:[%s14232_s3 + $0x28] sm:$0xff] }
 0x2f7   :  { %8969 = vmatpush3.bf16.msra.mxu1 %v8968_v22  ;;  %v6838_v44 = vpop.f32.mrb[32].mxu0  ;;  %v5487_v22 = vld [vmem:[%s14232_s3 + $0x20] sm:$0xff] }
 0x2f8   :  { %8971 = vmatprep.subr.bf16.mxu1 %v8970_v30  ;;  %v6839_v48 = vpop.f32.mrb[33].mxu0  ;;  %v8989_v28 = vpack.c.bf16 %v5488_v25, %v5487_v22  ;;  %v8992_v30 = vpack.c.bf16 %v5490_v31, %v5489_v29 }
 0x2f9   :  { %v6873_v50 = vpop.f32.mrb[32].mxu1  ;;  %v6840_v56 = vadd.f32 %v6839_v48, %v6838_v44  ;;  %8941 = vmatpush3.bf16.msra.mxu0 %v8940_v36  ;;  %v8998_v36 = vpack.c.bf16 %v5494_v34, %v5493_v42  ;;  %v5497_v48 = vld [vmem:[%s14232_s3 + $0x70] sm:$0xff] }
 0x2fa   :  { %v6874_v35 = vpop.f32.mrb[33].mxu1  ;;  %8943 = vmatprep.subr.bf16.mxu0 %v8942_v40  ;;  %v5495_v40 = vld [vmem:[%s14232_s3 + $0x60] sm:$0xff] }
 0x2fb   :  { %v6875_v45 = vadd.f32 %v6874_v35, %v6873_v50  ;;  %8973 = vmatpush3.bf16.msra.mxu1 %v8972_v38  ;;  %v4429_v59 = vadd.f32 %v6840_v56, %v13930_v12  ;;  %v9001_v44 = vpack.c.bf16 %v5496_v41, %v5495_v40  ;;  %v5498_v50 = vld [vmem:[%s14232_s3 + $0x78] sm:$0xff]  ;;  %v9074_v56 = vmov 0.0   ;;  %v5577_v35 = vld [vmem:[%s14234_s5] sm:$0xff] }
 0x2fc   :  { %8975 = vmatprep.subr.bf16.mxu1 %v8974_v23  ;;  %v9004_v54 = vpack.c.bf16 %v5498_v50, %v5497_v48  ;;  %v5684_v40 = vld [vmem:[%s14235_s6] ss:$0 sm:$0xff] }
 0x2fd   :  { %v4499_v1 = vadd.f32 %v6875_v45, %v4429_v59  ;;  %8945 = vmatpush3.bf16.msra.mxu0 %v8944_v57  ;;  %v5578_v57 = vld [vmem:[%s14234_s5 + $0x8] sm:$0xff]  ;;  %v5579_v45 = vld [vmem:[%s14234_s5 + $0x10] sm:$0xff] }
 0x2fe   :  { %8947 = vmatprep.subr.bf16.mxu0 %v8946_v53  ;;  %v5580_v53 = vld [vmem:[%s14234_s5 + $0x18] sm:$0xff]  ;;  %v5582_v59 = vld [vmem:[%s14234_s5 + $0x28] sm:$0xff] }
 0x2ff   :  { %8977 = vmatpush3.bf16.msra.mxu1 %v8976_v52  ;;  %v9007_v52 = vpack.c.bf16 %v5578_v57, %v5577_v35  ;;  %v9010_v58 = vpack.c.bf16 %v5580_v53, %v5579_v45 }
 0x300   :  { %8979 = vmatprep.subr.bf16.mxu1 %v8978_v60  ;;  %v9013_v60 = vpack.c.bf16 %v5582_v59, %v5581_v10 }
 0x301   :  { %8949 = vmatpush3.bf16.msra.mxu0 %v8948_v2 }
 0x302   :  { %8982 = vmatprep.subr.bf16.mxu0 %v9072_v27 }
 0x303   :  { %8981 = vmatpush3.bf16.msra.mxu1 %v8980_v3 }
 0x304   :  { %5407 = vmatmul.mubr.f32.vlgmr.msra.gmra.mrb[46].mxu0 %v13951_v21  ;;  %v5483_v21 = vld [vmem:[%s14232_s3] sm:$0xff]  ;;  %9006 = vmatprep.subr.bf16.mxu1 %v9072_v27 }
 0x305   :  { %7424 = vmatprep.mubr.msk.f32.mxu0 %vm9073_vm0, %v9074_v56 }
 0x306   :  { %5477 = vmatmul.mubr.f32.vlgmr.msra.gmra.mrb[46].mxu1 %v13960_v37  ;;  %v5484_v37 = vld [vmem:[%s14232_s3 + $0x8] sm:$0xff] }
 0x307   :  { %v8983_v19 = vpack.c.bf16 %v5484_v37, %v5483_v21  ;;  %7443 = vmatprep.mubr.msk.f32.mxu1 %vm9073_vm0, %v9074_v56  ;;  %9008 = vmatpush3.bf16.msra.mxu1 %v9007_v52 }
 0x308   :  { %9009 = vmatprep.subr.bf16.mxu1 %v9072_v27 }
 0x309   :  { %8984 = vmatpush3.bf16.msra.mxu0 %v8983_v19 }
 0x30a   :  { %8985 = vmatprep.subr.bf16.mxu0 %v9072_v27 }
 0x30b   :  { %9011 = vmatpush3.bf16.msra.mxu1 %v9010_v58 }
 0x30c   :  { %9012 = vmatprep.subr.bf16.mxu1 %v9072_v27 }
 0x30d   :  { %8987 = vmatpush3.bf16.msra.mxu0 %v8986_v20 }
 0x30e   :  { %8988 = vmatprep.subr.bf16.mxu0 %v9072_v27 }
 0x30f   :  { %9014 = vmatpush3.bf16.msra.mxu1 %v9013_v60 }
 0x310   :  { %9015 = vmatprep.subr.bf16.mxu1 %v9072_v27 }
 0x311   :  { %8990 = vmatpush3.bf16.msra.mxu0 %v8989_v28 }
 0x312   :  { %8991 = vmatprep.subr.bf16.mxu0 %v9072_v27 }
 0x315   :  { %8993 = vmatpush3.bf16.msra.mxu0 %v8992_v30  ;;  %v5583_v30 = vld [vmem:[%s14234_s5 + $0x30] sm:$0xff]  ;;  %s9047_s5 = scalar_lea.vmem %s5675_s1, 32 }
 0x316   :  { %8994 = vmatprep.subr.bf16.mxu0 %v9072_v27  ;;  %v9016_v32 = vpack.c.bf16 %v5584_v9, %v5583_v30  ;;  %p9048_p0 = scmp.ne.s32.totalorder %s5675_s1, %s9047_s5  ;;  %p9053_p2 = scmp.lt.s32.totalorder %s9047_s5, %s9047_s5 }
 0x317   :  { %v6908_v12 = vpop.f32.mrb[34].mxu0 }
 0x318   :  { %v6909_v49 = vpop.f32.mrb[35].mxu0  ;;  %9017 = vmatpush3.bf16.msra.mxu1 %v9016_v32  ;;  %p9054_p3 = por %p9053_p2, %p9052_p1 }
 0x319   :  { %v6943_v4 = vpop.f32.mrb[34].mxu1  ;;  %v6910_v51 = vadd.f32 %v6909_v49, %v6908_v12  ;;  %8996 = vmatpush3.bf16.msra.mxu0 %v8995_v39  ;;  %v5683_v39 = vld [vmem:[%s14233_s4] ss:$0 sm:$0xff] }
 0x31a   :  { %v6944_v5 = vpop.f32.mrb[35].mxu1  ;;  %8997 = vmatprep.subr.bf16.mxu0 %v9072_v27  ;;  %p9055_p4 = pnand %p9054_p3, %p9048_p0 }
 0x31b   :  { %v6945_v63 = vadd.f32 %v6944_v5, %v6943_v4  ;;  %v4569_v26 = vadd.f32 %v6910_v51, %v4499_v1 }
 0x31d   :  { %v4639_v6 = vadd.f32 %v6945_v63, %v4569_v26  ;;  %8999 = vmatpush3.bf16.msra.mxu0 %v8998_v36 }
 0x31e   :  { %9000 = vmatprep.subr.bf16.mxu0 %v9072_v27 }
 0x321   :  { %9002 = vmatpush3.bf16.msra.mxu0 %v9001_v44 }
 0x322   :  { %9003 = vmatprep.subr.bf16.mxu0 %v9072_v27 }
 0x325   :  { %9005 = vmatpush3.bf16.msra.mxu0 %v9004_v54 }
 0x337   :  { %v6978_v7 = vpop.f32.mrb[36].mxu0 }
 0x338   :  { %v6979_v11 = vpop.f32.mrb[37].mxu0 }
 0x339   :  { %v7013_v14 = vpop.f32.mrb[36].mxu1  ;;  %v6980_v15 = vadd.f32 %v6979_v11, %v6978_v7 }
 0x33a   :  { %v7014_v16 = vpop.f32.mrb[37].mxu1 }
 0x33b   :  { %v7015_v17 = vadd.f32 %v7014_v16, %v7013_v14  ;;  %v4709_v61 = vadd.f32 %v6980_v15, %v4639_v6 }
 0x33d   :  { %v4779_v18 = vadd.f32 %v7015_v17, %v4709_v61 }
 0x357   :  { %v7048_v38 = vpop.f32.mrb[38].mxu0 }
 0x358   :  { %v7049_v43 = vpop.f32.mrb[39].mxu0 }
 0x359   :  { %v7083_v13 = vpop.f32.mrb[38].mxu1  ;;  %v7050_v23 = vadd.f32 %v7049_v43, %v7048_v38 }
 0x35a   :  { %v7084_v46 = vpop.f32.mrb[39].mxu1 }
 0x35b   :  { %v7085_v33 = vadd.f32 %v7084_v46, %v7083_v13  ;;  %v4849_v47 = vadd.f32 %v7050_v23, %v4779_v18 }
 0x35d   :  { %v4919_v55 = vadd.f32 %v7085_v33, %v4849_v47 }
 0x377   :  { %v7118_v62 = vpop.f32.mrb[40].mxu0 }
 0x378   :  { %v7119_v0 = vpop.f32.mrb[41].mxu0 }
 0x379   :  { %v7153_v1 = vpop.f32.mrb[40].mxu1  ;;  %v7120_v2 = vadd.f32 %v7119_v0, %v7118_v62 }
 0x37a   :  { %v7154_v3 = vpop.f32.mrb[41].mxu1 }
 0x37b   :  { %v7155_v12 = vadd.f32 %v7154_v3, %v7153_v1  ;;  %v4989_v49 = vadd.f32 %v7120_v2, %v4919_v55 }
 0x37d   :  { %v5059_v4 = vadd.f32 %v7155_v12, %v4989_v49 }
 0x397   :  { %v7188_v51 = vpop.f32.mrb[42].mxu0 }
 0x398   :  { %v7189_v5 = vpop.f32.mrb[43].mxu0 }
 0x399   :  { %v7223_v63 = vpop.f32.mrb[42].mxu1  ;;  %v7190_v26 = vadd.f32 %v7189_v5, %v7188_v51 }
 0x39a   :  { %v7224_v6 = vpop.f32.mrb[43].mxu1 }
 0x39b   :  { %v7225_v7 = vadd.f32 %v7224_v6, %v7223_v63  ;;  %v5129_v11 = vadd.f32 %v7190_v26, %v5059_v4 }
 0x39d   :  { %v5199_v14 = vadd.f32 %v7225_v7, %v5129_v11 }
 0x3b7   :  { %v7258_v15 = vpop.f32.mrb[44].mxu0 }
 0x3b8   :  { %v7259_v16 = vpop.f32.mrb[45].mxu0 }
 0x3b9   :  { %v7293_v17 = vpop.f32.mrb[44].mxu1  ;;  %v7260_v61 = vadd.f32 %v7259_v16, %v7258_v15 }
 0x3ba   :  { %v7294_v18 = vpop.f32.mrb[45].mxu1 }
 0x3bb   :  { %v7295_v21 = vadd.f32 %v7294_v18, %v7293_v17  ;;  %v5269_v37 = vadd.f32 %v7260_v61, %v5199_v14 }
 0x3bd   :  { %v5339_v8 = vadd.f32 %v7295_v21, %v5269_v37 }
 0x3d7   :  { %v7328_v27 = vpop.f32.mrb[46].mxu0 }
 0x3d8   :  { %v7329_v19 = vpop.f32.mrb[47].mxu0 }
 0x3d9   :  { %v7363_v24 = vpop.f32.mrb[46].mxu1  ;;  %v7330_v20 = vadd.f32 %v7329_v19, %v7328_v27 }
 0x3da   :  { %v7364_v22 = vpop.f32.mrb[47].mxu1 }
 0x3db   :  { %v7365_v25 = vadd.f32 %v7364_v22, %v7363_v24  ;;  %v5409_v28 = vadd.f32 %v7330_v20, %v5339_v8 }
 0x3dd   :  { %v5479_v29 = vadd.f32 %v7365_v25, %v5409_v28 }
 0x3df   :  { %v5482_v31 = vmax.f32 %v5479_v29, 0.0 }
 0x3e1   :  { %7425 = vmatmul.mubr.f32.vlgmr.msra.gmra.mrb[48].mxu0 %v5482_v31 }
 0x4b4   :  { %v5572_v42 = vpop.f32.mrb[48].mxu0 }
 0x4b5   :  { %v5573_v34 = vadd.f32 %v5683_v39, %v5572_v42  ;;  %v7426_v36 = vpop.f32.mrb[49].mxu0 }
 0x4b7   :  { %v5576_v38 = vmax.f32 %v5573_v34, 0.0 }
 0x4b9   :  { %7444 = vmatmul.mubr.msk.f32.vlgmr.msra.gmra.mrb[48].mxu1 %vm5592_vm1, %v5576_v38 }
 0x58c   :  { %v5662_v41 = vpop.f32.mrb[48].mxu1 }
 0x58d   :  { %v5663_v43 = vadd.f32 %v5684_v40, %v5662_v41  ;;  %v7445_v13 = vpop.f32.mrb[49].mxu1 }
 0x58f   :  { %5667 = vst.msk [vmem:[#allocation2] sm:$0x3] %vm5666_vm2, %v5663_v43 }
 0x590   :  { %9058 = shalt.err (!%p9055_p4)
}
 0x591   :  { %s9059_s18 = scalar_lea.hbm %s14236_s7, 32 }
 0x592   :  { %p9060_p5 = scmp.ne.s32.totalorder %s14236_s7, %s9059_s18  ;;  %p9063_p6 = scmp.lt.u32.totalorder %s9059_s18, %s14236_s7 }
 0x594   :  { %p9065_p7 = pnand %p9063_p6, %p9060_p5 }
 0x596   :  { %9068 = shalt.err (!%p9065_p7)
}
 0x597   :  { %5677 = dma.vmem_to_hbm [thread:$0]  %s5675_s1, 32, %s14236_s7, [#allocation3]  }
 0x598   :  { %9069 = dma.done.wait [#allocation3], 32  }
 0x599   :  { %9070 = vsyncadd [#allocation3], 4294967264 }
 0x59a   :  { %5681 = vsyncpa [#allocation3], 1 }

</bundles_post_ra>
